<compile_context>
chip_gen: v5e
topology: v5e:2x2
jax: 0.10.0
libtpu: 0.0.40
codegen_flags: <defaults>
</compile_context>

<pallas_src>
import jax
import jax.numpy as jnp
from jax.experimental import pallas as pl
from jax.experimental.pallas import tpu as pltpu

FIELD_NUM = 9
FIELD_SIZE = 16                     # config['model']['hidden_size']
CROSS_LAYER_SIZES = (32, 16, 8)
PREV_DIMS = (FIELD_NUM,) + CROSS_LAYER_SIZES[:-1]   # split_half=False
DEEP_LAYER1 = 64
DEEP_LAYER2 = 32
SPLIT_HALF = False                  # see layout note above


# --------------------------------------------------------------------------
# Kernel
# --------------------------------------------------------------------------
def _xdeepfm_kernel(x0_ref, rep_ref,
                    w0_ref, b0_ref, w1_ref, b1_ref, w2_ref, b2_ref,
                    mw1_ref, mb1_ref, bs1_ref, bt1_ref,
                    mw2_ref, mb2_ref, bs2_ref, bt2_ref,
                    fw0_ref, fwc0_ref, fwc1_ref, fwc2_ref, fwd_ref, fb_ref,
                    out_ref):
    f32, bf16 = jnp.float32, jnp.bfloat16
    F = FIELD_NUM

    x0 = x0_ref[...]                                   # (TB, F*D) f32
    x0b = x0.astype(bf16)

    # ---- first-order term: folded into the final linear (no concat, no
    #      D-reduction) -> direct logits contribution ----
    logits = fb_ref[...] + jnp.dot(x0b, fw0_ref[...],
                                   preferred_element_type=f32)     # (TB, 2)

    # ---- x0 replicated OMAX=32 times per field, via the idle MXU.  Each
    #      per-field block is 512 lanes wide -> every later slice is
    #      128-lane aligned.  Computed once, reused by all CIN layers. ----
    x0r = jnp.dot(x0b, rep_ref[...], preferred_element_type=f32)   # (TB, F*512)
    seg = rep_ref.shape[1] // F                                    # 512

    # ---- Compressed Interaction Network (D on lanes, block-diag weights) ----
    h = x0b                                            # (TB, Hp*D) bf16
    for w_ref, b_ref, fwc_ref in ((w0_ref, b0_ref, fwc0_ref),
                                  (w1_ref, b1_ref, fwc1_ref),
                                  (w2_ref, b2_ref, fwc2_ref)):
        od = w_ref.shape[-1]                           # O*D (512 / 256 / 128)
        acc = None
        for f in range(F):
            # (TB, Hp*D) @ (Hp*D, O*D)  -- block-diagonal over D
            t = x0r[:, f * seg:f * seg + od] * jnp.dot(
                h, w_ref[f], preferred_element_type=f32)
            acc = t if acc is None else acc + t
        hf = jnp.maximum(acc + b_ref[...], 0.0)        # (TB, O*D) f32
        hb = hf.astype(bf16)
        # per-layer CIN feature's contribution to the logits: the sum over D
        # is folded into the (D-repeated) final-weight block.
        logits = logits + jnp.dot(hb, fwc_ref[...], preferred_element_type=f32)
        h = hb

    # ---- deep MLP on the SAME x0 view (emb.reshape(B, F*D)) ----
    # Dropout = identity (eval); BatchNorm folded to per-channel scale/shift.
    h1 = jnp.dot(x0b, mw1_ref[...], preferred_element_type=f32) + mb1_ref[...]
    h1 = jnp.maximum(h1 * bs1_ref[...] + bt1_ref[...], 0.0)
    h2 = jnp.dot(h1.astype(bf16), mw2_ref[...],
                 preferred_element_type=f32) + mb2_ref[...]
    h2 = jnp.maximum(h2 * bs2_ref[...] + bt2_ref[...], 0.0)
    logits = logits + jnp.dot(h2.astype(bf16), fwd_ref[...],
                              preferred_element_type=f32)

    out_ref[...] = logits


# --------------------------------------------------------------------------
# Wrapper / parameter preparation
# --------------------------------------------------------------------------
def _choose_tile(batch, target=256):
    """Batch tile: multiple of 8, <= target (v7x VMEM headroom), and split so
    that there are >= 2 grid steps whenever the batch allows it (keeps both
    v7x TensorCores busy).  Batches are padded, never collapsed to 1 tile."""
    target = max(8, target - target % 8)
    if batch >= 2 * target:
        return target
    half = (batch + 1) // 2
    return max(8, ((half + 7) // 8) * 8)


def _const_map(ndim):
    return lambda i: (0,) * ndim


def prepare_kernel_params(params):
    """Expand base (reference-format) params into the kernel's lane layout."""
    F, D = FIELD_NUM, FIELD_SIZE
    OMAX = max(CROSS_LAYER_SIZES)
    f32, bf16 = jnp.float32, jnp.bfloat16
    eye_d = jnp.eye(D, dtype=f32)
    eye_f = jnp.eye(F, dtype=f32)

    # x0 replication matrix: rep[f*D+d, (f*OMAX+o)*D+d] = 1
    rep = eye_f[:, None, :, None, None] * eye_d[None, :, None, None, :]
    rep = jnp.broadcast_to(rep, (F, D, F, OMAX, D)).reshape(F * D, F * OMAX * D)

    out = [rep.astype(bf16)]

    # CIN conv weights, expanded block-diagonally over D: (F, Hp*D, O*D)
    for (W, b), P, O in zip(params["cin"], PREV_DIMS, CROSS_LAYER_SIZES):
        Wf = W.reshape(F, P, O)                       # W is (F*P, O)
        wbd = jnp.einsum("fpo,de->fpdoe", Wf, eye_d).reshape(F, P * D, O * D)
        out.append(wbd.astype(bf16))
        out.append(jnp.repeat(b, D).reshape(1, O * D).astype(f32))

    s1, t1 = params["bn1"]
    s2, t2 = params["bn2"]
    out += [params["mw1"].astype(bf16), params["mb1"].reshape(1, -1).astype(f32),
            s1.reshape(1, -1).astype(f32), t1.reshape(1, -1).astype(f32),
            params["mw2"].astype(bf16), params["mb2"].reshape(1, -1).astype(f32),
            s2.reshape(1, -1).astype(f32), t2.reshape(1, -1).astype(f32)]

    # Final linear, split per feature block; CIN/first-order blocks repeated
    # over D so the per-batch embedding-dim sum folds into the dot.
    fw, fb = params["final"]                          # (97, 2), (2,)
    out.append(jnp.repeat(fw[:F], D, axis=0).astype(bf16))        # (F*D, 2)
    off = F
    for O in CROSS_LAYER_SIZES:
        out.append(jnp.repeat(fw[off:off + O], D, axis=0).astype(bf16))
        off += O
    out.append(fw[off:off + DEEP_LAYER2].astype(bf16))            # (32, 2)
    out.append(fb.reshape(1, 2).astype(f32))
    return tuple(out)


def xdeepfm_forward(emb, params, *, batch_tile=256):
    """emb: (B, field_num, field_size) float32 -> logits (B, 2)."""
    B, F, D = emb.shape
    # Lane layout: x0[b, f*D+d] = emb[b, f, d].  This is exactly the deep-MLP
    # input, so the embedding is passed (and read from HBM) only once.
    x0 = emb.reshape(B, F * D)

    TB = _choose_tile(B, batch_tile)
    padded = ((B + TB - 1) // TB) * TB
    if padded != B:
        x0 = jnp.pad(x0, ((0, padded - B), (0, 0)))
    grid = (padded // TB,)

    weights = prepare_kernel_params(params)

    in_specs = [pl.BlockSpec((TB, F * D), lambda i: (i, 0))]           # x0 tile
    # Weights / biases: full blocks, same block every grid step (no re-fetch).
    in_specs += [pl.BlockSpec(tuple(w.shape), _const_map(w.ndim)) for w in weights]

    out = pl.pallas_call(
        _xdeepfm_kernel,
        out_shape=jax.ShapeDtypeStruct((padded, 2), jnp.float32),
        grid=grid,
        in_specs=in_specs,
        out_specs=pl.BlockSpec((TB, 2), lambda i: (i, 0)),
        compiler_params=pltpu.CompilerParams(
            dimension_semantics=("parallel",),         # 2 TCs on v7x
            vmem_limit_bytes=48 * 1024 * 1024),        # fits v7x's 64 MiB
    )(x0, *weights)
    return out[:B]


# --------------------------------------------------------------------------
# Reference-format parameter init + pure-JAX reference forward
# --------------------------------------------------------------------------
def init_params(key):
    ks = iter(jax.random.split(key, 16))

    def nrm(shape, scale=0.1):
        return jax.random.normal(next(ks), shape, jnp.float32) * scale

    params = {}
    cin = []
    prev = FIELD_NUM
    for O in CROSS_LAYER_SIZES:
        W = nrm((FIELD_NUM * prev, O))            # Conv1d weight, (in, out)
        b = nrm((O,), 0.05)
        cin.append((W, b))
        prev = O // 2 if SPLIT_HALF else O
    params["cin"] = cin

    params["mw1"] = nrm((FIELD_NUM * FIELD_SIZE, DEEP_LAYER1))
    params["mb1"] = nrm((DEEP_LAYER1,), 0.05)
    params["mw2"] = nrm((DEEP_LAYER1, DEEP_LAYER2))
    params["mb2"] = nrm((DEEP_LAYER2,), 0.05)

    # BatchNorm1d (eval, PyTorch default init) folded to scale/shift.
    eps = 1e-5
    for name, dim in (("bn1", DEEP_LAYER1), ("bn2", DEEP_LAYER2)):
        gamma = jnp.ones((dim,), jnp.float32)
        beta = jnp.zeros((dim,), jnp.float32)
        mean = jnp.zeros((dim,), jnp.float32)
        var = jnp.ones((dim,), jnp.float32)
        scale = gamma / jnp.sqrt(var + eps)
        params[name] = (scale, beta - mean * scale)

    final_in = FIELD_NUM + sum(CROSS_LAYER_SIZES) + DEEP_LAYER2
    params["final"] = (nrm((final_in, 2)), nrm((2,), 0.05))
    return params


def ref_forward(emb, params):
    """Pure-JAX reference mirroring the PyTorch forward (eval mode)."""
    B, F, D = emb.shape
    y_first = jnp.sum(emb, axis=2)
    x0 = emb[:, :, None, :]
    h = emb
    xs = []
    for (W, b) in params["cin"]:
        z = (x0 * h[:, None, :, :]).reshape(B, -1, D)
        out = jnp.einsum("bcd,co->bod", z, W) + b.reshape(1, -1, 1)
        out = jnp.maximum(out, 0.0)
        h = out
        xs.append(out)
    y_cin = jnp.sum(jnp.concatenate(xs, axis=1), axis=2)
    deep = emb.reshape(B, F * D)
    s1, t1 = params["bn1"]
    s2, t2 = params["bn2"]
    h1 = jnp.maximum((deep @ params["mw1"] + params["mb1"]) * s1 + t1, 0.0)
    h2 = jnp.maximum((h1 @ params["mw2"] + params["mb2"]) * s2 + t2, 0.0)
    feat = jnp.concatenate([y_first, y_cin, h2], axis=1)
    fw, fb = params["final"]
    return feat @ fw + fb


def _check(out, ref, tag):
    err = float(jnp.max(jnp.abs(out - ref)))
    tol = 2e-2 * (1.0 + float(jnp.max(jnp.abs(ref))))
    if err > tol:
        raise AssertionError(
            f"[{tag}] kernel/reference mismatch (err={err}, tol={tol}):\n"
            f"{out}\nvs\n{ref}")


if __name__ == "__main__":
    key = jax.random.PRNGKey(0)
    kp, ke, ke2 = jax.random.split(key, 3)
    params = init_params(kp)

    # Small sanity shape (batch=2, fields=9, embed=16).
    emb = jax.random.normal(ke, (2, FIELD_NUM, FIELD_SIZE), jnp.float32)
    out = jax.block_until_ready(xdeepfm_forward(emb, params))
    assert out.shape == (2, 2)
    _check(out, ref_forward(emb, params), "B=2")

    # Also exercise multiple grid steps (2 tiles) and batch padding.
    emb2 = jax.random.normal(ke2, (48, FIELD_NUM, FIELD_SIZE), jnp.float32)
    out2 = jax.block_until_ready(xdeepfm_forward(emb2, params))
    assert out2.shape == (48, 2)
    _check(out2, ref_forward(emb2, params), "B=48")

    print("KERNEL_OK")
</pallas_src>

<mosaic_0001>
module attributes {stable_mosaic.version = 11 : i64} {
  func.func @_xdeepfm_kernel(%arg0: i32, %arg1: memref<8x144xf32, #tpu.memory_space<vmem>>, %arg2: memref<144x4608xbf16, #tpu.memory_space<vmem>>, %arg3: memref<9x144x512xbf16, #tpu.memory_space<vmem>>, %arg4: memref<1x512xf32, #tpu.memory_space<vmem>>, %arg5: memref<9x512x256xbf16, #tpu.memory_space<vmem>>, %arg6: memref<1x256xf32, #tpu.memory_space<vmem>>, %arg7: memref<9x256x128xbf16, #tpu.memory_space<vmem>>, %arg8: memref<1x128xf32, #tpu.memory_space<vmem>>, %arg9: memref<144x64xbf16, #tpu.memory_space<vmem>>, %arg10: memref<1x64xf32, #tpu.memory_space<vmem>>, %arg11: memref<1x64xf32, #tpu.memory_space<vmem>>, %arg12: memref<1x64xf32, #tpu.memory_space<vmem>>, %arg13: memref<64x32xbf16, #tpu.memory_space<vmem>>, %arg14: memref<1x32xf32, #tpu.memory_space<vmem>>, %arg15: memref<1x32xf32, #tpu.memory_space<vmem>>, %arg16: memref<1x32xf32, #tpu.memory_space<vmem>>, %arg17: memref<144x2xbf16, #tpu.memory_space<vmem>>, %arg18: memref<512x2xbf16, #tpu.memory_space<vmem>>, %arg19: memref<256x2xbf16, #tpu.memory_space<vmem>>, %arg20: memref<128x2xbf16, #tpu.memory_space<vmem>>, %arg21: memref<32x2xbf16, #tpu.memory_space<vmem>>, %arg22: memref<1x2xf32, #tpu.memory_space<vmem>>, %arg23: memref<8x2xf32, #tpu.memory_space<vmem>>) attributes {dimension_semantics = [#tpu.dimension_semantics<parallel>], iteration_bounds = array<i64: 1>, scalar_prefetch = 0 : i64, scratch_operands = 0 : i64, tpu.core_type = #tpu.core_type<tc>, window_params = [{transform_indices = @transform_0, window_bounds = array<i64: 8, 144>}, {pipeline_mode = #tpu.pipeline_mode<synchronous>, transform_indices = @transform_1, window_bounds = array<i64: 144, 4608>}, {pipeline_mode = #tpu.pipeline_mode<synchronous>, transform_indices = @transform_2, window_bounds = array<i64: 9, 144, 512>}, {pipeline_mode = #tpu.pipeline_mode<synchronous>, transform_indices = @transform_3, window_bounds = array<i64: 1, 512>}, {pipeline_mode = #tpu.pipeline_mode<synchronous>, transform_indices = @transform_4, window_bounds = array<i64: 9, 512, 256>}, {pipeline_mode = #tpu.pipeline_mode<synchronous>, transform_indices = @transform_5, window_bounds = array<i64: 1, 256>}, {pipeline_mode = #tpu.pipeline_mode<synchronous>, transform_indices = @transform_6, window_bounds = array<i64: 9, 256, 128>}, {pipeline_mode = #tpu.pipeline_mode<synchronous>, transform_indices = @transform_7, window_bounds = array<i64: 1, 128>}, {pipeline_mode = #tpu.pipeline_mode<synchronous>, transform_indices = @transform_8, window_bounds = array<i64: 144, 64>}, {pipeline_mode = #tpu.pipeline_mode<synchronous>, transform_indices = @transform_9, window_bounds = array<i64: 1, 64>}, {pipeline_mode = #tpu.pipeline_mode<synchronous>, transform_indices = @transform_10, window_bounds = array<i64: 1, 64>}, {pipeline_mode = #tpu.pipeline_mode<synchronous>, transform_indices = @transform_11, window_bounds = array<i64: 1, 64>}, {pipeline_mode = #tpu.pipeline_mode<synchronous>, transform_indices = @transform_12, window_bounds = array<i64: 64, 32>}, {pipeline_mode = #tpu.pipeline_mode<synchronous>, transform_indices = @transform_13, window_bounds = array<i64: 1, 32>}, {pipeline_mode = #tpu.pipeline_mode<synchronous>, transform_indices = @transform_14, window_bounds = array<i64: 1, 32>}, {pipeline_mode = #tpu.pipeline_mode<synchronous>, transform_indices = @transform_15, window_bounds = array<i64: 1, 32>}, {pipeline_mode = #tpu.pipeline_mode<synchronous>, transform_indices = @transform_16, window_bounds = array<i64: 144, 2>}, {pipeline_mode = #tpu.pipeline_mode<synchronous>, transform_indices = @transform_17, window_bounds = array<i64: 512, 2>}, {pipeline_mode = #tpu.pipeline_mode<synchronous>, transform_indices = @transform_18, window_bounds = array<i64: 256, 2>}, {pipeline_mode = #tpu.pipeline_mode<synchronous>, transform_indices = @transform_19, window_bounds = array<i64: 128, 2>}, {pipeline_mode = #tpu.pipeline_mode<synchronous>, transform_indices = @transform_20, window_bounds = array<i64: 32, 2>}, {pipeline_mode = #tpu.pipeline_mode<synchronous>, transform_indices = @transform_21, window_bounds = array<i64: 1, 2>}, {transform_indices = @transform_22, window_bounds = array<i64: 8, 2>}]} {
    %c0 = arith.constant 0 : index
    %c0_0 = arith.constant 0 : index
    %0 = vector.load %arg1[%c0, %c0_0] : memref<8x144xf32, #tpu.memory_space<vmem>>, vector<8x144xf32>
    %1 = arith.truncf %0 : vector<8x144xf32> to vector<8x144xbf16>
    %c0_1 = arith.constant 0 : index
    %c0_2 = arith.constant 0 : index
    %2 = vector.load %arg22[%c0_1, %c0_2] : memref<1x2xf32, #tpu.memory_space<vmem>>, vector<1x2xf32>
    %c0_3 = arith.constant 0 : index
    %c0_4 = arith.constant 0 : index
    %3 = vector.load %arg17[%c0_3, %c0_4] : memref<144x2xbf16, #tpu.memory_space<vmem>>, vector<144x2xbf16>
    %cst = arith.constant dense<0.000000e+00> : vector<8x2xf32>
    %4 = tpu.matmul %1, %3, %cst {dimension_numbers = #tpu.dot_dimension_numbers<[1], [0], [0], [1], [0, 0, 1, 1], [], []>} : vector<8x144xbf16>, vector<144x2xbf16>, vector<8x2xf32> -> vector<8x2xf32>
    %5 = vector.broadcast %2 : vector<1x2xf32> to vector<8x2xf32>
    %6 = arith.addf %5, %4 : vector<8x2xf32>
    %c0_5 = arith.constant 0 : index
    %c0_6 = arith.constant 0 : index
    %7 = vector.load %arg2[%c0_5, %c0_6] : memref<144x4608xbf16, #tpu.memory_space<vmem>>, vector<144x4608xbf16>
    %cst_7 = arith.constant dense<0.000000e+00> : vector<8x4608xf32>
    %8 = tpu.matmul %1, %7, %cst_7 {dimension_numbers = #tpu.dot_dimension_numbers<[1], [0], [0], [1], [0, 0, 1, 1], [], []>} : vector<8x144xbf16>, vector<144x4608xbf16>, vector<8x4608xf32> -> vector<8x4608xf32>
    %9 = vector.extract_strided_slice %8 {offsets = [0, 0], sizes = [8, 512], strides = [1, 1]} : vector<8x4608xf32> to vector<8x512xf32>
    %c0_8 = arith.constant 0 : index
    %c0_9 = arith.constant 0 : index
    %c0_10 = arith.constant 0 : index
    %10 = vector.load %arg3[%c0_8, %c0_9, %c0_10] : memref<9x144x512xbf16, #tpu.memory_space<vmem>>, vector<1x144x512xbf16>
    %11 = vector.shape_cast %10 : vector<1x144x512xbf16> to vector<144x512xbf16>
    %cst_11 = arith.constant dense<0.000000e+00> : vector<8x512xf32>
    %12 = tpu.matmul %1, %11, %cst_11 {dimension_numbers = #tpu.dot_dimension_numbers<[1], [0], [0], [1], [0, 0, 1, 1], [], []>} : vector<8x144xbf16>, vector<144x512xbf16>, vector<8x512xf32> -> vector<8x512xf32>
    %13 = arith.mulf %9, %12 : vector<8x512xf32>
    %14 = vector.extract_strided_slice %8 {offsets = [0, 512], sizes = [8, 512], strides = [1, 1]} : vector<8x4608xf32> to vector<8x512xf32>
    %c1 = arith.constant 1 : index
    %c0_12 = arith.constant 0 : index
    %c0_13 = arith.constant 0 : index
    %15 = vector.load %arg3[%c1, %c0_12, %c0_13] : memref<9x144x512xbf16, #tpu.memory_space<vmem>>, vector<1x144x512xbf16>
    %16 = vector.shape_cast %15 : vector<1x144x512xbf16> to vector<144x512xbf16>
    %cst_14 = arith.constant dense<0.000000e+00> : vector<8x512xf32>
    %17 = tpu.matmul %1, %16, %cst_14 {dimension_numbers = #tpu.dot_dimension_numbers<[1], [0], [0], [1], [0, 0, 1, 1], [], []>} : vector<8x144xbf16>, vector<144x512xbf16>, vector<8x512xf32> -> vector<8x512xf32>
    %18 = arith.mulf %14, %17 : vector<8x512xf32>
    %19 = arith.addf %13, %18 : vector<8x512xf32>
    %20 = vector.extract_strided_slice %8 {offsets = [0, 1024], sizes = [8, 512], strides = [1, 1]} : vector<8x4608xf32> to vector<8x512xf32>
    %c2 = arith.constant 2 : index
    %c0_15 = arith.constant 0 : index
    %c0_16 = arith.constant 0 : index
    %21 = vector.load %arg3[%c2, %c0_15, %c0_16] : memref<9x144x512xbf16, #tpu.memory_space<vmem>>, vector<1x144x512xbf16>
    %22 = vector.shape_cast %21 : vector<1x144x512xbf16> to vector<144x512xbf16>
    %cst_17 = arith.constant dense<0.000000e+00> : vector<8x512xf32>
    %23 = tpu.matmul %1, %22, %cst_17 {dimension_numbers = #tpu.dot_dimension_numbers<[1], [0], [0], [1], [0, 0, 1, 1], [], []>} : vector<8x144xbf16>, vector<144x512xbf16>, vector<8x512xf32> -> vector<8x512xf32>
    %24 = arith.mulf %20, %23 : vector<8x512xf32>
    %25 = arith.addf %19, %24 : vector<8x512xf32>
    %26 = vector.extract_strided_slice %8 {offsets = [0, 1536], sizes = [8, 512], strides = [1, 1]} : vector<8x4608xf32> to vector<8x512xf32>
    %c3 = arith.constant 3 : index
    %c0_18 = arith.constant 0 : index
    %c0_19 = arith.constant 0 : index
    %27 = vector.load %arg3[%c3, %c0_18, %c0_19] : memref<9x144x512xbf16, #tpu.memory_space<vmem>>, vector<1x144x512xbf16>
    %28 = vector.shape_cast %27 : vector<1x144x512xbf16> to vector<144x512xbf16>
    %cst_20 = arith.constant dense<0.000000e+00> : vector<8x512xf32>
    %29 = tpu.matmul %1, %28, %cst_20 {dimension_numbers = #tpu.dot_dimension_numbers<[1], [0], [0], [1], [0, 0, 1, 1], [], []>} : vector<8x144xbf16>, vector<144x512xbf16>, vector<8x512xf32> -> vector<8x512xf32>
    %30 = arith.mulf %26, %29 : vector<8x512xf32>
    %31 = arith.addf %25, %30 : vector<8x512xf32>
    %32 = vector.extract_strided_slice %8 {offsets = [0, 2048], sizes = [8, 512], strides = [1, 1]} : vector<8x4608xf32> to vector<8x512xf32>
    %c4 = arith.constant 4 : index
    %c0_21 = arith.constant 0 : index
    %c0_22 = arith.constant 0 : index
    %33 = vector.load %arg3[%c4, %c0_21, %c0_22] : memref<9x144x512xbf16, #tpu.memory_space<vmem>>, vector<1x144x512xbf16>
    %34 = vector.shape_cast %33 : vector<1x144x512xbf16> to vector<144x512xbf16>
    %cst_23 = arith.constant dense<0.000000e+00> : vector<8x512xf32>
    %35 = tpu.matmul %1, %34, %cst_23 {dimension_numbers = #tpu.dot_dimension_numbers<[1], [0], [0], [1], [0, 0, 1, 1], [], []>} : vector<8x144xbf16>, vector<144x512xbf16>, vector<8x512xf32> -> vector<8x512xf32>
    %36 = arith.mulf %32, %35 : vector<8x512xf32>
    %37 = arith.addf %31, %36 : vector<8x512xf32>
    %38 = vector.extract_strided_slice %8 {offsets = [0, 2560], sizes = [8, 512], strides = [1, 1]} : vector<8x4608xf32> to vector<8x512xf32>
    %c5 = arith.constant 5 : index
    %c0_24 = arith.constant 0 : index
    %c0_25 = arith.constant 0 : index
    %39 = vector.load %arg3[%c5, %c0_24, %c0_25] : memref<9x144x512xbf16, #tpu.memory_space<vmem>>, vector<1x144x512xbf16>
    %40 = vector.shape_cast %39 : vector<1x144x512xbf16> to vector<144x512xbf16>
    %cst_26 = arith.constant dense<0.000000e+00> : vector<8x512xf32>
    %41 = tpu.matmul %1, %40, %cst_26 {dimension_numbers = #tpu.dot_dimension_numbers<[1], [0], [0], [1], [0, 0, 1, 1], [], []>} : vector<8x144xbf16>, vector<144x512xbf16>, vector<8x512xf32> -> vector<8x512xf32>
    %42 = arith.mulf %38, %41 : vector<8x512xf32>
    %43 = arith.addf %37, %42 : vector<8x512xf32>
    %44 = vector.extract_strided_slice %8 {offsets = [0, 3072], sizes = [8, 512], strides = [1, 1]} : vector<8x4608xf32> to vector<8x512xf32>
    %c6 = arith.constant 6 : index
    %c0_27 = arith.constant 0 : index
    %c0_28 = arith.constant 0 : index
    %45 = vector.load %arg3[%c6, %c0_27, %c0_28] : memref<9x144x512xbf16, #tpu.memory_space<vmem>>, vector<1x144x512xbf16>
    %46 = vector.shape_cast %45 : vector<1x144x512xbf16> to vector<144x512xbf16>
    %cst_29 = arith.constant dense<0.000000e+00> : vector<8x512xf32>
    %47 = tpu.matmul %1, %46, %cst_29 {dimension_numbers = #tpu.dot_dimension_numbers<[1], [0], [0], [1], [0, 0, 1, 1], [], []>} : vector<8x144xbf16>, vector<144x512xbf16>, vector<8x512xf32> -> vector<8x512xf32>
    %48 = arith.mulf %44, %47 : vector<8x512xf32>
    %49 = arith.addf %43, %48 : vector<8x512xf32>
    %50 = vector.extract_strided_slice %8 {offsets = [0, 3584], sizes = [8, 512], strides = [1, 1]} : vector<8x4608xf32> to vector<8x512xf32>
    %c7 = arith.constant 7 : index
    %c0_30 = arith.constant 0 : index
    %c0_31 = arith.constant 0 : index
    %51 = vector.load %arg3[%c7, %c0_30, %c0_31] : memref<9x144x512xbf16, #tpu.memory_space<vmem>>, vector<1x144x512xbf16>
    %52 = vector.shape_cast %51 : vector<1x144x512xbf16> to vector<144x512xbf16>
    %cst_32 = arith.constant dense<0.000000e+00> : vector<8x512xf32>
    %53 = tpu.matmul %1, %52, %cst_32 {dimension_numbers = #tpu.dot_dimension_numbers<[1], [0], [0], [1], [0, 0, 1, 1], [], []>} : vector<8x144xbf16>, vector<144x512xbf16>, vector<8x512xf32> -> vector<8x512xf32>
    %54 = arith.mulf %50, %53 : vector<8x512xf32>
    %55 = arith.addf %49, %54 : vector<8x512xf32>
    %56 = vector.extract_strided_slice %8 {offsets = [0, 4096], sizes = [8, 512], strides = [1, 1]} : vector<8x4608xf32> to vector<8x512xf32>
    %c8 = arith.constant 8 : index
    %c0_33 = arith.constant 0 : index
    %c0_34 = arith.constant 0 : index
    %57 = vector.load %arg3[%c8, %c0_33, %c0_34] : memref<9x144x512xbf16, #tpu.memory_space<vmem>>, vector<1x144x512xbf16>
    %58 = vector.shape_cast %57 : vector<1x144x512xbf16> to vector<144x512xbf16>
    %cst_35 = arith.constant dense<0.000000e+00> : vector<8x512xf32>
    %59 = tpu.matmul %1, %58, %cst_35 {dimension_numbers = #tpu.dot_dimension_numbers<[1], [0], [0], [1], [0, 0, 1, 1], [], []>} : vector<8x144xbf16>, vector<144x512xbf16>, vector<8x512xf32> -> vector<8x512xf32>
    %60 = arith.mulf %56, %59 : vector<8x512xf32>
    %61 = arith.addf %55, %60 : vector<8x512xf32>
    %c0_36 = arith.constant 0 : index
    %c0_37 = arith.constant 0 : index
    %62 = vector.load %arg4[%c0_36, %c0_37] : memref<1x512xf32, #tpu.memory_space<vmem>>, vector<1x512xf32>
    %63 = vector.broadcast %62 : vector<1x512xf32> to vector<8x512xf32>
    %64 = arith.addf %61, %63 : vector<8x512xf32>
    %cst_38 = arith.constant 0.000000e+00 : f32
    %65 = vector.broadcast %cst_38 : f32 to vector<8x512xf32>
    %66 = arith.maximumf %64, %65 : vector<8x512xf32>
    %67 = arith.truncf %66 : vector<8x512xf32> to vector<8x512xbf16>
    %c0_39 = arith.constant 0 : index
    %c0_40 = arith.constant 0 : index
    %68 = vector.load %arg18[%c0_39, %c0_40] : memref<512x2xbf16, #tpu.memory_space<vmem>>, vector<512x2xbf16>
    %cst_41 = arith.constant dense<0.000000e+00> : vector<8x2xf32>
    %69 = tpu.matmul %67, %68, %cst_41 {dimension_numbers = #tpu.dot_dimension_numbers<[1], [0], [0], [1], [0, 0, 1, 1], [], []>} : vector<8x512xbf16>, vector<512x2xbf16>, vector<8x2xf32> -> vector<8x2xf32>
    %70 = arith.addf %6, %69 : vector<8x2xf32>
    %71 = vector.extract_strided_slice %8 {offsets = [0, 0], sizes = [8, 256], strides = [1, 1]} : vector<8x4608xf32> to vector<8x256xf32>
    %c0_42 = arith.constant 0 : index
    %c0_43 = arith.constant 0 : index
    %c0_44 = arith.constant 0 : index
    %72 = vector.load %arg5[%c0_42, %c0_43, %c0_44] : memref<9x512x256xbf16, #tpu.memory_space<vmem>>, vector<1x512x256xbf16>
    %73 = vector.shape_cast %72 : vector<1x512x256xbf16> to vector<512x256xbf16>
    %cst_45 = arith.constant dense<0.000000e+00> : vector<8x256xf32>
    %74 = tpu.matmul %67, %73, %cst_45 {dimension_numbers = #tpu.dot_dimension_numbers<[1], [0], [0], [1], [0, 0, 1, 1], [], []>} : vector<8x512xbf16>, vector<512x256xbf16>, vector<8x256xf32> -> vector<8x256xf32>
    %75 = arith.mulf %71, %74 : vector<8x256xf32>
    %76 = vector.extract_strided_slice %8 {offsets = [0, 512], sizes = [8, 256], strides = [1, 1]} : vector<8x4608xf32> to vector<8x256xf32>
    %c1_46 = arith.constant 1 : index
    %c0_47 = arith.constant 0 : index
    %c0_48 = arith.constant 0 : index
    %77 = vector.load %arg5[%c1_46, %c0_47, %c0_48] : memref<9x512x256xbf16, #tpu.memory_space<vmem>>, vector<1x512x256xbf16>
    %78 = vector.shape_cast %77 : vector<1x512x256xbf16> to vector<512x256xbf16>
    %cst_49 = arith.constant dense<0.000000e+00> : vector<8x256xf32>
    %79 = tpu.matmul %67, %78, %cst_49 {dimension_numbers = #tpu.dot_dimension_numbers<[1], [0], [0], [1], [0, 0, 1, 1], [], []>} : vector<8x512xbf16>, vector<512x256xbf16>, vector<8x256xf32> -> vector<8x256xf32>
    %80 = arith.mulf %76, %79 : vector<8x256xf32>
    %81 = arith.addf %75, %80 : vector<8x256xf32>
    %82 = vector.extract_strided_slice %8 {offsets = [0, 1024], sizes = [8, 256], strides = [1, 1]} : vector<8x4608xf32> to vector<8x256xf32>
    %c2_50 = arith.constant 2 : index
    %c0_51 = arith.constant 0 : index
    %c0_52 = arith.constant 0 : index
    %83 = vector.load %arg5[%c2_50, %c0_51, %c0_52] : memref<9x512x256xbf16, #tpu.memory_space<vmem>>, vector<1x512x256xbf16>
    %84 = vector.shape_cast %83 : vector<1x512x256xbf16> to vector<512x256xbf16>
    %cst_53 = arith.constant dense<0.000000e+00> : vector<8x256xf32>
    %85 = tpu.matmul %67, %84, %cst_53 {dimension_numbers = #tpu.dot_dimension_numbers<[1], [0], [0], [1], [0, 0, 1, 1], [], []>} : vector<8x512xbf16>, vector<512x256xbf16>, vector<8x256xf32> -> vector<8x256xf32>
    %86 = arith.mulf %82, %85 : vector<8x256xf32>
    %87 = arith.addf %81, %86 : vector<8x256xf32>
    %88 = vector.extract_strided_slice %8 {offsets = [0, 1536], sizes = [8, 256], strides = [1, 1]} : vector<8x4608xf32> to vector<8x256xf32>
    %c3_54 = arith.constant 3 : index
    %c0_55 = arith.constant 0 : index
    %c0_56 = arith.constant 0 : index
    %89 = vector.load %arg5[%c3_54, %c0_55, %c0_56] : memref<9x512x256xbf16, #tpu.memory_space<vmem>>, vector<1x512x256xbf16>
    %90 = vector.shape_cast %89 : vector<1x512x256xbf16> to vector<512x256xbf16>
    %cst_57 = arith.constant dense<0.000000e+00> : vector<8x256xf32>
    %91 = tpu.matmul %67, %90, %cst_57 {dimension_numbers = #tpu.dot_dimension_numbers<[1], [0], [0], [1], [0, 0, 1, 1], [], []>} : vector<8x512xbf16>, vector<512x256xbf16>, vector<8x256xf32> -> vector<8x256xf32>
    %92 = arith.mulf %88, %91 : vector<8x256xf32>
    %93 = arith.addf %87, %92 : vector<8x256xf32>
    %94 = vector.extract_strided_slice %8 {offsets = [0, 2048], sizes = [8, 256], strides = [1, 1]} : vector<8x4608xf32> to vector<8x256xf32>
    %c4_58 = arith.constant 4 : index
    %c0_59 = arith.constant 0 : index
    %c0_60 = arith.constant 0 : index
    %95 = vector.load %arg5[%c4_58, %c0_59, %c0_60] : memref<9x512x256xbf16, #tpu.memory_space<vmem>>, vector<1x512x256xbf16>
    %96 = vector.shape_cast %95 : vector<1x512x256xbf16> to vector<512x256xbf16>
    %cst_61 = arith.constant dense<0.000000e+00> : vector<8x256xf32>
    %97 = tpu.matmul %67, %96, %cst_61 {dimension_numbers = #tpu.dot_dimension_numbers<[1], [0], [0], [1], [0, 0, 1, 1], [], []>} : vector<8x512xbf16>, vector<512x256xbf16>, vector<8x256xf32> -> vector<8x256xf32>
    %98 = arith.mulf %94, %97 : vector<8x256xf32>
    %99 = arith.addf %93, %98 : vector<8x256xf32>
    %100 = vector.extract_strided_slice %8 {offsets = [0, 2560], sizes = [8, 256], strides = [1, 1]} : vector<8x4608xf32> to vector<8x256xf32>
    %c5_62 = arith.constant 5 : index
    %c0_63 = arith.constant 0 : index
    %c0_64 = arith.constant 0 : index
    %101 = vector.load %arg5[%c5_62, %c0_63, %c0_64] : memref<9x512x256xbf16, #tpu.memory_space<vmem>>, vector<1x512x256xbf16>
    %102 = vector.shape_cast %101 : vector<1x512x256xbf16> to vector<512x256xbf16>
    %cst_65 = arith.constant dense<0.000000e+00> : vector<8x256xf32>
    %103 = tpu.matmul %67, %102, %cst_65 {dimension_numbers = #tpu.dot_dimension_numbers<[1], [0], [0], [1], [0, 0, 1, 1], [], []>} : vector<8x512xbf16>, vector<512x256xbf16>, vector<8x256xf32> -> vector<8x256xf32>
    %104 = arith.mulf %100, %103 : vector<8x256xf32>
    %105 = arith.addf %99, %104 : vector<8x256xf32>
    %106 = vector.extract_strided_slice %8 {offsets = [0, 3072], sizes = [8, 256], strides = [1, 1]} : vector<8x4608xf32> to vector<8x256xf32>
    %c6_66 = arith.constant 6 : index
    %c0_67 = arith.constant 0 : index
    %c0_68 = arith.constant 0 : index
    %107 = vector.load %arg5[%c6_66, %c0_67, %c0_68] : memref<9x512x256xbf16, #tpu.memory_space<vmem>>, vector<1x512x256xbf16>
    %108 = vector.shape_cast %107 : vector<1x512x256xbf16> to vector<512x256xbf16>
    %cst_69 = arith.constant dense<0.000000e+00> : vector<8x256xf32>
    %109 = tpu.matmul %67, %108, %cst_69 {dimension_numbers = #tpu.dot_dimension_numbers<[1], [0], [0], [1], [0, 0, 1, 1], [], []>} : vector<8x512xbf16>, vector<512x256xbf16>, vector<8x256xf32> -> vector<8x256xf32>
    %110 = arith.mulf %106, %109 : vector<8x256xf32>
    %111 = arith.addf %105, %110 : vector<8x256xf32>
    %112 = vector.extract_strided_slice %8 {offsets = [0, 3584], sizes = [8, 256], strides = [1, 1]} : vector<8x4608xf32> to vector<8x256xf32>
    %c7_70 = arith.constant 7 : index
    %c0_71 = arith.constant 0 : index
    %c0_72 = arith.constant 0 : index
    %113 = vector.load %arg5[%c7_70, %c0_71, %c0_72] : memref<9x512x256xbf16, #tpu.memory_space<vmem>>, vector<1x512x256xbf16>
    %114 = vector.shape_cast %113 : vector<1x512x256xbf16> to vector<512x256xbf16>
    %cst_73 = arith.constant dense<0.000000e+00> : vector<8x256xf32>
    %115 = tpu.matmul %67, %114, %cst_73 {dimension_numbers = #tpu.dot_dimension_numbers<[1], [0], [0], [1], [0, 0, 1, 1], [], []>} : vector<8x512xbf16>, vector<512x256xbf16>, vector<8x256xf32> -> vector<8x256xf32>
    %116 = arith.mulf %112, %115 : vector<8x256xf32>
    %117 = arith.addf %111, %116 : vector<8x256xf32>
    %118 = vector.extract_strided_slice %8 {offsets = [0, 4096], sizes = [8, 256], strides = [1, 1]} : vector<8x4608xf32> to vector<8x256xf32>
    %c8_74 = arith.constant 8 : index
    %c0_75 = arith.constant 0 : index
    %c0_76 = arith.constant 0 : index
    %119 = vector.load %arg5[%c8_74, %c0_75, %c0_76] : memref<9x512x256xbf16, #tpu.memory_space<vmem>>, vector<1x512x256xbf16>
    %120 = vector.shape_cast %119 : vector<1x512x256xbf16> to vector<512x256xbf16>
    %cst_77 = arith.constant dense<0.000000e+00> : vector<8x256xf32>
    %121 = tpu.matmul %67, %120, %cst_77 {dimension_numbers = #tpu.dot_dimension_numbers<[1], [0], [0], [1], [0, 0, 1, 1], [], []>} : vector<8x512xbf16>, vector<512x256xbf16>, vector<8x256xf32> -> vector<8x256xf32>
    %122 = arith.mulf %118, %121 : vector<8x256xf32>
    %123 = arith.addf %117, %122 : vector<8x256xf32>
    %c0_78 = arith.constant 0 : index
    %c0_79 = arith.constant 0 : index
    %124 = vector.load %arg6[%c0_78, %c0_79] : memref<1x256xf32, #tpu.memory_space<vmem>>, vector<1x256xf32>
    %125 = vector.broadcast %124 : vector<1x256xf32> to vector<8x256xf32>
    %126 = arith.addf %123, %125 : vector<8x256xf32>
    %cst_80 = arith.constant 0.000000e+00 : f32
    %127 = vector.broadcast %cst_80 : f32 to vector<8x256xf32>
    %128 = arith.maximumf %126, %127 : vector<8x256xf32>
    %129 = arith.truncf %128 : vector<8x256xf32> to vector<8x256xbf16>
    %c0_81 = arith.constant 0 : index
    %c0_82 = arith.constant 0 : index
    %130 = vector.load %arg19[%c0_81, %c0_82] : memref<256x2xbf16, #tpu.memory_space<vmem>>, vector<256x2xbf16>
    %cst_83 = arith.constant dense<0.000000e+00> : vector<8x2xf32>
    %131 = tpu.matmul %129, %130, %cst_83 {dimension_numbers = #tpu.dot_dimension_numbers<[1], [0], [0], [1], [0, 0, 1, 1], [], []>} : vector<8x256xbf16>, vector<256x2xbf16>, vector<8x2xf32> -> vector<8x2xf32>
    %132 = arith.addf %70, %131 : vector<8x2xf32>
    %133 = vector.extract_strided_slice %8 {offsets = [0, 0], sizes = [8, 128], strides = [1, 1]} : vector<8x4608xf32> to vector<8x128xf32>
    %c0_84 = arith.constant 0 : index
    %c0_85 = arith.constant 0 : index
    %c0_86 = arith.constant 0 : index
    %134 = vector.load %arg7[%c0_84, %c0_85, %c0_86] : memref<9x256x128xbf16, #tpu.memory_space<vmem>>, vector<1x256x128xbf16>
    %135 = vector.shape_cast %134 : vector<1x256x128xbf16> to vector<256x128xbf16>
    %cst_87 = arith.constant dense<0.000000e+00> : vector<8x128xf32>
    %136 = tpu.matmul %129, %135, %cst_87 {dimension_numbers = #tpu.dot_dimension_numbers<[1], [0], [0], [1], [0, 0, 1, 1], [], []>} : vector<8x256xbf16>, vector<256x128xbf16>, vector<8x128xf32> -> vector<8x128xf32>
    %137 = arith.mulf %133, %136 : vector<8x128xf32>
    %138 = vector.extract_strided_slice %8 {offsets = [0, 512], sizes = [8, 128], strides = [1, 1]} : vector<8x4608xf32> to vector<8x128xf32>
    %c1_88 = arith.constant 1 : index
    %c0_89 = arith.constant 0 : index
    %c0_90 = arith.constant 0 : index
    %139 = vector.load %arg7[%c1_88, %c0_89, %c0_90] : memref<9x256x128xbf16, #tpu.memory_space<vmem>>, vector<1x256x128xbf16>
    %140 = vector.shape_cast %139 : vector<1x256x128xbf16> to vector<256x128xbf16>
    %cst_91 = arith.constant dense<0.000000e+00> : vector<8x128xf32>
    %141 = tpu.matmul %129, %140, %cst_91 {dimension_numbers = #tpu.dot_dimension_numbers<[1], [0], [0], [1], [0, 0, 1, 1], [], []>} : vector<8x256xbf16>, vector<256x128xbf16>, vector<8x128xf32> -> vector<8x128xf32>
    %142 = arith.mulf %138, %141 : vector<8x128xf32>
    %143 = arith.addf %137, %142 : vector<8x128xf32>
    %144 = vector.extract_strided_slice %8 {offsets = [0, 1024], sizes = [8, 128], strides = [1, 1]} : vector<8x4608xf32> to vector<8x128xf32>
    %c2_92 = arith.constant 2 : index
    %c0_93 = arith.constant 0 : index
    %c0_94 = arith.constant 0 : index
    %145 = vector.load %arg7[%c2_92, %c0_93, %c0_94] : memref<9x256x128xbf16, #tpu.memory_space<vmem>>, vector<1x256x128xbf16>
    %146 = vector.shape_cast %145 : vector<1x256x128xbf16> to vector<256x128xbf16>
    %cst_95 = arith.constant dense<0.000000e+00> : vector<8x128xf32>
    %147 = tpu.matmul %129, %146, %cst_95 {dimension_numbers = #tpu.dot_dimension_numbers<[1], [0], [0], [1], [0, 0, 1, 1], [], []>} : vector<8x256xbf16>, vector<256x128xbf16>, vector<8x128xf32> -> vector<8x128xf32>
    %148 = arith.mulf %144, %147 : vector<8x128xf32>
    %149 = arith.addf %143, %148 : vector<8x128xf32>
    %150 = vector.extract_strided_slice %8 {offsets = [0, 1536], sizes = [8, 128], strides = [1, 1]} : vector<8x4608xf32> to vector<8x128xf32>
    %c3_96 = arith.constant 3 : index
    %c0_97 = arith.constant 0 : index
    %c0_98 = arith.constant 0 : index
    %151 = vector.load %arg7[%c3_96, %c0_97, %c0_98] : memref<9x256x128xbf16, #tpu.memory_space<vmem>>, vector<1x256x128xbf16>
    %152 = vector.shape_cast %151 : vector<1x256x128xbf16> to vector<256x128xbf16>
    %cst_99 = arith.constant dense<0.000000e+00> : vector<8x128xf32>
    %153 = tpu.matmul %129, %152, %cst_99 {dimension_numbers = #tpu.dot_dimension_numbers<[1], [0], [0], [1], [0, 0, 1, 1], [], []>} : vector<8x256xbf16>, vector<256x128xbf16>, vector<8x128xf32> -> vector<8x128xf32>
    %154 = arith.mulf %150, %153 : vector<8x128xf32>
    %155 = arith.addf %149, %154 : vector<8x128xf32>
    %156 = vector.extract_strided_slice %8 {offsets = [0, 2048], sizes = [8, 128], strides = [1, 1]} : vector<8x4608xf32> to vector<8x128xf32>
    %c4_100 = arith.constant 4 : index
    %c0_101 = arith.constant 0 : index
    %c0_102 = arith.constant 0 : index
    %157 = vector.load %arg7[%c4_100, %c0_101, %c0_102] : memref<9x256x128xbf16, #tpu.memory_space<vmem>>, vector<1x256x128xbf16>
    %158 = vector.shape_cast %157 : vector<1x256x128xbf16> to vector<256x128xbf16>
    %cst_103 = arith.constant dense<0.000000e+00> : vector<8x128xf32>
    %159 = tpu.matmul %129, %158, %cst_103 {dimension_numbers = #tpu.dot_dimension_numbers<[1], [0], [0], [1], [0, 0, 1, 1], [], []>} : vector<8x256xbf16>, vector<256x128xbf16>, vector<8x128xf32> -> vector<8x128xf32>
    %160 = arith.mulf %156, %159 : vector<8x128xf32>
    %161 = arith.addf %155, %160 : vector<8x128xf32>
    %162 = vector.extract_strided_slice %8 {offsets = [0, 2560], sizes = [8, 128], strides = [1, 1]} : vector<8x4608xf32> to vector<8x128xf32>
    %c5_104 = arith.constant 5 : index
    %c0_105 = arith.constant 0 : index
    %c0_106 = arith.constant 0 : index
    %163 = vector.load %arg7[%c5_104, %c0_105, %c0_106] : memref<9x256x128xbf16, #tpu.memory_space<vmem>>, vector<1x256x128xbf16>
    %164 = vector.shape_cast %163 : vector<1x256x128xbf16> to vector<256x128xbf16>
    %cst_107 = arith.constant dense<0.000000e+00> : vector<8x128xf32>
    %165 = tpu.matmul %129, %164, %cst_107 {dimension_numbers = #tpu.dot_dimension_numbers<[1], [0], [0], [1], [0, 0, 1, 1], [], []>} : vector<8x256xbf16>, vector<256x128xbf16>, vector<8x128xf32> -> vector<8x128xf32>
    %166 = arith.mulf %162, %165 : vector<8x128xf32>
    %167 = arith.addf %161, %166 : vector<8x128xf32>
    %168 = vector.extract_strided_slice %8 {offsets = [0, 3072], sizes = [8, 128], strides = [1, 1]} : vector<8x4608xf32> to vector<8x128xf32>
    %c6_108 = arith.constant 6 : index
    %c0_109 = arith.constant 0 : index
    %c0_110 = arith.constant 0 : index
    %169 = vector.load %arg7[%c6_108, %c0_109, %c0_110] : memref<9x256x128xbf16, #tpu.memory_space<vmem>>, vector<1x256x128xbf16>
    %170 = vector.shape_cast %169 : vector<1x256x128xbf16> to vector<256x128xbf16>
    %cst_111 = arith.constant dense<0.000000e+00> : vector<8x128xf32>
    %171 = tpu.matmul %129, %170, %cst_111 {dimension_numbers = #tpu.dot_dimension_numbers<[1], [0], [0], [1], [0, 0, 1, 1], [], []>} : vector<8x256xbf16>, vector<256x128xbf16>, vector<8x128xf32> -> vector<8x128xf32>
    %172 = arith.mulf %168, %171 : vector<8x128xf32>
    %173 = arith.addf %167, %172 : vector<8x128xf32>
    %174 = vector.extract_strided_slice %8 {offsets = [0, 3584], sizes = [8, 128], strides = [1, 1]} : vector<8x4608xf32> to vector<8x128xf32>
    %c7_112 = arith.constant 7 : index
    %c0_113 = arith.constant 0 : index
    %c0_114 = arith.constant 0 : index
    %175 = vector.load %arg7[%c7_112, %c0_113, %c0_114] : memref<9x256x128xbf16, #tpu.memory_space<vmem>>, vector<1x256x128xbf16>
    %176 = vector.shape_cast %175 : vector<1x256x128xbf16> to vector<256x128xbf16>
    %cst_115 = arith.constant dense<0.000000e+00> : vector<8x128xf32>
    %177 = tpu.matmul %129, %176, %cst_115 {dimension_numbers = #tpu.dot_dimension_numbers<[1], [0], [0], [1], [0, 0, 1, 1], [], []>} : vector<8x256xbf16>, vector<256x128xbf16>, vector<8x128xf32> -> vector<8x128xf32>
    %178 = arith.mulf %174, %177 : vector<8x128xf32>
    %179 = arith.addf %173, %178 : vector<8x128xf32>
    %180 = vector.extract_strided_slice %8 {offsets = [0, 4096], sizes = [8, 128], strides = [1, 1]} : vector<8x4608xf32> to vector<8x128xf32>
    %c8_116 = arith.constant 8 : index
    %c0_117 = arith.constant 0 : index
    %c0_118 = arith.constant 0 : index
    %181 = vector.load %arg7[%c8_116, %c0_117, %c0_118] : memref<9x256x128xbf16, #tpu.memory_space<vmem>>, vector<1x256x128xbf16>
    %182 = vector.shape_cast %181 : vector<1x256x128xbf16> to vector<256x128xbf16>
    %cst_119 = arith.constant dense<0.000000e+00> : vector<8x128xf32>
    %183 = tpu.matmul %129, %182, %cst_119 {dimension_numbers = #tpu.dot_dimension_numbers<[1], [0], [0], [1], [0, 0, 1, 1], [], []>} : vector<8x256xbf16>, vector<256x128xbf16>, vector<8x128xf32> -> vector<8x128xf32>
    %184 = arith.mulf %180, %183 : vector<8x128xf32>
    %185 = arith.addf %179, %184 : vector<8x128xf32>
    %c0_120 = arith.constant 0 : index
    %c0_121 = arith.constant 0 : index
    %186 = vector.load %arg8[%c0_120, %c0_121] : memref<1x128xf32, #tpu.memory_space<vmem>>, vector<1x128xf32>
    %187 = vector.broadcast %186 : vector<1x128xf32> to vector<8x128xf32>
    %188 = arith.addf %185, %187 : vector<8x128xf32>
    %cst_122 = arith.constant 0.000000e+00 : f32
    %189 = vector.broadcast %cst_122 : f32 to vector<8x128xf32>
    %190 = arith.maximumf %188, %189 : vector<8x128xf32>
    %191 = arith.truncf %190 : vector<8x128xf32> to vector<8x128xbf16>
    %c0_123 = arith.constant 0 : index
    %c0_124 = arith.constant 0 : index
    %192 = vector.load %arg20[%c0_123, %c0_124] : memref<128x2xbf16, #tpu.memory_space<vmem>>, vector<128x2xbf16>
    %cst_125 = arith.constant dense<0.000000e+00> : vector<8x2xf32>
    %193 = tpu.matmul %191, %192, %cst_125 {dimension_numbers = #tpu.dot_dimension_numbers<[1], [0], [0], [1], [0, 0, 1, 1], [], []>} : vector<8x128xbf16>, vector<128x2xbf16>, vector<8x2xf32> -> vector<8x2xf32>
    %194 = arith.addf %132, %193 : vector<8x2xf32>
    %c0_126 = arith.constant 0 : index
    %c0_127 = arith.constant 0 : index
    %195 = vector.load %arg9[%c0_126, %c0_127] : memref<144x64xbf16, #tpu.memory_space<vmem>>, vector<144x64xbf16>
    %cst_128 = arith.constant dense<0.000000e+00> : vector<8x64xf32>
    %196 = tpu.matmul %1, %195, %cst_128 {dimension_numbers = #tpu.dot_dimension_numbers<[1], [0], [0], [1], [0, 0, 1, 1], [], []>} : vector<8x144xbf16>, vector<144x64xbf16>, vector<8x64xf32> -> vector<8x64xf32>
    %c0_129 = arith.constant 0 : index
    %c0_130 = arith.constant 0 : index
    %197 = vector.load %arg10[%c0_129, %c0_130] : memref<1x64xf32, #tpu.memory_space<vmem>>, vector<1x64xf32>
    %198 = vector.broadcast %197 : vector<1x64xf32> to vector<8x64xf32>
    %199 = arith.addf %196, %198 : vector<8x64xf32>
    %c0_131 = arith.constant 0 : index
    %c0_132 = arith.constant 0 : index
    %200 = vector.load %arg11[%c0_131, %c0_132] : memref<1x64xf32, #tpu.memory_space<vmem>>, vector<1x64xf32>
    %201 = vector.broadcast %200 : vector<1x64xf32> to vector<8x64xf32>
    %202 = arith.mulf %199, %201 : vector<8x64xf32>
    %c0_133 = arith.constant 0 : index
    %c0_134 = arith.constant 0 : index
    %203 = vector.load %arg12[%c0_133, %c0_134] : memref<1x64xf32, #tpu.memory_space<vmem>>, vector<1x64xf32>
    %204 = vector.broadcast %203 : vector<1x64xf32> to vector<8x64xf32>
    %205 = arith.addf %202, %204 : vector<8x64xf32>
    %cst_135 = arith.constant 0.000000e+00 : f32
    %206 = vector.broadcast %cst_135 : f32 to vector<8x64xf32>
    %207 = arith.maximumf %205, %206 : vector<8x64xf32>
    %208 = arith.truncf %207 : vector<8x64xf32> to vector<8x64xbf16>
    %c0_136 = arith.constant 0 : index
    %c0_137 = arith.constant 0 : index
    %209 = vector.load %arg13[%c0_136, %c0_137] : memref<64x32xbf16, #tpu.memory_space<vmem>>, vector<64x32xbf16>
    %cst_138 = arith.constant dense<0.000000e+00> : vector<8x32xf32>
    %210 = tpu.matmul %208, %209, %cst_138 {dimension_numbers = #tpu.dot_dimension_numbers<[1], [0], [0], [1], [0, 0, 1, 1], [], []>} : vector<8x64xbf16>, vector<64x32xbf16>, vector<8x32xf32> -> vector<8x32xf32>
    %c0_139 = arith.constant 0 : index
    %c0_140 = arith.constant 0 : index
    %211 = vector.load %arg14[%c0_139, %c0_140] : memref<1x32xf32, #tpu.memory_space<vmem>>, vector<1x32xf32>
    %212 = vector.broadcast %211 : vector<1x32xf32> to vector<8x32xf32>
    %213 = arith.addf %210, %212 : vector<8x32xf32>
    %c0_141 = arith.constant 0 : index
    %c0_142 = arith.constant 0 : index
    %214 = vector.load %arg15[%c0_141, %c0_142] : memref<1x32xf32, #tpu.memory_space<vmem>>, vector<1x32xf32>
    %215 = vector.broadcast %214 : vector<1x32xf32> to vector<8x32xf32>
    %216 = arith.mulf %213, %215 : vector<8x32xf32>
    %c0_143 = arith.constant 0 : index
    %c0_144 = arith.constant 0 : index
    %217 = vector.load %arg16[%c0_143, %c0_144] : memref<1x32xf32, #tpu.memory_space<vmem>>, vector<1x32xf32>
    %218 = vector.broadcast %217 : vector<1x32xf32> to vector<8x32xf32>
    %219 = arith.addf %216, %218 : vector<8x32xf32>
    %cst_145 = arith.constant 0.000000e+00 : f32
    %220 = vector.broadcast %cst_145 : f32 to vector<8x32xf32>
    %221 = arith.maximumf %219, %220 : vector<8x32xf32>
    %222 = arith.truncf %221 : vector<8x32xf32> to vector<8x32xbf16>
    %c0_146 = arith.constant 0 : index
    %c0_147 = arith.constant 0 : index
    %223 = vector.load %arg21[%c0_146, %c0_147] : memref<32x2xbf16, #tpu.memory_space<vmem>>, vector<32x2xbf16>
    %cst_148 = arith.constant dense<0.000000e+00> : vector<8x2xf32>
    %224 = tpu.matmul %222, %223, %cst_148 {dimension_numbers = #tpu.dot_dimension_numbers<[1], [0], [0], [1], [0, 0, 1, 1], [], []>} : vector<8x32xbf16>, vector<32x2xbf16>, vector<8x2xf32> -> vector<8x2xf32>
    %225 = arith.addf %194, %224 : vector<8x2xf32>
    %c0_149 = arith.constant 0 : index
    %c0_150 = arith.constant 0 : index
    %226 = vector.load %arg23[%c0_149, %c0_150] : memref<8x2xf32, #tpu.memory_space<vmem>>, vector<8x2xf32>
    tpu.vector_store %arg23[%c0_149, %c0_150], %225 {strides = array<i32>} : memref<8x2xf32, #tpu.memory_space<vmem>>, vector<8x2xf32>,
    return
  }
  func.func @transform_0(%arg0: i32) -> (i32, i32) {
    %c0_i32 = arith.constant 0 : i32
    %c0_i32_0 = arith.constant 0 : i32
    return %arg0, %c0_i32 : i32, i32
  }
  func.func @transform_1(%arg0: i32) -> (i32, i32) {
    %c0_i32 = arith.constant 0 : i32
    %c0_i32_0 = arith.constant 0 : i32
    %c0_i32_1 = arith.constant 0 : i32
    return %c0_i32, %c0_i32_0 : i32, i32
  }
  func.func @transform_2(%arg0: i32) -> (i32, i32, i32) {
    %c0_i32 = arith.constant 0 : i32
    %c0_i32_0 = arith.constant 0 : i32
    %c0_i32_1 = arith.constant 0 : i32
    %c0_i32_2 = arith.constant 0 : i32
    return %c0_i32, %c0_i32_0, %c0_i32_1 : i32, i32, i32
  }
  func.func @transform_3(%arg0: i32) -> (i32, i32) {
    %c0_i32 = arith.constant 0 : i32
    %c0_i32_0 = arith.constant 0 : i32
    %c0_i32_1 = arith.constant 0 : i32
    return %c0_i32, %c0_i32_0 : i32, i32
  }
  func.func @transform_4(%arg0: i32) -> (i32, i32, i32) {
    %c0_i32 = arith.constant 0 : i32
    %c0_i32_0 = arith.constant 0 : i32
    %c0_i32_1 = arith.constant 0 : i32
    %c0_i32_2 = arith.constant 0 : i32
    return %c0_i32, %c0_i32_0, %c0_i32_1 : i32, i32, i32
  }
  func.func @transform_5(%arg0: i32) -> (i32, i32) {
    %c0_i32 = arith.constant 0 : i32
    %c0_i32_0 = arith.constant 0 : i32
    %c0_i32_1 = arith.constant 0 : i32
    return %c0_i32, %c0_i32_0 : i32, i32
  }
  func.func @transform_6(%arg0: i32) -> (i32, i32, i32) {
    %c0_i32 = arith.constant 0 : i32
    %c0_i32_0 = arith.constant 0 : i32
    %c0_i32_1 = arith.constant 0 : i32
    %c0_i32_2 = arith.constant 0 : i32
    return %c0_i32, %c0_i32_0, %c0_i32_1 : i32, i32, i32
  }
  func.func @transform_7(%arg0: i32) -> (i32, i32) {
    %c0_i32 = arith.constant 0 : i32
    %c0_i32_0 = arith.constant 0 : i32
    %c0_i32_1 = arith.constant 0 : i32
    return %c0_i32, %c0_i32_0 : i32, i32
  }
  func.func @transform_8(%arg0: i32) -> (i32, i32) {
    %c0_i32 = arith.constant 0 : i32
    %c0_i32_0 = arith.constant 0 : i32
    %c0_i32_1 = arith.constant 0 : i32
    return %c0_i32, %c0_i32_0 : i32, i32
  }
  func.func @transform_9(%arg0: i32) -> (i32, i32) {
    %c0_i32 = arith.constant 0 : i32
    %c0_i32_0 = arith.constant 0 : i32
    %c0_i32_1 = arith.constant 0 : i32
    return %c0_i32, %c0_i32_0 : i32, i32
  }
  func.func @transform_10(%arg0: i32) -> (i32, i32) {
    %c0_i32 = arith.constant 0 : i32
    %c0_i32_0 = arith.constant 0 : i32
    %c0_i32_1 = arith.constant 0 : i32
    return %c0_i32, %c0_i32_0 : i32, i32
  }
  func.func @transform_11(%arg0: i32) -> (i32, i32) {
    %c0_i32 = arith.constant 0 : i32
    %c0_i32_0 = arith.constant 0 : i32
    %c0_i32_1 = arith.constant 0 : i32
    return %c0_i32, %c0_i32_0 : i32, i32
  }
  func.func @transform_12(%arg0: i32) -> (i32, i32) {
    %c0_i32 = arith.constant 0 : i32
    %c0_i32_0 = arith.constant 0 : i32
    %c0_i32_1 = arith.constant 0 : i32
    return %c0_i32, %c0_i32_0 : i32, i32
  }
  func.func @transform_13(%arg0: i32) -> (i32, i32) {
    %c0_i32 = arith.constant 0 : i32
    %c0_i32_0 = arith.constant 0 : i32
    %c0_i32_1 = arith.constant 0 : i32
    return %c0_i32, %c0_i32_0 : i32, i32
  }
  func.func @transform_14(%arg0: i32) -> (i32, i32) {
    %c0_i32 = arith.constant 0 : i32
    %c0_i32_0 = arith.constant 0 : i32
    %c0_i32_1 = arith.constant 0 : i32
    return %c0_i32, %c0_i32_0 : i32, i32
  }
  func.func @transform_15(%arg0: i32) -> (i32, i32) {
    %c0_i32 = arith.constant 0 : i32
    %c0_i32_0 = arith.constant 0 : i32
    %c0_i32_1 = arith.constant 0 : i32
    return %c0_i32, %c0_i32_0 : i32, i32
  }
  func.func @transform_16(%arg0: i32) -> (i32, i32) {
    %c0_i32 = arith.constant 0 : i32
    %c0_i32_0 = arith.constant 0 : i32
    %c0_i32_1 = arith.constant 0 : i32
    return %c0_i32, %c0_i32_0 : i32, i32
  }
  func.func @transform_17(%arg0: i32) -> (i32, i32) {
    %c0_i32 = arith.constant 0 : i32
    %c0_i32_0 = arith.constant 0 : i32
    %c0_i32_1 = arith.constant 0 : i32
    return %c0_i32, %c0_i32_0 : i32, i32
  }
  func.func @transform_18(%arg0: i32) -> (i32, i32) {
    %c0_i32 = arith.constant 0 : i32
    %c0_i32_0 = arith.constant 0 : i32
    %c0_i32_1 = arith.constant 0 : i32
    return %c0_i32, %c0_i32_0 : i32, i32
  }
  func.func @transform_19(%arg0: i32) -> (i32, i32) {
    %c0_i32 = arith.constant 0 : i32
    %c0_i32_0 = arith.constant 0 : i32
    %c0_i32_1 = arith.constant 0 : i32
    return %c0_i32, %c0_i32_0 : i32, i32
  }
  func.func @transform_20(%arg0: i32) -> (i32, i32) {
    %c0_i32 = arith.constant 0 : i32
    %c0_i32_0 = arith.constant 0 : i32
    %c0_i32_1 = arith.constant 0 : i32
    return %c0_i32, %c0_i32_0 : i32, i32
  }
  func.func @transform_21(%arg0: i32) -> (i32, i32) {
    %c0_i32 = arith.constant 0 : i32
    %c0_i32_0 = arith.constant 0 : i32
    %c0_i32_1 = arith.constant 0 : i32
    return %c0_i32, %c0_i32_0 : i32, i32
  }
  func.func @transform_22(%arg0: i32) -> (i32, i32) {
    %c0_i32 = arith.constant 0 : i32
    %c0_i32_0 = arith.constant 0 : i32
    return %arg0, %c0_i32 : i32, i32
  }
}

</mosaic_0001>

<bundles_post_ra>
// kernel: tpu_custom_call.1
= control target key start
LH: loop header
LB: loop body
LE: loop exit
PB: predicated region body
PF: predicated region fallthrough
CT: control target
= control target key end

     0   :  { %s21750_s0 = inlined_call_operand.hbm [shape: f32[8,144], index: 0, kind: input, shape index: {}]   ;;  %s21751_s1 = inlined_call_operand.hbm [shape: bf16[144,4608], index: 1, kind: input, shape index: {}]   ;;  %s21752_s2 = inlined_call_operand.hbm [shape: bf16[9,144,512], index: 2, kind: input, shape index: {}]   ;;  %s21753_s3 = inlined_call_operand.hbm [shape: f32[1,512], index: 3, kind: input, shape index: {}]   ;;  %s21754_s4 = inlined_call_operand.hbm [shape: bf16[9,512,256], index: 4, kind: input, shape index: {}]   ;;  %s21755_s5 = inlined_call_operand.hbm [shape: f32[1,256], index: 5, kind: input, shape index: {}]   ;;  %s21756_s6 = inlined_call_operand.hbm [shape: bf16[9,256,128], index: 6, kind: input, shape index: {}]   ;;  %s21757_s7 = inlined_call_operand.hbm [shape: f32[1,128], index: 7, kind: input, shape index: {}]   ;;  %s21758_s8 = inlined_call_operand.vmem [shape: bf16[144,64], index: 8, kind: input, shape index: {}]   ;;  %s21759_s9 = inlined_call_operand.hbm [shape: f32[1,64], index: 9, kind: input, shape index: {}]   ;;  %s21760_s10 = inlined_call_operand.hbm [shape: f32[1,64], index: 10, kind: input, shape index: {}]   ;;  %s21761_s11 = inlined_call_operand.hbm [shape: f32[1,64], index: 11, kind: input, shape index: {}]   ;;  %s21762_s12 = inlined_call_operand.vmem [shape: bf16[64,32], index: 12, kind: input, shape index: {}]   ;;  %s21763_s13 = inlined_call_operand.hbm [shape: f32[1,32], index: 13, kind: input, shape index: {}]   ;;  %s21764_s14 = inlined_call_operand.hbm [shape: f32[1,32], index: 14, kind: input, shape index: {}]   ;;  %s21765_s15 = inlined_call_operand.hbm [shape: f32[1,32], index: 15, kind: input, shape index: {}]   ;;  %s21766_s16 = inlined_call_operand.vmem [shape: bf16[144,2], index: 16, kind: input, shape index: {}]   ;;  %s21767_s17 = inlined_call_operand.vmem [shape: bf16[512,2], index: 17, kind: input, shape index: {}]   ;;  %s21768_s18 = inlined_call_operand.vmem [shape: bf16[256,2], index: 18, kind: input, shape index: {}]   ;;  %s21769_s19 = inlined_call_operand.vmem [shape: bf16[128,2], index: 19, kind: input, shape index: {}]   ;;  %s21770_s20 = inlined_call_operand.vmem [shape: bf16[32,2], index: 20, kind: input, shape index: {}]   ;;  %s21771_s21 = inlined_call_operand.hbm [shape: f32[1,2], index: 21, kind: input, shape index: {}]   ;;  %s21772_s22 = inlined_call_operand.vmem [shape: f32[8,2], index: 22, kind: output, shape index: {}]  }
   0x1   :  { %21777 = sst [smem:[#allocation39_spill]] %s21750_s0 }
   0x2   :  { %21778 = sst [smem:[#allocation40_spill]] %s21751_s1 }
   0x3   :  { %21779 = sst [smem:[#allocation41_spill]] %s21752_s2 }
   0x4   :  { %21780 = sst [smem:[#allocation42_spill]] %s21753_s3 }
   0x5   :  { %21781 = sst [smem:[#allocation43_spill]] %s21754_s4 }
   0x6   :  { %21782 = sst [smem:[#allocation44_spill]] %s21755_s5 }
   0x7   :  { %21783 = sst [smem:[#allocation45_spill]] %s21756_s6 }
   0x8   :  { %21784 = sst [smem:[#allocation46_spill]] %s21762_s12 }
   0x9   :  { %21785 = sst [smem:[#allocation47_spill]] %s21770_s20 }
   0xa   :  { %21786 = sst [smem:[#allocation48_spill]] %s21772_s22 }
   0xb   :  { %27 = vsyncpa [#allocation3], 0 }
   0xc   :  { %28 = vsyncpa [#allocation5], 0 }
   0xd   :  { %29 = vsyncpa [#allocation8], 0 }
   0xe   :  { %30 = vsyncpa [#allocation11], 0 }
   0xf   :  { %31 = vsyncpa [#allocation14], 0 }
  0x10   :  { %32 = vsyncpa [#allocation17], 0 }
  0x11   :  { %33 = vsyncpa [#allocation20], 0  ;;  %s21787_s29 = sld [smem:[#allocation40_spill]] }
  0x17   :  { %s50_s30 = sshll.u32 %s21787_s29, 4  ;;  %s51_s30 = int_to_ptr.hbm [resolvable:$true] %s50_s30 }
  0x18   :  { %34 = vsyncpa [#allocation23], 0  ;;  %s20608_s4 = smov [#allocation4]   ;;  %s21788_s5 = sld [smem:[#allocation42_spill]] }
  0x19   :  { %s52_s0 = sshll.u32 %s20608_s4, 4  ;;  %s20609_s6 = smov 2304   ;;  %s53_s0 = int_to_ptr.vmem [resolvable:$true] %s52_s0 }
  0x1a   :  { %s20610_s25 = smov 144   ;;  %s20611_s26 = smov [#allocation7]  }
  0x1b   :  { %58 = dma.hbm_to_vmem [thread:$0]  %s51_s30, 41472, %s53_s0, [#allocation5], %s20609_s6, %s20609_s6, %s20610_s25  }
  0x1c   :  { %s79_s2 = sshll.u32 %s20611_s26, 4  ;;  %s21789_s20 = sld [smem:[#allocation44_spill]]  ;;  %s80_s2 = int_to_ptr.vmem [resolvable:$true] %s79_s2 }
  0x1d   :  { %s125_s4 = sshll.u32 %s21757_s7, 4  ;;  %s20612_s12 = smov [#allocation10]   ;;  %s126_s4 = int_to_ptr.hbm [resolvable:$true] %s125_s4 }
  0x1e   :  { %s77_s24 = sshll.u32 %s21788_s5, 4  ;;  %s103_s23 = sshll.u32 %s20612_s12, 4  ;;  %s78_s24 = int_to_ptr.hbm [resolvable:$true] %s77_s24  ;;  %s104_s23 = int_to_ptr.vmem [resolvable:$true] %s103_s23 }
  0x1f   :  { %82 = dma.hbm_to_vmem [thread:$0]  %s78_s24, 64, %s80_s2, [#allocation8]  }
  0x20   :  { %s20613_s30 = smov [#allocation13]   ;;  %s149_s6 = sshll.u32 %s21760_s10, 4  ;;  %s150_s6 = int_to_ptr.hbm [resolvable:$true] %s149_s6 }
  0x21   :  { %s127_s0 = sshll.u32 %s20613_s30, 4  ;;  %s173_s24 = sshll.u32 %s21763_s13, 4  ;;  %s128_s0 = int_to_ptr.vmem [resolvable:$true] %s127_s0  ;;  %s174_s24 = int_to_ptr.hbm [resolvable:$true] %s173_s24 }
  0x22   :  { %s101_s3 = sshll.u32 %s21789_s20, 4  ;;  %s20614_s25 = smov [#allocation16]   ;;  %s102_s3 = int_to_ptr.hbm [resolvable:$true] %s101_s3 }
  0x23   :  { %106 = dma.hbm_to_vmem [thread:$0]  %s102_s3, 32, %s104_s23, [#allocation11]  }
  0x24   :  { %130 = dma.hbm_to_vmem [thread:$0]  %s126_s4, 16, %s128_s0, [#allocation14]  }
  0x25   :  { %s151_s7 = sshll.u32 %s20614_s25, 4  ;;  %s20615_s12 = smov [#allocation19]   ;;  %s152_s7 = int_to_ptr.vmem [resolvable:$true] %s151_s7 }
  0x26   :  { %154 = dma.hbm_to_vmem [thread:$0]  %s150_s6, 16, %s152_s7, [#allocation17]  }
  0x27   :  { %s175_s26 = sshll.u32 %s20615_s12, 4  ;;  %s195_s3 = sshll.u32 %s21765_s15, 4  ;;  %s176_s26 = int_to_ptr.vmem [resolvable:$true] %s175_s26  ;;  %s196_s3 = int_to_ptr.hbm [resolvable:$true] %s195_s3 }
  0x28   :  { %178 = dma.hbm_to_vmem [thread:$0]  %s174_s24, 16, %s176_s26, [#allocation20]  }
  0x29   :  { %s21790_s29 = sld [smem:[#allocation39_spill]]  ;;  %s20616_s23 = smov [#allocation22]  }
  0x2a   :  { %s197_s13 = sshll.u32 %s20616_s23, 4  ;;  %s20617_s30 = smov [#allocation2]   ;;  %s198_s13 = int_to_ptr.vmem [resolvable:$true] %s197_s13 }
  0x2b   :  { %200 = dma.hbm_to_vmem [thread:$0]  %s196_s3, 16, %s198_s13, [#allocation23]  }
  0x2c   :  { %s42_s0 = sshll.u32 %s20617_s30, 4  ;;  %s21791_s6 = sld [smem:[#allocation41_spill]]  ;;  %s43_s0 = int_to_ptr.vmem [resolvable:$true] %s42_s0 }
  0x2d   :  { %s20618_s15 = smov [#allocation6]   ;;  %s21792_s7 = sld [smem:[#allocation43_spill]] }
  0x2e   :  { %s65_s22 = sshll.u32 %s20618_s15, 4  ;;  %s20619_s26 = smov 256   ;;  %s66_s22 = int_to_ptr.vmem [resolvable:$true] %s65_s22 }
  0x2f   :  { %s40_s4 = sshll.u32 %s21790_s29, 4  ;;  %s20620_s2 = smov 16   ;;  %s41_s4 = int_to_ptr.hbm [resolvable:$true] %s40_s4 }
  0x30   :  { %45 = dma.hbm_to_vmem [thread:$0]  %s41_s4, 256, %s43_s0, [#allocation3]  }
  0x31   :  { %s20621_s27 = smov [#allocation9]   ;;  %s20622_s10 = smov 128  }
  0x32   :  { %s63_s20 = sshll.u32 %s21791_s6, 4  ;;  %s89_s3 = sshll.u32 %s20621_s27, 4  ;;  %s64_s20 = int_to_ptr.hbm [resolvable:$true] %s63_s20  ;;  %s90_s3 = int_to_ptr.vmem [resolvable:$true] %s89_s3 }
  0x33   :  { %s87_s12 = sshll.u32 %s21792_s7, 4  ;;  %s20623_s28 = smov 8   ;;  %s88_s12 = int_to_ptr.hbm [resolvable:$true] %s87_s12 }
  0x34   :  { %71 = dma.hbm_to_vmem [thread:$0]  %s64_s20, 41472, %s66_s22, [#allocation5], %s20619_s26, %s20619_s26, %s20620_s2  }
  0x35   :  { %95 = dma.hbm_to_vmem [thread:$0]  %s88_s12, 73728, %s90_s3, [#allocation8], %s20622_s10, %s20622_s10, %s20623_s28  }
  0x36   :  { %s21793_s4 = sld [smem:[#allocation45_spill]]  ;;  %s20624_s30 = smov [#allocation12]  }
  0x37   :  { %s113_s0 = sshll.u32 %s20624_s30, 4  ;;  %s138_s6 = sshll.u32 %s21759_s9, 4  ;;  %s114_s0 = int_to_ptr.vmem [resolvable:$true] %s113_s0  ;;  %s139_s6 = int_to_ptr.hbm [resolvable:$true] %s138_s6 }
  0x38   :  { %s20625_s20 = smov 64   ;;  %s20626_s15 = smov 4  }
  0x39   :  { %s20627_s22 = smov [#allocation15]   ;;  %s160_s12 = sshll.u32 %s21761_s11, 4  ;;  %s161_s12 = int_to_ptr.hbm [resolvable:$true] %s160_s12 }
  0x3a   :  { %s140_s24 = sshll.u32 %s20627_s22, 4  ;;  %s184_s27 = sshll.u32 %s21764_s14, 4  ;;  %s141_s24 = int_to_ptr.vmem [resolvable:$true] %s140_s24  ;;  %s185_s27 = int_to_ptr.hbm [resolvable:$true] %s184_s27 }
  0x3b   :  { %143 = dma.hbm_to_vmem [thread:$0]  %s139_s6, 16, %s141_s24, [#allocation14]  }
  0x3c   :  { %s111_s13 = sshll.u32 %s21793_s4, 4  ;;  %s20628_s3 = smov [#allocation18]   ;;  %s112_s13 = int_to_ptr.hbm [resolvable:$true] %s111_s13 }
  0x3d   :  { %119 = dma.hbm_to_vmem [thread:$0]  %s112_s13, 18432, %s114_s0, [#allocation11], %s20625_s20, %s20625_s20, %s20626_s15  }
  0x3e   :  { %s162_s10 = sshll.u32 %s20628_s3, 4  ;;  %s20629_s9 = smov [#allocation21]   ;;  %s163_s10 = int_to_ptr.vmem [resolvable:$true] %s162_s10 }
  0x3f   :  { %165 = dma.hbm_to_vmem [thread:$0]  %s161_s12, 16, %s163_s10, [#allocation17]  }
  0x40   :  { %s186_s28 = sshll.u32 %s20629_s9, 4  ;;  %s216_s4 = sshll.u32 %s21771_s21, 4  ;;  %s187_s28 = int_to_ptr.vmem [resolvable:$true] %s186_s28  ;;  %s217_s4 = int_to_ptr.hbm [resolvable:$true] %s216_s4 }
  0x41   :  { %189 = dma.hbm_to_vmem [thread:$0]  %s185_s27, 16, %s187_s28, [#allocation20]  }
  0x42   :  { %s20630_s11 = smov [#allocation24]  }
  0x43   :  { %s218_s13 = sshll.u32 %s20630_s11, 4  ;;  %s219_s13 = int_to_ptr.vmem [resolvable:$true] %s218_s13 }
  0x44   :  { %221 = dma.hbm_to_vmem [thread:$0]  %s217_s4, 16, %s219_s13, [#allocation23]  }
  0x45   :  { %20592 = dma.done.wait [#allocation3], 256  }
  0x46   :  { %20593 = vsyncadd [#allocation3], 4294967040 }
  0x47   :  { %20594 = dma.done.wait [#allocation5], 82944  }
  0x48   :  { %20595 = vsyncadd [#allocation5], 4294884352 }
  0x49   :  { %20596 = dma.done.wait [#allocation8], 73792  }
  0x4a   :  { %20597 = vsyncadd [#allocation8], 4294893504 }
  0x4b   :  { %20598 = dma.done.wait [#allocation11], 18464  }
  0x4c   :  { %20599 = vsyncadd [#allocation11], 4294948832 }
  0x4d   :  { %20600 = dma.done.wait [#allocation14], 32  }
  0x4e   :  { %20601 = vsyncadd [#allocation14], 4294967264 }
  0x4f   :  { %20602 = dma.done.wait [#allocation17], 32  }
  0x50   :  { %20603 = vsyncadd [#allocation17], 4294967264 }
  0x51   :  { %20604 = dma.done.wait [#allocation20], 32  }
  0x52   :  { %20605 = vsyncadd [#allocation20], 4294967264 }
  0x53   :  { %20606 = dma.done.wait [#allocation23], 32  }
  0x54   :  { %20607 = vsyncadd [#allocation23], 4294967264  ;;  %v18761_v0 = vld [vmem:[%s21766_s16 + $0x40] sm:$0xff]  ;;  %v13932_v1 = vld [vmem:[#allocation4 + $0x7e0] sm:$0xf]  ;;  %vm360_vm0 = vcmask 130048  }
  0x55   :  { %v19032_v2 = vld [vmem:[#allocation4 + $0x86c] sm:$0xf0]  ;;  %v18760_v4 = vld [vmem:[%s21766_s16 + $0x38] sm:$0xff]  ;;  %v19014_v5 = vld [vmem:[#allocation4 + $0x7e4] sm:$0xf]  ;;  %384 = vmatpush.bf16.msra.mxu1 %v18761_v0  ;;  %s21806_s22 = sld [smem:[#allocation46_spill]] }
  0x56   :  { %v13933_v3 = vor.u32 %v19032_v2, %v13932_v1  ;;  %v13934_v6 = vld [vmem:[#allocation4 + $0x870] sm:$0xf0]  ;;  %v13788_v8 = vld [vmem:[#allocation4 + $0x6c0] sm:$0xf]  ;;  %v18996_v9 = vld [vmem:[#allocation4 + $0x74c] sm:$0xf0]  ;;  %364 = vmatpush.bf16.msra.mxu0 %v18760_v4 }
  0x57   :  { %v13937_v7 = vor.u32 %v19014_v5, %v13934_v6  ;;  %v14076_v10 = vld [vmem:[#allocation4 + $0x900] sm:$0xf]  ;;  %v13789_v11 = vor.u32 %v18996_v9, %v13788_v8  ;;  %v19068_v12 = vld [vmem:[#allocation4 + $0x98c] sm:$0xf0]  ;;  %v18978_v14 = vld [vmem:[#allocation4 + $0x6c4] sm:$0xf] }
  0x58   :  { %2338 = vmatpush.bf16.msra.mxu2 %v13933_v3  ;;  %v18759_v13 = vld [vmem:[%s21766_s16 + $0x30] sm:$0xff]  ;;  %v14077_v15 = vor.u32 %v19068_v12, %v14076_v10  ;;  %v13790_v16 = vld [vmem:[#allocation4 + $0x750] sm:$0xf0]  ;;  %v18960_v22 = vld [vmem:[#allocation4 + $0x62c] sm:$0xf0]  ;;  %vm12808_vm1 = vcmask 523264  }
  0x59   :  { %2364 = vmatpush.bf16.msrb.mxu1 %v13937_v7  ;;  %v19050_v17 = vld [vmem:[#allocation4 + $0x904] sm:$0xf]  ;;  %v14078_v18 = vld [vmem:[#allocation4 + $0x990] sm:$0xf0]  ;;  %v13793_v19 = vor.u32 %v18978_v14, %v13790_v16  ;;  %v13644_v21 = vld [vmem:[#allocation4 + $0x5a0] sm:$0xf] }
  0x5a   :  { %v14081_v20 = vor.u32 %v19050_v17, %v14078_v18  ;;  %v284_v23 = vld [vmem:[#allocation2 + $0x8] sm:$0xff]  ;;  %2358 = vmatpush.bf16.msra.mxu3 %v14077_v15  ;;  %v13940_v25 = vld [vmem:[#allocation4 + $0x7e8] sm:$0xf]  ;;  %365 = vmatpush.bf16.msra.mxu0 %v18759_v13  ;;  %v13645_v28 = vor.u32 %v18960_v22, %v13644_v21  ;;  %v18942_v30 = vld [vmem:[#allocation4 + $0x5a4] sm:$0xf]  ;;  %s21807_s3 = sld [smem:[#allocation47_spill]] }
  0x5b   :  { %v20800_v24 = vpack.c.bf16 %v284_v23, %v284_v23  ;;  %v19033_v26 = vld [vmem:[#allocation4 + $0x874] sm:$0xf0]  ;;  %v13646_v31 = vld [vmem:[#allocation4 + $0x630] sm:$0xf0]  ;;  %v13500_v32 = vld [vmem:[#allocation4 + $0x480] sm:$0xf] }
  0x5c   :  { %v18758_v27 = vld [vmem:[%s21766_s16 + $0x28] sm:$0xff]  ;;  %2339 = vmatpush.bf16.msra.mxu2 %v13789_v11  ;;  %v13941_v29 = vor.u32 %v19033_v26, %v13940_v25  ;;  %v13649_v33 = vor.u32 %v18942_v30, %v13646_v31  ;;  %v18924_v34 = vld [vmem:[#allocation4 + $0x50c] sm:$0xf0]  ;;  %v13796_v35 = vld [vmem:[#allocation4 + $0x6c8] sm:$0xf]  ;;  %vm12853_vm2 = vcmask 261120  }
  0x5d   :  { %2365 = vmatpush.bf16.msrb.mxu1 %v13793_v19  ;;  %v18997_v36 = vld [vmem:[#allocation4 + $0x754] sm:$0xf0]  ;;  %14218 = vmatmul.msk.bf16.vlgmr.msra.gmra.mxu3 %vm360_vm0, %v20800_v24  ;;  %v18906_v37 = vld [vmem:[#allocation4 + $0x484] sm:$0xf]  ;;  %v13502_v38 = vld [vmem:[#allocation4 + $0x510] sm:$0xf0]  ;;  %v13501_v40 = vor.u32 %v18924_v34, %v13500_v32 }
  0x5e   :  { %2384 = vmatpush.bf16.msrb.mxu3 %v14081_v20  ;;  %12921 = vmatmul.msk.bf16.vlgmr.msra.gmra.mxu1 %vm360_vm0, %v20800_v24  ;;  %v13797_v39 = vor.u32 %v18997_v36, %v13796_v35  ;;  %v18757_v41 = vld [vmem:[%s21766_s16 + $0x20] sm:$0xff]  ;;  %v13652_v42 = vld [vmem:[#allocation4 + $0x5a8] sm:$0xf]  ;;  %v18961_v43 = vld [vmem:[#allocation4 + $0x634] sm:$0xf0]  ;;  %v13505_v44 = vor.u32 %v18906_v37, %v13502_v38  ;;  %vm12871_vm3 = vcmask 15360  }
  0x5f   :  { %366 = vmatpush.bf16.msra.mxu0 %v18758_v27  ;;  %v13356_v45 = vld [vmem:[#allocation4 + $0x360] sm:$0xf]  ;;  %v18888_v46 = vld [vmem:[#allocation4 + $0x3ec] sm:$0xf0]  ;;  %v18870_v47 = vld [vmem:[#allocation4 + $0x364] sm:$0xf]  ;;  %v13653_v49 = vor.u32 %v18961_v43, %v13652_v42 }
  0x60   :  { %2340 = vmatpush.bf16.msra.mxu2 %v13645_v28  ;;  %v13358_v48 = vld [vmem:[#allocation4 + $0x3f0] sm:$0xf0]  ;;  %v13357_v50 = vor.u32 %v18888_v46, %v13356_v45  ;;  %v18756_v51 = vld [vmem:[%s21766_s16 + $0x18] sm:$0xff]  ;;  %v18925_v53 = vld [vmem:[#allocation4 + $0x514] sm:$0xf0]  ;;  %s21808_s28 = sld [smem:[#allocation48_spill]] }
  0x61   :  { %2366 = vmatpush.bf16.msrb.mxu1 %v13649_v33  ;;  %v13508_v52 = vld [vmem:[#allocation4 + $0x488] sm:$0xf]  ;;  %v13361_v54 = vor.u32 %v18870_v47, %v13358_v48  ;;  %v13212_v55 = vld [vmem:[#allocation4 + $0x240] sm:$0xf]  ;;  %v18852_v56 = vld [vmem:[#allocation4 + $0x2cc] sm:$0xf0] }
  0x62   :  { %2390 = vmatpush.bf16.msra.mxu3 %v13941_v29  ;;  %v18834_v57 = vld [vmem:[#allocation4 + $0x244] sm:$0xf]  ;;  %v13214_v58 = vld [vmem:[#allocation4 + $0x2d0] sm:$0xf0]  ;;  %v13509_v59 = vor.u32 %v18925_v53, %v13508_v52  ;;  %v13213_v60 = vor.u32 %v18852_v56, %v13212_v55  ;;  %v13364_v62 = vld [vmem:[#allocation4 + $0x368] sm:$0xf] }
  0x63   :  { %367 = vmatpush.bf16.msra.mxu0 %v18757_v41  ;;  %v18755_v61 = vld [vmem:[%s21766_s16 + $0x10] sm:$0xff]  ;;  %v18889_v63 = vld [vmem:[#allocation4 + $0x3f4] sm:$0xf0]  ;;  %v13217_v0 = vor.u32 %v18834_v57, %v13214_v58  ;;  %v18816_v2 = vld [vmem:[#allocation4 + $0x1ac] sm:$0xf0] }
  0x64   :  { %2341 = vmatpush.bf16.msra.mxu2 %v13501_v40  ;;  %v13068_v1 = vld [vmem:[#allocation4 + $0x120] sm:$0xf]  ;;  %v18798_v3 = vld [vmem:[#allocation4 + $0x124] sm:$0xf]  ;;  %v13070_v4 = vld [vmem:[#allocation4 + $0x1b0] sm:$0xf0]  ;;  %v13365_v5 = vor.u32 %v18889_v63, %v13364_v62 }
  0x65   :  { %2367 = vmatpush.bf16.msrb.mxu1 %v13505_v44  ;;  %v13069_v6 = vor.u32 %v18816_v2, %v13068_v1  ;;  %v18754_v7 = vld [vmem:[%s21766_s16 + $0x8] sm:$0xff]  ;;  %v13220_v8 = vld [vmem:[#allocation4 + $0x248] sm:$0xf]  ;;  %v13073_v10 = vor.u32 %v18798_v3, %v13070_v4  ;;  %v12924_v11 = vld [vmem:[#allocation4] sm:$0xf] }
  0x66   :  { %2391 = vmatpush.bf16.msra.mxu3 %v13797_v39  ;;  %v18853_v9 = vld [vmem:[#allocation4 + $0x2d4] sm:$0xf0]  ;;  %v18780_v12 = vld [vmem:[#allocation4 + $0x8c] sm:$0xf0]  ;;  %v18762_v13 = vld [vmem:[#allocation4 + $0x4] sm:$0xf] }
  0x67   :  { %368 = vmatpush.bf16.msra.mxu0 %v18756_v51  ;;  %v12926_v14 = vld [vmem:[#allocation4 + $0x90] sm:$0xf0]  ;;  %v19015_v15 = vld [vmem:[#allocation4 + $0x7ec] sm:$0xf]  ;;  %v13942_v16 = vld [vmem:[#allocation4 + $0x878] sm:$0xf0]  ;;  %v13221_v17 = vor.u32 %v18853_v9, %v13220_v8  ;;  %v12925_v21 = vor.u32 %v18780_v12, %v12924_v11 }
  0x68   :  { %2342 = vmatpush.bf16.msra.mxu2 %v13357_v50  ;;  %v18753_v18 = vld [vmem:[%s21766_s16] sm:$0xff]  ;;  %v14084_v19 = vld [vmem:[#allocation4 + $0x908] sm:$0xf]  ;;  %v19069_v20 = vld [vmem:[#allocation4 + $0x994] sm:$0xf0]  ;;  %v12929_v26 = vor.u32 %v18762_v13, %v12926_v14  ;;  %v13945_v27 = vor.u32 %v19015_v15, %v13942_v16 }
  0x69   :  { %2368 = vmatpush.bf16.msrb.mxu1 %v13361_v54  ;;  %v283_v22 = vld [vmem:[#allocation2] sm:$0xff]  ;;  %v13076_v23 = vld [vmem:[#allocation4 + $0x128] sm:$0xf]  ;;  %v18817_v25 = vld [vmem:[#allocation4 + $0x1b4] sm:$0xf0]  ;;  %v14085_v31 = vor.u32 %v19069_v20, %v14084_v19 }
  0x6a   :  { %2392 = vmatpush.bf16.msra.mxu3 %v13653_v49  ;;  %v18979_v28 = vld [vmem:[#allocation4 + $0x6cc] sm:$0xf]  ;;  %v14086_v30 = vld [vmem:[#allocation4 + $0x998] sm:$0xf0]  ;;  %v13948_v33 = vld [vmem:[#allocation4 + $0x7f0] sm:$0xf]  ;;  %v20826_v36 = vpack.c.bf16 %v283_v22, %v283_v22  ;;  %v13077_v39 = vor.u32 %v18817_v25, %v13076_v23 }
  0x6b   :  { %369 = vmatpush.bf16.msra.mxu0 %v18755_v61  ;;  %v19051_v29 = vld [vmem:[#allocation4 + $0x90c] sm:$0xf]  ;;  %v13798_v32 = vld [vmem:[#allocation4 + $0x758] sm:$0xf0]  ;;  %v19034_v34 = vld [vmem:[#allocation4 + $0x87c] sm:$0xf0] }
  0x6c   :  { %2343 = vmatpush.bf16.msra.mxu2 %v13213_v60  ;;  %v14089_v35 = vor.u32 %v19051_v29, %v14086_v30  ;;  %v14092_v37 = vld [vmem:[#allocation4 + $0x910] sm:$0xf]  ;;  %v19070_v38 = vld [vmem:[#allocation4 + $0x99c] sm:$0xf0]  ;;  %v13801_v40 = vor.u32 %v18979_v28, %v13798_v32  ;;  %v13949_v41 = vor.u32 %v19034_v34, %v13948_v33  ;;  %v12932_v42 = vld [vmem:[#allocation4 + $0x8] sm:$0xf] }
  0x6d   :  { %2369 = vmatpush.bf16.msrb.mxu1 %v13217_v0  ;;  %14219 = vmatmul.msk.bf16.vlgmr.msrb.gmra.mxu3 %vm360_vm0, %v20800_v24  ;;  %v18781_v43 = vld [vmem:[#allocation4 + $0x94] sm:$0xf0]  ;;  %v18943_v44 = vld [vmem:[#allocation4 + $0x5ac] sm:$0xf]  ;;  %v13654_v45 = vld [vmem:[#allocation4 + $0x638] sm:$0xf0]  ;;  %v14093_v48 = vor.u32 %v19070_v38, %v14092_v37 }
  0x6e   :  { %2393 = vmatpush.bf16.msra.mxu3 %v13509_v59  ;;  %v13804_v46 = vld [vmem:[#allocation4 + $0x6d0] sm:$0xf]  ;;  %v18998_v47 = vld [vmem:[#allocation4 + $0x75c] sm:$0xf0]  ;;  %v19016_v49 = vld [vmem:[#allocation4 + $0x7f4] sm:$0xf]  ;;  %v12933_v51 = vor.u32 %v18781_v43, %v12932_v42  ;;  %v13657_v52 = vor.u32 %v18943_v44, %v13654_v45 }
  0x6f   :  { %370 = vmatpush.bf16.msra.mxu0 %v18754_v7  ;;  %v13950_v50 = vld [vmem:[#allocation4 + $0x880] sm:$0xf0]  ;;  %v13805_v53 = vor.u32 %v18998_v47, %v13804_v46  ;;  %v18907_v54 = vld [vmem:[#allocation4 + $0x48c] sm:$0xf]  ;;  %v13510_v56 = vld [vmem:[#allocation4 + $0x518] sm:$0xf0] }
  0x70   :  { %2344 = vmatpush.bf16.msra.mxu2 %v13069_v6  ;;  %v13953_v55 = vor.u32 %v19016_v49, %v13950_v50  ;;  %v13660_v57 = vld [vmem:[#allocation4 + $0x5b0] sm:$0xf]  ;;  %v18962_v58 = vld [vmem:[#allocation4 + $0x63c] sm:$0xf0]  ;;  %v18980_v59 = vld [vmem:[#allocation4 + $0x6d4] sm:$0xf]  ;;  %v13513_v61 = vor.u32 %v18907_v54, %v13510_v56 }
  0x71   :  { %2370 = vmatpush.bf16.msrb.mxu1 %v13073_v10  ;;  %v13806_v60 = vld [vmem:[#allocation4 + $0x760] sm:$0xf0]  ;;  %v13661_v62 = vor.u32 %v18962_v58, %v13660_v57  ;;  %v18871_v63 = vld [vmem:[#allocation4 + $0x36c] sm:$0xf]  ;;  %v13366_v1 = vld [vmem:[#allocation4 + $0x3f8] sm:$0xf0] }
  0x72   :  { %2394 = vmatpush.bf16.msra.mxu3 %v13365_v5  ;;  %v13809_v0 = vor.u32 %v18980_v59, %v13806_v60  ;;  %v13516_v2 = vld [vmem:[#allocation4 + $0x490] sm:$0xf]  ;;  %v18926_v3 = vld [vmem:[#allocation4 + $0x51c] sm:$0xf0]  ;;  %v18944_v4 = vld [vmem:[#allocation4 + $0x5b4] sm:$0xf]  ;;  %v13369_v6 = vor.u32 %v18871_v63, %v13366_v1 }
  0x73   :  { %371 = vmatpush.bf16.msra.mxu0 %v18753_v18  ;;  %v13662_v5 = vld [vmem:[#allocation4 + $0x640] sm:$0xf0]  ;;  %v13517_v7 = vor.u32 %v18926_v3, %v13516_v2  ;;  %v18835_v8 = vld [vmem:[#allocation4 + $0x24c] sm:$0xf]  ;;  %v13222_v9 = vld [vmem:[#allocation4 + $0x2d8] sm:$0xf0] }
  0x74   :  { %2345 = vmatpush.bf16.msra.mxu2 %v12925_v21  ;;  %v13665_v10 = vor.u32 %v18944_v4, %v13662_v5  ;;  %v13372_v11 = vld [vmem:[#allocation4 + $0x370] sm:$0xf]  ;;  %v18890_v12 = vld [vmem:[#allocation4 + $0x3fc] sm:$0xf0]  ;;  %v18908_v13 = vld [vmem:[#allocation4 + $0x494] sm:$0xf] }
  0x75   :  { %2371 = vmatpush.bf16.msrb.mxu1 %v12929_v26  ;;  %v13518_v14 = vld [vmem:[#allocation4 + $0x520] sm:$0xf0]  ;;  %v13956_v15 = vld [vmem:[#allocation4 + $0x7f8] sm:$0xf]  ;;  %v19035_v16 = vld [vmem:[#allocation4 + $0x884] sm:$0xf0]  ;;  %v13373_v18 = vor.u32 %v18890_v12, %v13372_v11 }
  0x76   :  { %2395 = vmatpush.bf16.msra.mxu3 %v13221_v17  ;;  %372 = vmatmul.bf16.vlgmr.msra.gmra.mxu0 %v20826_v36  ;;  %v13225_v17 = vor.u32 %v18835_v8, %v13222_v9  ;;  %v18799_v19 = vld [vmem:[#allocation4 + $0x12c] sm:$0xf]  ;;  %v13078_v20 = vld [vmem:[#allocation4 + $0x1b8] sm:$0xf0]  ;;  %v13521_v21 = vor.u32 %v18908_v13, %v13518_v14  ;;  %v13957_v22 = vor.u32 %v19035_v16, %v13956_v15  ;;  %v13228_v23 = vld [vmem:[#allocation4 + $0x250] sm:$0xf] }
  0x77   :  { %2410 = vmatpush.bf16.msrb.mxu0 %v14085_v31  ;;  %2346 = vmatmul.bf16.vlgmr.msra.gmra.mxu2 %v20826_v36  ;;  %v18854_v25 = vld [vmem:[#allocation4 + $0x2dc] sm:$0xf0]  ;;  %v18872_v26 = vld [vmem:[#allocation4 + $0x374] sm:$0xf]  ;;  %v13812_v28 = vld [vmem:[#allocation4 + $0x6d8] sm:$0xf]  ;;  %v13081_v30 = vor.u32 %v18799_v19, %v13078_v20 }
  0x78   :  { %2416 = vmatpush.bf16.msrb.mxu2 %v13945_v27  ;;  %2372 = vmatmul.bf16.vlgmr.msrb.gmra.mxu1 %v20826_v36  ;;  %v13374_v27 = vld [vmem:[#allocation4 + $0x400] sm:$0xf0]  ;;  %v18999_v29 = vld [vmem:[#allocation4 + $0x764] sm:$0xf0]  ;;  %v13229_v31 = vor.u32 %v18854_v25, %v13228_v23  ;;  %v18763_v32 = vld [vmem:[#allocation4 + $0xc] sm:$0xf] }
  0x79   :  { %2436 = vmatpush.bf16.msra.mxu1 %v14089_v35  ;;  %v12934_v33 = vld [vmem:[#allocation4 + $0x98] sm:$0xf0]  ;;  %v13377_v34 = vor.u32 %v18872_v26, %v13374_v27  ;;  %v13813_v35 = vor.u32 %v18999_v29, %v13812_v28  ;;  %v13084_v37 = vld [vmem:[#allocation4 + $0x130] sm:$0xf]  ;;  %v18818_v38 = vld [vmem:[#allocation4 + $0x1bc] sm:$0xf0] }
  0x7a   :  { %2396 = vmatpush.bf16.msra.mxu3 %v13077_v39  ;;  %v18836_v39 = vld [vmem:[#allocation4 + $0x254] sm:$0xf]  ;;  %v18963_v42 = vld [vmem:[#allocation4 + $0x644] sm:$0xf0]  ;;  %v14094_v44 = vld [vmem:[#allocation4 + $0x9a0] sm:$0xf0]  ;;  %v12937_v45 = vor.u32 %v18763_v32, %v12934_v33  ;;  %v13085_v46 = vor.u32 %v18818_v38, %v13084_v37 }
  0x7b   :  { %2442 = vmatpush.bf16.msra.mxu0 %v13949_v41  ;;  %v13668_v41 = vld [vmem:[#allocation4 + $0x5b8] sm:$0xf]  ;;  %v19052_v43 = vld [vmem:[#allocation4 + $0x914] sm:$0xf]  ;;  %v12940_v47 = vld [vmem:[#allocation4 + $0x10] sm:$0xf] }
  0x7c   :  { %2417 = vmatpush.bf16.msrb.mxu2 %v13801_v40  ;;  %v13230_v40 = vld [vmem:[#allocation4 + $0x2e0] sm:$0xf0]  ;;  %v13669_v50 = vor.u32 %v18963_v42, %v13668_v41  ;;  %v14097_v54 = vor.u32 %v19052_v43, %v14094_v44  ;;  %v13524_v56 = vld [vmem:[#allocation4 + $0x498] sm:$0xf]  ;;  %v18927_v57 = vld [vmem:[#allocation4 + $0x524] sm:$0xf0] }
  0x7d   :  { %2462 = vmatpush.bf16.msrb.mxu1 %v14093_v48  ;;  %v18782_v48 = vld [vmem:[#allocation4 + $0x9c] sm:$0xf0]  ;;  %v13233_v49 = vor.u32 %v18836_v39, %v13230_v40  ;;  %v14100_v58 = vld [vmem:[#allocation4 + $0x918] sm:$0xf]  ;;  %v19071_v59 = vld [vmem:[#allocation4 + $0x9a4] sm:$0xf0]  ;;  %v13525_v1 = vor.u32 %v18927_v57, %v13524_v56 }
  0x7e   :  { %2397 = vmatpush.bf16.msra.mxu3 %v12933_v51  ;;  %v18800_v51 = vld [vmem:[#allocation4 + $0x134] sm:$0xf]  ;;  %v12941_v60 = vor.u32 %v18782_v48, %v12940_v47  ;;  %v18981_v63 = vld [vmem:[#allocation4 + $0x6dc] sm:$0xf]  ;;  %v13814_v2 = vld [vmem:[#allocation4 + $0x768] sm:$0xf0]  ;;  %v14101_v5 = vor.u32 %v19071_v59, %v14100_v58 }
  0x7f   :  { %2443 = vmatpush.bf16.msra.mxu0 %v13805_v53  ;;  %v13958_v53 = vld [vmem:[#allocation4 + $0x888] sm:$0xf0]  ;;  %v13964_v3 = vld [vmem:[#allocation4 + $0x800] sm:$0xf]  ;;  %v19036_v4 = vld [vmem:[#allocation4 + $0x88c] sm:$0xf0]  ;;  %v13817_v11 = vor.u32 %v18981_v63, %v13814_v2 }
  0x80   :  { %2418 = vmatpush.bf16.msrb.mxu2 %v13657_v52  ;;  %v19017_v52 = vld [vmem:[#allocation4 + $0x7fc] sm:$0xf]  ;;  %v18891_v8 = vld [vmem:[#allocation4 + $0x404] sm:$0xf0]  ;;  %v13965_v12 = vor.u32 %v19036_v4, %v13964_v3  ;;  %v13236_v15 = vld [vmem:[#allocation4 + $0x258] sm:$0xf] }
  0x81   :  { %2398 = vmatmul.bf16.vlgmr.msra.gmra.mxu3 %v20826_v36  ;;  %v19053_v9 = vld [vmem:[#allocation4 + $0x91c] sm:$0xf]  ;;  %v18855_v19 = vld [vmem:[#allocation4 + $0x2e4] sm:$0xf0]  ;;  %v13820_v20 = vld [vmem:[#allocation4 + $0x6e0] sm:$0xf] }
  0x82   :  { %2468 = vmatpush.bf16.msrb.mxu3 %v13953_v55  ;;  %v13086_v55 = vld [vmem:[#allocation4 + $0x1c0] sm:$0xf0]  ;;  %v18945_v16 = vld [vmem:[#allocation4 + $0x5bc] sm:$0xf]  ;;  %v13966_v23 = vld [vmem:[#allocation4 + $0x890] sm:$0xf0] }
  0x83   :  { %2444 = vmatpush.bf16.msra.mxu0 %v13661_v62  ;;  %v18764_v62 = vld [vmem:[#allocation4 + $0x14] sm:$0xf]  ;;  %v13092_v26 = vld [vmem:[#allocation4 + $0x138] sm:$0xf]  ;;  %v18819_v27 = vld [vmem:[#allocation4 + $0x1c4] sm:$0xf0] }
  0x84   :  { %2419 = vmatpush.bf16.msrb.mxu2 %v13513_v61  ;;  %v13961_v61 = vor.u32 %v19017_v52, %v13958_v53  ;;  %v18909_v28 = vld [vmem:[#allocation4 + $0x49c] sm:$0xf]  ;;  %v13526_v29 = vld [vmem:[#allocation4 + $0x528] sm:$0xf0]  ;;  %v13676_v32 = vld [vmem:[#allocation4 + $0x5c0] sm:$0xf]  ;;  %v13093_v42 = vor.u32 %v18819_v27, %v13092_v26 }
  0x85   :  { %v18964_v33 = vld [vmem:[#allocation4 + $0x64c] sm:$0xf0]  ;;  %v13822_v37 = vld [vmem:[#allocation4 + $0x770] sm:$0xf0]  ;;  %v13529_v38 = vor.u32 %v18909_v28, %v13526_v29  ;;  %v12948_v39 = vld [vmem:[#allocation4 + $0x18] sm:$0xf] }
  0x86   :  { %2469 = vmatpush.bf16.msrb.mxu3 %v13809_v0  ;;  %14220 = vmatmul.msk.bf16.vlgmr.msrb.gmra.mxu0 %vm360_vm0, %v20800_v24  ;;  %v13089_v0 = vor.u32 %v18800_v51, %v13086_v55  ;;  %v18783_v40 = vld [vmem:[#allocation4 + $0xa4] sm:$0xf0]  ;;  %v18873_v41 = vld [vmem:[#allocation4 + $0x37c] sm:$0xf]  ;;  %v13677_v43 = vor.u32 %v18964_v33, %v13676_v32  ;;  %v13382_v44 = vld [vmem:[#allocation4 + $0x408] sm:$0xf0] }
  0x87   :  { %2445 = vmatpush.bf16.msra.mxu0 %v13517_v7  ;;  %v13380_v7 = vld [vmem:[#allocation4 + $0x378] sm:$0xf]  ;;  %v18946_v48 = vld [vmem:[#allocation4 + $0x5c4] sm:$0xf]  ;;  %v19072_v51 = vld [vmem:[#allocation4 + $0x9ac] sm:$0xf0]  ;;  %v13385_v52 = vor.u32 %v18873_v41, %v13382_v44  ;;  %v12949_v55 = vor.u32 %v18783_v40, %v12948_v39 }
  0x88   :  { %2420 = vmatpush.bf16.msrb.mxu2 %v13369_v6  ;;  %14221 = vmatmul.msk.bf16.vlgmr.msra.gmra.mxu1 %vm360_vm0, %v20800_v24  ;;  %v12942_v6 = vld [vmem:[#allocation4 + $0xa0] sm:$0xf0]  ;;  %v13381_v14 = vor.u32 %v18891_v8, %v13380_v7  ;;  %v18837_v53 = vld [vmem:[#allocation4 + $0x25c] sm:$0xf]  ;;  %v13388_v57 = vld [vmem:[#allocation4 + $0x380] sm:$0xf] }
  0x89   :  { %2494 = vmatpush.bf16.msra.mxu1 %v13957_v22  ;;  %v12945_v13 = vor.u32 %v18764_v62, %v12942_v6  ;;  %v19018_v22 = vld [vmem:[#allocation4 + $0x804] sm:$0xf]  ;;  %v18892_v58 = vld [vmem:[#allocation4 + $0x40c] sm:$0xf0]  ;;  %v19037_v62 = vld [vmem:[#allocation4 + $0x894] sm:$0xf0] }
  0x8a   :  { %2470 = vmatpush.bf16.msrb.mxu3 %v13665_v10  ;;  %v14102_v10 = vld [vmem:[#allocation4 + $0x9a8] sm:$0xf0]  ;;  %v18910_v63 = vld [vmem:[#allocation4 + $0x4a4] sm:$0xf]  ;;  %v13389_v2 = vor.u32 %v18892_v58, %v13388_v57  ;;  %v18801_v4 = vld [vmem:[#allocation4 + $0x13c] sm:$0xf] }
  0x8b   :  { %2446 = vmatpush.bf16.msra.mxu0 %v13373_v18  ;;  %v14105_v18 = vor.u32 %v19053_v9, %v14102_v10  ;;  %v13244_v6 = vld [vmem:[#allocation4 + $0x260] sm:$0xf]  ;;  %v18856_v8 = vld [vmem:[#allocation4 + $0x2ec] sm:$0xf0]  ;;  %v13828_v9 = vld [vmem:[#allocation4 + $0x6e8] sm:$0xf] }
  0x8c   :  { %2421 = vmatpush.bf16.msrb.mxu2 %v13225_v17  ;;  %v13670_v17 = vld [vmem:[#allocation4 + $0x648] sm:$0xf0]  ;;  %v19001_v10 = vld [vmem:[#allocation4 + $0x774] sm:$0xf0]  ;;  %v19054_v26 = vld [vmem:[#allocation4 + $0x924] sm:$0xf] }
  0x8d   :  { %2495 = vmatpush.bf16.msra.mxu1 %v13813_v35  ;;  %v13673_v25 = vor.u32 %v18945_v16, %v13670_v17  ;;  %v18982_v35 = vld [vmem:[#allocation4 + $0x6e4] sm:$0xf]  ;;  %v13829_v16 = vor.u32 %v19001_v10, %v13828_v9  ;;  %v12950_v17 = vld [vmem:[#allocation4 + $0xa8] sm:$0xf0]  ;;  %v14110_v27 = vld [vmem:[#allocation4 + $0x9b0] sm:$0xf0] }
  0x8e   :  { %2471 = vmatpush.bf16.msrb.mxu3 %v13521_v21  ;;  %v19000_v21 = vld [vmem:[#allocation4 + $0x76c] sm:$0xf0]  ;;  %v13825_v47 = vor.u32 %v18982_v35, %v13822_v37  ;;  %v12956_v29 = vld [vmem:[#allocation4 + $0x20] sm:$0xf]  ;;  %v19019_v33 = vld [vmem:[#allocation4 + $0x80c] sm:$0xf]  ;;  %v14113_v37 = vor.u32 %v19054_v26, %v14110_v27 }
  0x8f   :  { %2447 = vmatpush.bf16.msra.mxu0 %v13229_v31  ;;  %v13821_v31 = vor.u32 %v19000_v21, %v13820_v20  ;;  %v18838_v21 = vld [vmem:[#allocation4 + $0x264] sm:$0xf]  ;;  %v18784_v32 = vld [vmem:[#allocation4 + $0xac] sm:$0xf0]  ;;  %v13540_v39 = vld [vmem:[#allocation4 + $0x4a8] sm:$0xf] }
  0x90   :  { %2422 = vmatpush.bf16.msrb.mxu2 %v13081_v30  ;;  %v13237_v30 = vor.u32 %v18855_v19, %v13236_v15  ;;  %v13245_v15 = vor.u32 %v18856_v8, %v13244_v6  ;;  %v18820_v19 = vld [vmem:[#allocation4 + $0x1cc] sm:$0xf0]  ;;  %v18929_v40 = vld [vmem:[#allocation4 + $0x534] sm:$0xf0]  ;;  %v13102_v41 = vld [vmem:[#allocation4 + $0x1d0] sm:$0xf0] }
  0x91   :  { %2496 = vmatpush.bf16.msra.mxu1 %v13669_v50  ;;  %v14108_v50 = vld [vmem:[#allocation4 + $0x920] sm:$0xf]  ;;  %v19055_v57 = vld [vmem:[#allocation4 + $0x92c] sm:$0xf]  ;;  %v14118_v58 = vld [vmem:[#allocation4 + $0x9b8] sm:$0xf0] }
  0x92   :  { %2472 = vmatpush.bf16.msrb.mxu3 %v13377_v34  ;;  %v13969_v34 = vor.u32 %v19018_v22, %v13966_v23  ;;  %v13684_v22 = vld [vmem:[#allocation4 + $0x5c8] sm:$0xf]  ;;  %v18965_v23 = vld [vmem:[#allocation4 + $0x654] sm:$0xf0]  ;;  %v19020_v6 = vld [vmem:[#allocation4 + $0x814] sm:$0xf] }
  0x93   :  { %2448 = vmatpush.bf16.msra.mxu0 %v13085_v46  ;;  %v18928_v46 = vld [vmem:[#allocation4 + $0x52c] sm:$0xf0]  ;;  %v18875_v26 = vld [vmem:[#allocation4 + $0x38c] sm:$0xf] }
  0x94   :  { %2423 = vmatpush.bf16.msrb.mxu2 %v12937_v45  ;;  %v13532_v45 = vld [vmem:[#allocation4 + $0x4a0] sm:$0xf]  ;;  %v13548_v27 = vld [vmem:[#allocation4 + $0x4b0] sm:$0xf] }
  0x95   :  { %2497 = vmatpush.bf16.msra.mxu1 %v13525_v1  ;;  %v13533_v56 = vor.u32 %v18928_v46, %v13532_v45  ;;  %v12957_v45 = vor.u32 %v18784_v32, %v12956_v29  ;;  %v13541_v46 = vor.u32 %v18929_v40, %v13540_v39  ;;  %v13398_v29 = vld [vmem:[#allocation4 + $0x418] sm:$0xf0]  ;;  %v13694_v32 = vld [vmem:[#allocation4 + $0x660] sm:$0xf0]  ;;  %v13404_v39 = vld [vmem:[#allocation4 + $0x390] sm:$0xf] }
  0x96   :  { %2473 = vmatpush.bf16.msrb.mxu3 %v13233_v49  ;;  %v13678_v49 = vld [vmem:[#allocation4 + $0x650] sm:$0xf0]  ;;  %v13988_v40 = vld [vmem:[#allocation4 + $0x818] sm:$0xf] }
  0x97   :  { %2424 = vmatmul.bf16.vlgmr.msrb.gmra.mxu2 %v20826_v36  ;;  %2449 = vmatpush.bf16.msra.mxu0 %v12941_v60  ;;  %v13681_v59 = vor.u32 %v18946_v48, %v13678_v49  ;;  %v14109_v60 = vor.u32 %v19072_v51, %v14108_v50  ;;  %v13396_v48 = vld [vmem:[#allocation4 + $0x388] sm:$0xf]  ;;  %v18893_v51 = vld [vmem:[#allocation4 + $0x414] sm:$0xf0] }
  0x98   :  { %2488 = vmatpush.bf16.msra.mxu2 %v14097_v54  ;;  %14222 = vmatmul.msk.bf16.vlgmr.msrb.gmra.mxu1 %vm360_vm0, %v20800_v24  ;;  %v13238_v54 = vld [vmem:[#allocation4 + $0x2e8] sm:$0xf0] }
  0x99   :  { %2498 = vmatpush.bf16.msra.mxu1 %v13381_v14  ;;  %v13241_v1 = vor.u32 %v18837_v53, %v13238_v54  ;;  %v18765_v14 = vld [vmem:[#allocation4 + $0x1c] sm:$0xf]  ;;  %v12958_v54 = vld [vmem:[#allocation4 + $0xb0] sm:$0xf0] }
  0x9a   :  { %2474 = vmatpush.bf16.msrb.mxu3 %v13089_v0  ;;  %2450 = vmatmul.bf16.vlgmr.msra.gmra.mxu0 %v20826_v36  ;;  %v13534_v0 = vld [vmem:[#allocation4 + $0x530] sm:$0xf0]  ;;  %v12953_v28 = vor.u32 %v18765_v14, %v12950_v17  ;;  %v13830_v53 = vld [vmem:[#allocation4 + $0x778] sm:$0xf0]  ;;  %v18966_v17 = vld [vmem:[#allocation4 + $0x65c] sm:$0xf0] }
  0x9b   :  { %2514 = vmatpush.bf16.msrb.mxu0 %v14101_v5  ;;  %v13094_v5 = vld [vmem:[#allocation4 + $0x1c8] sm:$0xf0]  ;;  %v13537_v7 = vor.u32 %v18910_v63, %v13534_v0  ;;  %v13252_v63 = vld [vmem:[#allocation4 + $0x268] sm:$0xf]  ;;  %v18857_v0 = vld [vmem:[#allocation4 + $0x2f4] sm:$0xf0] }
  0x9c   :  { %2520 = vmatpush.bf16.msrb.mxu2 %v13961_v61  ;;  %v13972_v61 = vld [vmem:[#allocation4 + $0x808] sm:$0xf]  ;;  %v13253_v8 = vor.u32 %v18857_v0, %v13252_v63 }
  0x9d   :  { %2499 = vmatpush.bf16.msra.mxu1 %v13237_v30  ;;  %v13973_v3 = vor.u32 %v19037_v62, %v13972_v61 }
  0x9e   :  { %2475 = vmatpush.bf16.msrb.mxu3 %v12945_v13  ;;  %v13097_v13 = vor.u32 %v18801_v4, %v13094_v5  ;;  %v13836_v4 = vld [vmem:[#allocation4 + $0x6f0] sm:$0xf]  ;;  %v19002_v5 = vld [vmem:[#allocation4 + $0x77c] sm:$0xf0] }
  0x9f   :  { %2546 = vmatpush.bf16.msra.mxu0 %v13965_v12  ;;  %v13390_v12 = vld [vmem:[#allocation4 + $0x410] sm:$0xf0]  ;;  %v13837_v10 = vor.u32 %v19002_v5, %v13836_v4  ;;  %v13116_v5 = vld [vmem:[#allocation4 + $0x150] sm:$0xf] }
  0xa0   :  { %2521 = vmatpush.bf16.msrb.mxu2 %v13817_v11  ;;  %v18874_v11 = vld [vmem:[#allocation4 + $0x384] sm:$0xf] }
  0xa1   :  { %2476 = vmatmul.bf16.vlgmr.msrb.gmra.mxu3 %v20826_v36  ;;  %2500 = vmatpush.bf16.msra.mxu1 %v13093_v42  ;;  %v13393_v20 = vor.u32 %v18874_v11, %v13390_v12  ;;  %v14116_v42 = vld [vmem:[#allocation4 + $0x928] sm:$0xf]  ;;  %v18821_v12 = vld [vmem:[#allocation4 + $0x1d4] sm:$0xf0] }
  0xa2   :  { %2540 = vmatpush.bf16.msra.mxu3 %v14105_v18  ;;  %v13100_v18 = vld [vmem:[#allocation4 + $0x140] sm:$0xf]  ;;  %v13108_v11 = vld [vmem:[#allocation4 + $0x148] sm:$0xf] }
  0xa3   :  { %2547 = vmatpush.bf16.msra.mxu0 %v13821_v31  ;;  %v13101_v30 = vor.u32 %v18820_v19, %v13100_v18  ;;  %v13685_v31 = vor.u32 %v18965_v23, %v13684_v22  ;;  %v18984_v18 = vld [vmem:[#allocation4 + $0x6f4] sm:$0xf]  ;;  %v13838_v19 = vld [vmem:[#allocation4 + $0x780] sm:$0xf0] }
  0xa4   :  { %2522 = vmatpush.bf16.msrb.mxu2 %v13673_v25  ;;  %v13246_v25 = vld [vmem:[#allocation4 + $0x2f0] sm:$0xf0] }
  0xa5   :  { %2501 = vmatpush.bf16.msra.mxu1 %v12949_v55  ;;  %v13249_v35 = vor.u32 %v18838_v21, %v13246_v25  ;;  %v13980_v55 = vld [vmem:[#allocation4 + $0x810] sm:$0xf]  ;;  %v12964_v21 = vld [vmem:[#allocation4 + $0x28] sm:$0xf]  ;;  %v18785_v25 = vld [vmem:[#allocation4 + $0xb4] sm:$0xf0] }
  0xa6   :  { %2572 = vmatpush.bf16.msrb.mxu3 %v13969_v34  ;;  %v13974_v34 = vld [vmem:[#allocation4 + $0x898] sm:$0xf0] }
  0xa7   :  { %2548 = vmatpush.bf16.msra.mxu0 %v13677_v43  ;;  %14223 = vmatmul.msk.bf16.vlgmr.msra.gmra.mxu2 %vm360_vm0, %v20800_v24  ;;  %v19073_v43 = vld [vmem:[#allocation4 + $0x9b4] sm:$0xf0]  ;;  %v13977_v44 = vor.u32 %v19019_v33, %v13974_v34  ;;  %v14124_v33 = vld [vmem:[#allocation4 + $0x930] sm:$0xf]  ;;  %v19074_v34 = vld [vmem:[#allocation4 + $0x9bc] sm:$0xf0] }
  0xa8   :  { %2523 = vmatpush.bf16.msrb.mxu2 %v13529_v38  ;;  %2502 = vmatmul.bf16.vlgmr.msra.gmra.mxu1 %v20826_v36  ;;  %v18802_v38 = vld [vmem:[#allocation4 + $0x144] sm:$0xf]  ;;  %v14117_v50 = vor.u32 %v19073_v43, %v14116_v42  ;;  %v14125_v43 = vor.u32 %v19074_v34, %v14124_v33 }
  0xa9   :  { %2566 = vmatpush.bf16.msrb.mxu1 %v14109_v60  ;;  %v13105_v49 = vor.u32 %v18802_v38, %v13102_v41  ;;  %v19039_v41 = vld [vmem:[#allocation4 + $0x8a4] sm:$0xf0] }
  0xaa   :  { %2573 = vmatpush.bf16.msrb.mxu3 %v13825_v47  ;;  %14224 = vmatmul.msk.bf16.vlgmr.msrb.gmra.mxu0 %vm360_vm0, %v20800_v24  ;;  %v18766_v47 = vld [vmem:[#allocation4 + $0x24] sm:$0xf] }
  0xab   :  { %2549 = vmatpush.bf16.msra.mxu0 %v13533_v56  ;;  %v19038_v56 = vld [vmem:[#allocation4 + $0x89c] sm:$0xf0]  ;;  %v12961_v61 = vor.u32 %v18766_v47, %v12958_v54  ;;  %v18912_v47 = vld [vmem:[#allocation4 + $0x4b4] sm:$0xf]  ;;  %v19003_v54 = vld [vmem:[#allocation4 + $0x784] sm:$0xf0] }
  0xac   :  { %2524 = vmatpush.bf16.msrb.mxu2 %v13385_v52  ;;  %v18983_v52 = vld [vmem:[#allocation4 + $0x6ec] sm:$0xf]  ;;  %v13981_v62 = vor.u32 %v19038_v56, %v13980_v55 }
  0xad   :  { %2598 = vmatpush.bf16.msra.mxu1 %v13973_v3  ;;  %v13833_v60 = vor.u32 %v18983_v52, %v13830_v53  ;;  %v13686_v3 = vld [vmem:[#allocation4 + $0x658] sm:$0xf0]  ;;  %v13260_v52 = vld [vmem:[#allocation4 + $0x270] sm:$0xf]  ;;  %v13844_v53 = vld [vmem:[#allocation4 + $0x6f8] sm:$0xf] }
  0xae   :  { %2574 = vmatpush.bf16.msrb.mxu3 %v13681_v59  ;;  %v13397_v59 = vor.u32 %v18893_v51, %v13396_v48  ;;  %v13550_v48 = vld [vmem:[#allocation4 + $0x540] sm:$0xf0]  ;;  %v18803_v56 = vld [vmem:[#allocation4 + $0x14c] sm:$0xf] }
  0xaf   :  { %2550 = vmatpush.bf16.msra.mxu0 %v13389_v2  ;;  %v14121_v2 = vor.u32 %v19055_v57, %v14118_v58  ;;  %v13553_v55 = vor.u32 %v18912_v47, %v13550_v48  ;;  %v13110_v57 = vld [vmem:[#allocation4 + $0x1d8] sm:$0xf0]  ;;  %v18858_v58 = vld [vmem:[#allocation4 + $0x2fc] sm:$0xf0]  ;;  %v18859_v47 = vld [vmem:[#allocation4 + $0x304] sm:$0xf0] }
  0xb0   :  { %2525 = vmatpush.bf16.msrb.mxu2 %v13241_v1  ;;  %v18947_v1 = vld [vmem:[#allocation4 + $0x5cc] sm:$0xf]  ;;  %v13113_v63 = vor.u32 %v18803_v56, %v13110_v57  ;;  %v13261_v0 = vor.u32 %v18858_v58, %v13260_v52  ;;  %v13124_v58 = vld [vmem:[#allocation4 + $0x158] sm:$0xf] }
  0xb1   :  { %14225 = vmatmul.msk.bf16.vlgmr.msra.gmra.mxu3 %vm360_vm0, %v20800_v24  ;;  %2599 = vmatpush.bf16.msra.mxu1 %v13829_v16  ;;  %v13689_v9 = vor.u32 %v18947_v1, %v13686_v3  ;;  %v13542_v16 = vld [vmem:[#allocation4 + $0x538] sm:$0xf0]  ;;  %v18967_v3 = vld [vmem:[#allocation4 + $0x664] sm:$0xf0] }
  0xb2   :  { %2575 = vmatpush.bf16.msrb.mxu3 %v13537_v7  ;;  %v13982_v7 = vld [vmem:[#allocation4 + $0x8a0] sm:$0xf0]  ;;  %v12966_v1 = vld [vmem:[#allocation4 + $0xb8] sm:$0xf0] }
  0xb3   :  { %2551 = vmatpush.bf16.msra.mxu0 %v13245_v15  ;;  %v13985_v14 = vor.u32 %v19020_v6, %v13982_v7  ;;  %v18911_v15 = vld [vmem:[#allocation4 + $0x4ac] sm:$0xf]  ;;  %v18822_v6 = vld [vmem:[#allocation4 + $0x1dc] sm:$0xf0]  ;;  %v18840_v7 = vld [vmem:[#allocation4 + $0x274] sm:$0xf] }
  0xb4   :  { %2526 = vmatpush.bf16.msrb.mxu2 %v13097_v13  ;;  %v13692_v13 = vld [vmem:[#allocation4 + $0x5d0] sm:$0xf]  ;;  %v13545_v22 = vor.u32 %v18911_v15, %v13542_v16  ;;  %v18786_v15 = vld [vmem:[#allocation4 + $0xbc] sm:$0xf0]  ;;  %v13556_v16 = vld [vmem:[#allocation4 + $0x4b8] sm:$0xf] }
  0xb5   :  { %2600 = vmatpush.bf16.msra.mxu1 %v13685_v31  ;;  %v13693_v23 = vor.u32 %v18966_v17, %v13692_v13  ;;  %v18948_v31 = vld [vmem:[#allocation4 + $0x5d4] sm:$0xf]  ;;  %v18931_v17 = vld [vmem:[#allocation4 + $0x544] sm:$0xf0] }
  0xb6   :  { %2576 = vmatpush.bf16.msrb.mxu3 %v13393_v20  ;;  %v13109_v20 = vor.u32 %v18821_v12, %v13108_v11  ;;  %v13697_v42 = vor.u32 %v18948_v31, %v13694_v32  ;;  %v12972_v12 = vld [vmem:[#allocation4 + $0x30] sm:$0xf]  ;;  %v18895_v31 = vld [vmem:[#allocation4 + $0x424] sm:$0xf0]  ;;  %v13996_v32 = vld [vmem:[#allocation4 + $0x820] sm:$0xf] }
  0xb7   :  { %2552 = vmatpush.bf16.msra.mxu0 %v13101_v30  ;;  %v18930_v30 = vld [vmem:[#allocation4 + $0x53c] sm:$0xf0] }
  0xb8   :  { %2527 = vmatpush.bf16.msrb.mxu2 %v12953_v28  ;;  %14226 = vmatmul.msk.bf16.vlgmr.msrb.gmra.mxu1 %vm360_vm0, %v20800_v24  ;;  %v13841_v28 = vor.u32 %v18984_v18, %v13838_v19  ;;  %v13549_v38 = vor.u32 %v18930_v30, %v13548_v27  ;;  %v13557_v27 = vor.u32 %v18931_v17, %v13556_v16  ;;  %v13412_v30 = vld [vmem:[#allocation4 + $0x398] sm:$0xf]  ;;  %v18932_v17 = vld [vmem:[#allocation4 + $0x54c] sm:$0xf0] }
  0xb9   :  { %2601 = vmatpush.bf16.msra.mxu1 %v13541_v46  ;;  %v18894_v46 = vld [vmem:[#allocation4 + $0x41c] sm:$0xf0] }
  0xba   :  { %2577 = vmatpush.bf16.msrb.mxu3 %v13249_v35  ;;  %v12965_v35 = vor.u32 %v18785_v25, %v12964_v21  ;;  %v13405_v51 = vor.u32 %v18894_v46, %v13404_v39  ;;  %v19021_v21 = vld [vmem:[#allocation4 + $0x81c] sm:$0xf]  ;;  %v14132_v25 = vld [vmem:[#allocation4 + $0x938] sm:$0xf]  ;;  %v18768_v39 = vld [vmem:[#allocation4 + $0x34] sm:$0xf] }
  0xbb   :  { %2528 = vmatmul.bf16.vlgmr.msrb.gmra.mxu2 %v20826_v36  ;;  %2553 = vmatpush.bf16.msra.mxu0 %v12957_v45  ;;  %v13254_v45 = vld [vmem:[#allocation4 + $0x2f8] sm:$0xf0]  ;;  %v13268_v46 = vld [vmem:[#allocation4 + $0x278] sm:$0xf] }
  0xbc   :  { %2592 = vmatpush.bf16.msra.mxu2 %v14113_v37  ;;  %v13401_v37 = vor.u32 %v18875_v26, %v13398_v29  ;;  %v19075_v26 = vld [vmem:[#allocation4 + $0x9c4] sm:$0xf0]  ;;  %v13269_v56 = vor.u32 %v18859_v47, %v13268_v46  ;;  %v18860_v46 = vld [vmem:[#allocation4 + $0x30c] sm:$0xf0]  ;;  %v18878_v47 = vld [vmem:[#allocation4 + $0x3a4] sm:$0xf] }
  0xbd   :  { %2602 = vmatpush.bf16.msra.mxu1 %v13397_v59  ;;  %v18876_v59 = vld [vmem:[#allocation4 + $0x394] sm:$0xf]  ;;  %v14133_v34 = vor.u32 %v19075_v26, %v14132_v25  ;;  %v19041_v25 = vld [vmem:[#allocation4 + $0x8b4] sm:$0xf0] }
  0xbe   :  { %2578 = vmatpush.bf16.msrb.mxu3 %v13105_v49  ;;  %2554 = vmatmul.bf16.vlgmr.msra.gmra.mxu0 %v20826_v36  ;;  %v13989_v49 = vor.u32 %v19039_v41, %v13988_v40  ;;  %v12974_v40 = vld [vmem:[#allocation4 + $0xc0] sm:$0xf0]  ;;  %v13413_v41 = vor.u32 %v18895_v31, %v13412_v30  ;;  %v13270_v30 = vld [vmem:[#allocation4 + $0x308] sm:$0xf0]  ;;  %v13420_v31 = vld [vmem:[#allocation4 + $0x3a0] sm:$0xf] }
  0xbf   :  { %2618 = vmatpush.bf16.msrb.mxu0 %v14117_v50  ;;  %v12977_v48 = vor.u32 %v18768_v39, %v12974_v40  ;;  %v19005_v39 = vld [vmem:[#allocation4 + $0x794] sm:$0xf0] }
  0xc0   :  { %2624 = vmatpush.bf16.msrb.mxu2 %v13977_v44  ;;  %v18839_v44 = vld [vmem:[#allocation4 + $0x26c] sm:$0xf] }
  0xc1   :  { %2603 = vmatpush.bf16.msra.mxu1 %v13253_v8  ;;  %v13257_v50 = vor.u32 %v18839_v44, %v13254_v45  ;;  %v13262_v8 = vld [vmem:[#allocation4 + $0x300] sm:$0xf0] }
  0xc2   :  { %2579 = vmatpush.bf16.msrb.mxu3 %v12961_v61  ;;  %v13845_v61 = vor.u32 %v19003_v54, %v13844_v53  ;;  %v13265_v18 = vor.u32 %v18840_v7, %v13262_v8  ;;  %v19004_v53 = vld [vmem:[#allocation4 + $0x78c] sm:$0xf0]  ;;  %v19022_v54 = vld [vmem:[#allocation4 + $0x824] sm:$0xf]  ;;  %v18787_v8 = vld [vmem:[#allocation4 + $0xc4] sm:$0xf0] }
  0xc3   :  { %2650 = vmatpush.bf16.msra.mxu0 %v13981_v62  ;;  %v18767_v62 = vld [vmem:[#allocation4 + $0x2c] sm:$0xf] }
  0xc4   :  { %2625 = vmatpush.bf16.msrb.mxu2 %v13833_v60  ;;  %v13406_v60 = vld [vmem:[#allocation4 + $0x420] sm:$0xf0]  ;;  %v12969_v13 = vor.u32 %v18767_v62, %v12966_v1  ;;  %v13708_v1 = vld [vmem:[#allocation4 + $0x5e0] sm:$0xf] }
  0xc5   :  { %2580 = vmatmul.bf16.vlgmr.msrb.gmra.mxu3 %v20826_v36  ;;  %2604 = vmatpush.bf16.msra.mxu1 %v13109_v20  ;;  %v13409_v4 = vor.u32 %v18876_v59, %v13406_v60  ;;  %v18804_v20 = vld [vmem:[#allocation4 + $0x154] sm:$0xf]  ;;  %v18823_v59 = vld [vmem:[#allocation4 + $0x1e4] sm:$0xf0] }
  0xc6   :  { %2644 = vmatpush.bf16.msra.mxu3 %v14121_v2  ;;  %v13700_v2 = vld [vmem:[#allocation4 + $0x5d8] sm:$0xf] }
  0xc7   :  { %2651 = vmatpush.bf16.msra.mxu0 %v13837_v10  ;;  %v14126_v10 = vld [vmem:[#allocation4 + $0x9c0] sm:$0xf0]  ;;  %v13701_v11 = vor.u32 %v18967_v3, %v13700_v2  ;;  %v18968_v2 = vld [vmem:[#allocation4 + $0x66c] sm:$0xf0] }
  0xc8   :  { %2626 = vmatpush.bf16.msrb.mxu2 %v13689_v9  ;;  %v19056_v9 = vld [vmem:[#allocation4 + $0x934] sm:$0xf]  ;;  %v18986_v3 = vld [vmem:[#allocation4 + $0x704] sm:$0xf] }
  0xc9   :  { %2605 = vmatpush.bf16.msra.mxu1 %v12965_v35  ;;  %v14129_v19 = vor.u32 %v19056_v9, %v14126_v10  ;;  %v18985_v35 = vld [vmem:[#allocation4 + $0x6fc] sm:$0xf]  ;;  %v13564_v10 = vld [vmem:[#allocation4 + $0x4c0] sm:$0xf] }
  0xca   :  { %2676 = vmatpush.bf16.msrb.mxu3 %v13985_v14  ;;  %v13117_v14 = vor.u32 %v18822_v6, %v13116_v5  ;;  %v13125_v5 = vor.u32 %v18823_v59, %v13124_v58  ;;  %v12980_v6 = vld [vmem:[#allocation4 + $0x38] sm:$0xf]  ;;  %v18877_v9 = vld [vmem:[#allocation4 + $0x39c] sm:$0xf]  ;;  %v18824_v58 = vld [vmem:[#allocation4 + $0x1ec] sm:$0xf0] }
  0xcb   :  { %2652 = vmatpush.bf16.msra.mxu0 %v13693_v23  ;;  %14227 = vmatmul.msk.bf16.vlgmr.msra.gmra.mxu2 %vm360_vm0, %v20800_v24  ;;  %v13118_v23 = vld [vmem:[#allocation4 + $0x1e0] sm:$0xf0] }
  0xcc   :  { %2627 = vmatpush.bf16.msrb.mxu2 %v13545_v22  ;;  %2606 = vmatmul.bf16.vlgmr.msra.gmra.mxu1 %v20826_v36  ;;  %v13990_v22 = vld [vmem:[#allocation4 + $0x8a8] sm:$0xf0]  ;;  %v13121_v33 = vor.u32 %v18804_v20, %v13118_v23  ;;  %v12981_v20 = vor.u32 %v18787_v8, %v12980_v6  ;;  %v14004_v23 = vld [vmem:[#allocation4 + $0x828] sm:$0xf]  ;;  %v18842_v59 = vld [vmem:[#allocation4 + $0x284] sm:$0xf] }
  0xcd   :  { %2670 = vmatpush.bf16.msrb.mxu1 %v14125_v43  ;;  %v13993_v29 = vor.u32 %v19021_v21, %v13990_v22  ;;  %v14134_v43 = vld [vmem:[#allocation4 + $0x9c8] sm:$0xf0]  ;;  %v12988_v6 = vld [vmem:[#allocation4 + $0x40] sm:$0xf]  ;;  %v14006_v8 = vld [vmem:[#allocation4 + $0x8b8] sm:$0xf0] }
  0xce   :  { %2677 = vmatpush.bf16.msrb.mxu3 %v13841_v28  ;;  %14228 = vmatmul.msk.bf16.vlgmr.msrb.gmra.mxu0 %vm360_vm0, %v20800_v24  ;;  %v12973_v28 = vor.u32 %v18786_v15, %v12972_v12  ;;  %v19076_v15 = vld [vmem:[#allocation4 + $0x9cc] sm:$0xf0] }
  0xcf   :  { %2653 = vmatpush.bf16.msra.mxu0 %v13549_v38  ;;  %v19040_v38 = vld [vmem:[#allocation4 + $0x8ac] sm:$0xf0] }
  0xd0   :  { %2628 = vmatpush.bf16.msrb.mxu2 %v13401_v37  ;;  %v13846_v37 = vld [vmem:[#allocation4 + $0x788] sm:$0xf0]  ;;  %v13997_v45 = vor.u32 %v19040_v38, %v13996_v32  ;;  %v18896_v32 = vld [vmem:[#allocation4 + $0x42c] sm:$0xf0]  ;;  %v13860_v38 = vld [vmem:[#allocation4 + $0x708] sm:$0xf] }
  0xd1   :  { %2702 = vmatpush.bf16.msra.mxu1 %v13989_v49  ;;  %v13849_v44 = vor.u32 %v18985_v35, %v13846_v37  ;;  %v18949_v49 = vld [vmem:[#allocation4 + $0x5dc] sm:$0xf]  ;;  %v14005_v35 = vor.u32 %v19041_v25, %v14004_v23  ;;  %v13421_v40 = vor.u32 %v18896_v32, %v13420_v31  ;;  %v18770_v25 = vld [vmem:[#allocation4 + $0x44] sm:$0xf]  ;;  %v12990_v31 = vld [vmem:[#allocation4 + $0xd0] sm:$0xf0] }
  0xd2   :  { %2678 = vmatpush.bf16.msrb.mxu3 %v13697_v42  ;;  %v19057_v42 = vld [vmem:[#allocation4 + $0x93c] sm:$0xf]  ;;  %v14012_v32 = vld [vmem:[#allocation4 + $0x830] sm:$0xf] }
  0xd3   :  { %2654 = vmatpush.bf16.msra.mxu0 %v13405_v51  ;;  %v13852_v51 = vld [vmem:[#allocation4 + $0x700] sm:$0xf]  ;;  %v14137_v52 = vor.u32 %v19057_v42, %v14134_v43  ;;  %v18805_v42 = vld [vmem:[#allocation4 + $0x15c] sm:$0xf]  ;;  %v13126_v43 = vld [vmem:[#allocation4 + $0x1e8] sm:$0xf0] }
  0xd4   :  { %2629 = vmatpush.bf16.msrb.mxu2 %v13257_v50  ;;  %v13702_v50 = vld [vmem:[#allocation4 + $0x668] sm:$0xf0] }
  0xd5   :  { %14229 = vmatmul.msk.bf16.vlgmr.msra.gmra.mxu3 %vm360_vm0, %v20800_v24  ;;  %2703 = vmatpush.bf16.msra.mxu1 %v13845_v61  ;;  %v13705_v57 = vor.u32 %v18949_v49, %v13702_v50  ;;  %v13853_v61 = vor.u32 %v19004_v53, %v13852_v51  ;;  %v13861_v49 = vor.u32 %v19005_v39, %v13860_v38  ;;  %v13716_v51 = vld [vmem:[#allocation4 + $0x5e8] sm:$0xf] }
  0xd6   :  { %2679 = vmatpush.bf16.msrb.mxu3 %v13553_v55  ;;  %v13998_v55 = vld [vmem:[#allocation4 + $0x8b0] sm:$0xf0]  ;;  %v13129_v50 = vor.u32 %v18805_v42, %v13126_v43  ;;  %v18951_v43 = vld [vmem:[#allocation4 + $0x5ec] sm:$0xf] }
  0xd7   :  { %2655 = vmatpush.bf16.msra.mxu0 %v13261_v0  ;;  %v14001_v62 = vor.u32 %v19022_v54, %v13998_v55  ;;  %v13558_v0 = vld [vmem:[#allocation4 + $0x548] sm:$0xf0]  ;;  %v18769_v55 = vld [vmem:[#allocation4 + $0x3c] sm:$0xf] }
  0xd8   :  { %2630 = vmatpush.bf16.msrb.mxu2 %v13113_v63  ;;  %v18913_v63 = vld [vmem:[#allocation4 + $0x4bc] sm:$0xf] }
  0xd9   :  { %2704 = vmatpush.bf16.msra.mxu1 %v13701_v11  ;;  %v13561_v7 = vor.u32 %v18913_v63, %v13558_v0  ;;  %v13709_v11 = vor.u32 %v18968_v2, %v13708_v1  ;;  %v19058_v63 = vld [vmem:[#allocation4 + $0x944] sm:$0xf]  ;;  %v14142_v0 = vld [vmem:[#allocation4 + $0x9d0] sm:$0xf0]  ;;  %v13572_v2 = vld [vmem:[#allocation4 + $0x4c8] sm:$0xf] }
  0xda   :  { %2680 = vmatpush.bf16.msrb.mxu3 %v13409_v4  ;;  %v13854_v4 = vld [vmem:[#allocation4 + $0x790] sm:$0xf0] }
  0xdb   :  { %2656 = vmatpush.bf16.msra.mxu0 %v13117_v14  ;;  %v20864_v60 = vpop.f32.mrf.mxu1  ;;  %v13857_v12 = vor.u32 %v18986_v3, %v13854_v4  ;;  %v14140_v14 = vld [vmem:[#allocation4 + $0x940] sm:$0xf]  ;;  %v18933_v3 = vld [vmem:[#allocation4 + $0x554] sm:$0xf0] }
  0xdc   :  { %2631 = vmatpush.bf16.msrb.mxu2 %v12969_v13  ;;  %14230 = vmatmul.msk.bf16.vlgmr.msrb.gmra.mxu1 %vm360_vm0, %v20800_v24  ;;  %v13414_v13 = vld [vmem:[#allocation4 + $0x428] sm:$0xf0]  ;;  %v14141_v22 = vor.u32 %v19076_v15, %v14140_v14  ;;  %v13573_v14 = vor.u32 %v18933_v3, %v13572_v2  ;;  %v14148_v15 = vld [vmem:[#allocation4 + $0x948] sm:$0xf]  ;;  %v18988_v2 = vld [vmem:[#allocation4 + $0x714] sm:$0xf] }
  0xdd   :  { %2705 = vmatpush.bf16.msra.mxu1 %v13557_v27  ;;  %v13417_v21 = vor.u32 %v18877_v9, %v13414_v13  ;;  %v13565_v27 = vor.u32 %v18932_v17, %v13564_v10  ;;  %v14145_v9 = vor.u32 %v19058_v63, %v14142_v0  ;;  %v18788_v10 = vld [vmem:[#allocation4 + $0xcc] sm:$0xf0]  ;;  %v19077_v17 = vld [vmem:[#allocation4 + $0x9d4] sm:$0xf0]  ;;  %v13870_v3 = vld [vmem:[#allocation4 + $0x7a0] sm:$0xf0] }
  0xde   :  { %2681 = vmatpush.bf16.msrb.mxu3 %v13265_v18  ;;  %v18950_v18 = vld [vmem:[#allocation4 + $0x5e4] sm:$0xf]  ;;  %v13724_v63 = vld [vmem:[#allocation4 + $0x5f0] sm:$0xf] }
  0xdf   :  { %2632 = vmatmul.bf16.vlgmr.msrb.gmra.mxu2 %v20826_v36  ;;  %2657 = vmatpush.bf16.msra.mxu0 %v12973_v28 }
  0xe0   :  { %2696 = vmatpush.bf16.msra.mxu2 %v14129_v19  ;;  %v20867_v16 = vpop.f32.mrf.mxu3  ;;  %v13710_v19 = vld [vmem:[#allocation4 + $0x670] sm:$0xf0] }
  0xe1   :  { %2706 = vmatpush.bf16.msra.mxu1 %v13413_v41  ;;  %v13713_v28 = vor.u32 %v18950_v18, %v13710_v19  ;;  %v13428_v19 = vld [vmem:[#allocation4 + $0x3a8] sm:$0xf] }
  0xe2   :  { %2682 = vmatpush.bf16.msrb.mxu3 %v13121_v33  ;;  %2658 = vmatmul.bf16.vlgmr.msra.gmra.mxu0 %v20826_v36  ;;  %v18914_v33 = vld [vmem:[#allocation4 + $0x4c4] sm:$0xf] }
  0xe3   :  { %2722 = vmatpush.bf16.msrb.mxu0 %v14133_v34  ;;  %v388_v26 = vpop.f32.mrf.mxu1  ;;  %v13566_v34 = vld [vmem:[#allocation4 + $0x550] sm:$0xf0] }
  0xe4   :  { %2728 = vmatpush.bf16.msrb.mxu2 %v13993_v29  ;;  %v18841_v29 = vld [vmem:[#allocation4 + $0x27c] sm:$0xf]  ;;  %v13569_v41 = vor.u32 %v18914_v33, %v13566_v34  ;;  %v18987_v26 = vld [vmem:[#allocation4 + $0x70c] sm:$0xf]  ;;  %v19042_v33 = vld [vmem:[#allocation4 + $0x8bc] sm:$0xf0] }
  0xe5   :  { %2707 = vmatpush.bf16.msra.mxu1 %v13269_v56  ;;  %v13273_v37 = vor.u32 %v18841_v29, %v13270_v30  ;;  %v12982_v56 = vld [vmem:[#allocation4 + $0xc8] sm:$0xf0]  ;;  %v14149_v30 = vor.u32 %v19077_v17, %v14148_v15  ;;  %v14013_v42 = vor.u32 %v19042_v33, %v14012_v32  ;;  %v18952_v15 = vld [vmem:[#allocation4 + $0x5f4] sm:$0xf]  ;;  %v13726_v17 = vld [vmem:[#allocation4 + $0x680] sm:$0xf0] }
  0xe6   :  { %2683 = vmatpush.bf16.msrb.mxu3 %v12977_v48  ;;  %v13422_v48 = vld [vmem:[#allocation4 + $0x430] sm:$0xf0]  ;;  %v12985_v1 = vor.u32 %v18769_v55, %v12982_v56  ;;  %v13140_v55 = vld [vmem:[#allocation4 + $0x168] sm:$0xf]  ;;  %v18825_v56 = vld [vmem:[#allocation4 + $0x1f4] sm:$0xf0] }
  0xe7   :  { %2754 = vmatpush.bf16.msra.mxu0 %v13997_v45  ;;  %v13425_v54 = vor.u32 %v18878_v47, %v13422_v48  ;;  %v19006_v47 = vld [vmem:[#allocation4 + $0x79c] sm:$0xf0]  ;;  %v19024_v48 = vld [vmem:[#allocation4 + $0x834] sm:$0xf]  ;;  %v13436_v32 = vld [vmem:[#allocation4 + $0x3b0] sm:$0xf] }
  0xe8   :  { %2729 = vmatpush.bf16.msrb.mxu2 %v13849_v44  ;;  %v13276_v44 = vld [vmem:[#allocation4 + $0x280] sm:$0xf]  ;;  %v2362_v45 = vpop.f32.mrf.mxu3 }
  0xe9   :  { %2684 = vmatmul.bf16.vlgmr.msrb.gmra.mxu3 %v20826_v36  ;;  %2708 = vmatpush.bf16.msra.mxu1 %v13125_v5  ;;  %v13277_v53 = vor.u32 %v18860_v46, %v13276_v44  ;;  %v13718_v44 = vld [vmem:[#allocation4 + $0x678] sm:$0xf0]  ;;  %v13868_v45 = vld [vmem:[#allocation4 + $0x710] sm:$0xf] }
  0xea   :  { %2748 = vmatpush.bf16.msra.mxu3 %v14137_v52  ;;  %v18969_v52 = vld [vmem:[#allocation4 + $0x674] sm:$0xf0] }
  0xeb   :  { %2755 = vmatpush.bf16.msra.mxu0 %v13853_v61  ;;  %v13278_v61 = vld [vmem:[#allocation4 + $0x310] sm:$0xf0] }
  0xec   :  { %2730 = vmatpush.bf16.msrb.mxu2 %v13705_v57  ;;  %v13132_v57 = vld [vmem:[#allocation4 + $0x160] sm:$0xf]  ;;  %v13281_v5 = vor.u32 %v18842_v59, %v13278_v61  ;;  %v18915_v61 = vld [vmem:[#allocation4 + $0x4cc] sm:$0xf] }
  0xed   :  { %2709 = vmatpush.bf16.msra.mxu1 %v12981_v20  ;;  %v13133_v4 = vor.u32 %v18824_v58, %v13132_v57  ;;  %v18897_v20 = vld [vmem:[#allocation4 + $0x434] sm:$0xf0]  ;;  %v13869_v58 = vor.u32 %v19006_v47, %v13868_v45  ;;  %v18807_v45 = vld [vmem:[#allocation4 + $0x16c] sm:$0xf]  ;;  %v13292_v47 = vld [vmem:[#allocation4 + $0x290] sm:$0xf] }
  0xee   :  { %2780 = vmatpush.bf16.msrb.mxu3 %v14001_v62  ;;  %v13717_v62 = vor.u32 %v18969_v52, %v13716_v51  ;;  %v13429_v34 = vor.u32 %v18897_v20, %v13428_v19 }
  0xef   :  { %2756 = vmatpush.bf16.msra.mxu0 %v13709_v11  ;;  %14231 = vmatmul.msk.bf16.vlgmr.msra.gmra.mxu2 %vm360_vm0, %v20800_v24  ;;  %v18806_v11 = vld [vmem:[#allocation4 + $0x164] sm:$0xf] }
  0xf0   :  { %2731 = vmatpush.bf16.msrb.mxu2 %v13561_v7  ;;  %2710 = vmatmul.bf16.vlgmr.msra.gmra.mxu1 %v20826_v36  ;;  %v19023_v7 = vld [vmem:[#allocation4 + $0x82c] sm:$0xf]  ;;  %v2386_v13 = vpop.f32.mrf.mxu3 }
  0xf1   :  { %2774 = vmatpush.bf16.msrb.mxu1 %v14141_v22  ;;  %v14009_v18 = vor.u32 %v19023_v7, %v14006_v8  ;;  %v12989_v22 = vor.u32 %v18788_v10, %v12988_v6  ;;  %v18789_v6 = vld [vmem:[#allocation4 + $0xd4] sm:$0xf0]  ;;  %v18879_v7 = vld [vmem:[#allocation4 + $0x3ac] sm:$0xf]  ;;  %v13580_v8 = vld [vmem:[#allocation4 + $0x4d0] sm:$0xf]  ;;  %v13873_v10 = vor.u32 %v18988_v2, %v13870_v3 }
  0xf2   :  { %2781 = vmatpush.bf16.msrb.mxu3 %v13857_v12  ;;  %14232 = vmatmul.msk.bf16.vlgmr.msrb.gmra.mxu0 %vm360_vm0, %v20800_v24  ;;  %v13134_v12 = vld [vmem:[#allocation4 + $0x1f0] sm:$0xf0]  ;;  %v13294_v3 = vld [vmem:[#allocation4 + $0x320] sm:$0xf0] }
  0xf3   :  { %2757 = vmatpush.bf16.msra.mxu0 %v13565_v27  ;;  %v13137_v23 = vor.u32 %v18806_v11, %v13134_v12  ;;  %v13862_v27 = vld [vmem:[#allocation4 + $0x798] sm:$0xf0]  ;;  %v14156_v12 = vld [vmem:[#allocation4 + $0x950] sm:$0xf]  ;;  %v18844_v2 = vld [vmem:[#allocation4 + $0x294] sm:$0xf] }
  0xf4   :  { %2732 = vmatpush.bf16.msrb.mxu2 %v13417_v21  ;;  %v373_v21 = vpop.f32.mrf.mxu0  ;;  %v13865_v39 = vor.u32 %v18987_v26, %v13862_v27  ;;  %v13430_v11 = vld [vmem:[#allocation4 + $0x438] sm:$0xf0] }
  0xf5   :  { %2806 = vmatpush.bf16.msra.mxu1 %v14005_v35  ;;  %v2373_v29 = vpop.f32.mrf.mxu1  ;;  %v19059_v35 = vld [vmem:[#allocation4 + $0x94c] sm:$0xf] }
  0xf6   :  { %2782 = vmatpush.bf16.msrb.mxu3 %v13713_v28  ;;  %v20877_v28 = vadd.f32 %v20864_v60, %v373_v21  ;;  %v20880_v38 = vadd.f32 %v2386_v13, %v2373_v29  ;;  %v12993_v60 = vor.u32 %v18770_v25, %v12990_v31  ;;  %v19078_v13 = vld [vmem:[#allocation4 + $0x9dc] sm:$0xf0]  ;;  %v13433_v21 = vor.u32 %v18879_v7, %v13430_v11  ;;  %v19043_v25 = vld [vmem:[#allocation4 + $0x8c4] sm:$0xf0]  ;;  %v13286_v31 = vld [vmem:[#allocation4 + $0x318] sm:$0xf0] }
  0xf7   :  { %2758 = vmatpush.bf16.msra.mxu0 %v13421_v40  ;;  %v13284_v40 = vld [vmem:[#allocation4 + $0x288] sm:$0xf]  ;;  %v13729_v29 = vor.u32 %v18952_v15, %v13726_v17  ;;  %v13588_v7 = vld [vmem:[#allocation4 + $0x4d8] sm:$0xf]  ;;  %v13004_v11 = vld [vmem:[#allocation4 + $0x50] sm:$0xf] }
  0xf8   :  { %2733 = vmatpush.bf16.msrb.mxu2 %v13273_v37  ;;  %21794 = vst [vmem:[#allocation33_spill] sm:$0xff] %v20877_v28  ;;  %v14150_v37 = vld [vmem:[#allocation4 + $0x9d8] sm:$0xf0]  ;;  %v18790_v15 = vld [vmem:[#allocation4 + $0xdc] sm:$0xf0] }
  0xf9   :  { %2807 = vmatpush.bf16.msra.mxu1 %v13861_v49  ;;  %14233 = vmatmul.msk.bf16.vlgmr.msra.gmra.mxu3 %vm360_vm0, %v20800_v24  ;;  %v14153_v46 = vor.u32 %v19059_v35, %v14150_v37  ;;  %v14014_v49 = vld [vmem:[#allocation4 + $0x8c0] sm:$0xf0]  ;;  %v18916_v35 = vld [vmem:[#allocation4 + $0x4d4] sm:$0xf] }
  0xfa   :  { %2783 = vmatpush.bf16.msrb.mxu3 %v13569_v41  ;;  %v18861_v41 = vld [vmem:[#allocation4 + $0x314] sm:$0xf0]  ;;  %v2347_v51 = vpop.f32.mrf.mxu2  ;;  %v14017_v59 = vor.u32 %v19024_v48, %v14014_v49  ;;  %v13582_v37 = vld [vmem:[#allocation4 + $0x560] sm:$0xf0]  ;;  %v18862_v48 = vld [vmem:[#allocation4 + $0x31c] sm:$0xf0] }
  0xfb   :  { %2759 = vmatpush.bf16.msra.mxu0 %v13277_v53  ;;  %v13285_v52 = vor.u32 %v18861_v41, %v13284_v40  ;;  %v20886_v53 = vadd.f32 %v20867_v16, %v2347_v51  ;;  %v12996_v16 = vld [vmem:[#allocation4 + $0x48] sm:$0xf]  ;;  %v18880_v49 = vld [vmem:[#allocation4 + $0x3b4] sm:$0xf] }
  0xfc   :  { %2734 = vmatpush.bf16.msrb.mxu2 %v13129_v50  ;;  %v2388_v50 = vpop.f32.mrf.mxu3  ;;  %v375_v57 = vpop.f32.mrf.mxu0  ;;  %v18808_v17 = vld [vmem:[#allocation4 + $0x174] sm:$0xf] }
  0xfd   :  { %2808 = vmatpush.bf16.msra.mxu1 %v13717_v62  ;;  %v13574_v62 = vld [vmem:[#allocation4 + $0x558] sm:$0xf0]  ;;  %v2375_v0 = vpop.f32.mrf.mxu1  ;;  %v13438_v50 = vld [vmem:[#allocation4 + $0x440] sm:$0xf0] }
  0xfe   :  { %2784 = vmatpush.bf16.msrb.mxu3 %v13425_v54  ;;  %v13721_v54 = vor.u32 %v18951_v43, %v13718_v44  ;;  %v13585_v44 = vor.u32 %v18916_v35, %v13582_v37  ;;  %v18772_v37 = vld [vmem:[#allocation4 + $0x54] sm:$0xf] }
  0xff   :  { %2760 = vmatpush.bf16.msra.mxu0 %v13133_v4  ;;  %v13141_v4 = vor.u32 %v18825_v56, %v13140_v55  ;;  %v13732_v55 = vld [vmem:[#allocation4 + $0x5f8] sm:$0xf]  ;;  %v18971_v56 = vld [vmem:[#allocation4 + $0x684] sm:$0xf0] }
 0x100   :  { %2735 = vmatpush.bf16.msrb.mxu2 %v12985_v1  ;;  %14234 = vmatmul.msk.bf16.vlgmr.msrb.gmra.mxu1 %vm360_vm0, %v20800_v24  ;;  %v18970_v1 = vld [vmem:[#allocation4 + $0x67c] sm:$0xf0] }
 0x101   :  { %2809 = vmatpush.bf16.msra.mxu1 %v13573_v14  ;;  %v18934_v14 = vld [vmem:[#allocation4 + $0x55c] sm:$0xf0] }
 0x102   :  { %2785 = vmatpush.bf16.msrb.mxu3 %v13281_v5  ;;  %v13577_v5 = vor.u32 %v18915_v61, %v13574_v62  ;;  %v2349_v19 = vpop.f32.mrf.mxu2  ;;  %v13581_v27 = vor.u32 %v18934_v14, %v13580_v8  ;;  %v18771_v61 = vld [vmem:[#allocation4 + $0x4c] sm:$0xf]  ;;  %v12998_v62 = vld [vmem:[#allocation4 + $0xd8] sm:$0xf0]  ;;  %v18935_v8 = vld [vmem:[#allocation4 + $0x564] sm:$0xf0] }
 0x103   :  { %2736 = vmatmul.bf16.vlgmr.msrb.gmra.mxu2 %v20826_v36  ;;  %2761 = vmatpush.bf16.msra.mxu0 %v12989_v22  ;;  %v14157_v22 = vor.u32 %v19078_v13, %v14156_v12  ;;  %v19025_v12 = vld [vmem:[#allocation4 + $0x83c] sm:$0xf]  ;;  %v14022_v13 = vld [vmem:[#allocation4 + $0x8c8] sm:$0xf0]  ;;  %v13589_v19 = vor.u32 %v18935_v8, %v13588_v7  ;;  %v18990_v7 = vld [vmem:[#allocation4 + $0x724] sm:$0xf] }
 0x104   :  { %2800 = vmatpush.bf16.msra.mxu2 %v14145_v9  ;;  %v13725_v9 = vor.u32 %v18970_v1, %v13724_v63  ;;  %v2399_v20 = vpop.f32.mrf.mxu3  ;;  %v2412_v26 = vpop.f32.mrf.mxu0  ;;  %v13148_v63 = vld [vmem:[#allocation4 + $0x170] sm:$0xf]  ;;  %v18826_v1 = vld [vmem:[#allocation4 + $0x1fc] sm:$0xf0]  ;;  %v13886_v8 = vld [vmem:[#allocation4 + $0x7b0] sm:$0xf0] }
 0x105   :  { %2810 = vmatpush.bf16.msra.mxu1 %v13429_v34  ;;  %v20889_v33 = vpop.f32.mrf.mxu1  ;;  %v18898_v34 = vld [vmem:[#allocation4 + $0x43c] sm:$0xf0] }
 0x106   :  { %2786 = vmatpush.bf16.msrb.mxu3 %v13137_v23  ;;  %2762 = vmatmul.bf16.vlgmr.msra.gmra.mxu0 %v20826_v36  ;;  %v14020_v23 = vld [vmem:[#allocation4 + $0x838] sm:$0xf]  ;;  %v13437_v43 = vor.u32 %v18898_v34, %v13436_v32 }
 0x107   :  { %2826 = vmatpush.bf16.msrb.mxu0 %v14149_v30  ;;  %v18843_v30 = vld [vmem:[#allocation4 + $0x28c] sm:$0xf]  ;;  %v14021_v40 = vor.u32 %v19043_v25, %v14020_v23  ;;  %v13444_v23 = vld [vmem:[#allocation4 + $0x3b8] sm:$0xf]  ;;  %v18899_v25 = vld [vmem:[#allocation4 + $0x444] sm:$0xf0] }
 0x108   :  { %2832 = vmatpush.bf16.msrb.mxu2 %v14009_v18  ;;  %v12997_v18 = vor.u32 %v18789_v6, %v12996_v16  ;;  %v13289_v41 = vor.u32 %v18843_v30, %v13286_v31  ;;  %v19060_v16 = vld [vmem:[#allocation4 + $0x954] sm:$0xf]  ;;  %v13001_v6 = vor.u32 %v18771_v61, %v12998_v62  ;;  %v13878_v30 = vld [vmem:[#allocation4 + $0x7a8] sm:$0xf0]  ;;  %v14028_v31 = vld [vmem:[#allocation4 + $0x840] sm:$0xf] }
 0x109   :  { %2811 = vmatpush.bf16.msra.mxu1 %v13285_v52  ;;  %v13156_v62 = vld [vmem:[#allocation4 + $0x178] sm:$0xf] }
 0x10a   :  { %2787 = vmatpush.bf16.msrb.mxu3 %v12993_v60  ;;  %v13876_v60 = vld [vmem:[#allocation4 + $0x718] sm:$0xf] }
 0x10b   :  { %2858 = vmatpush.bf16.msra.mxu0 %v14013_v42  ;;  %v19007_v42 = vld [vmem:[#allocation4 + $0x7a4] sm:$0xf0] }
 0x10c   :  { %2833 = vmatpush.bf16.msrb.mxu2 %v13865_v39  ;;  %v20891_v39 = vadd.f32 %v2412_v26, %v2399_v20  ;;  %v13877_v51 = vor.u32 %v19007_v42, %v13876_v60  ;;  %v2401_v52 = vpop.f32.mrf.mxu3  ;;  %v2414_v57 = vpop.f32.mrf.mxu0  ;;  %v14164_v20 = vld [vmem:[#allocation4 + $0x958] sm:$0xf]  ;;  %v13005_v26 = vor.u32 %v18790_v15, %v13004_v11  ;;  %v13445_v42 = vor.u32 %v18899_v25, %v13444_v23  ;;  %v13596_v15 = vld [vmem:[#allocation4 + $0x4e0] sm:$0xf]  ;;  %v18936_v23 = vld [vmem:[#allocation4 + $0x56c] sm:$0xf0] }
 0x10d   :  { %2788 = vmatmul.bf16.vlgmr.msrb.gmra.mxu3 %v20826_v36  ;;  %2812 = vmatpush.bf16.msra.mxu1 %v13141_v4  ;;  %v2440_v0 = vpop.f32.mrf.mxu1  ;;  %v13733_v4 = vor.u32 %v18971_v56, %v13732_v55  ;;  %v18953_v52 = vld [vmem:[#allocation4 + $0x5fc] sm:$0xf]  ;;  %v13884_v55 = vld [vmem:[#allocation4 + $0x720] sm:$0xf]  ;;  %v19008_v57 = vld [vmem:[#allocation4 + $0x7ac] sm:$0xf0] }
 0x10e   :  { %2852 = vmatpush.bf16.msra.mxu3 %v14153_v46  ;;  %v13142_v46 = vld [vmem:[#allocation4 + $0x1f8] sm:$0xf0]  ;;  %v13885_v0 = vor.u32 %v19008_v57, %v13884_v55  ;;  %v18954_v25 = vld [vmem:[#allocation4 + $0x604] sm:$0xf] }
 0x10f   :  { %2859 = vmatpush.bf16.msra.mxu0 %v13869_v58  ;;  %v13293_v58 = vor.u32 %v18862_v48, %v13292_v47  ;;  %v13300_v47 = vld [vmem:[#allocation4 + $0x298] sm:$0xf]  ;;  %v18863_v48 = vld [vmem:[#allocation4 + $0x324] sm:$0xf0] }
 0x110   :  { %2834 = vmatpush.bf16.msrb.mxu2 %v13721_v54  ;;  %v13145_v54 = vor.u32 %v18807_v45, %v13142_v46  ;;  %v13301_v61 = vor.u32 %v18863_v48, %v13300_v47 }
 0x111   :  { %2813 = vmatpush.bf16.msra.mxu1 %v12997_v18  ;;  %v13150_v18 = vld [vmem:[#allocation4 + $0x200] sm:$0xf0] }
 0x112   :  { %2884 = vmatpush.bf16.msrb.mxu3 %v14017_v59  ;;  %v13441_v59 = vor.u32 %v18880_v49, %v13438_v50 }
 0x113   :  { %2860 = vmatpush.bf16.msra.mxu0 %v13725_v9  ;;  %14235 = vmatmul.msk.bf16.vlgmr.msra.gmra.mxu2 %vm360_vm0, %v20800_v24  ;;  %v13149_v9 = vor.u32 %v18826_v1, %v13148_v63  ;;  %v18827_v63 = vld [vmem:[#allocation4 + $0x204] sm:$0xf0] }
 0x114   :  { %2835 = vmatpush.bf16.msrb.mxu2 %v13577_v5  ;;  %2814 = vmatmul.bf16.vlgmr.msra.gmra.mxu1 %v20826_v36  ;;  %v14158_v5 = vld [vmem:[#allocation4 + $0x9e0] sm:$0xf0] }
 0x115   :  { %2878 = vmatpush.bf16.msrb.mxu1 %v14157_v22  ;;  %v14161_v14 = vor.u32 %v19060_v16, %v14158_v5  ;;  %v14025_v22 = vor.u32 %v19025_v12, %v14022_v13  ;;  %v2464_v34 = vpop.f32.mrf.mxu1  ;;  %v18791_v13 = vld [vmem:[#allocation4 + $0xe4] sm:$0xf0] }
 0x116   :  { %2885 = vmatpush.bf16.msrb.mxu3 %v13873_v10  ;;  %14236 = vmatmul.msk.bf16.vlgmr.msrb.gmra.mxu0 %vm360_vm0, %v20800_v24  ;;  %v13297_v10 = vor.u32 %v18844_v2, %v13294_v3  ;;  %v18917_v2 = vld [vmem:[#allocation4 + $0x4dc] sm:$0xf]  ;;  %v13590_v3 = vld [vmem:[#allocation4 + $0x568] sm:$0xf0] }
 0x117   :  { %2861 = vmatpush.bf16.msra.mxu0 %v13581_v27  ;;  %v13153_v27 = vor.u32 %v18808_v17, %v13150_v18  ;;  %v2451_v32 = vpop.f32.mrf.mxu0  ;;  %v13593_v12 = vor.u32 %v18917_v2, %v13590_v3  ;;  %v13748_v3 = vld [vmem:[#allocation4 + $0x608] sm:$0xf] }
 0x118   :  { %2836 = vmatpush.bf16.msrb.mxu2 %v13433_v21  ;;  %v19079_v21 = vld [vmem:[#allocation4 + $0x9e4] sm:$0xf0]  ;;  %v20901_v60 = vadd.f32 %v2464_v34, %v2451_v32  ;;  %v19045_v32 = vld [vmem:[#allocation4 + $0x8d4] sm:$0xf0]  ;;  %v13597_v34 = vor.u32 %v18936_v23, %v13596_v15  ;;  %v19062_v15 = vld [vmem:[#allocation4 + $0x964] sm:$0xf] }
 0x119   :  { %2910 = vmatpush.bf16.msra.mxu1 %v14021_v40  ;;  %v14165_v35 = vor.u32 %v19079_v21, %v14164_v20  ;;  %v13006_v40 = vld [vmem:[#allocation4 + $0xe0] sm:$0xf0]  ;;  %v13446_v20 = vld [vmem:[#allocation4 + $0x448] sm:$0xf0]  ;;  %v14172_v21 = vld [vmem:[#allocation4 + $0x960] sm:$0xf] }
 0x11a   :  { %2886 = vmatpush.bf16.msrb.mxu3 %v13729_v29  ;;  %v18989_v29 = vld [vmem:[#allocation4 + $0x71c] sm:$0xf]  ;;  %v2425_v45 = vpop.f32.mrf.mxu2  ;;  %v13009_v50 = vor.u32 %v18772_v37, %v13006_v40  ;;  %v13302_v40 = vld [vmem:[#allocation4 + $0x328] sm:$0xf0] }
 0x11b   :  { %2862 = vmatpush.bf16.msra.mxu0 %v13437_v43  ;;  %v19061_v43 = vld [vmem:[#allocation4 + $0x95c] sm:$0xf]  ;;  %v13881_v46 = vor.u32 %v18989_v29, %v13878_v30  ;;  %v20904_v49 = vadd.f32 %v20889_v33, %v2425_v45  ;;  %v13598_v45 = vld [vmem:[#allocation4 + $0x570] sm:$0xf0] }
 0x11c   :  { %2837 = vmatpush.bf16.msrb.mxu2 %v13289_v41  ;;  %v19044_v41 = vld [vmem:[#allocation4 + $0x8cc] sm:$0xf0]  ;;  %v18845_v37 = vld [vmem:[#allocation4 + $0x29c] sm:$0xf] }
 0x11d   :  { %2911 = vmatpush.bf16.msra.mxu1 %v13877_v51  ;;  %14237 = vmatmul.msk.bf16.vlgmr.msra.gmra.mxu3 %vm360_vm0, %v20800_v24  ;;  %v14029_v51 = vor.u32 %v19044_v41, %v14028_v31  ;;  %v2466_v5 = vpop.f32.mrf.mxu1  ;;  %v14036_v31 = vld [vmem:[#allocation4 + $0x848] sm:$0xf]  ;;  %v13452_v41 = vld [vmem:[#allocation4 + $0x3c0] sm:$0xf] }
 0x11e   :  { %2887 = vmatpush.bf16.msrb.mxu3 %v13585_v44  ;;  %v14166_v44 = vld [vmem:[#allocation4 + $0x9e8] sm:$0xf0]  ;;  %v14037_v47 = vor.u32 %v19045_v32, %v14036_v31  ;;  %v18792_v31 = vld [vmem:[#allocation4 + $0xec] sm:$0xf0]  ;;  %v18810_v32 = vld [vmem:[#allocation4 + $0x184] sm:$0xf] }
 0x11f   :  { %2863 = vmatpush.bf16.msra.mxu0 %v13293_v58  ;;  %v14169_v56 = vor.u32 %v19061_v43, %v14166_v44  ;;  %v19026_v58 = vld [vmem:[#allocation4 + $0x844] sm:$0xf]  ;;  %v2453_v16 = vpop.f32.mrf.mxu0  ;;  %v18900_v43 = vld [vmem:[#allocation4 + $0x44c] sm:$0xf0] }
 0x120   :  { %2838 = vmatpush.bf16.msrb.mxu2 %v13145_v54  ;;  %v13734_v54 = vld [vmem:[#allocation4 + $0x688] sm:$0xf0]  ;;  %v18918_v44 = vld [vmem:[#allocation4 + $0x4e4] sm:$0xf]  ;;  %v13453_v57 = vor.u32 %v18900_v43, %v13452_v41  ;;  %v18901_v43 = vld [vmem:[#allocation4 + $0x454] sm:$0xf0] }
 0x121   :  { %2912 = vmatpush.bf16.msra.mxu1 %v13733_v4  ;;  %v13737_v33 = vor.u32 %v18953_v52, %v13734_v54  ;;  %v13740_v4 = vld [vmem:[#allocation4 + $0x600] sm:$0xf]  ;;  %v13892_v52 = vld [vmem:[#allocation4 + $0x728] sm:$0xf]  ;;  %v19009_v54 = vld [vmem:[#allocation4 + $0x7b4] sm:$0xf0] }
 0x122   :  { %2888 = vmatpush.bf16.msrb.mxu3 %v13441_v59  ;;  %v14030_v59 = vld [vmem:[#allocation4 + $0x8d0] sm:$0xf0]  ;;  %v2427_v11 = vpop.f32.mrf.mxu2 }
 0x123   :  { %2864 = vmatpush.bf16.msra.mxu0 %v13149_v9  ;;  %v14033_v1 = vor.u32 %v19026_v58, %v14030_v59  ;;  %v13157_v9 = vor.u32 %v18827_v63, %v13156_v62  ;;  %v13601_v58 = vor.u32 %v18918_v44, %v13598_v45  ;;  %v18809_v59 = vld [vmem:[#allocation4 + $0x17c] sm:$0xf]  ;;  %v18864_v62 = vld [vmem:[#allocation4 + $0x32c] sm:$0xf0]  ;;  %v18882_v63 = vld [vmem:[#allocation4 + $0x3c4] sm:$0xf] }
 0x124   :  { %2839 = vmatpush.bf16.msrb.mxu2 %v13001_v6  ;;  %14238 = vmatmul.msk.bf16.vlgmr.msrb.gmra.mxu1 %vm360_vm0, %v20800_v24  ;;  %v18972_v6 = vld [vmem:[#allocation4 + $0x68c] sm:$0xf0]  ;;  %v2477_v17 = vpop.f32.mrf.mxu3  ;;  %v18846_v11 = vld [vmem:[#allocation4 + $0x2a4] sm:$0xf] }
 0x125   :  { %2913 = vmatpush.bf16.msra.mxu1 %v13589_v19  ;;  %v13741_v18 = vor.u32 %v18972_v6, %v13740_v4  ;;  %v13889_v19 = vor.u32 %v18990_v7, %v13886_v8  ;;  %v18973_v4 = vld [vmem:[#allocation4 + $0x694] sm:$0xf0]  ;;  %v18773_v6 = vld [vmem:[#allocation4 + $0x5c] sm:$0xf]  ;;  %v13014_v7 = vld [vmem:[#allocation4 + $0xe8] sm:$0xf0] }
 0x126   :  { %2889 = vmatpush.bf16.msrb.mxu3 %v13297_v10  ;;  %v13012_v10 = vld [vmem:[#allocation4 + $0x58] sm:$0xf]  ;;  %v13164_v8 = vld [vmem:[#allocation4 + $0x180] sm:$0xf] }
 0x127   :  { %2840 = vmatmul.bf16.vlgmr.msrb.gmra.mxu2 %v20826_v36  ;;  %2865 = vmatpush.bf16.msra.mxu0 %v13005_v26  ;;  %v13742_v26 = vld [vmem:[#allocation4 + $0x690] sm:$0xf0] }
 0x128   :  { %2904 = vmatpush.bf16.msra.mxu2 %v14161_v14  ;;  %v18881_v14 = vld [vmem:[#allocation4 + $0x3bc] sm:$0xf] }
 0x129   :  { %2914 = vmatpush.bf16.msra.mxu1 %v13445_v42  ;;  %v13449_v29 = vor.u32 %v18881_v14, %v13446_v20  ;;  %v2516_v42 = vpop.f32.mrf.mxu0  ;;  %v13749_v14 = vor.u32 %v18973_v4, %v13748_v3  ;;  %v13604_v20 = vld [vmem:[#allocation4 + $0x4e8] sm:$0xf] }
 0x12a   :  { %2890 = vmatpush.bf16.msrb.mxu3 %v13153_v27  ;;  %2866 = vmatmul.bf16.vlgmr.msra.gmra.mxu0 %v20826_v36  ;;  %v13013_v27 = vor.u32 %v18791_v13, %v13012_v10  ;;  %v18828_v10 = vld [vmem:[#allocation4 + $0x20c] sm:$0xf0] }
 0x12b   :  { %2930 = vmatpush.bf16.msrb.mxu0 %v14165_v35  ;;  %v13745_v35 = vor.u32 %v18954_v25, %v13742_v26  ;;  %v13165_v23 = vor.u32 %v18828_v10, %v13164_v8  ;;  %v13020_v26 = vld [vmem:[#allocation4 + $0x60] sm:$0xf]  ;;  %v13900_v8 = vld [vmem:[#allocation4 + $0x730] sm:$0xf] }
 0x12c   :  { %2936 = vmatpush.bf16.msrb.mxu2 %v14025_v22  ;;  %v19080_v22 = vld [vmem:[#allocation4 + $0x9ec] sm:$0xf0]  ;;  %v2479_v55 = vpop.f32.mrf.mxu3  ;;  %v13021_v44 = vor.u32 %v18792_v31, %v13020_v26  ;;  %v19010_v10 = vld [vmem:[#allocation4 + $0x7bc] sm:$0xf0]  ;;  %v13902_v26 = vld [vmem:[#allocation4 + $0x7c0] sm:$0xf0] }
 0x12d   :  { %2915 = vmatpush.bf16.msra.mxu1 %v13301_v61  ;;  %v14173_v30 = vor.u32 %v19080_v22, %v14172_v21  ;;  %v13158_v61 = vld [vmem:[#allocation4 + $0x208] sm:$0xf0]  ;;  %v18937_v21 = vld [vmem:[#allocation4 + $0x574] sm:$0xf0]  ;;  %v19046_v55 = vld [vmem:[#allocation4 + $0x8dc] sm:$0xf0] }
 0x12e   :  { %2891 = vmatpush.bf16.msrb.mxu3 %v13009_v50  ;;  %v2490_v50 = vpop.f32.mrf.mxu2  ;;  %v13161_v2 = vor.u32 %v18809_v59, %v13158_v61  ;;  %v19063_v61 = vld [vmem:[#allocation4 + $0x96c] sm:$0xf]  ;;  %v13028_v31 = vld [vmem:[#allocation4 + $0x68] sm:$0xf] }
 0x12f   :  { %2962 = vmatpush.bf16.msra.mxu0 %v14029_v51  ;;  %v13305_v51 = vor.u32 %v18845_v37, %v13302_v40  ;;  %v14180_v37 = vld [vmem:[#allocation4 + $0x968] sm:$0xf]  ;;  %v19081_v40 = vld [vmem:[#allocation4 + $0x9f4] sm:$0xf0] }
 0x130   :  { %2937 = vmatpush.bf16.msrb.mxu2 %v13881_v46  ;;  %v2503_v46 = vpop.f32.mrf.mxu1 }
 0x131   :  { %2892 = vmatmul.bf16.vlgmr.msrb.gmra.mxu3 %v20826_v36  ;;  %2916 = vmatpush.bf16.msra.mxu1 %v13157_v9  ;;  %v20912_v48 = vadd.f32 %v2516_v42, %v2503_v46  ;;  %v2518_v9 = vpop.f32.mrf.mxu0  ;;  %v13460_v42 = vld [vmem:[#allocation4 + $0x3c8] sm:$0xf]  ;;  %v18991_v46 = vld [vmem:[#allocation4 + $0x72c] sm:$0xf] }
 0x132   :  { %2956 = vmatpush.bf16.msra.mxu3 %v14169_v56  ;;  %v20914_v56 = vadd.f32 %v2490_v50, %v2477_v17  ;;  %v14174_v17 = vld [vmem:[#allocation4 + $0x9f0] sm:$0xf0]  ;;  %v14044_v50 = vld [vmem:[#allocation4 + $0x850] sm:$0xf]  ;;  %v13461_v59 = vor.u32 %v18901_v43, %v13460_v42  ;;  %v13462_v43 = vld [vmem:[#allocation4 + $0x458] sm:$0xf0] }
 0x133   :  { %2963 = vmatpush.bf16.msra.mxu0 %v13885_v0  ;;  %v13454_v0 = vld [vmem:[#allocation4 + $0x450] sm:$0xf0] }
 0x134   :  { %2938 = vmatpush.bf16.msrb.mxu2 %v13737_v33  ;;  %v13308_v33 = vld [vmem:[#allocation4 + $0x2a0] sm:$0xf]  ;;  %v13457_v5 = vor.u32 %v18882_v63, %v13454_v0  ;;  %v2542_v22 = vpop.f32.mrf.mxu3 }
 0x135   :  { %2917 = vmatpush.bf16.msra.mxu1 %v13013_v27  ;;  %v13309_v16 = vor.u32 %v18864_v62, %v13308_v33  ;;  %v19027_v27 = vld [vmem:[#allocation4 + $0x84c] sm:$0xf]  ;;  %v14182_v33 = vld [vmem:[#allocation4 + $0x9f8] sm:$0xf0] }
 0x136   :  { %2988 = vmatpush.bf16.msrb.mxu3 %v14033_v1  ;;  %v13893_v1 = vor.u32 %v19009_v54, %v13892_v52  ;;  %v18774_v52 = vld [vmem:[#allocation4 + $0x64] sm:$0xf]  ;;  %v13022_v54 = vld [vmem:[#allocation4 + $0xf0] sm:$0xf0]  ;;  %v14185_v9 = vor.u32 %v19063_v61, %v14182_v33  ;;  %v18847_v33 = vld [vmem:[#allocation4 + $0x2ac] sm:$0xf] }
 0x137   :  { %2964 = vmatpush.bf16.msra.mxu0 %v13741_v18  ;;  %14239 = vmatmul.msk.bf16.vlgmr.msra.gmra.mxu2 %vm360_vm0, %v20800_v24  ;;  %v2492_v18 = vpop.f32.mrf.mxu2 }
 0x138   :  { %2939 = vmatpush.bf16.msrb.mxu2 %v13593_v12  ;;  %2918 = vmatmul.bf16.vlgmr.msra.gmra.mxu1 %v20826_v36  ;;  %v13310_v12 = vld [vmem:[#allocation4 + $0x330] sm:$0xf0]  ;;  %v2505_v13 = vpop.f32.mrf.mxu1  ;;  %v13901_v18 = vor.u32 %v19010_v10, %v13900_v8  ;;  %v13908_v10 = vld [vmem:[#allocation4 + $0x738] sm:$0xf] }
 0x139   :  { %2982 = vmatpush.bf16.msrb.mxu1 %v14173_v30  ;;  %v13313_v25 = vor.u32 %v18846_v11, %v13310_v12  ;;  %v14177_v30 = vor.u32 %v19062_v15, %v14174_v17  ;;  %v19028_v11 = vld [vmem:[#allocation4 + $0x854] sm:$0xf]  ;;  %v14046_v12 = vld [vmem:[#allocation4 + $0x8e0] sm:$0xf0]  ;;  %v13172_v15 = vld [vmem:[#allocation4 + $0x188] sm:$0xf] }
 0x13a   :  { %2989 = vmatpush.bf16.msrb.mxu3 %v13889_v19  ;;  %14240 = vmatmul.msk.bf16.vlgmr.msrb.gmra.mxu0 %vm360_vm0, %v20800_v24  ;;  %v13017_v19 = vor.u32 %v18773_v6, %v13014_v7  ;;  %v18955_v6 = vld [vmem:[#allocation4 + $0x60c] sm:$0xf]  ;;  %v13750_v7 = vld [vmem:[#allocation4 + $0x698] sm:$0xf0]  ;;  %v18829_v17 = vld [vmem:[#allocation4 + $0x214] sm:$0xf0] }
 0x13b   :  { %2965 = vmatpush.bf16.msra.mxu0 %v13597_v34  ;;  %v13166_v34 = vld [vmem:[#allocation4 + $0x210] sm:$0xf0] }
 0x13c   :  { %2940 = vmatpush.bf16.msrb.mxu2 %v13449_v29  ;;  %v14038_v29 = vld [vmem:[#allocation4 + $0x8d8] sm:$0xf0]  ;;  %v13169_v45 = vor.u32 %v18810_v32, %v13166_v34  ;;  %v2544_v4 = vpop.f32.mrf.mxu3 }
 0x13d   :  { %3014 = vmatpush.bf16.msra.mxu1 %v14037_v47  ;;  %v14041_v41 = vor.u32 %v19027_v27, %v14038_v29  ;;  %v13894_v47 = vld [vmem:[#allocation4 + $0x7b8] sm:$0xf0]  ;;  %v13614_v4 = vld [vmem:[#allocation4 + $0x580] sm:$0xf0] }
 0x13e   :  { %2990 = vmatpush.bf16.msrb.mxu3 %v13745_v35  ;;  %v13605_v35 = vor.u32 %v18937_v21, %v13604_v20  ;;  %v13897_v0 = vor.u32 %v18991_v46, %v13894_v47  ;;  %v18919_v20 = vld [vmem:[#allocation4 + $0x4ec] sm:$0xf]  ;;  %v13606_v21 = vld [vmem:[#allocation4 + $0x578] sm:$0xf0]  ;;  %v18938_v47 = vld [vmem:[#allocation4 + $0x57c] sm:$0xf0] }
 0x13f   :  { %2966 = vmatpush.bf16.msra.mxu0 %v13453_v57  ;;  %v2555_v57 = vpop.f32.mrf.mxu0  ;;  %v2529_v63 = vpop.f32.mrf.mxu2  ;;  %v13609_v34 = vor.u32 %v18919_v20, %v13606_v21  ;;  %v18866_v20 = vld [vmem:[#allocation4 + $0x33c] sm:$0xf0]  ;;  %v18884_v21 = vld [vmem:[#allocation4 + $0x3d4] sm:$0xf] }
 0x140   :  { %2941 = vmatpush.bf16.msrb.mxu2 %v13305_v51  ;;  %v14181_v51 = vor.u32 %v19081_v40, %v14180_v37  ;;  %v20924_v3 = vadd.f32 %v2542_v22, %v2529_v63  ;;  %v13756_v22 = vld [vmem:[#allocation4 + $0x610] sm:$0xf]  ;;  %v18883_v37 = vld [vmem:[#allocation4 + $0x3cc] sm:$0xf]  ;;  %v13318_v63 = vld [vmem:[#allocation4 + $0x338] sm:$0xf0] }
 0x141   :  { %3015 = vmatpush.bf16.msra.mxu1 %v13893_v1  ;;  %14241 = vmatmul.msk.bf16.vlgmr.msra.gmra.mxu3 %vm360_vm0, %v20800_v24  ;;  %v13316_v1 = vld [vmem:[#allocation4 + $0x2a8] sm:$0xf]  ;;  %v13612_v40 = vld [vmem:[#allocation4 + $0x4f0] sm:$0xf] }
 0x142   :  { %2991 = vmatpush.bf16.msrb.mxu3 %v13601_v58  ;;  %v2568_v58 = vpop.f32.mrf.mxu1 }
 0x143   :  { %2967 = vmatpush.bf16.msra.mxu0 %v13309_v16  ;;  %v20922_v62 = vadd.f32 %v2568_v58, %v2555_v57  ;;  %v13025_v16 = vor.u32 %v18774_v52, %v13022_v54  ;;  %v13465_v54 = vor.u32 %v18883_v37, %v13462_v43  ;;  %v14052_v57 = vld [vmem:[#allocation4 + $0x858] sm:$0xf]  ;;  %v19047_v58 = vld [vmem:[#allocation4 + $0x8e4] sm:$0xf0]  ;;  %v18848_v37 = vld [vmem:[#allocation4 + $0x2b4] sm:$0xf] }
 0x144   :  { %2942 = vmatpush.bf16.msrb.mxu2 %v13161_v2  ;;  %v18865_v2 = vld [vmem:[#allocation4 + $0x334] sm:$0xf0] }
 0x145   :  { %3016 = vmatpush.bf16.msra.mxu1 %v13749_v14  ;;  %v13317_v13 = vor.u32 %v18865_v2, %v13316_v1  ;;  %v13753_v14 = vor.u32 %v18955_v6, %v13750_v7  ;;  %v18902_v1 = vld [vmem:[#allocation4 + $0x45c] sm:$0xf0]  ;;  %v18920_v2 = vld [vmem:[#allocation4 + $0x4f4] sm:$0xf]  ;;  %v14053_v6 = vor.u32 %v19047_v58, %v14052_v57  ;;  %v19029_v57 = vld [vmem:[#allocation4 + $0x85c] sm:$0xf] }
 0x146   :  { %2992 = vmatpush.bf16.msrb.mxu3 %v13457_v5  ;;  %v14045_v5 = vor.u32 %v19046_v55, %v14044_v50  ;;  %v18956_v50 = vld [vmem:[#allocation4 + $0x614] sm:$0xf]  ;;  %v14054_v58 = vld [vmem:[#allocation4 + $0x8e8] sm:$0xf0] }
 0x147   :  { %2968 = vmatpush.bf16.msra.mxu0 %v13165_v23  ;;  %v18974_v23 = vld [vmem:[#allocation4 + $0x69c] sm:$0xf0]  ;;  %v2557_v27 = vpop.f32.mrf.mxu0  ;;  %v2531_v32 = vpop.f32.mrf.mxu2 }
 0x148   :  { %2943 = vmatpush.bf16.msrb.mxu2 %v13017_v19  ;;  %14242 = vmatmul.msk.bf16.vlgmr.msrb.gmra.mxu1 %vm360_vm0, %v20800_v24  ;;  %v14049_v19 = vor.u32 %v19028_v11, %v14046_v12  ;;  %v2581_v46 = vpop.f32.mrf.mxu3  ;;  %v19011_v11 = vld [vmem:[#allocation4 + $0x7c4] sm:$0xf0]  ;;  %v13030_v32 = vld [vmem:[#allocation4 + $0xf8] sm:$0xf0] }
 0x149   :  { %3017 = vmatpush.bf16.msra.mxu1 %v13605_v35  ;;  %v18793_v35 = vld [vmem:[#allocation4 + $0xf4] sm:$0xf0]  ;;  %v18975_v27 = vld [vmem:[#allocation4 + $0x6a4] sm:$0xf0] }
 0x14a   :  { %2993 = vmatpush.bf16.msrb.mxu3 %v13313_v25  ;;  %v18992_v25 = vld [vmem:[#allocation4 + $0x734] sm:$0xf]  ;;  %v2570_v29 = vpop.f32.mrf.mxu1  ;;  %v13029_v52 = vor.u32 %v18793_v35, %v13028_v31  ;;  %v18775_v31 = vld [vmem:[#allocation4 + $0x6c] sm:$0xf]  ;;  %v18830_v35 = vld [vmem:[#allocation4 + $0x21c] sm:$0xf0] }
 0x14b   :  { %2944 = vmatmul.bf16.vlgmr.msrb.gmra.mxu2 %v20826_v36  ;;  %2969 = vmatpush.bf16.msra.mxu0 %v13021_v44  ;;  %v13905_v42 = vor.u32 %v18992_v25, %v13902_v26  ;;  %v14188_v44 = vld [vmem:[#allocation4 + $0x970] sm:$0xf]  ;;  %v13764_v26 = vld [vmem:[#allocation4 + $0x618] sm:$0xf] }
 0x14c   :  { %3008 = vmatpush.bf16.msra.mxu2 %v14177_v30  ;;  %v13173_v30 = vor.u32 %v18829_v17, %v13172_v15  ;;  %v18811_v15 = vld [vmem:[#allocation4 + $0x18c] sm:$0xf]  ;;  %v13174_v17 = vld [vmem:[#allocation4 + $0x218] sm:$0xf0]  ;;  %v13765_v43 = vor.u32 %v18975_v27, %v13764_v26  ;;  %v13332_v26 = vld [vmem:[#allocation4 + $0x2b8] sm:$0xf] }
 0x14d   :  { %3018 = vmatpush.bf16.msra.mxu1 %v13461_v59  ;;  %v13613_v59 = vor.u32 %v18938_v47, %v13612_v40  ;;  %v13177_v25 = vor.u32 %v18811_v15, %v13174_v17  ;;  %v13326_v40 = vld [vmem:[#allocation4 + $0x340] sm:$0xf0]  ;;  %v13033_v47 = vor.u32 %v18775_v31, %v13030_v32  ;;  %v18776_v15 = vld [vmem:[#allocation4 + $0x74] sm:$0xf]  ;;  %v18867_v27 = vld [vmem:[#allocation4 + $0x344] sm:$0xf0] }
 0x14e   :  { %2994 = vmatpush.bf16.msrb.mxu3 %v13169_v45  ;;  %2970 = vmatmul.bf16.vlgmr.msra.gmra.mxu0 %v20826_v36  ;;  %v19082_v45 = vld [vmem:[#allocation4 + $0x9fc] sm:$0xf0]  ;;  %v13038_v17 = vld [vmem:[#allocation4 + $0x100] sm:$0xf0]  ;;  %v18957_v32 = vld [vmem:[#allocation4 + $0x61c] sm:$0xf] }
 0x14f   :  { %3034 = vmatpush.bf16.msrb.mxu0 %v14181_v51  ;;  %v13758_v51 = vld [vmem:[#allocation4 + $0x6a0] sm:$0xf0]  ;;  %v14189_v55 = vor.u32 %v19082_v45, %v14188_v44  ;;  %v2594_v8 = vpop.f32.mrf.mxu2  ;;  %v19064_v44 = vld [vmem:[#allocation4 + $0x974] sm:$0xf] }
 0x150   :  { %3040 = vmatpush.bf16.msrb.mxu2 %v14041_v41  ;;  %v13757_v41 = vor.u32 %v18974_v23, %v13756_v22  ;;  %v13761_v61 = vor.u32 %v18956_v50, %v13758_v51  ;;  %v20934_v12 = vadd.f32 %v2594_v8, %v2581_v46  ;;  %v13470_v22 = vld [vmem:[#allocation4 + $0x460] sm:$0xf0]  ;;  %v13909_v23 = vor.u32 %v19011_v11, %v13908_v10  ;;  %v13620_v50 = vld [vmem:[#allocation4 + $0x4f8] sm:$0xf]  ;;  %v18939_v51 = vld [vmem:[#allocation4 + $0x584] sm:$0xf0] }
 0x151   :  { %3019 = vmatpush.bf16.msra.mxu1 %v13317_v13  ;;  %v14190_v45 = vld [vmem:[#allocation4 + $0xa00] sm:$0xf0]  ;;  %v18993_v10 = vld [vmem:[#allocation4 + $0x73c] sm:$0xf]  ;;  %v13910_v11 = vld [vmem:[#allocation4 + $0x7c8] sm:$0xf0] }
 0x152   :  { %2995 = vmatpush.bf16.msrb.mxu3 %v13025_v16  ;;  %v2607_v16 = vpop.f32.mrf.mxu1 }
 0x153   :  { %3066 = vmatpush.bf16.msra.mxu0 %v14045_v5  ;;  %v2620_v5 = vpop.f32.mrf.mxu0 }
 0x154   :  { %3041 = vmatpush.bf16.msrb.mxu2 %v13897_v0  ;;  %v13468_v0 = vld [vmem:[#allocation4 + $0x3d0] sm:$0xf]  ;;  %v20932_v7 = vadd.f32 %v2620_v5, %v2607_v16  ;;  %v14057_v16 = vor.u32 %v19029_v57, %v14054_v58  ;;  %v13476_v5 = vld [vmem:[#allocation4 + $0x3d8] sm:$0xf]  ;;  %v13622_v57 = vld [vmem:[#allocation4 + $0x588] sm:$0xf0] }
 0x155   :  { %2996 = vmatmul.bf16.vlgmr.msrb.gmra.mxu3 %v20826_v36  ;;  %3020 = vmatpush.bf16.msra.mxu1 %v13173_v30  ;;  %v13469_v13 = vor.u32 %v18902_v1, %v13468_v0  ;;  %v13473_v30 = vor.u32 %v18884_v21, %v13470_v22  ;;  %v13182_v0 = vld [vmem:[#allocation4 + $0x220] sm:$0xf0]  ;;  %v13621_v1 = vor.u32 %v18939_v51, %v13620_v50  ;;  %v19065_v21 = vld [vmem:[#allocation4 + $0x97c] sm:$0xf]  ;;  %v14198_v22 = vld [vmem:[#allocation4 + $0xa08] sm:$0xf0] }
 0x156   :  { %3060 = vmatpush.bf16.msra.mxu3 %v14185_v9  ;;  %v13321_v9 = vor.u32 %v18847_v33, %v13318_v63  ;;  %v18794_v33 = vld [vmem:[#allocation4 + $0xfc] sm:$0xf0]  ;;  %v18812_v63 = vld [vmem:[#allocation4 + $0x194] sm:$0xf]  ;;  %v13188_v50 = vld [vmem:[#allocation4 + $0x198] sm:$0xf] }
 0x157   :  { %3067 = vmatpush.bf16.msra.mxu0 %v13901_v18  ;;  %v13324_v18 = vld [vmem:[#allocation4 + $0x2b0] sm:$0xf]  ;;  %v2596_v46 = vpop.f32.mrf.mxu2  ;;  %v18831_v51 = vld [vmem:[#allocation4 + $0x224] sm:$0xf0]  ;;  %v13772_v58 = vld [vmem:[#allocation4 + $0x620] sm:$0xf] }
 0x158   :  { %3042 = vmatpush.bf16.msrb.mxu2 %v13753_v14  ;;  %v13617_v14 = vor.u32 %v18920_v2, %v13614_v4  ;;  %v13325_v29 = vor.u32 %v18866_v20, %v13324_v18  ;;  %v14196_v2 = vld [vmem:[#allocation4 + $0x978] sm:$0xf]  ;;  %v19083_v4 = vld [vmem:[#allocation4 + $0xa04] sm:$0xf0]  ;;  %v19048_v18 = vld [vmem:[#allocation4 + $0x8ec] sm:$0xf0]  ;;  %v13333_v46 = vor.u32 %v18867_v27, %v13332_v26 }
 0x159   :  { %3021 = vmatpush.bf16.msra.mxu1 %v13029_v52 }
 0x15a   :  { %3092 = vmatpush.bf16.msrb.mxu3 %v14049_v19  ;;  %v2583_v19 = vpop.f32.mrf.mxu3 }
 0x15b   :  { %3068 = vmatpush.bf16.msra.mxu0 %v13757_v41  ;;  %14243 = vmatmul.msk.bf16.vlgmr.msra.gmra.mxu2 %vm360_vm0, %v20800_v24  ;;  %v2609_v41 = vpop.f32.mrf.mxu1 }
 0x15c   :  { %3043 = vmatpush.bf16.msrb.mxu2 %v13609_v34  ;;  %3022 = vmatmul.bf16.vlgmr.msra.gmra.mxu1 %v20826_v36  ;;  %v13180_v34 = vld [vmem:[#allocation4 + $0x190] sm:$0xf]  ;;  %v14201_v41 = vor.u32 %v19065_v21, %v14198_v22 }
 0x15d   :  { %3086 = vmatpush.bf16.msrb.mxu1 %v14189_v55  ;;  %v13181_v52 = vor.u32 %v18830_v35, %v13180_v34  ;;  %v13036_v55 = vld [vmem:[#allocation4 + $0x70] sm:$0xf]  ;;  %v13766_v34 = vld [vmem:[#allocation4 + $0x6a8] sm:$0xf0]  ;;  %v13916_v35 = vld [vmem:[#allocation4 + $0x740] sm:$0xf] }
 0x15e   :  { %3093 = vmatpush.bf16.msrb.mxu3 %v13905_v42  ;;  %14244 = vmatmul.msk.bf16.vlgmr.msrb.gmra.mxu0 %vm360_vm0, %v20800_v24  ;;  %v2622_v42 = vpop.f32.mrf.mxu0  ;;  %v13037_v8 = vor.u32 %v18794_v33, %v13036_v55  ;;  %v18921_v55 = vld [vmem:[#allocation4 + $0x4fc] sm:$0xf]  ;;  %v18994_v33 = vld [vmem:[#allocation4 + $0x744] sm:$0xf] }
 0x15f   :  { %3069 = vmatpush.bf16.msra.mxu0 %v13613_v59  ;;  %v19012_v42 = vld [vmem:[#allocation4 + $0x7cc] sm:$0xf0] }
 0x160   :  { %3044 = vmatpush.bf16.msrb.mxu2 %v13465_v54  ;;  %v13329_v54 = vor.u32 %v18848_v37, %v13326_v40 }
 0x161   :  { %3118 = vmatpush.bf16.msra.mxu1 %v14053_v6  ;;  %v18903_v6 = vld [vmem:[#allocation4 + $0x464] sm:$0xf0] }
 0x162   :  { %3094 = vmatpush.bf16.msrb.mxu3 %v13761_v61  ;;  %v2646_v59 = vpop.f32.mrf.mxu3  ;;  %v14193_v61 = vor.u32 %v19064_v44, %v14190_v45  ;;  %v13477_v20 = vor.u32 %v18903_v6, %v13476_v5  ;;  %v2633_v37 = vpop.f32.mrf.mxu2  ;;  %v14062_v44 = vld [vmem:[#allocation4 + $0x8f0] sm:$0xf0]  ;;  %v18885_v5 = vld [vmem:[#allocation4 + $0x3dc] sm:$0xf]  ;;  %v13628_v6 = vld [vmem:[#allocation4 + $0x500] sm:$0xf] }
 0x163   :  { %3070 = vmatpush.bf16.msra.mxu0 %v13469_v13  ;;  %v14060_v13 = vld [vmem:[#allocation4 + $0x860] sm:$0xf]  ;;  %v2672_v19 = vpop.f32.mrf.mxu1  ;;  %v20946_v45 = vadd.f32 %v2646_v59, %v2633_v37  ;;  %v13918_v59 = vld [vmem:[#allocation4 + $0x7d0] sm:$0xf0] }
 0x164   :  { %3045 = vmatpush.bf16.msrb.mxu2 %v13321_v9  ;;  %v13185_v9 = vor.u32 %v18812_v63, %v13182_v0  ;;  %v14061_v31 = vor.u32 %v19048_v18, %v14060_v13  ;;  %v13189_v0 = vor.u32 %v18831_v51, %v13188_v50  ;;  %v19084_v13 = vld [vmem:[#allocation4 + $0xa0c] sm:$0xf0]  ;;  %v13774_v18 = vld [vmem:[#allocation4 + $0x6b0] sm:$0xf0] }
 0x165   :  { %3119 = vmatpush.bf16.msra.mxu1 %v13909_v23  ;;  %14245 = vmatmul.msk.bf16.vlgmr.msra.gmra.mxu3 %vm360_vm0, %v20800_v24  ;;  %v13630_v37 = vld [vmem:[#allocation4 + $0x590] sm:$0xf0] }
 0x166   :  { %3095 = vmatpush.bf16.msrb.mxu3 %v13617_v14  ;;  %v14197_v14 = vor.u32 %v19083_v4, %v14196_v2  ;;  %v2659_v23 = vpop.f32.mrf.mxu0  ;;  %v13625_v4 = vor.u32 %v18921_v55, %v13622_v57  ;;  %v13340_v55 = vld [vmem:[#allocation4 + $0x2c0] sm:$0xf] }
 0x167   :  { %3071 = vmatpush.bf16.msra.mxu0 %v13325_v29  ;;  %v20942_v29 = vadd.f32 %v2672_v19, %v2659_v23  ;;  %v14068_v23 = vld [vmem:[#allocation4 + $0x868] sm:$0xf] }
 0x168   :  { %3046 = vmatpush.bf16.msrb.mxu2 %v13177_v25  ;;  %v13913_v25 = vor.u32 %v18993_v10, %v13910_v11  ;;  %v13478_v10 = vld [vmem:[#allocation4 + $0x468] sm:$0xf0]  ;;  %v14204_v11 = vld [vmem:[#allocation4 + $0x980] sm:$0xf] }
 0x169   :  { %3120 = vmatpush.bf16.msra.mxu1 %v13765_v43  ;;  %v19030_v43 = vld [vmem:[#allocation4 + $0x864] sm:$0xf]  ;;  %v13481_v21 = vor.u32 %v18885_v5, %v13478_v10  ;;  %v14205_v22 = vor.u32 %v19084_v13, %v14204_v11  ;;  %v18832_v10 = vld [vmem:[#allocation4 + $0x22c] sm:$0xf0]  ;;  %v13342_v13 = vld [vmem:[#allocation4 + $0x350] sm:$0xf0] }
 0x16a   :  { %3096 = vmatpush.bf16.msrb.mxu3 %v13473_v30  ;;  %v13041_v30 = vor.u32 %v18776_v15, %v13038_v17  ;;  %v2648_v40 = vpop.f32.mrf.mxu3  ;;  %v18940_v15 = vld [vmem:[#allocation4 + $0x58c] sm:$0xf0]  ;;  %v18958_v17 = vld [vmem:[#allocation4 + $0x624] sm:$0xf] }
 0x16b   :  { %3072 = vmatpush.bf16.msra.mxu0 %v13181_v52  ;;  %v13917_v52 = vor.u32 %v19012_v42, %v13916_v35  ;;  %v2674_v63 = vpop.f32.mrf.mxu1  ;;  %v13629_v26 = vor.u32 %v18940_v15, %v13628_v6  ;;  %v13777_v27 = vor.u32 %v18958_v17, %v13774_v18  ;;  %v18922_v35 = vld [vmem:[#allocation4 + $0x504] sm:$0xf]  ;;  %v18777_v6 = vld [vmem:[#allocation4 + $0x7c] sm:$0xf]  ;;  %v14206_v18 = vld [vmem:[#allocation4 + $0xa10] sm:$0xf0] }
 0x16c   :  { %3047 = vmatpush.bf16.msrb.mxu2 %v13033_v47  ;;  %14246 = vmatmul.msk.bf16.vlgmr.msrb.gmra.mxu1 %vm360_vm0, %v20800_v24  ;;  %v13769_v47 = vor.u32 %v18957_v32, %v13766_v34  ;;  %v13484_v32 = vld [vmem:[#allocation4 + $0x3e0] sm:$0xf]  ;;  %v18904_v34 = vld [vmem:[#allocation4 + $0x46c] sm:$0xf0]  ;;  %v13633_v51 = vor.u32 %v18922_v35, %v13630_v37  ;;  %v18850_v11 = vld [vmem:[#allocation4 + $0x2c4] sm:$0xf] }
 0x16d   :  { %3121 = vmatpush.bf16.msra.mxu1 %v13621_v1  ;;  %v13044_v1 = vld [vmem:[#allocation4 + $0x78] sm:$0xf]  ;;  %v13485_v50 = vor.u32 %v18904_v34, %v13484_v32  ;;  %v19066_v17 = vld [vmem:[#allocation4 + $0x984] sm:$0xf]  ;;  %v18796_v34 = vld [vmem:[#allocation4 + $0x10c] sm:$0xf0] }
 0x16e   :  { %3097 = vmatpush.bf16.msrb.mxu3 %v13329_v54  ;;  %v14065_v54 = vor.u32 %v19030_v43, %v14062_v44  ;;  %v2661_v2 = vpop.f32.mrf.mxu0  ;;  %v13924_v44 = vld [vmem:[#allocation4 + $0x748] sm:$0xf]  ;;  %v14209_v32 = vor.u32 %v19066_v17, %v14206_v18  ;;  %v18814_v35 = vld [vmem:[#allocation4 + $0x1a4] sm:$0xf]  ;;  %v13198_v37 = vld [vmem:[#allocation4 + $0x230] sm:$0xf0] }
 0x16f   :  { %3048 = vmatmul.bf16.vlgmr.msrb.gmra.mxu2 %v20826_v36  ;;  %3073 = vmatpush.bf16.msra.mxu0 %v13037_v8  ;;  %v13780_v2 = vld [vmem:[#allocation4 + $0x628] sm:$0xf] }
 0x170   :  { %3112 = vmatpush.bf16.msra.mxu2 %v14193_v61  ;;  %v18976_v61 = vld [vmem:[#allocation4 + $0x6ac] sm:$0xf0] }
 0x171   :  { %3122 = vmatpush.bf16.msra.mxu1 %v13477_v20  ;;  %v13773_v8 = vor.u32 %v18976_v61, %v13772_v58  ;;  %v18868_v58 = vld [vmem:[#allocation4 + $0x34c] sm:$0xf0]  ;;  %v18886_v61 = vld [vmem:[#allocation4 + $0x3e4] sm:$0xf] }
 0x172   :  { %3098 = vmatpush.bf16.msrb.mxu3 %v13185_v9  ;;  %3074 = vmatmul.bf16.vlgmr.msra.gmra.mxu0 %v20826_v36  ;;  %v13921_v9 = vor.u32 %v18994_v33, %v13918_v59  ;;  %v2685_v19 = vpop.f32.mrf.mxu3  ;;  %v13486_v33 = vld [vmem:[#allocation4 + $0x470] sm:$0xf0] }
 0x173   :  { %3138 = vmatpush.bf16.msrb.mxu0 %v14197_v14  ;;  %v2635_v14 = vpop.f32.mrf.mxu2  ;;  %v2711_v40 = vpop.f32.mrf.mxu1  ;;  %v13489_v5 = vor.u32 %v18886_v61, %v13486_v33  ;;  %v18778_v61 = vld [vmem:[#allocation4 + $0x84] sm:$0xf]  ;;  %v13054_v33 = vld [vmem:[#allocation4 + $0x110] sm:$0xf0] }
 0x174   :  { %3144 = vmatpush.bf16.msrb.mxu2 %v14057_v16  ;;  %v18795_v16 = vld [vmem:[#allocation4 + $0x104] sm:$0xf0] }
 0x175   :  { %3123 = vmatpush.bf16.msra.mxu1 %v13333_v46  ;;  %v13045_v20 = vor.u32 %v18795_v16, %v13044_v1  ;;  %v19013_v46 = vld [vmem:[#allocation4 + $0x7d4] sm:$0xf0]  ;;  %v13341_v16 = vor.u32 %v18868_v58, %v13340_v55  ;;  %v13926_v55 = vld [vmem:[#allocation4 + $0x7d8] sm:$0xf0] }
 0x176   :  { %3099 = vmatpush.bf16.msrb.mxu3 %v13041_v30  ;;  %v18849_v30 = vld [vmem:[#allocation4 + $0x2bc] sm:$0xf]  ;;  %v2724_v42 = vpop.f32.mrf.mxu0 }
 0x177   :  { %3170 = vmatpush.bf16.msra.mxu0 %v14061_v31  ;;  %v13334_v31 = vld [vmem:[#allocation4 + $0x348] sm:$0xf0] }
 0x178   :  { %3145 = vmatpush.bf16.msrb.mxu2 %v13913_v25  ;;  %v19049_v25 = vld [vmem:[#allocation4 + $0x8f4] sm:$0xf0]  ;;  %v13337_v43 = vor.u32 %v18849_v30, %v13334_v31  ;;  %v14070_v30 = vld [vmem:[#allocation4 + $0x8f8] sm:$0xf0] }
 0x179   :  { %3100 = vmatmul.bf16.vlgmr.msrb.gmra.mxu3 %v20826_v36  ;;  %3124 = vmatpush.bf16.msra.mxu1 %v13189_v0  ;;  %v13925_v0 = vor.u32 %v19013_v46, %v13924_v44  ;;  %v13492_v46 = vld [vmem:[#allocation4 + $0x3e8] sm:$0xf] }
 0x17a   :  { %3164 = vmatpush.bf16.msra.mxu3 %v14201_v41  ;;  %v14069_v41 = vor.u32 %v19049_v25, %v14068_v23  ;;  %v2687_v59 = vpop.f32.mrf.mxu3  ;;  %v13345_v25 = vor.u32 %v18850_v11, %v13342_v13  ;;  %v18959_v11 = vld [vmem:[#allocation4 + $0x62c] sm:$0xf]  ;;  %v13782_v13 = vld [vmem:[#allocation4 + $0x6b8] sm:$0xf0] }
 0x17b   :  { %3171 = vmatpush.bf16.msra.mxu0 %v13917_v52  ;;  %v18813_v52 = vld [vmem:[#allocation4 + $0x19c] sm:$0xf]  ;;  %v2698_v57 = vpop.f32.mrf.mxu2  ;;  %v2713_v14 = vpop.f32.mrf.mxu1  ;;  %v19116_v59 = vld [vmem:[#allocation6 + $0xec] sm:$0xf0] }
 0x17c   :  { %3146 = vmatpush.bf16.msrb.mxu2 %v13769_v47  ;;  %v20952_v47 = vadd.f32 %v2724_v42, %v2711_v40  ;;  %v20955_v63 = vadd.f32 %v2698_v57, %v2685_v19  ;;  %v14212_v42 = vld [vmem:[#allocation4 + $0x988] sm:$0xf]  ;;  %v14368_v57 = vld [vmem:[#allocation6 + $0xe0] sm:$0xf] }
 0x17d   :  { %3125 = vmatpush.bf16.msra.mxu1 %v13045_v20  ;;  %v14352_v14 = vld [vmem:[#allocation6 + $0xc0] sm:$0xf] }
 0x17e   :  { %3196 = vmatpush.bf16.msrb.mxu3 %v14065_v54  ;;  %v13190_v54 = vld [vmem:[#allocation4 + $0x228] sm:$0xf0]  ;;  %v2726_v19 = vpop.f32.mrf.mxu0 }
 0x17f   :  { %3172 = vmatpush.bf16.msra.mxu0 %v13773_v8  ;;  %14247 = vmatmul.msk.bf16.vlgmr.msra.gmra.mxu2 %vm360_vm0, %v20800_v24  ;;  %v13193_v1 = vor.u32 %v18813_v52, %v13190_v54  ;;  %v13046_v8 = vld [vmem:[#allocation4 + $0x108] sm:$0xf0]  ;;  %v13201_v52 = vor.u32 %v18814_v35, %v13198_v37  ;;  %v19112_v19 = vld [vmem:[#allocation6 + $0xcc] sm:$0xf0]  ;;  %v13638_v35 = vld [vmem:[#allocation4 + $0x598] sm:$0xf0] }
 0x180   :  { %3147 = vmatpush.bf16.msrb.mxu2 %v13625_v4  ;;  %3126 = vmatmul.bf16.vlgmr.msra.gmra.mxu1 %v20826_v36  ;;  %v18977_v4 = vld [vmem:[#allocation4 + $0x6b4] sm:$0xf0]  ;;  %v13049_v20 = vor.u32 %v18777_v6, %v13046_v8  ;;  %v18995_v54 = vld [vmem:[#allocation4 + $0x74c] sm:$0xf]  ;;  %v14336_v37 = vld [vmem:[#allocation6 + $0xa0] sm:$0xf] }
 0x181   :  { %3190 = vmatpush.bf16.msrb.mxu1 %v14205_v22  ;;  %v13781_v15 = vor.u32 %v18977_v4, %v13780_v2  ;;  %v18941_v22 = vld [vmem:[#allocation4 + $0x594] sm:$0xf0]  ;;  %v19067_v2 = vld [vmem:[#allocation4 + $0x98c] sm:$0xf]  ;;  %v14214_v4 = vld [vmem:[#allocation4 + $0xa18] sm:$0xf0] }
 0x182   :  { %3197 = vmatpush.bf16.msrb.mxu3 %v13921_v9  ;;  %14248 = vmatmul.msk.bf16.vlgmr.msrb.gmra.mxu0 %vm360_vm0, %v20800_v24  ;;  %v13196_v9 = vld [vmem:[#allocation4 + $0x1a0] sm:$0xf]  ;;  %v2750_v40 = vpop.f32.mrf.mxu3  ;;  %v18869_v6 = vld [vmem:[#allocation4 + $0x354] sm:$0xf0]  ;;  %v14217_v18 = vor.u32 %v19067_v2, %v14214_v4  ;;  %v19106_v2 = vld [vmem:[#allocation6 + $0xa4] sm:$0xf] }
 0x183   :  { %3173 = vmatpush.bf16.msra.mxu0 %v13629_v26  ;;  %v13197_v23 = vor.u32 %v18832_v10, %v13196_v9  ;;  %v13052_v26 = vld [vmem:[#allocation4 + $0x80] sm:$0xf]  ;;  %v2700_v31 = vpop.f32.mrf.mxu2  ;;  %v13057_v9 = vor.u32 %v18778_v61, %v13054_v33  ;;  %v14369_v10 = vor.u32 %v19116_v59, %v14368_v57  ;;  %v13494_v61 = vld [vmem:[#allocation4 + $0x478] sm:$0xf0]  ;;  %v19120_v59 = vld [vmem:[#allocation6 + $0x10c] sm:$0xf0] }
 0x184   :  { %3148 = vmatpush.bf16.msrb.mxu2 %v13481_v21  ;;  %v13636_v21 = vld [vmem:[#allocation4 + $0x508] sm:$0xf]  ;;  %v14353_v31 = vor.u32 %v19112_v19, %v14352_v14  ;;  %v14384_v33 = vld [vmem:[#allocation6 + $0x100] sm:$0xf]  ;;  %v14338_v4 = vld [vmem:[#allocation6 + $0xb0] sm:$0xf0] }
 0x185   :  { %3222 = vmatpush.bf16.msra.mxu1 %v14069_v41  ;;  %v13637_v41 = vor.u32 %v18941_v22, %v13636_v21  ;;  %v14370_v21 = vld [vmem:[#allocation6 + $0xf0] sm:$0xf0]  ;;  %v18851_v14 = vld [vmem:[#allocation4 + $0x2cc] sm:$0xf]  ;;  %v19100_v19 = vld [vmem:[#allocation6 + $0x6c] sm:$0xf0] }
 0x186   :  { %3198 = vmatpush.bf16.msrb.mxu3 %v13777_v27  ;;  %v19031_v27 = vld [vmem:[#allocation4 + $0x86c] sm:$0xf]  ;;  %v2763_v8 = vpop.f32.mrf.mxu0 }
 0x187   :  { %3174 = vmatpush.bf16.msra.mxu0 %v13485_v50  ;;  %v14073_v44 = vor.u32 %v19031_v27, %v14070_v30  ;;  %v18905_v50 = vld [vmem:[#allocation4 + $0x474] sm:$0xf0]  ;;  %v13204_v27 = vld [vmem:[#allocation4 + $0x1a8] sm:$0xf] }
 0x188   :  { %3149 = vmatpush.bf16.msrb.mxu2 %v13337_v43  ;;  %v19085_v43 = vld [vmem:[#allocation4 + $0xa14] sm:$0xf0] }
 0x189   :  { %3223 = vmatpush.bf16.msra.mxu1 %v13925_v0  ;;  %14249 = vmatmul.msk.bf16.vlgmr.msra.gmra.mxu3 %vm360_vm0, %v20800_v24  ;;  %v14213_v58 = vor.u32 %v19085_v43, %v14212_v42  ;;  %v2776_v0 = vpop.f32.mrf.mxu1  ;;  %v18833_v30 = vld [vmem:[#allocation4 + $0x234] sm:$0xf0]  ;;  %v14354_v42 = vld [vmem:[#allocation6 + $0xd0] sm:$0xf0] }
 0x18a   :  { %3199 = vmatpush.bf16.msrb.mxu3 %v13633_v51  ;;  %v13053_v51 = vor.u32 %v18796_v34, %v13052_v26  ;;  %v13785_v26 = vor.u32 %v18959_v11, %v13782_v13  ;;  %v18923_v34 = vld [vmem:[#allocation4 + $0x50c] sm:$0xf]  ;;  %v14341_v13 = vor.u32 %v19106_v2, %v14338_v4  ;;  %v19094_v2 = vld [vmem:[#allocation6 + $0x44] sm:$0xf]  ;;  %v14290_v4 = vld [vmem:[#allocation6 + $0x50] sm:$0xf0] }
 0x18b   :  { %3175 = vmatpush.bf16.msra.mxu0 %v13341_v16  ;;  %v13929_v16 = vor.u32 %v18995_v54, %v13926_v55  ;;  %v2737_v17 = vpop.f32.mrf.mxu2  ;;  %v14320_v54 = vld [vmem:[#allocation6 + $0x80] sm:$0xf] }
 0x18c   :  { %3150 = vmatpush.bf16.msrb.mxu2 %v13193_v1  ;;  %v13493_v1 = vor.u32 %v18905_v50, %v13492_v46  ;;  %v20966_v22 = vadd.f32 %v2750_v40, %v2737_v17  ;;  %v19110_v40 = vld [vmem:[#allocation6 + $0xc4] sm:$0xf]  ;;  %v13060_v46 = vld [vmem:[#allocation4 + $0x88] sm:$0xf]  ;;  %v13641_v50 = vor.u32 %v18923_v34, %v13638_v35  ;;  %v13350_v17 = vld [vmem:[#allocation4 + $0x358] sm:$0xf0] }
 0x18d   :  { %3224 = vmatpush.bf16.msra.mxu1 %v13781_v15  ;;  %v20962_v15 = vadd.f32 %v2776_v0, %v2763_v8  ;;  %v14385_v8 = vor.u32 %v19120_v59, %v14384_v33  ;;  %v18815_v35 = vld [vmem:[#allocation4 + $0x1ac] sm:$0xf]  ;;  %v13062_v59 = vld [vmem:[#allocation4 + $0x118] sm:$0xf0] }
 0x18e   :  { %3200 = vmatpush.bf16.msrb.mxu3 %v13489_v5  ;;  %v13348_v5 = vld [vmem:[#allocation4 + $0x2c8] sm:$0xf]  ;;  %v2765_v55 = vpop.f32.mrf.mxu0  ;;  %v18779_v33 = vld [vmem:[#allocation4 + $0x8c] sm:$0xf] }
 0x18f   :  { %3176 = vmatpush.bf16.msra.mxu0 %v13197_v23  ;;  %v2752_v23 = vpop.f32.mrf.mxu3  ;;  %v14344_v55 = vld [vmem:[#allocation6 + $0xa8] sm:$0xf] }
 0x190   :  { %3151 = vmatpush.bf16.msrb.mxu2 %v13049_v20  ;;  %14250 = vmatmul.msk.bf16.vlgmr.msrb.gmra.mxu1 %vm360_vm0, %v20800_v24  ;;  %v19114_v20 = vld [vmem:[#allocation6 + $0xe4] sm:$0xf] }
 0x191   :  { %3225 = vmatpush.bf16.msra.mxu1 %v13637_v41  ;;  %v19108_v41 = vld [vmem:[#allocation6 + $0xac] sm:$0xf0]  ;;  %v2778_v43 = vpop.f32.mrf.mxu1 }
 0x192   :  { %3201 = vmatpush.bf16.msrb.mxu3 %v13345_v25  ;;  %v13349_v25 = vor.u32 %v18869_v6, %v13348_v5  ;;  %v14337_v57 = vor.u32 %v19108_v41, %v14336_v37  ;;  %v13206_v37 = vld [vmem:[#allocation4 + $0x238] sm:$0xf0]  ;;  %v14288_v41 = vld [vmem:[#allocation6 + $0x40] sm:$0xf]  ;;  %v19096_v43 = vld [vmem:[#allocation6 + $0x4c] sm:$0xf0] }
 0x193   :  { %3152 = vmatmul.bf16.vlgmr.msrb.gmra.mxu2 %v20826_v36  ;;  %3177 = vmatpush.bf16.msra.mxu0 %v13053_v51  ;;  %v18797_v51 = vld [vmem:[#allocation4 + $0x114] sm:$0xf0]  ;;  %v2739_v0 = vpop.f32.mrf.mxu2 }
 0x194   :  { %3216 = vmatpush.bf16.msra.mxu2 %v14209_v32  ;;  %v14373_v32 = vor.u32 %v19114_v20, %v14370_v21  ;;  %v13061_v5 = vor.u32 %v18797_v51, %v13060_v46  ;;  %v19102_v20 = vld [vmem:[#allocation6 + $0x84] sm:$0xf]  ;;  %v14322_v21 = vld [vmem:[#allocation6 + $0x90] sm:$0xf0]  ;;  %v14272_v0 = vld [vmem:[#allocation6 + $0x20] sm:$0xf] }
 0x195   :  { %3226 = vmatpush.bf16.msra.mxu1 %v13493_v1  ;;  %v19104_v1 = vld [vmem:[#allocation6 + $0x8c] sm:$0xf0]  ;;  %v14325_v34 = vor.u32 %v19102_v20, %v14322_v21  ;;  %v14306_v46 = vld [vmem:[#allocation6 + $0x70] sm:$0xf0]  ;;  %v14378_v20 = vld [vmem:[#allocation6 + $0xf8] sm:$0xf0] }
 0x196   :  { %3202 = vmatpush.bf16.msrb.mxu3 %v13201_v52  ;;  %3178 = vmatmul.bf16.vlgmr.msra.gmra.mxu0 %v20826_v36  ;;  %v18887_v52 = vld [vmem:[#allocation4 + $0x3ec] sm:$0xf]  ;;  %v14321_v11 = vor.u32 %v19104_v1, %v14320_v54  ;;  %v13209_v54 = vor.u32 %v18815_v35, %v13206_v37  ;;  %v19092_v1 = vld [vmem:[#allocation6 + $0x2c] sm:$0xf0]  ;;  %v14312_v37 = vld [vmem:[#allocation6 + $0x68] sm:$0xf] }
 0x197   :  { %3242 = vmatpush.bf16.msrb.mxu0 %v14213_v58  ;;  %v14357_v58 = vor.u32 %v19110_v40, %v14354_v42  ;;  %v13497_v6 = vor.u32 %v18887_v52, %v13494_v61 }
 0x198   :  { %3248 = vmatpush.bf16.msrb.mxu2 %v14073_v44  ;;  %v13205_v44 = vor.u32 %v18833_v30, %v13204_v27  ;;  %v14360_v27 = vld [vmem:[#allocation6 + $0xc8] sm:$0xf]  ;;  %v19113_v30 = vld [vmem:[#allocation6 + $0xd4] sm:$0xf0] }
 0x199   :  { %3227 = vmatpush.bf16.msra.mxu1 %v13349_v25  ;;  %v2815_v23 = vpop.f32.mrf.mxu1  ;;  %v14361_v52 = vor.u32 %v19113_v30, %v14360_v27  ;;  %v14274_v27 = vld [vmem:[#allocation6 + $0x30] sm:$0xf0] }
 0x19a   :  { %3203 = vmatpush.bf16.msrb.mxu3 %v13057_v9  ;;  %v14376_v9 = vld [vmem:[#allocation6 + $0xe8] sm:$0xf] }
 0x19b   :  { %3490 = vmatpush.bf16.msra.mxu0 %v14369_v10  ;;  %v19117_v10 = vld [vmem:[#allocation6 + $0xf4] sm:$0xf0]  ;;  %v2802_v42 = vpop.f32.mrf.mxu2 }
 0x19c   :  { %3249 = vmatpush.bf16.msrb.mxu2 %v13929_v16  ;;  %v2789_v16 = vpop.f32.mrf.mxu3  ;;  %v14377_v25 = vor.u32 %v19117_v10, %v14376_v9  ;;  %v13065_v9 = vor.u32 %v18779_v33, %v13062_v59  ;;  %v14328_v10 = vld [vmem:[#allocation6 + $0x88] sm:$0xf]  ;;  %v19119_v33 = vld [vmem:[#allocation6 + $0x10c] sm:$0xf]  ;;  %v14394_v59 = vld [vmem:[#allocation6 + $0x118] sm:$0xf0] }
 0x19d   :  { %3204 = vmatmul.bf16.vlgmr.msrb.gmra.mxu3 %v20826_v36  ;;  %3228 = vmatpush.bf16.msra.mxu1 %v13205_v44  ;;  %v19098_v44 = vld [vmem:[#allocation6 + $0x64] sm:$0xf]  ;;  %v20975_v51 = vadd.f32 %v2802_v42, %v2789_v16 }
 0x19e   :  { %3268 = vmatpush.bf16.msra.mxu3 %v14217_v18  ;;  %v14304_v18 = vld [vmem:[#allocation6 + $0x60] sm:$0xf]  ;;  %v14309_v61 = vor.u32 %v19098_v44, %v14306_v46  ;;  %v19111_v44 = vld [vmem:[#allocation6 + $0xcc] sm:$0xf]  ;;  %v14362_v46 = vld [vmem:[#allocation6 + $0xd8] sm:$0xf0] }
 0x19f   :  { %3491 = vmatpush.bf16.msra.mxu0 %v14353_v31  ;;  %v2828_v31 = vpop.f32.mrf.mxu0 }
 0x1a0   :  { %3250 = vmatpush.bf16.msrb.mxu2 %v13785_v26  ;;  %v13353_v26 = vor.u32 %v18851_v14, %v13350_v17  ;;  %v20972_v40 = vadd.f32 %v2828_v31, %v2815_v23  ;;  %v14273_v14 = vor.u32 %v19092_v1, %v14272_v0  ;;  %v14293_v17 = vor.u32 %v19094_v2, %v14290_v4  ;;  %v14296_v1 = vld [vmem:[#allocation6 + $0x48] sm:$0xf]  ;;  %v19097_v2 = vld [vmem:[#allocation6 + $0x54] sm:$0xf0] }
 0x1a1   :  { %3229 = vmatpush.bf16.msra.mxu1 %v13061_v5  ;;  %v2817_v16 = vpop.f32.mrf.mxu1  ;;  %v14365_v0 = vor.u32 %v19111_v44, %v14362_v46  ;;  %v14264_v44 = vld [vmem:[#allocation6 + $0x8] sm:$0xf] }
 0x1a2   :  { %3516 = vmatpush.bf16.msrb.mxu3 %v14373_v32  ;;  %v14305_v32 = vor.u32 %v19100_v19, %v14304_v18  ;;  %v14256_v18 = vld [vmem:[#allocation6] sm:$0xf]  ;;  %v19115_v19 = vld [vmem:[#allocation6 + $0xec] sm:$0xf] }
 0x1a3   :  { %3492 = vmatpush.bf16.msra.mxu0 %v14337_v57  ;;  %14251 = vmatmul.msk.bf16.vlgmr.msra.gmra.mxu2 %vm360_vm0, %v20800_v24  ;;  %v19109_v57 = vld [vmem:[#allocation6 + $0xb4] sm:$0xf0]  ;;  %v2804_v21 = vpop.f32.mrf.mxu2  ;;  %v14381_v35 = vor.u32 %v19115_v19, %v14378_v20 }
 0x1a4   :  { %3251 = vmatpush.bf16.msrb.mxu2 %v13641_v50  ;;  %3230 = vmatmul.bf16.vlgmr.msra.gmra.mxu1 %v20826_v36  ;;  %v2791_v50 = vpop.f32.mrf.mxu3  ;;  %v14345_v5 = vor.u32 %v19109_v57, %v14344_v55  ;;  %v14258_v55 = vld [vmem:[#allocation6 + $0x10] sm:$0xf0]  ;;  %v19152_v57 = vld [vmem:[#allocation6 + $0x20c] sm:$0xf0]  ;;  %v14297_v21 = vor.u32 %v19097_v2, %v14296_v1  ;;  %v19142_v2 = vld [vmem:[#allocation6 + $0x1c4] sm:$0xf] }
 0x1a5   :  { %3510 = vmatpush.bf16.msrb.mxu1 %v14385_v8  ;;  %v14386_v8 = vld [vmem:[#allocation6 + $0x110] sm:$0xf0]  ;;  %v14516_v50 = vld [vmem:[#allocation6 + $0x200] sm:$0xf]  ;;  %v19140_v1 = vld [vmem:[#allocation6 + $0x1ac] sm:$0xf0] }
 0x1a6   :  { %3517 = vmatpush.bf16.msrb.mxu3 %v14357_v58  ;;  %14252 = vmatmul.msk.bf16.vlgmr.msrb.gmra.mxu0 %vm360_vm0, %v20800_v24  ;;  %v14289_v58 = vor.u32 %v19096_v43, %v14288_v41  ;;  %v19101_v41 = vld [vmem:[#allocation6 + $0x74] sm:$0xf0] }
 0x1a7   :  { %3493 = vmatpush.bf16.msra.mxu0 %v14321_v11  ;;  %v19105_v11 = vld [vmem:[#allocation6 + $0x94] sm:$0xf0] }
 0x1a8   :  { %3252 = vmatpush.bf16.msrb.mxu2 %v13497_v6  ;;  %v19118_v6 = vld [vmem:[#allocation6 + $0x104] sm:$0xf]  ;;  %v14329_v31 = vor.u32 %v19105_v11, %v14328_v10 }
 0x1a9   :  { %3542 = vmatpush.bf16.msra.mxu1 %v14377_v25  ;;  %v14389_v23 = vor.u32 %v19118_v6, %v14386_v8  ;;  %v19088_v25 = vld [vmem:[#allocation6 + $0xc] sm:$0xf0]  ;;  %v19107_v6 = vld [vmem:[#allocation6 + $0xac] sm:$0xf]  ;;  %v14346_v8 = vld [vmem:[#allocation6 + $0xb8] sm:$0xf0] }
 0x1aa   :  { %3518 = vmatpush.bf16.msrb.mxu3 %v14341_v13  ;;  %v2830_v13 = vpop.f32.mrf.mxu0  ;;  %v14257_v42 = vor.u32 %v19088_v25, %v14256_v18  ;;  %v14518_v18 = vld [vmem:[#allocation6 + $0x210] sm:$0xf0]  ;;  %v14280_v25 = vld [vmem:[#allocation6 + $0x28] sm:$0xf] }
 0x1ab   :  { %3494 = vmatpush.bf16.msra.mxu0 %v14305_v32  ;;  %v14392_v32 = vld [vmem:[#allocation6 + $0x108] sm:$0xf]  ;;  %v2841_v11 = vpop.f32.mrf.mxu2  ;;  %v14397_v13 = vor.u32 %v19119_v33, %v14394_v59  ;;  %v14532_v33 = vld [vmem:[#allocation6 + $0x220] sm:$0xf]  ;;  %v19156_v59 = vld [vmem:[#allocation6 + $0x22c] sm:$0xf0] }
 0x1ac   :  { %3253 = vmatpush.bf16.msrb.mxu2 %v13353_v26  ;;  %v19090_v26 = vld [vmem:[#allocation6 + $0x24] sm:$0xf]  ;;  %v2854_v30 = vpop.f32.mrf.mxu3 }
 0x1ad   :  { %3543 = vmatpush.bf16.msra.mxu1 %v14361_v52  ;;  %14253 = vmatmul.msk.bf16.vlgmr.msra.gmra.mxu3 %vm360_vm0, %v20800_v24  ;;  %v14277_v43 = vor.u32 %v19090_v26, %v14274_v27  ;;  %v20986_v19 = vadd.f32 %v2854_v30, %v2841_v11  ;;  %v19093_v26 = vld [vmem:[#allocation6 + $0x34] sm:$0xf0]  ;;  %v19146_v30 = vld [vmem:[#allocation6 + $0x1e4] sm:$0xf] }
 0x1ae   :  { %3519 = vmatpush.bf16.msrb.mxu3 %v14325_v34  ;;  %v19121_v34 = vld [vmem:[#allocation6 + $0x114] sm:$0xf0] }
 0x1af   :  { %3495 = vmatpush.bf16.msra.mxu0 %v14289_v58  ;;  %v14393_v52 = vor.u32 %v19121_v34, %v14392_v32  ;;  %v2880_v58 = vpop.f32.mrf.mxu1  ;;  %v19103_v32 = vld [vmem:[#allocation6 + $0x8c] sm:$0xf]  ;;  %v14330_v34 = vld [vmem:[#allocation6 + $0x98] sm:$0xf0]  ;;  %v19153_v11 = vld [vmem:[#allocation6 + $0x214] sm:$0xf0] }
 0x1b0   :  { %3254 = vmatpush.bf16.msrb.mxu2 %v13209_v54  ;;  %v19086_v54 = vld [vmem:[#allocation6 + $0x4] sm:$0xf]  ;;  %v14333_v46 = vor.u32 %v19103_v32, %v14330_v34  ;;  %v14508_v32 = vld [vmem:[#allocation6 + $0x1e8] sm:$0xf]  ;;  %v19149_v34 = vld [vmem:[#allocation6 + $0x1f4] sm:$0xf0] }
 0x1b1   :  { %3544 = vmatpush.bf16.msra.mxu1 %v14345_v5  ;;  %v14261_v16 = vor.u32 %v19086_v54, %v14258_v55  ;;  %v14517_v5 = vor.u32 %v19152_v57, %v14516_v50  ;;  %v19089_v50 = vld [vmem:[#allocation6 + $0x14] sm:$0xf0]  ;;  %v14468_v54 = vld [vmem:[#allocation6 + $0x1a0] sm:$0xf] }
 0x1b2   :  { %3520 = vmatpush.bf16.msrb.mxu3 %v14309_v61  ;;  %v14313_v61 = vor.u32 %v19101_v41, %v14312_v37  ;;  %v2867_v4 = vpop.f32.mrf.mxu0  ;;  %v19144_v37 = vld [vmem:[#allocation6 + $0x1cc] sm:$0xf0]  ;;  %v14502_v41 = vld [vmem:[#allocation6 + $0x1f0] sm:$0xf0] }
 0x1b3   :  { %3496 = vmatpush.bf16.msra.mxu0 %v14273_v14  ;;  %v20982_v10 = vadd.f32 %v2880_v58, %v2867_v4  ;;  %v19148_v14 = vld [vmem:[#allocation6 + $0x1ec] sm:$0xf0]  ;;  %v14505_v58 = vor.u32 %v19146_v30, %v14502_v41  ;;  %v14486_v4 = vld [vmem:[#allocation6 + $0x1d0] sm:$0xf0]  ;;  %v19091_v41 = vld [vmem:[#allocation6 + $0x2c] sm:$0xf] }
 0x1b4   :  { %3255 = vmatpush.bf16.msrb.mxu2 %v13065_v9  ;;  %v14500_v9 = vld [vmem:[#allocation6 + $0x1e0] sm:$0xf]  ;;  %14398 = vmatmul.msk.bf16.vlgmr.msrb.gmra.mxu1 %vm360_vm0, %v20800_v24  ;;  %v2856_v20 = vpop.f32.mrf.mxu3 }
 0x1b5   :  { %3545 = vmatpush.bf16.msra.mxu1 %v14329_v31  ;;  %v14501_v27 = vor.u32 %v19148_v14, %v14500_v9  ;;  %v14524_v9 = vld [vmem:[#allocation6 + $0x208] sm:$0xf]  ;;  %v14489_v14 = vor.u32 %v19142_v2, %v14486_v4  ;;  %v14452_v20 = vld [vmem:[#allocation6 + $0x180] sm:$0xf]  ;;  %v19087_v2 = vld [vmem:[#allocation6 + $0xc] sm:$0xf] }
 0x1b6   :  { %3521 = vmatpush.bf16.msrb.mxu3 %v14293_v17  ;;  %v19150_v17 = vld [vmem:[#allocation6 + $0x204] sm:$0xf]  ;;  %v14266_v4 = vld [vmem:[#allocation6 + $0x18] sm:$0xf0] }
 0x1b7   :  { %3256 = vmatmul.bf16.vlgmr.msrb.gmra.mxu2 %v20826_v36  ;;  %3497 = vmatpush.bf16.msra.mxu0 %v14257_v42  ;;  %v14521_v31 = vor.u32 %v19150_v17, %v14518_v18  ;;  %v2882_v42 = vpop.f32.mrf.mxu1  ;;  %v19095_v17 = vld [vmem:[#allocation6 + $0x4c] sm:$0xf]  ;;  %v14298_v18 = vld [vmem:[#allocation6 + $0x58] sm:$0xf0] }
 0x1b8   :  { %3536 = vmatpush.bf16.msra.mxu2 %v14389_v23  ;;  %v14349_v23 = vor.u32 %v19107_v6, %v14346_v8  ;;  %v14533_v8 = vor.u32 %v19156_v59, %v14532_v33  ;;  %v14282_v42 = vld [vmem:[#allocation6 + $0x38] sm:$0xf0]  ;;  %v14492_v33 = vld [vmem:[#allocation6 + $0x1c8] sm:$0xf]  ;;  %v19145_v59 = vld [vmem:[#allocation6 + $0x1d4] sm:$0xf0] }
 0x1b9   :  { %3546 = vmatpush.bf16.msra.mxu1 %v14313_v61  ;;  %v14314_v61 = vld [vmem:[#allocation6 + $0x78] sm:$0xf0] }
 0x1ba   :  { %3522 = vmatpush.bf16.msrb.mxu3 %v14277_v43  ;;  %3498 = vmatmul.bf16.vlgmr.msra.gmra.mxu0 %v20826_v36  ;;  %v14281_v43 = vor.u32 %v19093_v26, %v14280_v25  ;;  %v2869_v55 = vpop.f32.mrf.mxu0  ;;  %v14470_v25 = vld [vmem:[#allocation6 + $0x1b0] sm:$0xf0] }
 0x1bb   :  { %3562 = vmatpush.bf16.msrb.mxu0 %v14393_v52  ;;  %v19099_v52 = vld [vmem:[#allocation6 + $0x6c] sm:$0xf] }
 0x1bc   :  { %3568 = vmatpush.bf16.msrb.mxu2 %v14381_v35  ;;  %v14484_v35 = vld [vmem:[#allocation6 + $0x1c0] sm:$0xf]  ;;  %v14317_v6 = vor.u32 %v19099_v52, %v14314_v61  ;;  %v19134_v52 = vld [vmem:[#allocation6 + $0x184] sm:$0xf]  ;;  %v14285_v61 = vor.u32 %v19091_v41, %v14282_v42 }
 0x1bd   :  { %3547 = vmatpush.bf16.msra.mxu1 %v14297_v21  ;;  %v14485_v57 = vor.u32 %v19144_v37, %v14484_v35  ;;  %v19136_v21 = vld [vmem:[#allocation6 + $0x18c] sm:$0xf0] }
 0x1be   :  { %3523 = vmatpush.bf16.msrb.mxu3 %v14261_v16  ;;  %v2893_v16 = vpop.f32.mrf.mxu3  ;;  %v14453_v37 = vor.u32 %v19136_v21, %v14452_v20  ;;  %v19141_v20 = vld [vmem:[#allocation6 + $0x1b4] sm:$0xf0] }
 0x1bf   :  { %3815 = vmatpush.bf16.msra.mxu0 %v14517_v5  ;;  %v14265_v5 = vor.u32 %v19089_v50, %v14264_v44  ;;  %v2919_v26 = vpop.f32.mrf.mxu1  ;;  %v19132_v50 = vld [vmem:[#allocation6 + $0x16c] sm:$0xf0] }
 0x1c0   :  { %3569 = vmatpush.bf16.msrb.mxu2 %v14365_v0  ;;  %v2843_v0 = vpop.f32.mrf.mxu2 }
 0x1c1   :  { %3524 = vmatmul.bf16.vlgmr.msrb.gmra.mxu3 %v20826_v36  ;;  %3548 = vmatpush.bf16.msra.mxu1 %v14281_v43  ;;  %v14436_v43 = vld [vmem:[#allocation6 + $0x160] sm:$0xf] }
 0x1c2   :  { %3588 = vmatpush.bf16.msra.mxu3 %v14397_v13  ;;  %v14469_v13 = vor.u32 %v19140_v1, %v14468_v54  ;;  %v2932_v35 = vpop.f32.mrf.mxu0  ;;  %v14454_v54 = vld [vmem:[#allocation6 + $0x190] sm:$0xf0]  ;;  %v14437_v0 = vor.u32 %v19132_v50, %v14436_v43  ;;  %v14540_v43 = vld [vmem:[#allocation6 + $0x228] sm:$0xf] }
 0x1c3   :  { %3816 = vmatpush.bf16.msra.mxu0 %v14501_v27  ;;  %v14525_v27 = vor.u32 %v19153_v11, %v14524_v9  ;;  %v20992_v44 = vadd.f32 %v2932_v35, %v2919_v26  ;;  %v14457_v1 = vor.u32 %v19134_v52, %v14454_v54  ;;  %v14493_v11 = vor.u32 %v19145_v59, %v14492_v33  ;;  %v14404_v26 = vld [vmem:[#allocation6 + $0x120] sm:$0xf]  ;;  %v19124_v35 = vld [vmem:[#allocation6 + $0x12c] sm:$0xf0]  ;;  %v14460_v52 = vld [vmem:[#allocation6 + $0x188] sm:$0xf] }
 0x1c4   :  { %3570 = vmatpush.bf16.msrb.mxu2 %v14349_v23  ;;  %v19138_v23 = vld [vmem:[#allocation6 + $0x1a4] sm:$0xf]  ;;  %v19137_v54 = vld [vmem:[#allocation6 + $0x194] sm:$0xf0]  ;;  %v14510_v33 = vld [vmem:[#allocation6 + $0x1f8] sm:$0xf0] }
 0x1c5   :  { %3549 = vmatpush.bf16.msra.mxu1 %v14265_v5  ;;  %v14473_v30 = vor.u32 %v19138_v23, %v14470_v25  ;;  %v14420_v5 = vld [vmem:[#allocation6 + $0x140] sm:$0xf] }
 0x1c6   :  { %3841 = vmatpush.bf16.msrb.mxu3 %v14521_v31  ;;  %v14301_v31 = vor.u32 %v19095_v17, %v14298_v18  ;;  %v2895_v55 = vpop.f32.mrf.mxu3  ;;  %v14269_v17 = vor.u32 %v19087_v2, %v14266_v4  ;;  %v14476_v18 = vld [vmem:[#allocation6 + $0x1a8] sm:$0xf]  ;;  %v14664_v59 = vld [vmem:[#allocation6 + $0x320] sm:$0xf]  ;;  %v14406_v2 = vld [vmem:[#allocation6 + $0x130] sm:$0xf0] }
 0x1c7   :  { %3817 = vmatpush.bf16.msra.mxu0 %v14485_v57  ;;  %14399 = vmatmul.msk.bf16.vlgmr.msra.gmra.mxu2 %vm360_vm0, %v20800_v24  ;;  %v2921_v9 = vpop.f32.mrf.mxu1  ;;  %v14477_v42 = vor.u32 %v19141_v20, %v14476_v18  ;;  %v14405_v55 = vor.u32 %v19124_v35, %v14404_v26  ;;  %v19188_v4 = vld [vmem:[#allocation6 + $0x32c] sm:$0xf0]  ;;  %v19143_v20 = vld [vmem:[#allocation6 + $0x1cc] sm:$0xf] }
 0x1c8   :  { %3571 = vmatpush.bf16.msrb.mxu2 %v14333_v46  ;;  %v2906_v46 = vpop.f32.mrf.mxu2  ;;  %3550 = vmatmul.bf16.vlgmr.msra.gmra.mxu1 %v20826_v36  ;;  %v14665_v18 = vor.u32 %v19188_v4, %v14664_v59  ;;  %v19125_v4 = vld [vmem:[#allocation6 + $0x134] sm:$0xf0] }
 0x1c9   :  { %3835 = vmatpush.bf16.msrb.mxu1 %v14533_v8  ;;  %v20995_v57 = vadd.f32 %v2906_v46, %v2893_v16  ;;  %v19130_v8 = vld [vmem:[#allocation6 + $0x164] sm:$0xf]  ;;  %v14438_v16 = vld [vmem:[#allocation6 + $0x170] sm:$0xf0]  ;;  %v19157_v46 = vld [vmem:[#allocation6 + $0x234] sm:$0xf0] }
 0x1ca   :  { %3842 = vmatpush.bf16.msrb.mxu3 %v14505_v58  ;;  %v14509_v58 = vor.u32 %v19149_v34, %v14508_v32  ;;  %14400 = vmatmul.msk.bf16.vlgmr.msrb.gmra.mxu0 %vm360_vm0, %v20800_v24  ;;  %v2934_v21 = vpop.f32.mrf.mxu0  ;;  %v14441_v25 = vor.u32 %v19130_v8, %v14438_v16  ;;  %v19155_v8 = vld [vmem:[#allocation6 + $0x22c] sm:$0xf]  ;;  %v14542_v16 = vld [vmem:[#allocation6 + $0x238] sm:$0xf0] }
 0x1cb   :  { %3818 = vmatpush.bf16.msra.mxu0 %v14469_v13  ;;  %v19154_v13 = vld [vmem:[#allocation6 + $0x224] sm:$0xf]  ;;  %v14494_v21 = vld [vmem:[#allocation6 + $0x1d8] sm:$0xf0] }
 0x1cc   :  { %3572 = vmatpush.bf16.msrb.mxu2 %v14317_v6  ;;  %v19128_v6 = vld [vmem:[#allocation6 + $0x14c] sm:$0xf0] }
 0x1cd   :  { %3867 = vmatpush.bf16.msra.mxu1 %v14525_v27  ;;  %v14421_v23 = vor.u32 %v19128_v6, %v14420_v5  ;;  %v19151_v27 = vld [vmem:[#allocation6 + $0x20c] sm:$0xf]  ;;  %v14461_v6 = vor.u32 %v19137_v54, %v14460_v52 }
 0x1ce   :  { %3843 = vmatpush.bf16.msrb.mxu3 %v14489_v14  ;;  %v14534_v14 = vld [vmem:[#allocation6 + $0x230] sm:$0xf0]  ;;  %v2958_v41 = vpop.f32.mrf.mxu3  ;;  %v19139_v54 = vld [vmem:[#allocation6 + $0x1ac] sm:$0xf] }
 0x1cf   :  { %3819 = vmatpush.bf16.msra.mxu0 %v14453_v37  ;;  %v14537_v34 = vor.u32 %v19154_v13, %v14534_v14  ;;  %v19126_v37 = vld [vmem:[#allocation6 + $0x144] sm:$0xf]  ;;  %v2984_v5 = vpop.f32.mrf.mxu1  ;;  %v19133_v13 = vld [vmem:[#allocation6 + $0x174] sm:$0xf0] }
 0x1d0   :  { %3573 = vmatpush.bf16.msrb.mxu2 %v14301_v31  ;;  %v14526_v31 = vld [vmem:[#allocation6 + $0x218] sm:$0xf0]  ;;  %v2908_v32 = vpop.f32.mrf.mxu2 }
 0x1d1   :  { %3868 = vmatpush.bf16.msra.mxu1 %v14509_v58  ;;  %14401 = vmatmul.msk.bf16.vlgmr.msra.gmra.mxu3 %vm360_vm0, %v20800_v24  ;;  %v14529_v50 = vor.u32 %v19151_v27, %v14526_v31  ;;  %v14545_v27 = vor.u32 %v19155_v8, %v14542_v16  ;;  %v19184_v31 = vld [vmem:[#allocation6 + $0x30c] sm:$0xf0]  ;;  %v19186_v32 = vld [vmem:[#allocation6 + $0x324] sm:$0xf] }
 0x1d2   :  { %3844 = vmatpush.bf16.msrb.mxu3 %v14473_v30  ;;  %v14422_v30 = vld [vmem:[#allocation6 + $0x150] sm:$0xf0]  ;;  %v2971_v14 = vpop.f32.mrf.mxu0 }
 0x1d3   :  { %3820 = vmatpush.bf16.msra.mxu0 %v14437_v0  ;;  %v14425_v58 = vor.u32 %v19126_v37, %v14422_v30  ;;  %v14541_v0 = vor.u32 %v19157_v46, %v14540_v43  ;;  %v14428_v43 = vld [vmem:[#allocation6 + $0x148] sm:$0xf]  ;;  %v19129_v46 = vld [vmem:[#allocation6 + $0x154] sm:$0xf0] }
 0x1d4   :  { %3574 = vmatpush.bf16.msrb.mxu2 %v14285_v61  ;;  %v19147_v61 = vld [vmem:[#allocation6 + $0x1ec] sm:$0xf] }
 0x1d5   :  { %3869 = vmatpush.bf16.msra.mxu1 %v14493_v11  ;;  %v14513_v9 = vor.u32 %v19147_v61, %v14510_v33  ;;  %v14444_v11 = vld [vmem:[#allocation6 + $0x168] sm:$0xf]  ;;  %v19180_v61 = vld [vmem:[#allocation6 + $0x2ec] sm:$0xf0]  ;;  %v14650_v33 = vld [vmem:[#allocation6 + $0x310] sm:$0xf0] }
 0x1d6   :  { %3845 = vmatpush.bf16.msrb.mxu3 %v14457_v1  ;;  %v19122_v1 = vld [vmem:[#allocation6 + $0x124] sm:$0xf]  ;;  %v2960_v37 = vpop.f32.mrf.mxu3  ;;  %v14445_v30 = vor.u32 %v19133_v13, %v14444_v11  ;;  %v14462_v11 = vld [vmem:[#allocation6 + $0x198] sm:$0xf0]  ;;  %v14680_v13 = vld [vmem:[#allocation6 + $0x340] sm:$0xf] }
 0x1d7   :  { %3821 = vmatpush.bf16.msra.mxu0 %v14421_v23  ;;  %v14648_v23 = vld [vmem:[#allocation6 + $0x300] sm:$0xf]  ;;  %v2986_v59 = vpop.f32.mrf.mxu1 }
 0x1d8   :  { %3575 = vmatpush.bf16.msrb.mxu2 %v14269_v17  ;;  %v14409_v17 = vor.u32 %v19122_v1, %v14406_v2  ;;  %v2945_v26 = vpop.f32.mrf.mxu2  ;;  %14546 = vmatmul.msk.bf16.vlgmr.msrb.gmra.mxu1 %vm360_vm0, %v20800_v24  ;;  %v14412_v1 = vld [vmem:[#allocation6 + $0x128] sm:$0xf] }
 0x1d9   :  { %3870 = vmatpush.bf16.msra.mxu1 %v14477_v42  ;;  %v21006_v35 = vadd.f32 %v2958_v41, %v2945_v26  ;;  %v14497_v42 = vor.u32 %v19143_v20, %v14494_v21  ;;  %v19182_v41 = vld [vmem:[#allocation6 + $0x304] sm:$0xf]  ;;  %v14634_v21 = vld [vmem:[#allocation6 + $0x2f0] sm:$0xf0]  ;;  %v14413_v26 = vor.u32 %v19125_v4, %v14412_v1  ;;  %v14430_v4 = vld [vmem:[#allocation6 + $0x158] sm:$0xf0] }
 0x1da   :  { %3846 = vmatpush.bf16.msrb.mxu3 %v14441_v25  ;;  %v21002_v25 = vadd.f32 %v2984_v5, %v2971_v14  ;;  %v19135_v5 = vld [vmem:[#allocation6 + $0x18c] sm:$0xf]  ;;  %v2973_v8 = vpop.f32.mrf.mxu0  ;;  %v19192_v14 = vld [vmem:[#allocation6 + $0x34c] sm:$0xf0]  ;;  %v19178_v20 = vld [vmem:[#allocation6 + $0x2e4] sm:$0xf] }
 0x1db   :  { %3576 = vmatmul.bf16.vlgmr.msrb.gmra.mxu2 %v20826_v36  ;;  %3822 = vmatpush.bf16.msra.mxu0 %v14405_v55  ;;  %v14478_v55 = vld [vmem:[#allocation6 + $0x1b8] sm:$0xf0] }
 0x1dc   :  { %3861 = vmatpush.bf16.msra.mxu2 %v14537_v34  ;;  %v14666_v34 = vld [vmem:[#allocation6 + $0x330] sm:$0xf0]  ;;  %v14481_v2 = vor.u32 %v19139_v54, %v14478_v55 }
 0x1dd   :  { %3871 = vmatpush.bf16.msra.mxu1 %v14461_v6  ;;  %v14669_v52 = vor.u32 %v19186_v32, %v14666_v34  ;;  %v14616_v6 = vld [vmem:[#allocation6 + $0x2c0] sm:$0xf]  ;;  %v14672_v32 = vld [vmem:[#allocation6 + $0x328] sm:$0xf]  ;;  %v19189_v34 = vld [vmem:[#allocation6 + $0x334] sm:$0xf0] }
 0x1de   :  { %3847 = vmatpush.bf16.msrb.mxu3 %v14425_v58  ;;  %3823 = vmatmul.bf16.vlgmr.msra.gmra.mxu0 %v20826_v36  ;;  %v14632_v58 = vld [vmem:[#allocation6 + $0x2e0] sm:$0xf]  ;;  %v14618_v54 = vld [vmem:[#allocation6 + $0x2d0] sm:$0xf0] }
 0x1df   :  { %3887 = vmatpush.bf16.msrb.mxu0 %v14541_v0  ;;  %v14429_v0 = vor.u32 %v19129_v46, %v14428_v43  ;;  %v14633_v16 = vor.u32 %v19180_v61, %v14632_v58  ;;  %v14446_v43 = vld [vmem:[#allocation6 + $0x178] sm:$0xf0]  ;;  %v14600_v46 = vld [vmem:[#allocation6 + $0x2a0] sm:$0xf]  ;;  %v3023_v55 = vpop.f32.mrf.mxu1  ;;  %v14673_v58 = vor.u32 %v19189_v34, %v14672_v32 }
 0x1e0   :  { %3893 = vmatpush.bf16.msrb.mxu2 %v14529_v50  ;;  %v14649_v50 = vor.u32 %v19184_v31, %v14648_v23  ;;  %v2997_v23 = vpop.f32.mrf.mxu3  ;;  %v14681_v31 = vor.u32 %v19192_v14, %v14680_v13  ;;  %v14414_v32 = vld [vmem:[#allocation6 + $0x138] sm:$0xf0]  ;;  %v14568_v34 = vld [vmem:[#allocation6 + $0x260] sm:$0xf] }
 0x1e1   :  { %3872 = vmatpush.bf16.msra.mxu1 %v14445_v30  ;;  %v14637_v30 = vor.u32 %v19178_v20, %v14634_v21  ;;  %v14640_v20 = vld [vmem:[#allocation6 + $0x2e8] sm:$0xf]  ;;  %v19181_v21 = vld [vmem:[#allocation6 + $0x2f4] sm:$0xf0] }
 0x1e2   :  { %3848 = vmatpush.bf16.msrb.mxu3 %v14409_v17  ;;  %v2947_v17 = vpop.f32.mrf.mxu2  ;;  %v3036_v59 = vpop.f32.mrf.mxu0 }
 0x1e3   :  { %4144 = vmatpush.bf16.msra.mxu0 %v14665_v18  ;;  %v19176_v18 = vld [vmem:[#allocation6 + $0x2cc] sm:$0xf0] }
 0x1e4   :  { %3894 = vmatpush.bf16.msrb.mxu2 %v14513_v9  ;;  %v14653_v9 = vor.u32 %v19182_v41, %v14650_v33  ;;  %v14617_v37 = vor.u32 %v19176_v18, %v14616_v6  ;;  %v14656_v41 = vld [vmem:[#allocation6 + $0x308] sm:$0xf]  ;;  %v19185_v33 = vld [vmem:[#allocation6 + $0x314] sm:$0xf0]  ;;  %v21012_v6 = vadd.f32 %v3036_v59, %v3023_v55  ;;  %v19187_v59 = vld [vmem:[#allocation6 + $0x32c] sm:$0xf] }
 0x1e5   :  { %3849 = vmatmul.bf16.vlgmr.msrb.gmra.mxu3 %v20826_v36  ;;  %3873 = vmatpush.bf16.msra.mxu1 %v14429_v0  ;;  %v14657_v17 = vor.u32 %v19185_v33, %v14656_v41  ;;  %v19177_v55 = vld [vmem:[#allocation6 + $0x2d4] sm:$0xf0]  ;;  %v14552_v33 = vld [vmem:[#allocation6 + $0x240] sm:$0xf] }
 0x1e6   :  { %3913 = vmatpush.bf16.msra.mxu3 %v14545_v27  ;;  %v14465_v27 = vor.u32 %v19135_v5, %v14462_v11  ;;  %v14584_v5 = vld [vmem:[#allocation6 + $0x280] sm:$0xf]  ;;  %v14602_v11 = vld [vmem:[#allocation6 + $0x2b0] sm:$0xf0] }
 0x1e7   :  { %4145 = vmatpush.bf16.msra.mxu0 %v14649_v50  ;;  %v19172_v50 = vld [vmem:[#allocation6 + $0x2ac] sm:$0xf0] }
 0x1e8   :  { %3895 = vmatpush.bf16.msrb.mxu2 %v14497_v42  ;;  %v19131_v42 = vld [vmem:[#allocation6 + $0x16c] sm:$0xf]  ;;  %v14601_v0 = vor.u32 %v19172_v50, %v14600_v46  ;;  %v2999_v13 = vpop.f32.mrf.mxu3  ;;  %v19190_v46 = vld [vmem:[#allocation6 + $0x344] sm:$0xf]  ;;  %v14682_v50 = vld [vmem:[#allocation6 + $0x350] sm:$0xf0] }
 0x1e9   :  { %3874 = vmatpush.bf16.msra.mxu1 %v14413_v26  ;;  %v14449_v61 = vor.u32 %v19131_v42, %v14446_v43  ;;  %v3025_v42 = vpop.f32.mrf.mxu1  ;;  %v14641_v43 = vor.u32 %v19181_v21, %v14640_v20  ;;  %v19193_v13 = vld [vmem:[#allocation6 + $0x354] sm:$0xf0] }
 0x1ea   :  { %4170 = vmatpush.bf16.msrb.mxu3 %v14669_v52  ;;  %v19174_v52 = vld [vmem:[#allocation6 + $0x2c4] sm:$0xf]  ;;  %v3010_v8 = vpop.f32.mrf.mxu2  ;;  %v19173_v20 = vld [vmem:[#allocation6 + $0x2b4] sm:$0xf0] }
 0x1eb   :  { %4146 = vmatpush.bf16.msra.mxu0 %v14633_v16  ;;  %14547 = vmatmul.msk.bf16.vlgmr.msra.gmra.mxu2 %vm360_vm0, %v20800_v24  ;;  %v14621_v1 = vor.u32 %v19174_v52, %v14618_v54  ;;  %v19168_v16 = vld [vmem:[#allocation6 + $0x28c] sm:$0xf0]  ;;  %v21015_v14 = vadd.f32 %v3010_v8, %v2997_v23  ;;  %v14586_v23 = vld [vmem:[#allocation6 + $0x290] sm:$0xf0]  ;;  %v14624_v54 = vld [vmem:[#allocation6 + $0x2c8] sm:$0xf] }
 0x1ec   :  { %3896 = vmatpush.bf16.msrb.mxu2 %v14481_v2  ;;  %v19127_v2 = vld [vmem:[#allocation6 + $0x14c] sm:$0xf]  ;;  %3875 = vmatmul.bf16.vlgmr.msra.gmra.mxu1 %v20826_v36  ;;  %v14585_v26 = vor.u32 %v19168_v16, %v14584_v5  ;;  %v19162_v5 = vld [vmem:[#allocation6 + $0x264] sm:$0xf]  ;;  %v14570_v8 = vld [vmem:[#allocation6 + $0x270] sm:$0xf0] }
 0x1ed   :  { %4164 = vmatpush.bf16.msrb.mxu1 %v14681_v31  ;;  %v14433_v18 = vor.u32 %v19127_v2, %v14430_v4  ;;  %v19123_v31 = vld [vmem:[#allocation6 + $0x12c] sm:$0xf]  ;;  %v14685_v2 = vor.u32 %v19190_v46, %v14682_v50  ;;  %v19160_v4 = vld [vmem:[#allocation6 + $0x24c] sm:$0xf0]  ;;  %v14690_v50 = vld [vmem:[#allocation6 + $0x358] sm:$0xf0] }
 0x1ee   :  { %4171 = vmatpush.bf16.msrb.mxu3 %v14653_v9  ;;  %v19170_v9 = vld [vmem:[#allocation6 + $0x2a4] sm:$0xf]  ;;  %14548 = vmatmul.msk.bf16.vlgmr.msrb.gmra.mxu0 %vm360_vm0, %v20800_v24  ;;  %v14417_v52 = vor.u32 %v19123_v31, %v14414_v32  ;;  %v14553_v21 = vor.u32 %v19160_v4, %v14552_v33  ;;  %v14658_v31 = vld [vmem:[#allocation6 + $0x318] sm:$0xf0]  ;;  %v14812_v32 = vld [vmem:[#allocation6 + $0x440] sm:$0xf] }
 0x1ef   :  { %4147 = vmatpush.bf16.msra.mxu0 %v14617_v37  ;;  %v19164_v37 = vld [vmem:[#allocation6 + $0x26c] sm:$0xf0]  ;;  %v19191_v46 = vld [vmem:[#allocation6 + $0x34c] sm:$0xf] }
 0x1f0   :  { %3897 = vmatpush.bf16.msrb.mxu2 %v14465_v27  ;;  %v14605_v27 = vor.u32 %v19170_v9, %v14602_v11  ;;  %v3062_v16 = vpop.f32.mrf.mxu3  ;;  %v14625_v9 = vor.u32 %v19177_v55, %v14624_v54  ;;  %v14688_v11 = vld [vmem:[#allocation6 + $0x348] sm:$0xf]  ;;  %v19169_v55 = vld [vmem:[#allocation6 + $0x294] sm:$0xf0]  ;;  %v19179_v33 = vld [vmem:[#allocation6 + $0x2ec] sm:$0xf]  ;;  %v14693_v4 = vor.u32 %v19191_v46, %v14690_v50 }
 0x1f1   :  { %4196 = vmatpush.bf16.msra.mxu1 %v14673_v58  ;;  %v3038_v58 = vpop.f32.mrf.mxu0  ;;  %v3088_v42 = vpop.f32.mrf.mxu1  ;;  %v14592_v54 = vld [vmem:[#allocation6 + $0x288] sm:$0xf]  ;;  %v19161_v50 = vld [vmem:[#allocation6 + $0x254] sm:$0xf0] }
 0x1f2   :  { %4172 = vmatpush.bf16.msrb.mxu3 %v14637_v30  ;;  %v19166_v30 = vld [vmem:[#allocation6 + $0x284] sm:$0xf] }
 0x1f3   :  { %4148 = vmatpush.bf16.msra.mxu0 %v14601_v0  ;;  %v14589_v41 = vor.u32 %v19166_v30, %v14586_v23  ;;  %v14674_v0 = vld [vmem:[#allocation6 + $0x338] sm:$0xf0]  ;;  %v14554_v30 = vld [vmem:[#allocation6 + $0x250] sm:$0xf0]  ;;  %v19224_v23 = vld [vmem:[#allocation6 + $0x44c] sm:$0xf0] }
 0x1f4   :  { %3898 = vmatpush.bf16.msrb.mxu2 %v14449_v61  ;;  %v14569_v61 = vor.u32 %v19164_v37, %v14568_v34  ;;  %v14689_v34 = vor.u32 %v19193_v13, %v14688_v11  ;;  %v19158_v37 = vld [vmem:[#allocation6 + $0x244] sm:$0xf] }
 0x1f5   :  { %4197 = vmatpush.bf16.msra.mxu1 %v14657_v17  ;;  %14549 = vmatmul.msk.bf16.vlgmr.msra.gmra.mxu3 %vm360_vm0, %v20800_v24  ;;  %v14677_v17 = vor.u32 %v19187_v59, %v14674_v0  ;;  %v14642_v59 = vld [vmem:[#allocation6 + $0x2f8] sm:$0xf0]  ;;  %v14796_v0 = vld [vmem:[#allocation6 + $0x420] sm:$0xf] }
 0x1f6   :  { %4173 = vmatpush.bf16.msrb.mxu3 %v14621_v1  ;;  %v3012_v1 = vpop.f32.mrf.mxu2 }
 0x1f7   :  { %4149 = vmatpush.bf16.msra.mxu0 %v14585_v26  ;;  %v14573_v26 = vor.u32 %v19162_v5, %v14570_v8  ;;  %v19220_v5 = vld [vmem:[#allocation6 + $0x42c] sm:$0xf0]  ;;  %v19222_v8 = vld [vmem:[#allocation6 + $0x444] sm:$0xf] }
 0x1f8   :  { %3899 = vmatpush.bf16.msrb.mxu2 %v14433_v18  ;;  %v14608_v18 = vld [vmem:[#allocation6 + $0x2a8] sm:$0xf]  ;;  %v3064_v13 = vpop.f32.mrf.mxu3 }
 0x1f9   :  { %4198 = vmatpush.bf16.msra.mxu1 %v14641_v43  ;;  %v14609_v43 = vor.u32 %v19173_v20, %v14608_v18  ;;  %v3075_v58 = vpop.f32.mrf.mxu0  ;;  %v14645_v18 = vor.u32 %v19179_v33, %v14642_v59  ;;  %v14576_v20 = vld [vmem:[#allocation6 + $0x268] sm:$0xf]  ;;  %v14828_v33 = vld [vmem:[#allocation6 + $0x460] sm:$0xf]  ;;  %v19228_v59 = vld [vmem:[#allocation6 + $0x46c] sm:$0xf0] }
 0x1fa   :  { %4174 = vmatpush.bf16.msrb.mxu3 %v14605_v27  ;;  %v19183_v27 = vld [vmem:[#allocation6 + $0x30c] sm:$0xf]  ;;  %v21022_v1 = vadd.f32 %v3088_v42, %v3075_v58 }
 0x1fb   :  { %4150 = vmatpush.bf16.msra.mxu0 %v14569_v61  ;;  %v14557_v61 = vor.u32 %v19158_v37, %v14554_v30  ;;  %v19216_v37 = vld [vmem:[#allocation6 + $0x40c] sm:$0xf0]  ;;  %v14798_v30 = vld [vmem:[#allocation6 + $0x430] sm:$0xf0] }
 0x1fc   :  { %3900 = vmatpush.bf16.msrb.mxu2 %v14417_v52  ;;  %v14661_v52 = vor.u32 %v19183_v27, %v14658_v31  ;;  %14694 = vmatmul.msk.bf16.vlgmr.msrb.gmra.mxu1 %vm360_vm0, %v20800_v24  ;;  %v19175_v31 = vld [vmem:[#allocation6 + $0x2cc] sm:$0xf] }
 0x1fd   :  { %4199 = vmatpush.bf16.msra.mxu1 %v14625_v9  ;;  %v14814_v9 = vld [vmem:[#allocation6 + $0x450] sm:$0xf0] }
 0x1fe   :  { %4175 = vmatpush.bf16.msrb.mxu3 %v14589_v41  ;;  %v14813_v41 = vor.u32 %v19224_v23, %v14812_v32  ;;  %v14817_v27 = vor.u32 %v19222_v8, %v14814_v9  ;;  %v14626_v32 = vld [vmem:[#allocation6 + $0x2d8] sm:$0xf0]  ;;  %v3090_v23 = vpop.f32.mrf.mxu1 }
 0x1ff   :  { %3901 = vmatmul.bf16.vlgmr.msrb.gmra.mxu2 %v20826_v36  ;;  %4151 = vmatpush.bf16.msra.mxu0 %v14553_v21  ;;  %v19165_v21 = vld [vmem:[#allocation6 + $0x274] sm:$0xf0]  ;;  %v14629_v46 = vor.u32 %v19175_v31, %v14626_v32  ;;  %v14594_v31 = vld [vmem:[#allocation6 + $0x298] sm:$0xf0]  ;;  %v14748_v32 = vld [vmem:[#allocation6 + $0x3c0] sm:$0xf] }
 0x200   :  { %4190 = vmatpush.bf16.msra.mxu2 %v14685_v2  ;;  %v3049_v2 = vpop.f32.mrf.mxu2  ;;  %v14577_v42 = vor.u32 %v19165_v21, %v14576_v20  ;;  %v3101_v8 = vpop.f32.mrf.mxu3  ;;  %v19225_v20 = vld [vmem:[#allocation6 + $0x454] sm:$0xf0] }
 0x201   :  { %v21026_v11 = vadd.f32 %v3062_v16, %v3049_v2  ;;  %4200 = vmatpush.bf16.msra.mxu1 %v14609_v43  ;;  %v19218_v16 = vld [vmem:[#allocation6 + $0x424] sm:$0xf]  ;;  %v14560_v43 = vld [vmem:[#allocation6 + $0x248] sm:$0xf]  ;;  %v19212_v2 = vld [vmem:[#allocation6 + $0x3ec] sm:$0xf0] }
 0x202   :  { %4176 = vmatpush.bf16.msrb.mxu3 %v14573_v26  ;;  %4152 = vmatmul.bf16.vlgmr.msra.gmra.mxu0 %v20826_v36  ;;  %v14797_v26 = vor.u32 %v19220_v5, %v14796_v0  ;;  %v14782_v5 = vld [vmem:[#allocation6 + $0x410] sm:$0xf0]  ;;  %v14561_v9 = vor.u32 %v19161_v50, %v14560_v43  ;;  %v14804_v43 = vld [vmem:[#allocation6 + $0x428] sm:$0xf] }
 0x203   :  { %4216 = vmatpush.bf16.msrb.mxu0 %v14689_v34  ;;  %v14780_v34 = vld [vmem:[#allocation6 + $0x400] sm:$0xf] }
 0x204   :  { %4222 = vmatpush.bf16.msrb.mxu2 %v14677_v17  ;;  %v14593_v17 = vor.u32 %v19169_v55, %v14592_v54  ;;  %v14764_v54 = vld [vmem:[#allocation6 + $0x3e0] sm:$0xf]  ;;  %v3077_v55 = vpop.f32.mrf.mxu0  ;;  %v14781_v58 = vor.u32 %v19216_v37, %v14780_v34  ;;  %v19208_v34 = vld [vmem:[#allocation6 + $0x3cc] sm:$0xf0]  ;;  %v19210_v37 = vld [vmem:[#allocation6 + $0x3e4] sm:$0xf] }
 0x205   :  { %v14765_v21 = vor.u32 %v19212_v2, %v14764_v54  ;;  %v19163_v55 = vld [vmem:[#allocation6 + $0x26c] sm:$0xf]  ;;  %v14750_v2 = vld [vmem:[#allocation6 + $0x3d0] sm:$0xf0] }
 0x206   :  { %4177 = vmatpush.bf16.msrb.mxu3 %v14557_v61  ;;  %4201 = vmatpush.bf16.msra.mxu1 %v14593_v17  ;;  %v14801_v61 = vor.u32 %v19218_v16, %v14798_v30  ;;  %v14829_v17 = vor.u32 %v19228_v59, %v14828_v33  ;;  %v14766_v16 = vld [vmem:[#allocation6 + $0x3f0] sm:$0xf0]  ;;  %v3127_v30 = vpop.f32.mrf.mxu1  ;;  %v19204_v59 = vld [vmem:[#allocation6 + $0x3ac] sm:$0xf0] }
 0x207   :  { %4473 = vmatpush.bf16.msra.mxu0 %v14813_v41  ;;  %v14610_v41 = vld [vmem:[#allocation6 + $0x2b8] sm:$0xf0]  ;;  %v14769_v54 = vor.u32 %v19210_v37, %v14766_v16 }
 0x208   :  { %4223 = vmatpush.bf16.msrb.mxu2 %v14661_v52  ;;  %v19171_v52 = vld [vmem:[#allocation6 + $0x2ac] sm:$0xf]  ;;  %v3051_v0 = vpop.f32.mrf.mxu2 }
 0x209   :  { %4178 = vmatmul.bf16.vlgmr.msrb.gmra.mxu3 %v20826_v36  ;;  %v14613_v13 = vor.u32 %v19171_v52, %v14610_v41  ;;  %v14749_v52 = vor.u32 %v19208_v34, %v14748_v32  ;;  %v19206_v0 = vld [vmem:[#allocation6 + $0x3c4] sm:$0xf]  ;;  %v19200_v32 = vld [vmem:[#allocation6 + $0x38c] sm:$0xf0] }
 0x20a   :  { %4242 = vmatpush.bf16.msra.mxu3 %v14693_v4  ;;  %v19214_v4 = vld [vmem:[#allocation6 + $0x404] sm:$0xf]  ;;  %4202 = vmatpush.bf16.msra.mxu1 %v14577_v42 }
 0x20b   :  { %4474 = vmatpush.bf16.msra.mxu0 %v14797_v26  ;;  %v14785_v26 = vor.u32 %v19214_v4, %v14782_v5  ;;  %v3103_v4 = vpop.f32.mrf.mxu3  ;;  %v19202_v34 = vld [vmem:[#allocation6 + $0x3a4] sm:$0xf] }
 0x20c   :  { %4224 = vmatpush.bf16.msrb.mxu2 %v14645_v18  ;;  %v14820_v18 = vld [vmem:[#allocation6 + $0x448] sm:$0xf]  ;;  %v3140_v50 = vpop.f32.mrf.mxu0  ;;  %v14718_v4 = vld [vmem:[#allocation6 + $0x390] sm:$0xf0] }
 0x20d   :  { %v14821_v23 = vor.u32 %v19225_v20, %v14820_v18  ;;  %v21032_v41 = vadd.f32 %v3140_v50, %v3127_v30  ;;  %v19217_v18 = vld [vmem:[#allocation6 + $0x414] sm:$0xf0]  ;;  %v19226_v30 = vld [vmem:[#allocation6 + $0x464] sm:$0xf] }
 0x20e   :  { %4499 = vmatpush.bf16.msrb.mxu3 %v14817_v27  ;;  %v19167_v27 = vld [vmem:[#allocation6 + $0x28c] sm:$0xf]  ;;  %4203 = vmatpush.bf16.msra.mxu1 %v14561_v9  ;;  %v3129_v37 = vpop.f32.mrf.mxu1 }
 0x20f   :  { %4475 = vmatpush.bf16.msra.mxu0 %v14781_v58  ;;  %14695 = vmatmul.msk.bf16.vlgmr.msra.gmra.mxu2 %vm360_vm0, %v20800_v24  ;;  %v14597_v42 = vor.u32 %v19167_v27, %v14594_v31  ;;  %v14578_v58 = vld [vmem:[#allocation6 + $0x278] sm:$0xf0]  ;;  %v14716_v31 = vld [vmem:[#allocation6 + $0x380] sm:$0xf] }
 0x210   :  { %4225 = vmatpush.bf16.msrb.mxu2 %v14629_v46  ;;  %v19221_v46 = vld [vmem:[#allocation6 + $0x434] sm:$0xf0]  ;;  %v3114_v33 = vpop.f32.mrf.mxu2  ;;  %v14562_v27 = vld [vmem:[#allocation6 + $0x258] sm:$0xf0] }
 0x211   :  { %4204 = vmatmul.bf16.vlgmr.msra.gmra.mxu1 %v20826_v36  ;;  %v21035_v5 = vadd.f32 %v3114_v33, %v3101_v8  ;;  %v14805_v9 = vor.u32 %v19221_v46, %v14804_v43  ;;  %v14734_v8 = vld [vmem:[#allocation6 + $0x3b0] sm:$0xf0]  ;;  %v14772_v43 = vld [vmem:[#allocation6 + $0x3e8] sm:$0xf]  ;;  %v19213_v46 = vld [vmem:[#allocation6 + $0x3f4] sm:$0xf0] }
 0x212   :  { %4500 = vmatpush.bf16.msrb.mxu3 %v14801_v61  ;;  %4493 = vmatpush.bf16.msrb.mxu1 %v14829_v17  ;;  %v14732_v61 = vld [vmem:[#allocation6 + $0x3a0] sm:$0xf]  ;;  %v14788_v17 = vld [vmem:[#allocation6 + $0x408] sm:$0xf] }
 0x213   :  { %4476 = vmatpush.bf16.msra.mxu0 %v14765_v21  ;;  %21795 = vst [vmem:[#allocation34_spill] sm:$0xff] %v21035_v5  ;;  %v14733_v20 = vor.u32 %v19204_v59, %v14732_v61  ;;  %v14753_v21 = vor.u32 %v19206_v0, %v14750_v2  ;;  %v14789_v16 = vor.u32 %v19217_v18, %v14788_v17  ;;  %v14822_v61 = vld [vmem:[#allocation6 + $0x458] sm:$0xf0]  ;;  %v19196_v0 = vld [vmem:[#allocation6 + $0x36c] sm:$0xf0] }
 0x214   :  { %4226 = vmatpush.bf16.msrb.mxu2 %v14613_v13  ;;  %14696 = vmatmul.msk.bf16.vlgmr.msrb.gmra.mxu0 %vm360_vm0, %v20800_v24  ;;  %v14581_v13 = vor.u32 %v19163_v55, %v14578_v58  ;;  %v3142_v50 = vpop.f32.mrf.mxu0  ;;  %v14700_v55 = vld [vmem:[#allocation6 + $0x360] sm:$0xf]  ;;  %v19223_v58 = vld [vmem:[#allocation6 + $0x44c] sm:$0xf]  ;;  %v19198_v2 = vld [vmem:[#allocation6 + $0x384] sm:$0xf]  ;;  %v14773_v17 = vor.u32 %v19213_v46, %v14772_v43 }
 0x215   :  { %v19229_v18 = vld [vmem:[#allocation6 + $0x474] sm:$0xf0]  ;;  %v19260_v50 = vld [vmem:[#allocation6 + $0x56c] sm:$0xf0]  ;;  %v19227_v43 = vld [vmem:[#allocation6 + $0x46c] sm:$0xf] }
 0x216   :  { %4501 = vmatpush.bf16.msrb.mxu3 %v14785_v26  ;;  %4525 = vmatpush.bf16.msra.mxu1 %v14821_v23  ;;  %v19159_v26 = vld [vmem:[#allocation6 + $0x24c] sm:$0xf]  ;;  %v14830_v23 = vld [vmem:[#allocation6 + $0x470] sm:$0xf0]  ;;  %v14838_v46 = vld [vmem:[#allocation6 + $0x478] sm:$0xf0] }
 0x217   :  { %4477 = vmatpush.bf16.msra.mxu0 %v14749_v52  ;;  %v14717_v52 = vor.u32 %v19200_v32, %v14716_v31  ;;  %v14833_v59 = vor.u32 %v19226_v30, %v14830_v23  ;;  %v14721_v31 = vor.u32 %v19198_v2, %v14718_v4  ;;  %v19219_v32 = vld [vmem:[#allocation6 + $0x42c] sm:$0xf]  ;;  %v19194_v30 = vld [vmem:[#allocation6 + $0x364] sm:$0xf]  ;;  %v14702_v23 = vld [vmem:[#allocation6 + $0x370] sm:$0xf0] }
 0x218   :  { %4227 = vmatpush.bf16.msrb.mxu2 %v14597_v42  ;;  %v14565_v42 = vor.u32 %v19159_v26, %v14562_v27  ;;  %v3116_v33 = vpop.f32.mrf.mxu2  ;;  %v14825_v26 = vor.u32 %v19223_v58, %v14822_v61  ;;  %v14756_v27 = vld [vmem:[#allocation6 + $0x3c8] sm:$0xf]  ;;  %v14705_v61 = vor.u32 %v19194_v30, %v14702_v23  ;;  %v14944_v2 = vld [vmem:[#allocation6 + $0x540] sm:$0xf] }
 0x219   :  { %14697 = vmatmul.msk.bf16.vlgmr.msra.gmra.mxu3 %vm360_vm0, %v20800_v24 }
 0x21a   :  { %4502 = vmatpush.bf16.msrb.mxu3 %v14769_v54  ;;  %4526 = vmatpush.bf16.msra.mxu1 %v14805_v9  ;;  %v14737_v54 = vor.u32 %v19202_v34, %v14734_v8  ;;  %v3166_v9 = vpop.f32.mrf.mxu3  ;;  %v14806_v34 = vld [vmem:[#allocation6 + $0x438] sm:$0xf0]  ;;  %v14960_v8 = vld [vmem:[#allocation6 + $0x560] sm:$0xf] }
 0x21b   :  { %4478 = vmatpush.bf16.msra.mxu0 %v14733_v20  ;;  %v19209_v20 = vld [vmem:[#allocation6 + $0x3d4] sm:$0xf0]  ;;  %v14961_v33 = vor.u32 %v19260_v50, %v14960_v8  ;;  %v14774_v50 = vld [vmem:[#allocation6 + $0x3f8] sm:$0xf0] }
 0x21c   :  { %4228 = vmatpush.bf16.msrb.mxu2 %v14581_v13  ;;  %v14836_v13 = vld [vmem:[#allocation6 + $0x468] sm:$0xf]  ;;  %v3179_v58 = vpop.f32.mrf.mxu0  ;;  %v19201_v8 = vld [vmem:[#allocation6 + $0x394] sm:$0xf0] }
 0x21d   :  { %v14837_v37 = vor.u32 %v19229_v18, %v14836_v13  ;;  %v19256_v18 = vld [vmem:[#allocation6 + $0x54c] sm:$0xf0] }
 0x21e   :  { %4503 = vmatpush.bf16.msrb.mxu3 %v14753_v21  ;;  %4527 = vmatpush.bf16.msra.mxu1 %v14789_v16  ;;  %v14701_v21 = vor.u32 %v19196_v0, %v14700_v55  ;;  %v3192_v16 = vpop.f32.mrf.mxu1  ;;  %v19205_v55 = vld [vmem:[#allocation6 + $0x3b4] sm:$0xf0]  ;;  %v14790_v0 = vld [vmem:[#allocation6 + $0x418] sm:$0xf0]  ;;  %v14945_v30 = vor.u32 %v19256_v18, %v14944_v2  ;;  %v19264_v18 = vld [vmem:[#allocation6 + $0x58c] sm:$0xf0] }
 0x21f   :  { %4479 = vmatpush.bf16.msra.mxu0 %v14717_v52  ;;  %v14809_v52 = vor.u32 %v19219_v32, %v14806_v34  ;;  %v21042_v4 = vadd.f32 %v3192_v16, %v3179_v58  ;;  %v14724_v34 = vld [vmem:[#allocation6 + $0x388] sm:$0xf]  ;;  %v14928_v16 = vld [vmem:[#allocation6 + $0x520] sm:$0xf] }
 0x220   :  { %4229 = vmatpush.bf16.msrb.mxu2 %v14565_v42  ;;  %v14757_v42 = vor.u32 %v19209_v20, %v14756_v27  ;;  %v3153_v13 = vpop.f32.mrf.mxu2  ;;  %v14962_v27 = vld [vmem:[#allocation6 + $0x570] sm:$0xf0] }
 0x221   :  { %14842 = vmatmul.msk.bf16.vlgmr.msrb.gmra.mxu1 %vm360_vm0, %v20800_v24  ;;  %v21046_v20 = vadd.f32 %v3166_v9, %v3153_v13  ;;  %v19254_v9 = vld [vmem:[#allocation6 + $0x544] sm:$0xf]  ;;  %v14758_v13 = vld [vmem:[#allocation6 + $0x3d8] sm:$0xf0] }
 0x222   :  { %4504 = vmatpush.bf16.msrb.mxu3 %v14737_v54  ;;  %4528 = vmatpush.bf16.msra.mxu1 %v14773_v17  ;;  %v14740_v54 = vld [vmem:[#allocation6 + $0x3a8] sm:$0xf]  ;;  %v14841_v17 = vor.u32 %v19227_v43, %v14838_v46  ;;  %v19252_v43 = vld [vmem:[#allocation6 + $0x52c] sm:$0xf0]  ;;  %v14946_v46 = vld [vmem:[#allocation6 + $0x550] sm:$0xf0] }
 0x223   :  { %4230 = vmatmul.bf16.vlgmr.msrb.gmra.mxu2 %v20826_v36  ;;  %4480 = vmatpush.bf16.msra.mxu0 %v14701_v21  ;;  %21796 = vst [vmem:[#allocation35_spill] sm:$0xff] %v21046_v20  ;;  %v3168_v21 = vpop.f32.mrf.mxu3  ;;  %v14949_v2 = vor.u32 %v19254_v9, %v14946_v46  ;;  %v14896_v9 = vld [vmem:[#allocation6 + $0x4e0] sm:$0xf]  ;;  %v19244_v46 = vld [vmem:[#allocation6 + $0x4ec] sm:$0xf0] }
 0x224   :  { %4519 = vmatpush.bf16.msra.mxu2 %v14833_v59  ;;  %v19215_v59 = vld [vmem:[#allocation6 + $0x40c] sm:$0xf]  ;;  %v19250_v21 = vld [vmem:[#allocation6 + $0x524] sm:$0xf]  ;;  %v19332_v20 = vld [vmem:[#allocation6 + $0x7ac] sm:$0xf0] }
 0x225   :  { %v14793_v32 = vor.u32 %v19215_v59, %v14790_v0  ;;  %v3181_v59 = vpop.f32.mrf.mxu0  ;;  %v14929_v0 = vor.u32 %v19252_v43, %v14928_v16  ;;  %v19203_v16 = vld [vmem:[#allocation6 + $0x3ac] sm:$0xf]  ;;  %v14742_v43 = vld [vmem:[#allocation6 + $0x3b8] sm:$0xf0] }
 0x226   :  { %4505 = vmatpush.bf16.msrb.mxu3 %v14721_v31  ;;  %4529 = vmatpush.bf16.msra.mxu1 %v14757_v42  ;;  %v14741_v31 = vor.u32 %v19205_v55, %v14740_v54  ;;  %v3194_v58 = vpop.f32.mrf.mxu1  ;;  %v14725_v42 = vor.u32 %v19201_v8, %v14724_v34  ;;  %v14708_v54 = vld [vmem:[#allocation6 + $0x368] sm:$0xf]  ;;  %v19197_v55 = vld [vmem:[#allocation6 + $0x374] sm:$0xf0]  ;;  %v19246_v59 = vld [vmem:[#allocation6 + $0x504] sm:$0xf] }
 0x227   :  { %4545 = vmatpush.bf16.msrb.mxu0 %v14837_v37  ;;  %v19211_v37 = vld [vmem:[#allocation6 + $0x3ec] sm:$0xf]  ;;  %v14709_v8 = vor.u32 %v19197_v55, %v14708_v54  ;;  %v19261_v58 = vld [vmem:[#allocation6 + $0x574] sm:$0xf0]  ;;  %v14952_v55 = vld [vmem:[#allocation6 + $0x548] sm:$0xf] }
 0x228   :  { %4551 = vmatpush.bf16.msrb.mxu2 %v14825_v26  ;;  %v19258_v26 = vld [vmem:[#allocation6 + $0x564] sm:$0xf]  ;;  %4481 = vmatmul.bf16.vlgmr.msra.gmra.mxu0 %v20826_v36 }
 0x229   :  { %v14965_v23 = vor.u32 %v19258_v26, %v14962_v27  ;;  %v3155_v26 = vpop.f32.mrf.mxu2  ;;  %v19248_v27 = vld [vmem:[#allocation6 + $0x50c] sm:$0xf0] }
 0x22a   :  { %4506 = vmatpush.bf16.msrb.mxu3 %v14705_v61  ;;  %4530 = vmatpush.bf16.msra.mxu1 %v14741_v31  ;;  %v19207_v61 = vld [vmem:[#allocation6 + $0x3cc] sm:$0xf]  ;;  %v14930_v31 = vld [vmem:[#allocation6 + $0x530] sm:$0xf0] }
 0x22b   :  { %4802 = vmatpush.bf16.msra.mxu0 %v14961_v33  ;;  %v14912_v33 = vld [vmem:[#allocation6 + $0x500] sm:$0xf]  ;;  %v3205_v34 = vpop.f32.mrf.mxu3  ;;  %v14914_v26 = vld [vmem:[#allocation6 + $0x510] sm:$0xf0] }
 0x22c   :  { %4552 = vmatpush.bf16.msrb.mxu2 %v14809_v52  ;;  %v14777_v52 = vor.u32 %v19211_v37, %v14774_v50  ;;  %v14968_v50 = vld [vmem:[#allocation6 + $0x568] sm:$0xf] }
 0x22d   :  { %4507 = vmatmul.bf16.vlgmr.msrb.gmra.mxu3 %v20826_v36  ;;  %v14969_v54 = vor.u32 %v19261_v58, %v14968_v50 }
 0x22e   :  { %4571 = vmatpush.bf16.msra.mxu3 %v14841_v17  ;;  %v14976_v17 = vld [vmem:[#allocation6 + $0x580] sm:$0xf]  ;;  %4531 = vmatpush.bf16.msra.mxu1 %v14725_v42  ;;  %v3231_v42 = vpop.f32.mrf.mxu1 }
 0x22f   :  { %4803 = vmatpush.bf16.msra.mxu0 %v14945_v30  ;;  %v14977_v37 = vor.u32 %v19264_v18, %v14976_v17  ;;  %v14913_v30 = vor.u32 %v19248_v27, %v14912_v33  ;;  %v14897_v33 = vor.u32 %v19244_v46, %v14896_v9  ;;  %v14726_v17 = vld [vmem:[#allocation6 + $0x398] sm:$0xf0]  ;;  %v14880_v18 = vld [vmem:[#allocation6 + $0x4c0] sm:$0xf]  ;;  %v19195_v46 = vld [vmem:[#allocation6 + $0x36c] sm:$0xf] }
 0x230   :  { %4553 = vmatpush.bf16.msrb.mxu2 %v14793_v32  ;;  %v14761_v32 = vor.u32 %v19207_v61, %v14758_v13  ;;  %v19257_v61 = vld [vmem:[#allocation6 + $0x554] sm:$0xf0]  ;;  %v19199_v13 = vld [vmem:[#allocation6 + $0x38c] sm:$0xf] }
 0x231   :  { %v14953_v58 = vor.u32 %v19257_v61, %v14952_v55  ;;  %v19262_v55 = vld [vmem:[#allocation6 + $0x584] sm:$0xf]  ;;  %v14978_v61 = vld [vmem:[#allocation6 + $0x590] sm:$0xf0] }
 0x232   :  { %4828 = vmatpush.bf16.msrb.mxu3 %v14965_v23  ;;  %v14933_v23 = vor.u32 %v19250_v21, %v14930_v31  ;;  %4532 = vmatpush.bf16.msra.mxu1 %v14709_v8  ;;  %v3218_v21 = vpop.f32.mrf.mxu2  ;;  %v19240_v31 = vld [vmem:[#allocation6 + $0x4cc] sm:$0xf0]  ;;  %v19242_v8 = vld [vmem:[#allocation6 + $0x4e4] sm:$0xf] }
 0x233   :  { %4804 = vmatpush.bf16.msra.mxu0 %v14929_v0  ;;  %14843 = vmatmul.msk.bf16.vlgmr.msra.gmra.mxu2 %vm360_vm0, %v20800_v24  ;;  %v3244_v0 = vpop.f32.mrf.mxu0  ;;  %v21055_v50 = vadd.f32 %v3218_v21, %v3205_v34  ;;  %v14882_v34 = vld [vmem:[#allocation6 + $0x4d0] sm:$0xf0] }
 0x234   :  { %4554 = vmatpush.bf16.msrb.mxu2 %v14777_v52  ;;  %v14745_v52 = vor.u32 %v19203_v16, %v14742_v43  ;;  %v21052_v27 = vadd.f32 %v3244_v0, %v3231_v42  ;;  %v19253_v16 = vld [vmem:[#allocation6 + $0x534] sm:$0xf0]  ;;  %v14881_v43 = vor.u32 %v19240_v31, %v14880_v18  ;;  %v19236_v42 = vld [vmem:[#allocation6 + $0x4ac] sm:$0xf0]  ;;  %v19238_v0 = vld [vmem:[#allocation6 + $0x4c4] sm:$0xf] }
 0x235   :  { %4533 = vmatmul.bf16.vlgmr.msra.gmra.mxu1 %v20826_v36  ;;  %21798 = vst [vmem:[#allocation37_spill] sm:$0xff] %v21055_v50  ;;  %v14885_v18 = vor.u32 %v19238_v0, %v14882_v34  ;;  %v14848_v31 = vld [vmem:[#allocation6 + $0x480] sm:$0xf]  ;;  %v14954_v0 = vld [vmem:[#allocation6 + $0x558] sm:$0xf0] }
 0x236   :  { %4829 = vmatpush.bf16.msrb.mxu3 %v14949_v2  ;;  %4822 = vmatpush.bf16.msrb.mxu1 %v14977_v37  ;;  %v14917_v2 = vor.u32 %v19246_v59, %v14914_v26  ;;  %21797 = vst [vmem:[#allocation36_spill] sm:$0xff] %v21052_v27  ;;  %v3207_v37 = vpop.f32.mrf.mxu3  ;;  %v14710_v59 = vld [vmem:[#allocation6 + $0x378] sm:$0xf0]  ;;  %v14864_v26 = vld [vmem:[#allocation6 + $0x4a0] sm:$0xf]  ;;  %v3233_v21 = vpop.f32.mrf.mxu1 }
 0x237   :  { %4805 = vmatpush.bf16.msra.mxu0 %v14913_v30  ;;  %v14729_v30 = vor.u32 %v19199_v13, %v14726_v17  ;;  %v14865_v17 = vor.u32 %v19236_v42, %v14864_v26  ;;  %v14866_v21 = vld [vmem:[#allocation6 + $0x4b0] sm:$0xf0]  ;;  %v19255_v42 = vld [vmem:[#allocation6 + $0x54c] sm:$0xf]  ;;  %v15108_v34 = vld [vmem:[#allocation6 + $0x680] sm:$0xf] }
 0x238   :  { %4555 = vmatpush.bf16.msrb.mxu2 %v14761_v32  ;;  %v14898_v32 = vld [vmem:[#allocation6 + $0x4f0] sm:$0xf0]  ;;  %14844 = vmatmul.msk.bf16.vlgmr.msrb.gmra.mxu0 %vm360_vm0, %v20800_v24  ;;  %v19296_v27 = vld [vmem:[#allocation6 + $0x68c] sm:$0xf0] }
 0x239   :  { %v14901_v9 = vor.u32 %v19242_v8, %v14898_v32  ;;  %v19259_v8 = vld [vmem:[#allocation6 + $0x56c] sm:$0xf]  ;;  %v14970_v32 = vld [vmem:[#allocation6 + $0x578] sm:$0xf0] }
 0x23a   :  { %4830 = vmatpush.bf16.msrb.mxu3 %v14933_v23  ;;  %4854 = vmatpush.bf16.msra.mxu1 %v14969_v54  ;;  %v14936_v23 = vld [vmem:[#allocation6 + $0x528] sm:$0xf]  ;;  %v3220_v37 = vpop.f32.mrf.mxu2 }
 0x23b   :  { %4806 = vmatpush.bf16.msra.mxu0 %v14897_v33  ;;  %v14937_v54 = vor.u32 %v19253_v16, %v14936_v23  ;;  %v14920_v33 = vld [vmem:[#allocation6 + $0x508] sm:$0xf]  ;;  %v3246_v13 = vpop.f32.mrf.mxu0  ;;  %v19232_v23 = vld [vmem:[#allocation6 + $0x48c] sm:$0xf0]  ;;  %v19234_v16 = vld [vmem:[#allocation6 + $0x4a4] sm:$0xf] }
 0x23c   :  { %4556 = vmatpush.bf16.msrb.mxu2 %v14745_v52  ;;  %v14713_v52 = vor.u32 %v19195_v46, %v14710_v59  ;;  %v19265_v46 = vld [vmem:[#allocation6 + $0x594] sm:$0xf0]  ;;  %v14973_v59 = vor.u32 %v19259_v8, %v14970_v32  ;;  %v14904_v13 = vld [vmem:[#allocation6 + $0x4e8] sm:$0xf]  ;;  %v14869_v26 = vor.u32 %v19234_v16, %v14866_v21  ;;  %v14850_v37 = vld [vmem:[#allocation6 + $0x490] sm:$0xf0] }
 0x23d   :  { %14845 = vmatmul.msk.bf16.vlgmr.msra.gmra.mxu3 %vm360_vm0, %v20800_v24  ;;  %v14938_v16 = vld [vmem:[#allocation6 + $0x538] sm:$0xf0]  ;;  %v15092_v21 = vld [vmem:[#allocation6 + $0x660] sm:$0xf] }
 0x23e   :  { %4831 = vmatpush.bf16.msrb.mxu3 %v14917_v2  ;;  %4855 = vmatpush.bf16.msra.mxu1 %v14953_v58  ;;  %v19249_v2 = vld [vmem:[#allocation6 + $0x514] sm:$0xf0]  ;;  %v14981_v58 = vor.u32 %v19262_v55, %v14978_v61  ;;  %v3270_v28 = vpop.f32.mrf.mxu3  ;;  %v19230_v61 = vld [vmem:[#allocation6 + $0x484] sm:$0xf] }
 0x23f   :  { %4807 = vmatpush.bf16.msra.mxu0 %v14881_v43  ;;  %v14921_v50 = vor.u32 %v19249_v2, %v14920_v33  ;;  %v19245_v43 = vld [vmem:[#allocation6 + $0x4f4] sm:$0xf0]  ;;  %v19263_v33 = vld [vmem:[#allocation6 + $0x58c] sm:$0xf]  ;;  %v14986_v2 = vld [vmem:[#allocation6 + $0x598] sm:$0xf0]  ;;  %v14853_v32 = vor.u32 %v19230_v61, %v14850_v37 }
 0x240   :  { %4557 = vmatpush.bf16.msrb.mxu2 %v14729_v30  ;;  %v14984_v30 = vld [vmem:[#allocation6 + $0x588] sm:$0xf] }
 0x241   :  { %v14985_v55 = vor.u32 %v19265_v46, %v14984_v30 }
 0x242   :  { %4832 = vmatpush.bf16.msrb.mxu3 %v14901_v9  ;;  %4856 = vmatpush.bf16.msra.mxu1 %v14937_v54  ;;  %v14849_v9 = vor.u32 %v19232_v23, %v14848_v31  ;;  %v3512_v54 = vpop.f32.mrf.mxu1  ;;  %v19241_v31 = vld [vmem:[#allocation6 + $0x4d4] sm:$0xf0]  ;;  %v19251_v23 = vld [vmem:[#allocation6 + $0x52c] sm:$0xf]  ;;  %v3257_v46 = vpop.f32.mrf.mxu2 }
 0x243   :  { %4808 = vmatpush.bf16.msra.mxu0 %v14865_v17  ;;  %v14957_v17 = vor.u32 %v19255_v42, %v14954_v0  ;;  %v3499_v8 = vpop.f32.mrf.mxu0  ;;  %v21066_v42 = vadd.f32 %v3270_v28, %v3257_v46  ;;  %v14872_v0 = vld [vmem:[#allocation6 + $0x4a8] sm:$0xf]  ;;  %v19290_v28 = vld [vmem:[#allocation6 + $0x664] sm:$0xf] }
 0x244   :  { %4558 = vmatpush.bf16.msrb.mxu2 %v14713_v52  ;;  %v14905_v52 = vor.u32 %v19245_v43, %v14904_v13  ;;  %v21062_v30 = vadd.f32 %v3512_v54, %v3499_v8  ;;  %v19294_v13 = vld [vmem:[#allocation6 + $0x684] sm:$0xf]  ;;  %v15110_v43 = vld [vmem:[#allocation6 + $0x690] sm:$0xf0]  ;;  %v14922_v54 = vld [vmem:[#allocation6 + $0x518] sm:$0xf0] }
 0x245   :  { %14990 = vmatmul.msk.bf16.vlgmr.msrb.gmra.mxu1 %vm360_vm0, %v20800_v24  ;;  %21799 = vst [vmem:[#allocation38_spill] sm:$0xff] %v21066_v42  ;;  %v15113_v37 = vor.u32 %v19294_v13, %v15110_v43  ;;  %v15094_v8 = vld [vmem:[#allocation6 + $0x670] sm:$0xf0]  ;;  %v19300_v13 = vld [vmem:[#allocation6 + $0x6ac] sm:$0xf0] }
 0x246   :  { %4833 = vmatpush.bf16.msrb.mxu3 %v14885_v18  ;;  %4857 = vmatpush.bf16.msra.mxu1 %v14921_v50  ;;  %v14888_v18 = vld [vmem:[#allocation6 + $0x4c8] sm:$0xf]  ;;  %v14989_v50 = vor.u32 %v19263_v33, %v14986_v2  ;;  %v15076_v33 = vld [vmem:[#allocation6 + $0x640] sm:$0xf]  ;;  %v19288_v2 = vld [vmem:[#allocation6 + $0x64c] sm:$0xf0] }
 0x247   :  { %4559 = vmatmul.bf16.vlgmr.msrb.gmra.mxu2 %v20826_v36  ;;  %4809 = vmatpush.bf16.msra.mxu0 %v14849_v9  ;;  %v3272_v9 = vpop.f32.mrf.mxu3  ;;  %v19297_v42 = vld [vmem:[#allocation6 + $0x694] sm:$0xf0] }
 0x248   :  { %4848 = vmatpush.bf16.msra.mxu2 %v14981_v58  ;;  %v15109_v58 = vor.u32 %v19296_v27, %v15108_v34  ;;  %v14941_v27 = vor.u32 %v19251_v23, %v14938_v16  ;;  %v19237_v34 = vld [vmem:[#allocation6 + $0x4b4] sm:$0xf0]  ;;  %v15077_v16 = vor.u32 %v19288_v2, %v15076_v33  ;;  %v19284_v9 = vld [vmem:[#allocation6 + $0x62c] sm:$0xf0]  ;;  %v19239_v33 = vld [vmem:[#allocation6 + $0x4cc] sm:$0xf] }
 0x249   :  { %v14890_v2 = vld [vmem:[#allocation6 + $0x4d8] sm:$0xf0] }
 0x24a   :  { %4834 = vmatpush.bf16.msrb.mxu3 %v14869_v26  ;;  %4858 = vmatpush.bf16.msra.mxu1 %v14905_v52  ;;  %v14889_v26 = vor.u32 %v19241_v31, %v14888_v18  ;;  %v3514_v46 = vpop.f32.mrf.mxu1  ;;  %v14873_v52 = vor.u32 %v19237_v34, %v14872_v0  ;;  %v14856_v18 = vld [vmem:[#allocation6 + $0x488] sm:$0xf]  ;;  %v19233_v31 = vld [vmem:[#allocation6 + $0x494] sm:$0xf0]  ;;  %v3259_v43 = vpop.f32.mrf.mxu2  ;;  %v15078_v0 = vld [vmem:[#allocation6 + $0x650] sm:$0xf0] }
 0x24b   :  { %4874 = vmatpush.bf16.msrb.mxu0 %v14985_v55  ;;  %v19247_v55 = vld [vmem:[#allocation6 + $0x50c] sm:$0xf]  ;;  %v3501_v23 = vpop.f32.mrf.mxu0  ;;  %v14857_v46 = vor.u32 %v19233_v31, %v14856_v18  ;;  %v15062_v43 = vld [vmem:[#allocation6 + $0x630] sm:$0xf0]  ;;  %v15100_v31 = vld [vmem:[#allocation6 + $0x668] sm:$0xf] }
 0x24c   :  { %4880 = vmatpush.bf16.msrb.mxu2 %v14973_v59  ;;  %v19292_v59 = vld [vmem:[#allocation6 + $0x66c] sm:$0xf0]  ;;  %4810 = vmatmul.bf16.vlgmr.msra.gmra.mxu0 %v20826_v36  ;;  %v19282_v23 = vld [vmem:[#allocation6 + $0x624] sm:$0xf] }
 0x24d   :  { %v15093_v61 = vor.u32 %v19292_v59, %v15092_v21  ;;  %v15097_v21 = vor.u32 %v19290_v28, %v15094_v8  ;;  %v15124_v59 = vld [vmem:[#allocation6 + $0x6a0] sm:$0xf]  ;;  %v19280_v8 = vld [vmem:[#allocation6 + $0x60c] sm:$0xf0] }
 0x24e   :  { %4835 = vmatpush.bf16.msrb.mxu3 %v14853_v32  ;;  %4859 = vmatpush.bf16.msra.mxu1 %v14889_v26  ;;  %v19243_v32 = vld [vmem:[#allocation6 + $0x4ec] sm:$0xf]  ;;  %v19286_v26 = vld [vmem:[#allocation6 + $0x644] sm:$0xf]  ;;  %v15044_v28 = vld [vmem:[#allocation6 + $0x600] sm:$0xf] }
 0x24f   :  { %5131 = vmatpush.bf16.msra.mxu0 %v15109_v58  ;;  %v15060_v58 = vld [vmem:[#allocation6 + $0x620] sm:$0xf]  ;;  %v3525_v34 = vpop.f32.mrf.mxu3 }
 0x250   :  { %4881 = vmatpush.bf16.msrb.mxu2 %v14957_v17  ;;  %v14925_v17 = vor.u32 %v19247_v55, %v14922_v54  ;;  %v15125_v55 = vor.u32 %v19300_v13, %v15124_v59  ;;  %v15116_v54 = vld [vmem:[#allocation6 + $0x688] sm:$0xf]  ;;  %v14874_v59 = vld [vmem:[#allocation6 + $0x4b8] sm:$0xf0]  ;;  %v15028_v13 = vld [vmem:[#allocation6 + $0x5e0] sm:$0xf] }
 0x251   :  { %4836 = vmatmul.bf16.vlgmr.msrb.gmra.mxu3 %v20826_v36  ;;  %v15117_v18 = vor.u32 %v19297_v42, %v15116_v54  ;;  %v15046_v42 = vld [vmem:[#allocation6 + $0x610] sm:$0xf0] }
 0x252   :  { %4900 = vmatpush.bf16.msra.mxu3 %v14989_v50  ;;  %v14906_v50 = vld [vmem:[#allocation6 + $0x4f8] sm:$0xf0]  ;;  %4860 = vmatpush.bf16.msra.mxu1 %v14873_v52  ;;  %v3551_v52 = vpop.f32.mrf.mxu1 }
 0x253   :  { %5132 = vmatpush.bf16.msra.mxu0 %v15093_v61  ;;  %v15061_v61 = vor.u32 %v19284_v9, %v15060_v58  ;;  %v15045_v58 = vor.u32 %v19280_v8, %v15044_v28 }
 0x254   :  { %4882 = vmatpush.bf16.msrb.mxu2 %v14941_v27  ;;  %v14909_v27 = vor.u32 %v19243_v32, %v14906_v50  ;;  %v19293_v32 = vld [vmem:[#allocation6 + $0x674] sm:$0xf0]  ;;  %v19235_v50 = vld [vmem:[#allocation6 + $0x4ac] sm:$0xf] }
 0x255   :  { %v15101_v54 = vor.u32 %v19293_v32, %v15100_v31  ;;  %v15030_v31 = vld [vmem:[#allocation6 + $0x5f0] sm:$0xf0] }
 0x256   :  { %5157 = vmatpush.bf16.msrb.mxu3 %v15113_v37  ;;  %v15081_v37 = vor.u32 %v19286_v26, %v15078_v0  ;;  %4861 = vmatpush.bf16.msra.mxu1 %v14857_v46  ;;  %v3538_v26 = vpop.f32.mrf.mxu2  ;;  %v19276_v0 = vld [vmem:[#allocation6 + $0x5ec] sm:$0xf0]  ;;  %v19278_v46 = vld [vmem:[#allocation6 + $0x604] sm:$0xf] }
 0x257   :  { %5133 = vmatpush.bf16.msra.mxu0 %v15077_v16  ;;  %14991 = vmatmul.msk.bf16.vlgmr.msra.gmra.mxu2 %vm360_vm0, %v20800_v24  ;;  %v3564_v16 = vpop.f32.mrf.mxu0  ;;  %v15029_v28 = vor.u32 %v19276_v0, %v15028_v13  ;;  %v15049_v8 = vor.u32 %v19278_v46, %v15046_v42  ;;  %v19295_v0 = vld [vmem:[#allocation6 + $0x68c] sm:$0xf]  ;;  %v15118_v46 = vld [vmem:[#allocation6 + $0x698] sm:$0xf0] }
 0x258   :  { %4883 = vmatpush.bf16.msrb.mxu2 %v14925_v17  ;;  %v14893_v17 = vor.u32 %v19239_v33, %v14890_v2  ;;  %v3565_v9 = vadd.f32 %v3564_v16, %v3551_v52  ;;  %v15084_v33 = vld [vmem:[#allocation6 + $0x648] sm:$0xf]  ;;  %v19289_v2 = vld [vmem:[#allocation6 + $0x654] sm:$0xf0]  ;;  %v19272_v52 = vld [vmem:[#allocation6 + $0x5cc] sm:$0xf0] }
 0x259   :  { %4862 = vmatmul.bf16.vlgmr.msra.gmra.mxu1 %v20826_v36  ;;  %v19298_v16 = vld [vmem:[#allocation6 + $0x6a4] sm:$0xf] }
 0x25a   :  { %5158 = vmatpush.bf16.msrb.mxu3 %v15097_v21  ;;  %5151 = vmatpush.bf16.msrb.mxu1 %v15125_v55  ;;  %v15065_v21 = vor.u32 %v19282_v23, %v15062_v43  ;;  %v21073_v55 = vadd.f32 %v3538_v26, %v3525_v34  ;;  %v19231_v23 = vld [vmem:[#allocation6 + $0x48c] sm:$0xf]  ;;  %v14858_v43 = vld [vmem:[#allocation6 + $0x498] sm:$0xf0]  ;;  %v15012_v34 = vld [vmem:[#allocation6 + $0x5c0] sm:$0xf]  ;;  %v3553_v32 = vpop.f32.mrf.mxu1 }
 0x25b   :  { %5134 = vmatpush.bf16.msra.mxu0 %v15061_v61  ;;  %v21076_v61 = vmul.f32 %v3565_v9, %v20891_v39  ;;  %v15085_v39 = vor.u32 %v19289_v2, %v15084_v33  ;;  %v15126_v9 = vld [vmem:[#allocation6 + $0x6b0] sm:$0xf0]  ;;  %v14996_v26 = vld [vmem:[#allocation6 + $0x5a0] sm:$0xf]  ;;  %v19270_v33 = vld [vmem:[#allocation6 + $0x5c4] sm:$0xf] }
 0x25c   :  { %4884 = vmatpush.bf16.msrb.mxu2 %v14909_v27  ;;  %v3527_v27 = vpop.f32.mrf.mxu3  ;;  %14992 = vmatmul.msk.bf16.vlgmr.msrb.gmra.mxu0 %vm360_vm0, %v20800_v24  ;;  %v15014_v2 = vld [vmem:[#allocation6 + $0x5d0] sm:$0xf0] }
 0x25d   :  { %v15129_v27 = vor.u32 %v19298_v16, %v15126_v9  ;;  %v19266_v9 = vld [vmem:[#allocation6 + $0x5a4] sm:$0xf] }
 0x25e   :  { %5159 = vmatpush.bf16.msrb.mxu3 %v15081_v37  ;;  %5183 = vmatpush.bf16.msra.mxu1 %v15117_v18  ;;  %v14877_v37 = vor.u32 %v19235_v50, %v14874_v59  ;;  %v19274_v18 = vld [vmem:[#allocation6 + $0x5e4] sm:$0xf]  ;;  %v15013_v59 = vor.u32 %v19272_v52, %v15012_v34  ;;  %v3540_v42 = vpop.f32.mrf.mxu2  ;;  %v15017_v34 = vor.u32 %v19270_v33, %v15014_v2  ;;  %v19291_v52 = vld [vmem:[#allocation6 + $0x66c] sm:$0xf]  ;;  %v15086_v33 = vld [vmem:[#allocation6 + $0x658] sm:$0xf0] }
 0x25f   :  { %5135 = vmatpush.bf16.msra.mxu0 %v15045_v58  ;;  %v15068_v58 = vld [vmem:[#allocation6 + $0x628] sm:$0xf]  ;;  %v3566_v50 = vpop.f32.mrf.mxu0  ;;  %v15033_v13 = vor.u32 %v19274_v18, %v15030_v31  ;;  %v15102_v18 = vld [vmem:[#allocation6 + $0x678] sm:$0xf0]  ;;  %v15256_v31 = vld [vmem:[#allocation6 + $0x7a0] sm:$0xf] }
 0x260   :  { %4885 = vmatpush.bf16.msrb.mxu2 %v14893_v17  ;;  %v14861_v17 = vor.u32 %v19231_v23, %v14858_v43  ;;  %v19301_v23 = vld [vmem:[#allocation6 + $0x6b4] sm:$0xf0]  ;;  %v15121_v43 = vor.u32 %v19295_v0, %v15118_v46  ;;  %v15052_v50 = vld [vmem:[#allocation6 + $0x608] sm:$0xf]  ;;  %v14998_v42 = vld [vmem:[#allocation6 + $0x5b0] sm:$0xf0] }
 0x261   :  { %14993 = vmatmul.msk.bf16.vlgmr.msra.gmra.mxu3 %vm360_vm0, %v20800_v24  ;;  %v15001_v46 = vor.u32 %v19266_v9, %v14998_v42  ;;  %v15240_v2 = vld [vmem:[#allocation6 + $0x780] sm:$0xf]  ;;  %v15020_v9 = vld [vmem:[#allocation6 + $0x5c8] sm:$0xf]  ;;  %v19273_v42 = vld [vmem:[#allocation6 + $0x5d4] sm:$0xf0] }
 0x262   :  { %5160 = vmatpush.bf16.msrb.mxu3 %v15065_v21  ;;  %5184 = vmatpush.bf16.msra.mxu1 %v15101_v54  ;;  %v19285_v21 = vld [vmem:[#allocation6 + $0x634] sm:$0xf0]  ;;  %v19268_v54 = vld [vmem:[#allocation6 + $0x5ac] sm:$0xf0] }
 0x263   :  { %5136 = vmatpush.bf16.msra.mxu0 %v15029_v28  ;;  %v15069_v5 = vor.u32 %v19285_v21, %v15068_v58  ;;  %v19281_v28 = vld [vmem:[#allocation6 + $0x614] sm:$0xf0]  ;;  %v19299_v58 = vld [vmem:[#allocation6 + $0x6ac] sm:$0xf]  ;;  %v15134_v21 = vld [vmem:[#allocation6 + $0x6b8] sm:$0xf0] }
 0x264   :  { %4886 = vmatpush.bf16.msrb.mxu2 %v14877_v37  ;;  %v3590_v32 = vpop.f32.mrf.mxu3  ;;  %v15132_v37 = vld [vmem:[#allocation6 + $0x6a8] sm:$0xf] }
 0x265   :  { %v15133_v16 = vor.u32 %v19301_v23, %v15132_v37 }
 0x266   :  { %5161 = vmatpush.bf16.msrb.mxu3 %v15049_v8  ;;  %5185 = vmatpush.bf16.msra.mxu1 %v15085_v39  ;;  %v14997_v8 = vor.u32 %v19268_v54, %v14996_v26  ;;  %v3837_v39 = vpop.f32.mrf.mxu1  ;;  %v19277_v26 = vld [vmem:[#allocation6 + $0x5f4] sm:$0xf0]  ;;  %v19287_v54 = vld [vmem:[#allocation6 + $0x64c] sm:$0xf]  ;;  %v3577_v23 = vpop.f32.mrf.mxu2 }
 0x267   :  { %5137 = vmatpush.bf16.msra.mxu0 %v15013_v59  ;;  %v15105_v59 = vor.u32 %v19291_v52, %v15102_v18  ;;  %v3824_v0 = vpop.f32.mrf.mxu0  ;;  %v3591_v52 = vadd.f32 %v3590_v32, %v3577_v23 }
 0x268   :  { %4887 = vmatpush.bf16.msrb.mxu2 %v14861_v17  ;;  %v15053_v17 = vor.u32 %v19281_v28, %v15052_v50  ;;  %v3838_v37 = vadd.f32 %v3837_v39, %v3824_v0  ;;  %v19328_v50 = vld [vmem:[#allocation6 + $0x78c] sm:$0xf0]  ;;  %v15258_v28 = vld [vmem:[#allocation6 + $0x7b0] sm:$0xf0] }
 0x269   :  { %15138 = vmatmul.msk.bf16.vlgmr.msrb.gmra.mxu1 %vm360_vm0, %v20800_v24  ;;  %v15241_v32 = vor.u32 %v19328_v50, %v15240_v2  ;;  %v15242_v0 = vld [vmem:[#allocation6 + $0x790] sm:$0xf0]  ;;  %v15208_v2 = vld [vmem:[#allocation6 + $0x740] sm:$0xf] }
 0x26a   :  { %5162 = vmatpush.bf16.msrb.mxu3 %v15033_v13  ;;  %5186 = vmatpush.bf16.msra.mxu1 %v15069_v5  ;;  %v15036_v13 = vld [vmem:[#allocation6 + $0x5e8] sm:$0xf]  ;;  %v15137_v5 = vor.u32 %v19299_v58, %v15134_v21  ;;  %v15070_v58 = vld [vmem:[#allocation6 + $0x638] sm:$0xf0]  ;;  %v15224_v21 = vld [vmem:[#allocation6 + $0x760] sm:$0xf] }
 0x26b   :  { %4888 = vmatmul.bf16.vlgmr.msrb.gmra.mxu2 %v20826_v36  ;;  %5138 = vmatpush.bf16.msra.mxu0 %v14997_v8  ;;  %v15037_v8 = vor.u32 %v19277_v26, %v15036_v13  ;;  %v19326_v26 = vld [vmem:[#allocation6 + $0x784] sm:$0xf] }
 0x26c   :  { %5177 = vmatpush.bf16.msra.mxu2 %v15129_v27  ;;  %v15257_v27 = vor.u32 %v19332_v20, %v15256_v31  ;;  %v3592_v18 = vpop.f32.mrf.mxu3  ;;  %v3594_v20 = vmul.f32 %v21062_v30, %v20886_v53  ;;  %v15089_v31 = vor.u32 %v19287_v54, %v15086_v33  ;;  %v19324_v30 = vld [vmem:[#allocation6 + $0x76c] sm:$0xf0]  ;;  %v15021_v54 = vor.u32 %v19273_v42, %v15020_v9  ;;  %v15004_v33 = vld [vmem:[#allocation6 + $0x5a8] sm:$0xf] }
 0x26d   :  { %v15225_v23 = vor.u32 %v19324_v30, %v15224_v21  ;;  %v15245_v50 = vor.u32 %v19326_v26, %v15242_v0  ;;  %v19320_v18 = vld [vmem:[#allocation6 + $0x74c] sm:$0xf0]  ;;  %v19275_v21 = vld [vmem:[#allocation6 + $0x5ec] sm:$0xf]  ;;  %v15038_v30 = vld [vmem:[#allocation6 + $0x5f8] sm:$0xf0] }
 0x26e   :  { %5163 = vmatpush.bf16.msrb.mxu3 %v15017_v34  ;;  %5187 = vmatpush.bf16.msra.mxu1 %v15053_v17  ;;  %v3919_v34 = vmul.f32 %v3838_v37, %v20901_v60  ;;  %v19283_v17 = vld [vmem:[#allocation6 + $0x62c] sm:$0xf]  ;;  %v15192_v26 = vld [vmem:[#allocation6 + $0x720] sm:$0xf]  ;;  %v19316_v0 = vld [vmem:[#allocation6 + $0x72c] sm:$0xf0] }
 0x26f   :  { %5203 = vmatpush.bf16.msrb.mxu0 %v15133_v16  ;;  %v21090_v16 = vmul.f32 %v3591_v52, %v20904_v49  ;;  %v15073_v49 = vor.u32 %v19283_v17, %v15070_v58  ;;  %v3826_v37 = vpop.f32.mrf.mxu0  ;;  %v3579_v52 = vpop.f32.mrf.mxu2  ;;  %v15264_v17 = vld [vmem:[#allocation6 + $0x7a8] sm:$0xf]  ;;  %v19333_v58 = vld [vmem:[#allocation6 + $0x7b4] sm:$0xf0] }
 0x270   :  { %5209 = vmatpush.bf16.msrb.mxu2 %v15121_v43  ;;  %v19330_v43 = vld [vmem:[#allocation6 + $0x7a4] sm:$0xf]  ;;  %5139 = vmatmul.bf16.vlgmr.msra.gmra.mxu0 %v20826_v36  ;;  %v21092_v13 = vadd.f32 %v3919_v34, %v3594_v20  ;;  %v15226_v20 = vld [vmem:[#allocation6 + $0x770] sm:$0xf0] }
 0x271   :  { %v15261_v39 = vor.u32 %v19330_v43, %v15258_v28  ;;  %v15272_v43 = vld [vmem:[#allocation6 + $0x7c0] sm:$0xf]  ;;  %v19336_v28 = vld [vmem:[#allocation6 + $0x7cc] sm:$0xf0]  ;;  %v15210_v37 = vld [vmem:[#allocation6 + $0x750] sm:$0xf0] }
 0x272   :  { %5164 = vmatpush.bf16.msrb.mxu3 %v15001_v46  ;;  %5188 = vmatpush.bf16.msra.mxu1 %v15037_v8  ;;  %v19269_v46 = vld [vmem:[#allocation6 + $0x5b4] sm:$0xf0]  ;;  %v19322_v8 = vld [vmem:[#allocation6 + $0x764] sm:$0xf]  ;;  %v15273_v42 = vor.u32 %v19336_v28, %v15272_v43  ;;  %v15022_v43 = vld [vmem:[#allocation6 + $0x5d8] sm:$0xf0] }
 0x273   :  { %5460 = vmatpush.bf16.msra.mxu0 %v15257_v27  ;;  %v19279_v27 = vld [vmem:[#allocation6 + $0x60c] sm:$0xf]  ;;  %v15005_v9 = vor.u32 %v19269_v46, %v15004_v33  ;;  %v15265_v33 = vor.u32 %v19333_v58, %v15264_v17  ;;  %v15248_v46 = vld [vmem:[#allocation6 + $0x788] sm:$0xf]  ;;  %v15176_v28 = vld [vmem:[#allocation6 + $0x700] sm:$0xf]  ;;  %v3595_v58 = vmul.f32 %v21073_v55, %v20880_v38 }
 0x274   :  { %5210 = vmatpush.bf16.msrb.mxu2 %v15105_v59  ;;  %v3839_v59 = vpop.f32.mrf.mxu1  ;;  %v3850_v34 = vpop.f32.mrf.mxu3 }
 0x275   :  { %5165 = vmatmul.bf16.vlgmr.msrb.gmra.mxu3 %v20826_v36  ;;  %v19318_v59 = vld [vmem:[#allocation6 + $0x744] sm:$0xf] }
 0x276   :  { %5229 = vmatpush.bf16.msra.mxu3 %v15137_v5  ;;  %v15054_v5 = vld [vmem:[#allocation6 + $0x618] sm:$0xf0]  ;;  %5189 = vmatpush.bf16.msra.mxu1 %v15021_v54 }
 0x277   :  { %5461 = vmatpush.bf16.msra.mxu0 %v15241_v32  ;;  %v15209_v32 = vor.u32 %v19320_v18, %v15208_v2  ;;  %v15193_v2 = vor.u32 %v19316_v0, %v15192_v26  ;;  %v3863_v18 = vpop.f32.mrf.mxu2 }
 0x278   :  { %5211 = vmatpush.bf16.msrb.mxu2 %v15089_v31  ;;  %v15057_v31 = vor.u32 %v19279_v27, %v15054_v5  ;;  %v19329_v27 = vld [vmem:[#allocation6 + $0x794] sm:$0xf0]  ;;  %v19271_v5 = vld [vmem:[#allocation6 + $0x5cc] sm:$0xf] }
 0x279   :  { %v15249_v17 = vor.u32 %v19329_v27, %v15248_v46  ;;  %v15178_v46 = vld [vmem:[#allocation6 + $0x710] sm:$0xf0] }
 0x27a   :  { %5486 = vmatpush.bf16.msrb.mxu3 %v15261_v39  ;;  %v15229_v39 = vor.u32 %v19322_v8, %v15226_v20  ;;  %5190 = vmatpush.bf16.msra.mxu1 %v15005_v9  ;;  %v19312_v8 = vld [vmem:[#allocation6 + $0x70c] sm:$0xf0]  ;;  %v19314_v20 = vld [vmem:[#allocation6 + $0x724] sm:$0xf]  ;;  %v15194_v9 = vld [vmem:[#allocation6 + $0x730] sm:$0xf0] }
 0x27b   :  { %5462 = vmatpush.bf16.msra.mxu0 %v15225_v23  ;;  %15139 = vmatmul.msk.bf16.vlgmr.msra.gmra.mxu2 %vm360_vm0, %v20800_v24  ;;  %v3889_v23 = vpop.f32.mrf.mxu0  ;;  %v15177_v0 = vor.u32 %v19312_v8, %v15176_v28  ;;  %v19321_v28 = vld [vmem:[#allocation6 + $0x754] sm:$0xf0]  ;;  %v15144_v8 = vld [vmem:[#allocation6 + $0x6c0] sm:$0xf] }
 0x27c   :  { %5212 = vmatpush.bf16.msrb.mxu2 %v15073_v49  ;;  %v3876_v54 = vpop.f32.mrf.mxu1  ;;  %v15041_v49 = vor.u32 %v19275_v21, %v15038_v30  ;;  %v15232_v21 = vld [vmem:[#allocation6 + $0x768] sm:$0xf]  ;;  %v19325_v30 = vld [vmem:[#allocation6 + $0x774] sm:$0xf0] }
 0x27d   :  { %v3890_v52 = vadd.f32 %v3889_v23, %v3876_v54  ;;  %5191 = vmatmul.bf16.vlgmr.msra.gmra.mxu1 %v20826_v36  ;;  %v15160_v54 = vld [vmem:[#allocation6 + $0x6e0] sm:$0xf]  ;;  %v15233_v23 = vor.u32 %v19325_v30, %v15232_v21 }
 0x27e   :  { %5487 = vmatpush.bf16.msrb.mxu3 %v15245_v50  ;;  %5480 = vmatpush.bf16.msrb.mxu1 %v15273_v42  ;;  %v15213_v50 = vor.u32 %v19318_v59, %v15210_v37  ;;  %v3864_v42 = vadd.f32 %v3863_v18, %v3850_v34  ;;  %v15197_v34 = vor.u32 %v19314_v20, %v15194_v9  ;;  %v19267_v59 = vld [vmem:[#allocation6 + $0x5ac] sm:$0xf]  ;;  %v15006_v37 = vld [vmem:[#allocation6 + $0x5b8] sm:$0xf0] }
 0x27f   :  { %5463 = vmatpush.bf16.msra.mxu0 %v15209_v32  ;;  %v3921_v32 = vmul.f32 %v3890_v52, %v20912_v48  ;;  %v19308_v48 = vld [vmem:[#allocation6 + $0x6ec] sm:$0xf0]  ;;  %v19331_v20 = vld [vmem:[#allocation6 + $0x7ac] sm:$0xf]  ;;  %v15266_v9 = vld [vmem:[#allocation6 + $0x7b8] sm:$0xf0] }
 0x280   :  { %5213 = vmatpush.bf16.msrb.mxu2 %v15057_v31  ;;  %v3852_v31 = vpop.f32.mrf.mxu3  ;;  %15140 = vmatmul.msk.bf16.vlgmr.msrb.gmra.mxu0 %vm360_vm0, %v20800_v24  ;;  %v3920_v26 = vmul.f32 %v3864_v42, %v20914_v56 }
 0x281   :  { %v21105_v55 = vadd.f32 %v3921_v32, %v21076_v61  ;;  %v15161_v61 = vor.u32 %v19308_v48, %v15160_v54  ;;  %v3865_v31 = vpop.f32.mrf.mxu2  ;;  %v15162_v32 = vld [vmem:[#allocation6 + $0x6f0] sm:$0xf0]  ;;  %v19327_v48 = vld [vmem:[#allocation6 + $0x78c] sm:$0xf] }
 0x282   :  { %5488 = vmatpush.bf16.msrb.mxu3 %v15229_v39  ;;  %5512 = vmatpush.bf16.msra.mxu1 %v15265_v33  ;;  %v15025_v39 = vor.u32 %v19271_v5, %v15022_v43  ;;  %v19310_v33 = vld [vmem:[#allocation6 + $0x704] sm:$0xf]  ;;  %v21107_v27 = vadd.f32 %v3920_v26, %v3595_v58  ;;  %v15274_v43 = vld [vmem:[#allocation6 + $0x7d0] sm:$0xf0]  ;;  %v19337_v26 = vld [vmem:[#allocation6 + $0x7d4] sm:$0xf0] }
 0x283   :  { %5464 = vmatpush.bf16.msra.mxu0 %v15193_v2  ;;  %v19334_v5 = vld [vmem:[#allocation6 + $0x7c4] sm:$0xf]  ;;  %v15009_v2 = vor.u32 %v19267_v59, %v15006_v37  ;;  %v3891_v52 = vpop.f32.mrf.mxu0  ;;  %v15181_v18 = vor.u32 %v19310_v33, %v15178_v46  ;;  %v15269_v59 = vor.u32 %v19331_v20, %v15266_v9  ;;  %v15200_v37 = vld [vmem:[#allocation6 + $0x728] sm:$0xf]  ;;  %v15250_v33 = vld [vmem:[#allocation6 + $0x798] sm:$0xf0] }
 0x284   :  { %5214 = vmatpush.bf16.msrb.mxu2 %v15041_v49  ;;  %v3878_v49 = vpop.f32.mrf.mxu1  ;;  %v15277_v42 = vor.u32 %v19334_v5, %v15274_v43  ;;  %v19306_v58 = vld [vmem:[#allocation6 + $0x6e4] sm:$0xf]  ;;  %v15404_v46 = vld [vmem:[#allocation6 + $0x8c0] sm:$0xf]  ;;  %v15146_v43 = vld [vmem:[#allocation6 + $0x6d0] sm:$0xf0] }
 0x285   :  { %15141 = vmatmul.msk.bf16.vlgmr.msra.gmra.mxu3 %vm360_vm0, %v20800_v24  ;;  %v15165_v54 = vor.u32 %v19306_v58, %v15162_v32  ;;  %v19302_v5 = vld [vmem:[#allocation6 + $0x6c4] sm:$0xf]  ;;  %v19368_v52 = vld [vmem:[#allocation6 + $0x8cc] sm:$0xf0]  ;;  %v15388_v58 = vld [vmem:[#allocation6 + $0x8a0] sm:$0xf] }
 0x286   :  { %5489 = vmatpush.bf16.msrb.mxu3 %v15213_v50  ;;  %5513 = vmatpush.bf16.msra.mxu1 %v15249_v17  ;;  %v15216_v50 = vld [vmem:[#allocation6 + $0x748] sm:$0xf]  ;;  %v19304_v17 = vld [vmem:[#allocation6 + $0x6cc] sm:$0xf0]  ;;  %v15149_v9 = vor.u32 %v19302_v5, %v15146_v43  ;;  %v15405_v31 = vor.u32 %v19368_v52, %v15404_v46  ;;  %v19309_v5 = vld [vmem:[#allocation6 + $0x6f4] sm:$0xf0] }
 0x287   :  { %5465 = vmatpush.bf16.msra.mxu0 %v15177_v0  ;;  %v15217_v30 = vor.u32 %v19321_v28, %v15216_v50  ;;  %v19317_v0 = vld [vmem:[#allocation6 + $0x734] sm:$0xf0]  ;;  %v19335_v50 = vld [vmem:[#allocation6 + $0x7cc] sm:$0xf]  ;;  %v15282_v28 = vld [vmem:[#allocation6 + $0x7d8] sm:$0xf0] }
 0x288   :  { %5215 = vmatpush.bf16.msrb.mxu2 %v15025_v39  ;;  %v3915_v21 = vpop.f32.mrf.mxu3  ;;  %v15280_v39 = vld [vmem:[#allocation6 + $0x7c8] sm:$0xf] }
 0x289   :  { %v15281_v49 = vor.u32 %v19337_v26, %v15280_v39  ;;  %v3902_v39 = vpop.f32.mrf.mxu2  ;;  %v19364_v26 = vld [vmem:[#allocation6 + $0x8ac] sm:$0xf0]  ;;  %v15168_v46 = vld [vmem:[#allocation6 + $0x6e8] sm:$0xf] }
 0x28a   :  { %5490 = vmatpush.bf16.msrb.mxu3 %v15197_v34  ;;  %5514 = vmatpush.bf16.msra.mxu1 %v15233_v23  ;;  %v15145_v34 = vor.u32 %v19304_v17, %v15144_v8  ;;  %v19313_v8 = vld [vmem:[#allocation6 + $0x714] sm:$0xf0]  ;;  %v15234_v17 = vld [vmem:[#allocation6 + $0x778] sm:$0xf0] }
 0x28b   :  { %5466 = vmatpush.bf16.msra.mxu0 %v15161_v61  ;;  %v15253_v61 = vor.u32 %v19327_v48, %v15250_v33  ;;  %v4153_v20 = vpop.f32.mrf.mxu0 }
 0x28c   :  { %5216 = vmatpush.bf16.msrb.mxu2 %v15009_v2  ;;  %v4166_v23 = vpop.f32.mrf.mxu1  ;;  %v15201_v2 = vor.u32 %v19317_v0, %v15200_v37  ;;  %v15406_v37 = vld [vmem:[#allocation6 + $0x8d0] sm:$0xf0]  ;;  %v3916_v0 = vadd.f32 %v3915_v21, %v3902_v39  ;;  %v15372_v21 = vld [vmem:[#allocation6 + $0x880] sm:$0xf] }
 0x28d   :  { %v4167_v32 = vadd.f32 %v4166_v23, %v4153_v20  ;;  %15286 = vmatmul.msk.bf16.vlgmr.msrb.gmra.mxu1 %vm360_vm0, %v20800_v24  ;;  %v19319_v23 = vld [vmem:[#allocation6 + $0x74c] sm:$0xf] }
 0x28e   :  { %5491 = vmatpush.bf16.msrb.mxu3 %v15181_v18  ;;  %5515 = vmatpush.bf16.msra.mxu1 %v15217_v30  ;;  %v15184_v18 = vld [vmem:[#allocation6 + $0x708] sm:$0xf]  ;;  %v15285_v30 = vor.u32 %v19335_v50, %v15282_v28  ;;  %v3922_v43 = vmul.f32 %v3916_v0, %v20924_v3  ;;  %v15218_v50 = vld [vmem:[#allocation6 + $0x758] sm:$0xf0]  ;;  %v19360_v28 = vld [vmem:[#allocation6 + $0x88c] sm:$0xf0]  ;;  %v15169_v3 = vor.u32 %v19309_v5, %v15168_v46 }
 0x28f   :  { %5217 = vmatmul.bf16.vlgmr.msrb.gmra.mxu2 %v20826_v36  ;;  %5467 = vmatpush.bf16.msra.mxu0 %v15145_v34  ;;  %v15185_v34 = vor.u32 %v19313_v8, %v15184_v18  ;;  %v19362_v18 = vld [vmem:[#allocation6 + $0x8a4] sm:$0xf]  ;;  %v15390_v8 = vld [vmem:[#allocation6 + $0x8b0] sm:$0xf0]  ;;  %v15412_v5 = vld [vmem:[#allocation6 + $0x8c8] sm:$0xf] }
 0x290   :  { %5506 = vmatpush.bf16.msra.mxu2 %v15277_v42  ;;  %v19323_v42 = vld [vmem:[#allocation6 + $0x76c] sm:$0xf]  ;;  %v3917_v48 = vpop.f32.mrf.mxu3  ;;  %v15393_v39 = vor.u32 %v19362_v18, %v15390_v8  ;;  %v19358_v0 = vld [vmem:[#allocation6 + $0x884] sm:$0xf]  ;;  %v15358_v8 = vld [vmem:[#allocation6 + $0x870] sm:$0xf0] }
 0x291   :  { %v15237_v33 = vor.u32 %v19323_v42, %v15234_v17  ;;  %v19305_v42 = vld [vmem:[#allocation6 + $0x6d4] sm:$0xf0]  ;;  %v19315_v17 = vld [vmem:[#allocation6 + $0x72c] sm:$0xf]  ;;  %v15374_v48 = vld [vmem:[#allocation6 + $0x890] sm:$0xf0] }
 0x292   :  { %5492 = vmatpush.bf16.msrb.mxu3 %v15165_v54  ;;  %5516 = vmatpush.bf16.msra.mxu1 %v15201_v2  ;;  %v4248_v54 = vmul.f32 %v4167_v32, %v20922_v62  ;;  %v15373_v32 = vor.u32 %v19360_v28, %v15372_v21  ;;  %v15340_v21 = vld [vmem:[#allocation6 + $0x840] sm:$0xf]  ;;  %v19352_v28 = vld [vmem:[#allocation6 + $0x84c] sm:$0xf0]  ;;  %v19354_v18 = vld [vmem:[#allocation6 + $0x864] sm:$0xf] }
 0x293   :  { %5532 = vmatpush.bf16.msrb.mxu0 %v15281_v49  ;;  %v15389_v49 = vor.u32 %v19364_v26, %v15388_v58  ;;  %v15356_v58 = vld [vmem:[#allocation6 + $0x860] sm:$0xf] }
 0x294   :  { %5538 = vmatpush.bf16.msrb.mxu2 %v15269_v59  ;;  %v19366_v59 = vld [vmem:[#allocation6 + $0x8c4] sm:$0xf]  ;;  %5468 = vmatmul.bf16.vlgmr.msra.gmra.mxu0 %v20826_v36  ;;  %v21118_v2 = vadd.f32 %v4248_v54, %v21092_v13  ;;  %v4168_v20 = vpop.f32.mrf.mxu1  ;;  %v4155_v13 = vpop.f32.mrf.mxu0  ;;  %v15420_v26 = vld [vmem:[#allocation6 + $0x8e0] sm:$0xf] }
 0x295   :  { %v15409_v52 = vor.u32 %v19366_v59, %v15406_v37  ;;  %v3904_v59 = vpop.f32.mrf.mxu2  ;;  %v19356_v37 = vld [vmem:[#allocation6 + $0x86c] sm:$0xf0]  ;;  %v15361_v13 = vor.u32 %v19354_v18, %v15358_v8  ;;  %v19346_v8 = vld [vmem:[#allocation6 + $0x824] sm:$0xf] }
 0x296   :  { %5493 = vmatpush.bf16.msrb.mxu3 %v15149_v9  ;;  %5517 = vmatpush.bf16.msra.mxu1 %v15185_v34  ;;  %v15152_v9 = vld [vmem:[#allocation6 + $0x6c8] sm:$0xf]  ;;  %v19348_v59 = vld [vmem:[#allocation6 + $0x82c] sm:$0xf0] }
 0x297   :  { %5789 = vmatpush.bf16.msra.mxu0 %v15405_v31  ;;  %v15221_v31 = vor.u32 %v19319_v23, %v15218_v50  ;;  %v15153_v54 = vor.u32 %v19305_v42, %v15152_v9  ;;  %v19311_v23 = vld [vmem:[#allocation6 + $0x70c] sm:$0xf]  ;;  %v15186_v50 = vld [vmem:[#allocation6 + $0x718] sm:$0xf0]  ;;  %v19365_v42 = vld [vmem:[#allocation6 + $0x8b4] sm:$0xf0] }
 0x298   :  { %5539 = vmatpush.bf16.msrb.mxu2 %v15253_v61  ;;  %v21121_v61 = vadd.f32 %v3922_v43, %v21090_v16  ;;  %v19372_v16 = vld [vmem:[#allocation6 + $0x8ec] sm:$0xf0]  ;;  %v4179_v34 = vpop.f32.mrf.mxu3  ;;  %v19369_v43 = vld [vmem:[#allocation6 + $0x8d4] sm:$0xf0]  ;;  %v15189_v9 = vor.u32 %v19311_v23, %v15186_v50 }
 0x299   :  { %5494 = vmatmul.bf16.vlgmr.msrb.gmra.mxu3 %v20826_v36  ;;  %v15421_v46 = vor.u32 %v19372_v16, %v15420_v26 }
 0x29a   :  { %5558 = vmatpush.bf16.msra.mxu3 %v15285_v30  ;;  %v15202_v30 = vld [vmem:[#allocation6 + $0x738] sm:$0xf0]  ;;  %5518 = vmatpush.bf16.msra.mxu1 %v15169_v3  ;;  %v15413_v3 = vor.u32 %v19369_v43, %v15412_v5  ;;  %v15380_v43 = vld [vmem:[#allocation6 + $0x888] sm:$0xf] }
 0x29b   :  { %5790 = vmatpush.bf16.msra.mxu0 %v15389_v49  ;;  %v15357_v49 = vor.u32 %v19356_v37, %v15356_v58  ;;  %v15341_v58 = vor.u32 %v19352_v28, %v15340_v21  ;;  %v19350_v37 = vld [vmem:[#allocation6 + $0x844] sm:$0xf]  ;;  %v19303_v21 = vld [vmem:[#allocation6 + $0x6cc] sm:$0xf]  ;;  %v15154_v28 = vld [vmem:[#allocation6 + $0x6d8] sm:$0xf0] }
 0x29c   :  { %5540 = vmatpush.bf16.msrb.mxu2 %v15237_v33  ;;  %v15205_v33 = vor.u32 %v19315_v17, %v15202_v30  ;;  %v4205_v20 = vpop.f32.mrf.mxu1  ;;  %v4218_v17 = vpop.f32.mrf.mxu0  ;;  %v15324_v30 = vld [vmem:[#allocation6 + $0x820] sm:$0xf] }
 0x29d   :  { %v4219_v26 = vadd.f32 %v4218_v17, %v4205_v20  ;;  %v4192_v16 = vpop.f32.mrf.mxu2  ;;  %v15325_v23 = vor.u32 %v19348_v59, %v15324_v30  ;;  %v15326_v20 = vld [vmem:[#allocation6 + $0x830] sm:$0xf0] }
 0x29e   :  { %5815 = vmatpush.bf16.msrb.mxu3 %v15409_v52  ;;  %v15377_v52 = vor.u32 %v19358_v0, %v15374_v48  ;;  %5519 = vmatpush.bf16.msra.mxu1 %v15153_v54  ;;  %v15342_v0 = vld [vmem:[#allocation6 + $0x850] sm:$0xf0]  ;;  %v4193_v54 = vadd.f32 %v4192_v16, %v4179_v34  ;;  %v15308_v34 = vld [vmem:[#allocation6 + $0x800] sm:$0xf]  ;;  %v15329_v30 = vor.u32 %v19346_v8, %v15326_v20  ;;  %v15414_v16 = vld [vmem:[#allocation6 + $0x8d8] sm:$0xf0] }
 0x29f   :  { %5791 = vmatpush.bf16.msra.mxu0 %v15373_v32  ;;  %15287 = vmatmul.msk.bf16.vlgmr.msra.gmra.mxu2 %vm360_vm0, %v20800_v24  ;;  %v19307_v32 = vld [vmem:[#allocation6 + $0x6ec] sm:$0xf]  ;;  %v15345_v50 = vor.u32 %v19350_v37, %v15342_v0  ;;  %v15422_v17 = vld [vmem:[#allocation6 + $0x8f0] sm:$0xf0]  ;;  %v19340_v0 = vld [vmem:[#allocation6 + $0x7ec] sm:$0xf0] }
 0x2a0   :  { %5541 = vmatpush.bf16.msrb.mxu2 %v15221_v31  ;;  %v15396_v31 = vld [vmem:[#allocation6 + $0x8a8] sm:$0xf]  ;;  %v4181_v48 = vpop.f32.mrf.mxu3  ;;  %v19338_v20 = vld [vmem:[#allocation6 + $0x7e4] sm:$0xf] }
 0x2a1   :  { %5520 = vmatmul.bf16.vlgmr.msra.gmra.mxu1 %v20826_v36  ;;  %v19342_v48 = vld [vmem:[#allocation6 + $0x804] sm:$0xf] }
 0x2a2   :  { %5816 = vmatpush.bf16.msrb.mxu3 %v15393_v39  ;;  %5809 = vmatpush.bf16.msrb.mxu1 %v15421_v46  ;;  %v15170_v39 = vld [vmem:[#allocation6 + $0x6f8] sm:$0xf0]  ;;  %v4250_v46 = vmul.f32 %v4219_v26, %v20932_v7  ;;  %v19344_v7 = vld [vmem:[#allocation6 + $0x80c] sm:$0xf0]  ;;  %v15292_v26 = vld [vmem:[#allocation6 + $0x7e0] sm:$0xf] }
 0x2a3   :  { %5792 = vmatpush.bf16.msra.mxu0 %v15357_v49  ;;  %v15173_v5 = vor.u32 %v19307_v32, %v15170_v39  ;;  %v19361_v49 = vld [vmem:[#allocation6 + $0x894] sm:$0xf0]  ;;  %v15309_v39 = vor.u32 %v19344_v7, %v15308_v34  ;;  %v15398_v34 = vld [vmem:[#allocation6 + $0x8b8] sm:$0xf0]  ;;  %v15552_v7 = vld [vmem:[#allocation6 + $0x9e0] sm:$0xf] }
 0x2a4   :  { %5542 = vmatpush.bf16.msrb.mxu2 %v15205_v33  ;;  %v15397_v33 = vor.u32 %v19365_v42, %v15396_v31  ;;  %15288 = vmatmul.msk.bf16.vlgmr.msrb.gmra.mxu0 %vm360_vm0, %v20800_v24  ;;  %v21132_v18 = vadd.f32 %v4250_v46, %v21105_v55  ;;  %v15381_v31 = vor.u32 %v19361_v49, %v15380_v43  ;;  %v19370_v42 = vld [vmem:[#allocation6 + $0x8e4] sm:$0xf]  ;;  %v19357_v32 = vld [vmem:[#allocation6 + $0x874] sm:$0xf0]  ;;  %v4220_v55 = vpop.f32.mrf.mxu0 }
 0x2a5   :  { %v4194_v59 = vpop.f32.mrf.mxu2  ;;  %v15425_v37 = vor.u32 %v19370_v42, %v15422_v17  ;;  %v19373_v43 = vld [vmem:[#allocation6 + $0x8f4] sm:$0xf0]  ;;  %v19404_v42 = vld [vmem:[#allocation6 + $0x9ec] sm:$0xf0]  ;;  %v15332_v55 = vld [vmem:[#allocation6 + $0x828] sm:$0xf] }
 0x2a6   :  { %5817 = vmatpush.bf16.msrb.mxu3 %v15377_v52  ;;  %5841 = vmatpush.bf16.msra.mxu1 %v15413_v3  ;;  %v4249_v52 = vmul.f32 %v4193_v54, %v20934_v12  ;;  %v15310_v54 = vld [vmem:[#allocation6 + $0x810] sm:$0xf0]  ;;  %v15382_v59 = vld [vmem:[#allocation6 + $0x898] sm:$0xf0] }
 0x2a7   :  { %5793 = vmatpush.bf16.msra.mxu0 %v15341_v58  ;;  %v15157_v58 = vor.u32 %v19303_v21, %v15154_v28  ;;  %v15313_v21 = vor.u32 %v19342_v48, %v15310_v54  ;;  %v19363_v28 = vld [vmem:[#allocation6 + $0x8ac] sm:$0xf] }
 0x2a8   :  { %5543 = vmatpush.bf16.msrb.mxu2 %v15189_v9  ;;  %v21135_v3 = vadd.f32 %v4249_v52, %v21107_v27  ;;  %v4207_v9 = vpop.f32.mrf.mxu1  ;;  %v19367_v27 = vld [vmem:[#allocation6 + $0x8cc] sm:$0xf]  ;;  %v15348_v52 = vld [vmem:[#allocation6 + $0x848] sm:$0xf] }
 0x2a9   :  { %15289 = vmatmul.msk.bf16.vlgmr.msra.gmra.mxu3 %vm360_vm0, %v20800_v24  ;;  %v15417_v49 = vor.u32 %v19367_v27, %v15414_v16  ;;  %v15294_v9 = vld [vmem:[#allocation6 + $0x7f0] sm:$0xf0]  ;;  %v15553_v27 = vor.u32 %v19404_v42, %v15552_v7  ;;  %v19359_v16 = vld [vmem:[#allocation6 + $0x88c] sm:$0xf]  ;;  %v15366_v42 = vld [vmem:[#allocation6 + $0x878] sm:$0xf0] }
 0x2aa   :  { %5818 = vmatpush.bf16.msrb.mxu3 %v15361_v13  ;;  %5842 = vmatpush.bf16.msra.mxu1 %v15397_v33  ;;  %v15364_v13 = vld [vmem:[#allocation6 + $0x868] sm:$0xf]  ;;  %v4244_v33 = vpop.f32.mrf.mxu3 }
 0x2ab   :  { %5794 = vmatpush.bf16.msra.mxu0 %v15325_v23  ;;  %v15365_v46 = vor.u32 %v19357_v32, %v15364_v13  ;;  %v19353_v23 = vld [vmem:[#allocation6 + $0x854] sm:$0xf0]  ;;  %v15430_v13 = vld [vmem:[#allocation6 + $0x8f8] sm:$0xf0]  ;;  %v15401_v32 = vor.u32 %v19363_v28, %v15398_v34  ;;  %v15316_v28 = vld [vmem:[#allocation6 + $0x808] sm:$0xf] }
 0x2ac   :  { %5544 = vmatpush.bf16.msrb.mxu2 %v15173_v5  ;;  %v15428_v5 = vld [vmem:[#allocation6 + $0x8e8] sm:$0xf]  ;;  %v15349_v17 = vor.u32 %v19353_v23, %v15348_v52  ;;  %v19345_v34 = vld [vmem:[#allocation6 + $0x814] sm:$0xf0] }
 0x2ad   :  { %v15429_v8 = vor.u32 %v19373_v43, %v15428_v5  ;;  %v4231_v48 = vpop.f32.mrf.mxu2  ;;  %v19402_v5 = vld [vmem:[#allocation6 + $0x9e4] sm:$0xf]  ;;  %v15554_v43 = vld [vmem:[#allocation6 + $0x9f0] sm:$0xf0] }
 0x2ae   :  { %5819 = vmatpush.bf16.msrb.mxu3 %v15345_v50  ;;  %5843 = vmatpush.bf16.msra.mxu1 %v15381_v31  ;;  %v15293_v50 = vor.u32 %v19340_v0, %v15292_v26  ;;  %v15297_v26 = vor.u32 %v19338_v20, %v15294_v9  ;;  %v15557_v20 = vor.u32 %v19402_v5, %v15554_v43  ;;  %v19355_v9 = vld [vmem:[#allocation6 + $0x86c] sm:$0xf]  ;;  %v19394_v5 = vld [vmem:[#allocation6 + $0x9a4] sm:$0xf]  ;;  %v15522_v43 = vld [vmem:[#allocation6 + $0x9b0] sm:$0xf0] }
 0x2af   :  { %5795 = vmatpush.bf16.msra.mxu0 %v15309_v39  ;;  %v19349_v39 = vld [vmem:[#allocation6 + $0x834] sm:$0xf0] }
 0x2b0   :  { %5545 = vmatpush.bf16.msrb.mxu2 %v15157_v58  ;;  %v4495_v31 = vpop.f32.mrf.mxu1  ;;  %v19371_v58 = vld [vmem:[#allocation6 + $0x8ec] sm:$0xf]  ;;  %v15333_v23 = vor.u32 %v19349_v39, %v15332_v55  ;;  %v15300_v39 = vld [vmem:[#allocation6 + $0x7e8] sm:$0xf] }
 0x2b1   :  { %15434 = vmatmul.msk.bf16.vlgmr.msrb.gmra.mxu1 %vm360_vm0, %v20800_v24  ;;  %v15433_v54 = vor.u32 %v19371_v58, %v15430_v13  ;;  %v19398_v58 = vld [vmem:[#allocation6 + $0x9c4] sm:$0xf]  ;;  %v15538_v13 = vld [vmem:[#allocation6 + $0x9d0] sm:$0xf0] }
 0x2b2   :  { %5820 = vmatpush.bf16.msrb.mxu3 %v15329_v30  ;;  %5844 = vmatpush.bf16.msra.mxu1 %v15365_v46  ;;  %v4482_v30 = vpop.f32.mrf.mxu0  ;;  %v19400_v46 = vld [vmem:[#allocation6 + $0x9cc] sm:$0xf0]  ;;  %v4246_v52 = vpop.f32.mrf.mxu3 }
 0x2b3   :  { %5546 = vmatmul.bf16.vlgmr.msrb.gmra.mxu2 %v20826_v36  ;;  %5796 = vmatpush.bf16.msra.mxu0 %v15293_v50  ;;  %v4496_v0 = vadd.f32 %v4495_v31, %v4482_v30  ;;  %v15369_v30 = vor.u32 %v19355_v9, %v15366_v42  ;;  %v15488_v9 = vld [vmem:[#allocation6 + $0x960] sm:$0xf]  ;;  %v19388_v42 = vld [vmem:[#allocation6 + $0x96c] sm:$0xf0] }
 0x2b4   :  { %5835 = vmatpush.bf16.msra.mxu2 %v15425_v37  ;;  %v15536_v37 = vld [vmem:[#allocation6 + $0x9c0] sm:$0xf] }
 0x2b5   :  { %v4577_v50 = vmul.f32 %v4496_v0, %v20942_v29  ;;  %v15350_v0 = vld [vmem:[#allocation6 + $0x858] sm:$0xf0] }
 0x2b6   :  { %5821 = vmatpush.bf16.msrb.mxu3 %v15313_v21  ;;  %5845 = vmatpush.bf16.msra.mxu1 %v15349_v17  ;;  %v15385_v21 = vor.u32 %v19359_v16, %v15382_v59  ;;  %v19396_v17 = vld [vmem:[#allocation6 + $0x9ac] sm:$0xf0]  ;;  %v15504_v16 = vld [vmem:[#allocation6 + $0x980] sm:$0xf] }
 0x2b7   :  { %5861 = vmatpush.bf16.msrb.mxu0 %v15429_v8  ;;  %v15537_v8 = vor.u32 %v19400_v46, %v15536_v37  ;;  %v21146_v31 = vadd.f32 %v4577_v50, %v21118_v2  ;;  %v15541_v37 = vor.u32 %v19398_v58, %v15538_v13  ;;  %v19392_v46 = vld [vmem:[#allocation6 + $0x98c] sm:$0xf0] }
 0x2b8   :  { %5867 = vmatpush.bf16.msrb.mxu2 %v15417_v49  ;;  %v4245_v49 = vadd.f32 %v4244_v33, %v4231_v48  ;;  %5797 = vmatmul.bf16.vlgmr.msra.gmra.mxu0 %v20826_v36  ;;  %v15520_v33 = vld [vmem:[#allocation6 + $0x9a0] sm:$0xf]  ;;  %v4497_v55 = vpop.f32.mrf.mxu1 }
 0x2b9   :  { %v15521_v59 = vor.u32 %v19396_v17, %v15520_v33  ;;  %v15568_v48 = vld [vmem:[#allocation6 + $0xa00] sm:$0xf]  ;;  %v19390_v33 = vld [vmem:[#allocation6 + $0x984] sm:$0xf]  ;;  %v15506_v17 = vld [vmem:[#allocation6 + $0x990] sm:$0xf0] }
 0x2ba   :  { %v4251_v7 = vmul.f32 %v4245_v49, %v20946_v45  ;;  %5822 = vmatpush.bf16.msrb.mxu3 %v15297_v26  ;;  %5846 = vmatpush.bf16.msra.mxu1 %v15333_v23  ;;  %v15317_v45 = vor.u32 %v19345_v34, %v15316_v28  ;;  %v19341_v26 = vld [vmem:[#allocation6 + $0x7f4] sm:$0xf0]  ;;  %v4484_v2 = vpop.f32.mrf.mxu0  ;;  %v4508_v49 = vpop.f32.mrf.mxu3  ;;  %v15505_v34 = vor.u32 %v19392_v46, %v15504_v16  ;;  %v19343_v16 = vld [vmem:[#allocation6 + $0x80c] sm:$0xf] }
 0x2bb   :  { %6118 = vmatpush.bf16.msra.mxu0 %v15553_v27  ;;  %v19351_v27 = vld [vmem:[#allocation6 + $0x84c] sm:$0xf]  ;;  %v15301_v52 = vor.u32 %v19341_v26, %v15300_v39  ;;  %v19405_v28 = vld [vmem:[#allocation6 + $0x9f4] sm:$0xf0]  ;;  %v15489_v26 = vor.u32 %v19388_v42, %v15488_v9  ;;  %v15318_v2 = vld [vmem:[#allocation6 + $0x818] sm:$0xf0] }
 0x2bc   :  { %5868 = vmatpush.bf16.msrb.mxu2 %v15401_v32  ;;  %v21149_v32 = vadd.f32 %v4251_v7, %v21121_v61  ;;  %v19408_v61 = vld [vmem:[#allocation6 + $0xa0c] sm:$0xf0]  ;;  %v15353_v23 = vor.u32 %v19351_v27, %v15350_v0  ;;  %v15525_v7 = vor.u32 %v19394_v5, %v15522_v43  ;;  %v19401_v39 = vld [vmem:[#allocation6 + $0x9d4] sm:$0xf0]  ;;  %v15509_v27 = vor.u32 %v19390_v33, %v15506_v17  ;;  %v19382_v42 = vld [vmem:[#allocation6 + $0x944] sm:$0xf] }
 0x2bd   :  { %5823 = vmatmul.bf16.vlgmr.msrb.gmra.mxu3 %v20826_v36  ;;  %v15569_v50 = vor.u32 %v19408_v61, %v15568_v48  ;;  %v19384_v48 = vld [vmem:[#allocation6 + $0x94c] sm:$0xf0]  ;;  %v19386_v61 = vld [vmem:[#allocation6 + $0x964] sm:$0xf]  ;;  %v15474_v33 = vld [vmem:[#allocation6 + $0x950] sm:$0xf0] }
 0x2be   :  { %5887 = vmatpush.bf16.msra.mxu3 %v15433_v54  ;;  %v4233_v54 = vpop.f32.mrf.mxu2  ;;  %5847 = vmatpush.bf16.msra.mxu1 %v15317_v45  ;;  %v15544_v45 = vld [vmem:[#allocation6 + $0x9c8] sm:$0xf] }
 0x2bf   :  { %6119 = vmatpush.bf16.msra.mxu0 %v15537_v8  ;;  %v19347_v8 = vld [vmem:[#allocation6 + $0x82c] sm:$0xf]  ;;  %v15490_v54 = vld [vmem:[#allocation6 + $0x970] sm:$0xf0]  ;;  %v15545_v43 = vor.u32 %v19401_v39, %v15544_v45 }
 0x2c0   :  { %5869 = vmatpush.bf16.msrb.mxu2 %v15385_v21  ;;  %v15560_v21 = vld [vmem:[#allocation6 + $0x9e8] sm:$0xf]  ;;  %v4534_v58 = vpop.f32.mrf.mxu1  ;;  %v15570_v45 = vld [vmem:[#allocation6 + $0xa10] sm:$0xf0] }
 0x2c1   :  { %v15561_v13 = vor.u32 %v19405_v28, %v15560_v21  ;;  %v19397_v21 = vld [vmem:[#allocation6 + $0x9b4] sm:$0xf0] }
 0x2c2   :  { %6144 = vmatpush.bf16.msrb.mxu3 %v15557_v20  ;;  %v15334_v20 = vld [vmem:[#allocation6 + $0x838] sm:$0xf0]  ;;  %5848 = vmatpush.bf16.msra.mxu1 %v15301_v52  ;;  %v4510_v46 = vpop.f32.mrf.mxu3 }
 0x2c3   :  { %6120 = vmatpush.bf16.msra.mxu0 %v15521_v59  ;;  %15435 = vmatmul.msk.bf16.vlgmr.msra.gmra.mxu2 %vm360_vm0, %v20800_v24  ;;  %v15337_v55 = vor.u32 %v19347_v8, %v15334_v20  ;;  %v15472_v59 = vld [vmem:[#allocation6 + $0x940] sm:$0xf]  ;;  %v19339_v8 = vld [vmem:[#allocation6 + $0x7ec] sm:$0xf]  ;;  %v15302_v20 = vld [vmem:[#allocation6 + $0x7f8] sm:$0xf0] }
 0x2c4   :  { %5870 = vmatpush.bf16.msrb.mxu2 %v15369_v30  ;;  %v4547_v30 = vpop.f32.mrf.mxu0  ;;  %v15305_v39 = vor.u32 %v19339_v8, %v15302_v20  ;;  %v15546_v8 = vld [vmem:[#allocation6 + $0x9d8] sm:$0xf0]  ;;  %v19374_v20 = vld [vmem:[#allocation6 + $0x904] sm:$0xf] }
 0x2c5   :  { %5849 = vmatmul.bf16.vlgmr.msra.gmra.mxu1 %v20826_v36 }
 0x2c6   :  { %6145 = vmatpush.bf16.msrb.mxu3 %v15541_v37  ;;  %6138 = vmatpush.bf16.msrb.mxu1 %v15569_v50  ;;  %v4548_v37 = vadd.f32 %v4547_v30, %v4534_v58  ;;  %v4521_v0 = vpop.f32.mrf.mxu2  ;;  %v15528_v50 = vld [vmem:[#allocation6 + $0x9a8] sm:$0xf] }
 0x2c7   :  { %6121 = vmatpush.bf16.msra.mxu0 %v15505_v34  ;;  %v4522_v5 = vadd.f32 %v4521_v0, %v4508_v49  ;;  %v15473_v34 = vor.u32 %v19384_v48, %v15472_v59  ;;  %v15456_v49 = vld [vmem:[#allocation6 + $0x920] sm:$0xf]  ;;  %v15512_v30 = vld [vmem:[#allocation6 + $0x988] sm:$0xf]  ;;  %v15562_v59 = vld [vmem:[#allocation6 + $0x9f8] sm:$0xf0] }
 0x2c8   :  { %5871 = vmatpush.bf16.msrb.mxu2 %v15353_v23  ;;  %v4579_v52 = vmul.f32 %v4548_v37, %v20952_v47  ;;  %15436 = vmatmul.msk.bf16.vlgmr.msrb.gmra.mxu0 %vm360_vm0, %v20800_v24  ;;  %v15321_v23 = vor.u32 %v19343_v16, %v15318_v2  ;;  %v19380_v47 = vld [vmem:[#allocation6 + $0x92c] sm:$0xf0]  ;;  %v4536_v58 = vpop.f32.mrf.mxu1  ;;  %v15477_v16 = vor.u32 %v19382_v42, %v15474_v33  ;;  %v15440_v2 = vld [vmem:[#allocation6 + $0x900] sm:$0xf] }
 0x2c9   :  { %v4578_v28 = vmul.f32 %v4522_v5, %v20955_v63  ;;  %v19376_v48 = vld [vmem:[#allocation6 + $0x90c] sm:$0xf0]  ;;  %v19407_v58 = vld [vmem:[#allocation6 + $0xa0c] sm:$0xf] }
 0x2ca   :  { %6146 = vmatpush.bf16.msrb.mxu3 %v15525_v7  ;;  %6170 = vmatpush.bf16.msra.mxu1 %v15561_v13  ;;  %v15493_v7 = vor.u32 %v19386_v61, %v15490_v54  ;;  %v21160_v9 = vadd.f32 %v4579_v52, %v21132_v18  ;;  %v15529_v13 = vor.u32 %v19397_v21, %v15528_v50  ;;  %v19378_v61 = vld [vmem:[#allocation6 + $0x924] sm:$0xf]  ;;  %v15458_v54 = vld [vmem:[#allocation6 + $0x930] sm:$0xf0]  ;;  %v4573_v46 = vpop.f32.mrf.mxu3  ;;  %v19409_v52 = vld [vmem:[#allocation6 + $0xa14] sm:$0xf0] }
 0x2cb   :  { %6122 = vmatpush.bf16.msra.mxu0 %v15489_v26  ;;  %v21163_v17 = vadd.f32 %v4578_v28, %v21135_v3  ;;  %v19393_v26 = vld [vmem:[#allocation6 + $0x994] sm:$0xf0]  ;;  %v19403_v3 = vld [vmem:[#allocation6 + $0x9ec] sm:$0xf]  ;;  %v15496_v50 = vld [vmem:[#allocation6 + $0x968] sm:$0xf]  ;;  %v15441_v28 = vor.u32 %v19376_v48, %v15440_v2 }
 0x2cc   :  { %5872 = vmatpush.bf16.msrb.mxu2 %v15337_v55  ;;  %v19406_v55 = vld [vmem:[#allocation6 + $0xa04] sm:$0xf]  ;;  %v4549_v18 = vpop.f32.mrf.mxu0  ;;  %v15513_v5 = vor.u32 %v19393_v26, %v15512_v30  ;;  %v19389_v21 = vld [vmem:[#allocation6 + $0x974] sm:$0xf0] }
 0x2cd   :  { %15437 = vmatmul.msk.bf16.vlgmr.msra.gmra.mxu3 %vm360_vm0, %v20800_v24  ;;  %v15573_v0 = vor.u32 %v19406_v55, %v15570_v45  ;;  %v15497_v33 = vor.u32 %v19389_v21, %v15496_v50  ;;  %v15480_v45 = vld [vmem:[#allocation6 + $0x948] sm:$0xf]  ;;  %v19395_v18 = vld [vmem:[#allocation6 + $0x9ac] sm:$0xf] }
 0x2ce   :  { %6147 = vmatpush.bf16.msrb.mxu3 %v15509_v27  ;;  %6171 = vmatpush.bf16.msra.mxu1 %v15545_v43  ;;  %v15457_v27 = vor.u32 %v19380_v47, %v15456_v49  ;;  %v4523_v37 = vpop.f32.mrf.mxu2  ;;  %v15576_v43 = vld [vmem:[#allocation6 + $0xa08] sm:$0xf]  ;;  %v15442_v49 = vld [vmem:[#allocation6 + $0x910] sm:$0xf0] }
 0x2cf   :  { %6123 = vmatpush.bf16.msra.mxu0 %v15473_v34  ;;  %v15461_v34 = vor.u32 %v19378_v61, %v15458_v54  ;;  %v15577_v47 = vor.u32 %v19409_v52, %v15576_v43  ;;  %v15445_v26 = vor.u32 %v19374_v20, %v15442_v49  ;;  %v15464_v54 = vld [vmem:[#allocation6 + $0x928] sm:$0xf]  ;;  %v19391_v52 = vld [vmem:[#allocation6 + $0x98c] sm:$0xf] }
 0x2d0   :  { %5873 = vmatpush.bf16.msrb.mxu2 %v15321_v23  ;;  %v15565_v23 = vor.u32 %v19403_v3, %v15562_v59  ;;  %v4824_v42 = vpop.f32.mrf.mxu1  ;;  %v19387_v49 = vld [vmem:[#allocation6 + $0x96c] sm:$0xf] }
 0x2d2   :  { %6148 = vmatpush.bf16.msrb.mxu3 %v15493_v7  ;;  %6172 = vmatpush.bf16.msra.mxu1 %v15529_v13  ;;  %v19399_v7 = vld [vmem:[#allocation6 + $0x9cc] sm:$0xf]  ;;  %v15578_v13 = vld [vmem:[#allocation6 + $0xa18] sm:$0xf0]  ;;  %v4575_v37 = vpop.f32.mrf.mxu3 }
 0x2d3   :  { %6124 = vmatpush.bf16.msra.mxu0 %v15457_v27  ;;  %v15549_v55 = vor.u32 %v19399_v7, %v15546_v8  ;;  %v15530_v27 = vld [vmem:[#allocation6 + $0x9b8] sm:$0xf0]  ;;  %v15581_v3 = vor.u32 %v19407_v58, %v15578_v13  ;;  %v15448_v7 = vld [vmem:[#allocation6 + $0x908] sm:$0xf]  ;;  %v19377_v8 = vld [vmem:[#allocation6 + $0x914] sm:$0xf0] }
 0x2d4   :  { %5874 = vmatpush.bf16.msrb.mxu2 %v15305_v39  ;;  %v19385_v39 = vld [vmem:[#allocation6 + $0x954] sm:$0xf0]  ;;  %v4811_v30 = vpop.f32.mrf.mxu0  ;;  %v15533_v61 = vor.u32 %v19395_v18, %v15530_v27  ;;  %v19383_v58 = vld [vmem:[#allocation6 + $0x94c] sm:$0xf] }
 0x2d5   :  { %15582 = vmatmul.msk.bf16.vlgmr.msrb.gmra.mxu1 %vm360_vm0, %v20800_v24  ;;  %v19375_v37 = vld [vmem:[#allocation6 + $0x90c] sm:$0xf] }
 0x2d6   :  { %6149 = vmatpush.bf16.msrb.mxu3 %v15477_v16  ;;  %6173 = vmatpush.bf16.msra.mxu1 %v15513_v5  ;;  %v4825_v16 = vadd.f32 %v4824_v42, %v4811_v30  ;;  %v4560_v2 = vpop.f32.mrf.mxu2  ;;  %v19381_v5 = vld [vmem:[#allocation6 + $0x934] sm:$0xf0]  ;;  %v15466_v30 = vld [vmem:[#allocation6 + $0x938] sm:$0xf0] }
 0x2d7   :  { %5875 = vmatmul.bf16.vlgmr.msrb.gmra.mxu2 %v20826_v36  ;;  %6125 = vmatpush.bf16.msra.mxu0 %v15441_v28  ;;  %v4574_v59 = vadd.f32 %v4573_v46, %v4560_v2  ;;  %v15465_v28 = vor.u32 %v19381_v5, %v15464_v54 }
 0x2d8   :  { %6164 = vmatpush.bf16.msra.mxu2 %v15573_v0  ;;  %v15481_v0 = vor.u32 %v19385_v39, %v15480_v45  ;;  %v4906_v48 = vmul.f32 %v4825_v16, %v20962_v15  ;;  %v4826_v21 = vpop.f32.mrf.mxu1  ;;  %v19379_v39 = vld [vmem:[#allocation6 + $0x92c] sm:$0xf] }
 0x2d9   :  { %v4580_v43 = vmul.f32 %v4574_v59, %v20966_v22  ;;  %v15498_v22 = vld [vmem:[#allocation6 + $0x978] sm:$0xf0] }
 0x2da   :  { %6150 = vmatpush.bf16.msrb.mxu3 %v15461_v34  ;;  %6174 = vmatpush.bf16.msra.mxu1 %v15497_v33  ;;  %v4910_v50 = vadd.f32 %v4906_v48, %v21146_v31  ;;  %v4837_v42 = vpop.f32.mrf.mxu3  ;;  %v15449_v33 = vor.u32 %v19377_v8, %v15448_v7  ;;  %v15501_v31 = vor.u32 %v19387_v49, %v15498_v22 }
 0x2db   :  { %6190 = vmatpush.bf16.msrb.mxu0 %v15577_v47  ;;  %v4584_v46 = vadd.f32 %v4580_v43, %v21149_v32  ;;  %v15482_v32 = vld [vmem:[#allocation6 + $0x958] sm:$0xf0] }
 0x2dc   :  { %6196 = vmatpush.bf16.msrb.mxu2 %v15565_v23  ;;  %6126 = vmatmul.bf16.vlgmr.msra.gmra.mxu0 %v20826_v36  ;;  %v15514_v23 = vld [vmem:[#allocation6 + $0x998] sm:$0xf0]  ;;  %v4813_v20 = vpop.f32.mrf.mxu0 }
 0x2dd   :  { %v15517_v34 = vor.u32 %v19391_v52, %v15514_v23 }
 0x2de   :  { %6151 = vmatpush.bf16.msrb.mxu3 %v15445_v26  ;;  %6175 = vmatpush.bf16.msra.mxu1 %v15481_v0  ;;  %v4562_v47 = vpop.f32.mrf.mxu2  ;;  %v15450_v0 = vld [vmem:[#allocation6 + $0x918] sm:$0xf0] }
 0x2df   :  { %v15453_v5 = vor.u32 %v19375_v37, %v15450_v0 }
 0x2e0   :  { %6197 = vmatpush.bf16.msrb.mxu2 %v15549_v55  ;;  %v4863_v13 = vpop.f32.mrf.mxu1  ;;  %v15485_v55 = vor.u32 %v19383_v58, %v15482_v32 }
 0x2e1   :  { %6152 = vmatmul.bf16.vlgmr.msrb.gmra.mxu3 %v20826_v36 }
 0x2e2   :  { %6216 = vmatpush.bf16.msra.mxu3 %v15581_v3  ;;  %6176 = vmatpush.bf16.msra.mxu1 %v15465_v28  ;;  %v4839_v27 = vpop.f32.mrf.mxu3  ;;  %v15469_v3 = vor.u32 %v19379_v39, %v15466_v30 }
 0x2e4   :  { %6198 = vmatpush.bf16.msrb.mxu2 %v15533_v61  ;;  %v4876_v45 = vpop.f32.mrf.mxu0 }
 0x2e5   :  { %v4877_v26 = vadd.f32 %v4876_v45, %v4863_v13 }
 0x2e6   :  { %6177 = vmatpush.bf16.msra.mxu1 %v15449_v33  ;;  %v4850_v18 = vpop.f32.mrf.mxu2 }
 0x2e7   :  { %15583 = vmatmul.msk.bf16.vlgmr.msra.gmra.mxu2 %vm360_vm0, %v20800_v24  ;;  %v4851_v16 = vadd.f32 %v4850_v18, %v4837_v42  ;;  %v4908_v2 = vmul.f32 %v4877_v26, %v20972_v40 }
 0x2e8   :  { %6199 = vmatpush.bf16.msrb.mxu2 %v15517_v34  ;;  %v4865_v54 = vpop.f32.mrf.mxu1 }
 0x2e9   :  { %6178 = vmatmul.bf16.vlgmr.msra.gmra.mxu1 %v20826_v36  ;;  %v4907_v59 = vmul.f32 %v4851_v16, %v20975_v51  ;;  %v4912_v48 = vadd.f32 %v4908_v2, %v21160_v9  ;;  %v19415_v2 = vld [vmem:[%s21767_s17 + $0x28] sm:$0xff] }
 0x2ea   :  { %v4902_v52 = vpop.f32.mrf.mxu3 }
 0x2eb   :  { %v4911_v61 = vadd.f32 %v4907_v59, %v21163_v17 }
 0x2ec   :  { %6200 = vmatpush.bf16.msrb.mxu2 %v15501_v31  ;;  %15584 = vmatmul.msk.bf16.vlgmr.msrb.gmra.mxu0 %vm360_vm0, %v20800_v24  ;;  %v4878_v40 = vpop.f32.mrf.mxu0 }
 0x2ee   :  { %v4852_v43 = vpop.f32.mrf.mxu2 }
 0x2ef   :  { %v19425_v43 = vld [vmem:[%s21767_s17 + $0x78] sm:$0xff] }
 0x2f0   :  { %6201 = vmatpush.bf16.msrb.mxu2 %v15485_v55  ;;  %v5153_v23 = vpop.f32.mrf.mxu1  ;;  %v19417_v55 = vld [vmem:[%s21767_s17 + $0x38] sm:$0xff]  ;;  %6521 = vmatpush.bf16.msrb.mxu1 %v19425_v43 }
 0x2f1   :  { %15585 = vmatmul.msk.bf16.vlgmr.msra.gmra.mxu3 %vm360_vm0, %v20800_v24  ;;  %6508 = vmatpush.bf16.msra.mxu0 %v19417_v55 }
 0x2f2   :  { %v4904_v9 = vpop.f32.mrf.mxu3 }
 0x2f3   :  { %v19411_v9 = vld [vmem:[%s21767_s17 + $0x8] sm:$0xff] }
 0x2f4   :  { %6202 = vmatpush.bf16.msrb.mxu2 %v15469_v3  ;;  %v5140_v21 = vpop.f32.mrf.mxu0  ;;  %v19414_v3 = vld [vmem:[%s21767_s17 + $0x20] sm:$0xff] }
 0x2f5   :  { %v5154_v28 = vadd.f32 %v5153_v23, %v5140_v21  ;;  %v19432_v23 = vld [vmem:[%s21767_s17 + $0xb0] sm:$0xff] }
 0x2f6   :  { %v4889_v34 = vpop.f32.mrf.mxu2 }
 0x2f7   :  { %v4903_v7 = vadd.f32 %v4902_v52, %v4889_v34  ;;  %v5235_v17 = vmul.f32 %v5154_v28, %v20982_v10  ;;  %v19412_v52 = vld [vmem:[%s21767_s17 + $0x10] sm:$0xff] }
 0x2f8   :  { %6203 = vmatpush.bf16.msrb.mxu2 %v15453_v5  ;;  %v5155_v22 = vpop.f32.mrf.mxu1 }
 0x2f9   :  { %v4909_v8 = vmul.f32 %v4903_v7, %v20986_v19  ;;  %v21190_v20 = vadd.f32 %v5235_v17, %v4910_v50  ;;  %v19431_v17 = vld [vmem:[%s21767_s17 + $0xa8] sm:$0xff]  ;;  %v19410_v22 = vld [vmem:[%s21767_s17] sm:$0xff] }
 0x2fa   :  { %v5166_v33 = vpop.f32.mrf.mxu3 }
 0x2fb   :  { %6204 = vmatmul.bf16.vlgmr.msrb.gmra.mxu2 %v20826_v36  ;;  %v4913_v49 = vadd.f32 %v4909_v8, %v4584_v46  ;;  %v19416_v46 = vld [vmem:[%s21767_s17 + $0x30] sm:$0xff] }
 0x2fc   :  { %v5142_v47 = vpop.f32.mrf.mxu0  ;;  %6509 = vmatpush.bf16.msra.mxu0 %v19416_v46 }
 0x2fd   :  { %v19430_v47 = vld [vmem:[%s21767_s17 + $0xa0] sm:$0xff] }
 0x2fe   :  { %v4891_v42 = vpop.f32.mrf.mxu2 }
 0x2ff   :  { %v15772_v42 = vld [vmem:[#allocation9 + $0x70] sm:$0xf] }
 0x300   :  { %v5192_v31 = vpop.f32.mrf.mxu1  ;;  %6510 = vmatpush.bf16.msra.mxu0 %v19415_v2 }
 0x302   :  { %v5168_v45 = vpop.f32.mrf.mxu3 }
 0x304   :  { %v5205_v58 = vpop.f32.mrf.mxu0  ;;  %6511 = vmatpush.bf16.msra.mxu0 %v19414_v3  ;;  %v19441_v3 = vld [vmem:[%s21767_s17 + $0xf8] sm:$0xff] }
 0x305   :  { %v5206_v32 = vadd.f32 %v5205_v58, %v5192_v31  ;;  %6547 = vmatpush.bf16.msra.mxu2 %v19441_v3  ;;  %v19487_v3 = vld [vmem:[#allocation9 + $0x164] sm:$0xf0] }
 0x306   :  { %v5179_v13 = vpop.f32.mrf.mxu2 }
 0x307   :  { %v5180_v39 = vadd.f32 %v5179_v13, %v5166_v33  ;;  %v5237_v30 = vmul.f32 %v5206_v32, %v20992_v44  ;;  %v19457_v33 = vld [vmem:[#allocation9 + $0x74] sm:$0xf0]  ;;  %v19422_v13 = vld [vmem:[%s21767_s17 + $0x60] sm:$0xff] }
 0x308   :  { %v5194_v18 = vpop.f32.mrf.mxu1  ;;  %v15773_v58 = vor.u32 %v19457_v33, %v15772_v42 }
 0x309   :  { %v5236_v19 = vmul.f32 %v5180_v39, %v20995_v57  ;;  %v21197_v50 = vadd.f32 %v5237_v30, %v4912_v48  ;;  %v19413_v48 = vld [vmem:[%s21767_s17 + $0x18] sm:$0xff]  ;;  %v15764_v30 = vld [vmem:[#allocation9 + $0x60] sm:$0xf] }
 0x30a   :  { %v5231_v44 = vpop.f32.mrf.mxu3  ;;  %6512 = vmatpush.bf16.msra.mxu0 %v19413_v48  ;;  %v19429_v39 = vld [vmem:[%s21767_s17 + $0x98] sm:$0xff]  ;;  %v19428_v48 = vld [vmem:[%s21767_s17 + $0x90] sm:$0xff] }
 0x30b   :  { %v21202_v26 = vadd.f32 %v5236_v19, %v4911_v61  ;;  %v19433_v61 = vld [vmem:[%s21767_s17 + $0xb8] sm:$0xff] }
 0x30c   :  { %v5207_v27 = vpop.f32.mrf.mxu0  ;;  %6534 = vmatpush.bf16.msrb.mxu3 %v19433_v61  ;;  %v19455_v19 = vld [vmem:[#allocation9 + $0x64] sm:$0xf0]  ;;  %v19453_v61 = vld [vmem:[#allocation9 + $0x54] sm:$0xf0] }
 0x30d   :  { %v15765_v27 = vor.u32 %v19455_v19, %v15764_v30  ;;  %v19473_v30 = vld [vmem:[#allocation9 + $0xf4] sm:$0xf0]  ;;  %v15732_v19 = vld [vmem:[#allocation9 + $0x20] sm:$0xf] }
 0x30e   :  { %v5181_v16 = vpop.f32.mrf.mxu2  ;;  %6513 = vmatpush.bf16.msra.mxu0 %v19412_v52  ;;  %v19440_v52 = vld [vmem:[%s21767_s17 + $0xf0] sm:$0xff] }
 0x30f   :  { %6548 = vmatpush.bf16.msra.mxu2 %v19440_v52 }
 0x310   :  { %v21210_v59 = vpop.f32.mrf.mxu1  ;;  %6535 = vmatpush.bf16.msrb.mxu3 %v19432_v23 }
 0x312   :  { %v5233_v5 = vpop.f32.mrf.mxu3  ;;  %6514 = vmatpush.bf16.msra.mxu0 %v19411_v9  ;;  %v19419_v9 = vld [vmem:[%s21767_s17 + $0x48] sm:$0xff] }
 0x314   :  { %v21212_v37 = vpop.f32.mrf.mxu0  ;;  %6536 = vmatpush.bf16.msrb.mxu3 %v19431_v17  ;;  %v19439_v17 = vld [vmem:[%s21767_s17 + $0xe8] sm:$0xff] }
 0x315   :  { %6549 = vmatpush.bf16.msra.mxu2 %v19439_v17  ;;  %v15820_v17 = vld [vmem:[#allocation9 + $0xd0] sm:$0xf] }
 0x316   :  { %v5218_v0 = vpop.f32.mrf.mxu2  ;;  %6515 = vmatpush.bf16.msra.mxu0 %v19410_v22  ;;  %v19449_v22 = vld [vmem:[#allocation9 + $0x34] sm:$0xf0] }
 0x317   :  { %v5232_v54 = vadd.f32 %v5231_v44, %v5218_v0  ;;  %v19421_v44 = vld [vmem:[%s21767_s17 + $0x58] sm:$0xff] }
 0x318   :  { %v5484_v28 = vpop.f32.mrf.mxu1  ;;  %6537 = vmatpush.bf16.msrb.mxu3 %v19430_v47  ;;  %v15900_v47 = vld [vmem:[#allocation9 + $0x170] sm:$0xf] }
 0x319   :  { %v5238_v40 = vmul.f32 %v5232_v54, %v21006_v35  ;;  %v19424_v35 = vld [vmem:[%s21767_s17 + $0x70] sm:$0xff] }
 0x31a   :  { %6522 = vmatpush.bf16.msrb.mxu1 %v19424_v35  ;;  %6945 = vmatpush.bf16.msrb.mxu0 %v15773_v58  ;;  %v15748_v28 = vld [vmem:[#allocation9 + $0x40] sm:$0xf] }
 0x31b   :  { %v21230_v21 = vadd.f32 %v5238_v40, %v4913_v49  ;;  %v19423_v49 = vld [vmem:[%s21767_s17 + $0x68] sm:$0xff] }
 0x31c   :  { %v5471_v34 = vpop.f32.mrf.mxu0  ;;  %v5495_v8 = vpop.f32.mrf.mxu3  ;;  %6538 = vmatpush.bf16.msrb.mxu3 %v19429_v39 }
 0x31d   :  { %v19451_v34 = vld [vmem:[#allocation9 + $0x44] sm:$0xf0] }
 0x31e   :  { %v5220_v7 = vpop.f32.mrf.mxu2  ;;  %6523 = vmatpush.bf16.msrb.mxu1 %v19423_v49  ;;  %6946 = vmatpush.bf16.msrb.mxu0 %v15765_v27  ;;  %v15740_v49 = vld [vmem:[#allocation9 + $0x30] sm:$0xf] }
 0x31f   :  { %v15749_v7 = vor.u32 %v19451_v34, %v15748_v28  ;;  %v15741_v33 = vor.u32 %v19449_v22, %v15740_v49  ;;  %v15884_v28 = vld [vmem:[#allocation9 + $0x150] sm:$0xf]  ;;  %v19485_v34 = vld [vmem:[#allocation9 + $0x154] sm:$0xf0]  ;;  %v15716_v22 = vld [vmem:[#allocation9] sm:$0xf] }
 0x320   :  { %v5521_v31 = vpop.f32.mrf.mxu1  ;;  %6539 = vmatpush.bf16.msrb.mxu3 %v19428_v48 }
 0x322   :  { %6524 = vmatpush.bf16.msrb.mxu1 %v19422_v13  ;;  %v19418_v13 = vld [vmem:[%s21767_s17 + $0x40] sm:$0xff] }
 0x324   :  { %v5534_v32 = vpop.f32.mrf.mxu0  ;;  %v5497_v46 = vpop.f32.mrf.mxu3 }
 0x325   :  { %v5535_v55 = vadd.f32 %v5534_v32, %v5521_v31  ;;  %v19489_v31 = vld [vmem:[#allocation9 + $0x174] sm:$0xf0]  ;;  %v19447_v46 = vld [vmem:[#allocation9 + $0x24] sm:$0xf0] }
 0x326   :  { %v5508_v45 = vpop.f32.mrf.mxu2  ;;  %6525 = vmatpush.bf16.msrb.mxu1 %v19421_v44  ;;  %v15901_v58 = vor.u32 %v19489_v31, %v15900_v47  ;;  %v15892_v44 = vld [vmem:[#allocation9 + $0x160] sm:$0xf]  ;;  %v19443_v47 = vld [vmem:[#allocation9 + $0x4] sm:$0xf0] }
 0x327   :  { %v5509_v18 = vadd.f32 %v5508_v45, %v5495_v8  ;;  %v5566_v16 = vmul.f32 %v5535_v55, %v21012_v6  ;;  %v15756_v6 = vld [vmem:[#allocation9 + $0x50] sm:$0xf]  ;;  %v15893_v48 = vor.u32 %v19487_v3, %v15892_v44 }
 0x328   :  { %v5523_v5 = vpop.f32.mrf.mxu1  ;;  %v15757_v40 = vor.u32 %v19453_v61, %v15756_v6  ;;  %v19426_v8 = vld [vmem:[%s21767_s17 + $0x80] sm:$0xff]  ;;  %v19437_v61 = vld [vmem:[%s21767_s17 + $0xd8] sm:$0xff] }
 0x329   :  { %v5565_v2 = vmul.f32 %v5509_v18, %v21015_v14  ;;  %v21265_v0 = vadd.f32 %v5566_v16, %v21197_v50  ;;  %v19420_v50 = vld [vmem:[%s21767_s17 + $0x50] sm:$0xff]  ;;  %v19438_v55 = vld [vmem:[%s21767_s17 + $0xe0] sm:$0xff] }
 0x32a   :  { %6947 = vmatpush.bf16.msrb.mxu0 %v15757_v40  ;;  %6526 = vmatpush.bf16.msrb.mxu1 %v19420_v50  ;;  %v15836_v45 = vld [vmem:[#allocation9 + $0xf0] sm:$0xf]  ;;  %v15828_v5 = vld [vmem:[#allocation9 + $0xe0] sm:$0xf]  ;;  %v19471_v40 = vld [vmem:[#allocation9 + $0xe4] sm:$0xf0] }
 0x32b   :  { %v21271_v54 = vadd.f32 %v5565_v2, %v21202_v26  ;;  %v19427_v26 = vld [vmem:[%s21767_s17 + $0x88] sm:$0xff]  ;;  %6550 = vmatpush.bf16.msra.mxu2 %v19438_v55  ;;  %v15837_v16 = vor.u32 %v19473_v30, %v15836_v45  ;;  %v15733_v2 = vor.u32 %v19447_v46, %v15732_v19  ;;  %v19467_v30 = vld [vmem:[#allocation9 + $0xc4] sm:$0xf0] }
 0x32c   :  { %v5536_v43 = vpop.f32.mrf.mxu0  ;;  %v5560_v35 = vpop.f32.mrf.mxu3  ;;  %6540 = vmatpush.bf16.msrb.mxu3 %v19427_v26  ;;  %v19445_v26 = vld [vmem:[#allocation9 + $0x14] sm:$0xf0] }
 0x32d   :  { %v15724_v43 = vld [vmem:[#allocation9 + $0x10] sm:$0xf]  ;;  %v19435_v45 = vld [vmem:[%s21767_s17 + $0xc8] sm:$0xff] }
 0x32e   :  { %v5510_v23 = vpop.f32.mrf.mxu2  ;;  %6948 = vmatpush.bf16.msrb.mxu0 %v15749_v7  ;;  %6527 = vmatpush.bf16.msrb.mxu1 %v19419_v9  ;;  %v19436_v9 = vld [vmem:[%s21767_s17 + $0xd0] sm:$0xff] }
 0x32f   :  { %6551 = vmatpush.bf16.msra.mxu2 %v19437_v61  ;;  %v15829_v23 = vor.u32 %v19471_v40, %v15828_v5  ;;  %v19465_v61 = vld [vmem:[#allocation9 + $0xb4] sm:$0xf0] }
 0x330   :  { %v21291_v42 = vpop.f32.mrf.mxu1  ;;  %6541 = vmatpush.bf16.msrb.mxu3 %v19426_v8  ;;  %v19469_v8 = vld [vmem:[#allocation9 + $0xd4] sm:$0xf0] }
 0x332   :  { %6949 = vmatpush.bf16.msrb.mxu0 %v15741_v33  ;;  %6528 = vmatpush.bf16.msrb.mxu1 %v19418_v13  ;;  %v15876_v33 = vld [vmem:[#allocation9 + $0x140] sm:$0xf]  ;;  %v19483_v13 = vld [vmem:[#allocation9 + $0x144] sm:$0xf0] }
 0x333   :  { %6552 = vmatpush.bf16.msra.mxu2 %v19436_v9  ;;  %v15877_v55 = vor.u32 %v19483_v13, %v15876_v33  ;;  %v19463_v9 = vld [vmem:[#allocation9 + $0xa4] sm:$0xf0]  ;;  %v19477_v33 = vld [vmem:[#allocation9 + $0x114] sm:$0xf0]  ;;  %v5483_v13 = vadd.f32 %v21210_v59, %v21212_v37  ;;  %v15780_v59 = vld [vmem:[#allocation9 + $0x80] sm:$0xf] }
 0x334   :  { %6971 = vmatpush.bf16.msra.mxu3 %v15901_v58  ;;  %v5562_v27 = vpop.f32.mrf.mxu3  ;;  %v15717_v58 = vor.u32 %v19443_v47, %v15716_v22  ;;  %v15852_v22 = vld [vmem:[#allocation9 + $0x110] sm:$0xf]  ;;  %v19459_v37 = vld [vmem:[#allocation9 + $0x84] sm:$0xf0] }
 0x335   :  { %v21293_v32 = vpop.f32.mrf.mxu0  ;;  %v19481_v27 = vld [vmem:[#allocation9 + $0x134] sm:$0xf0] }
 0x336   :  { %v5547_v39 = vpop.f32.mrf.mxu2  ;;  %6958 = vmatpush.bf16.msra.mxu1 %v15837_v16  ;;  %6950 = vmatpush.bf16.msrb.mxu0 %v15733_v2 }
 0x337   :  { %v5561_v18 = vadd.f32 %v5560_v35, %v5547_v39  ;;  %v15885_v35 = vor.u32 %v19485_v34, %v15884_v28  ;;  %v15812_v39 = vld [vmem:[#allocation9 + $0xc0] sm:$0xf]  ;;  %6553 = vmatpush.bf16.msra.mxu2 %v19435_v45  ;;  %v19479_v34 = vld [vmem:[#allocation9 + $0x124] sm:$0xf0]  ;;  %v19461_v45 = vld [vmem:[#allocation9 + $0x94] sm:$0xf0] }
 0x338   :  { %6972 = vmatpush.bf16.msra.mxu3 %v15893_v48  ;;  %v5813_v52 = vpop.f32.mrf.mxu1  ;;  %v15813_v46 = vor.u32 %v19467_v30, %v15812_v39  ;;  %v19434_v48 = vld [vmem:[%s21767_s17 + $0xc0] sm:$0xff] }
 0x339   :  { %v5567_v6 = vmul.f32 %v5561_v18, %v21026_v11  ;;  %v15725_v11 = vor.u32 %v19445_v26, %v15724_v43  ;;  %v15868_v18 = vld [vmem:[#allocation9 + $0x130] sm:$0xf]  ;;  %v19505_v52 = vld [vmem:[#allocation9 + $0x1f4] sm:$0xf0] }
 0x33a   :  { %6959 = vmatpush.bf16.msra.mxu1 %v15829_v23  ;;  %v15869_v16 = vor.u32 %v19481_v27, %v15868_v18  ;;  %v15964_v43 = vld [vmem:[#allocation9 + $0x1f0] sm:$0xf]  ;;  %v15860_v23 = vld [vmem:[#allocation9 + $0x120] sm:$0xf]  ;;  %v5812_v27 = vadd.f32 %v21291_v42, %v21293_v32 }
 0x33b   :  { %v21306_v50 = vadd.f32 %v5567_v6, %v21230_v21  ;;  %6951 = vmatpush.bf16.msrb.mxu0 %v15725_v11  ;;  %v15821_v21 = vor.u32 %v19469_v8, %v15820_v17  ;;  %v15804_v6 = vld [vmem:[#allocation9 + $0xb0] sm:$0xf]  ;;  %6554 = vmatpush.bf16.msra.mxu2 %v19434_v48  ;;  %v15965_v28 = vor.u32 %v19505_v52, %v15964_v43  ;;  %v15844_v18 = vld [vmem:[#allocation9 + $0x100] sm:$0xf] }
 0x33c   :  { %6973 = vmatpush.bf16.msra.mxu3 %v15885_v35  ;;  %v15805_v40 = vor.u32 %v19465_v61, %v15804_v6  ;;  %v15861_v11 = vor.u32 %v19479_v34, %v15860_v23  ;;  %v5564_v48 = vmul.f32 %v5483_v13, %v21002_v25  ;;  %v15940_v6 = vld [vmem:[#allocation9 + $0x1c0] sm:$0xf]  ;;  %v5893_v43 = vmul.f32 %v5812_v27, %v21022_v1  ;;  %v15932_v34 = vld [vmem:[#allocation9 + $0x1b0] sm:$0xf]  ;;  %v19493_v27 = vld [vmem:[#allocation9 + $0x194] sm:$0xf0] }
 0x33d   :  { %v5800_v7 = vpop.f32.mrf.mxu0 }
 0x33e   :  { %v5549_v49 = vpop.f32.mrf.mxu2  ;;  %6960 = vmatpush.bf16.msra.mxu1 %v15821_v21  ;;  %v15796_v7 = vld [vmem:[#allocation9 + $0xa0] sm:$0xf]  ;;  %v19503_v21 = vld [vmem:[#allocation9 + $0x1e4] sm:$0xf0]  ;;  %v5568_v42 = vadd.f32 %v5564_v48, %v21190_v20 }
 0x33f   :  { %6952 = vmatpush.bf16.msrb.mxu0 %v15717_v58  ;;  %6984 = vmatpush.bf16.msrb.mxu2 %v15965_v28  ;;  %v15797_v8 = vor.u32 %v19463_v9, %v15796_v7  ;;  %v15956_v49 = vld [vmem:[#allocation9 + $0x1e0] sm:$0xf]  ;;  %v15853_v58 = vor.u32 %v19477_v33, %v15852_v22 }
 0x340   :  { %v21311_v31 = vpop.f32.mrf.mxu3  ;;  %6974 = vmatpush.bf16.msra.mxu3 %v15877_v55  ;;  %v15957_v47 = vor.u32 %v19503_v21, %v15956_v49  ;;  %v21800_v22 = vld [vmem:[#allocation35_spill] sm:$0xff] }
 0x342   :  { %v5850_v19 = vpop.f32.mrf.mxu1  ;;  %6961 = vmatpush.bf16.msra.mxu1 %v15813_v46  ;;  %v19501_v46 = vld [vmem:[#allocation9 + $0x1d4] sm:$0xf0] }
 0x343   :  { %6985 = vmatpush.bf16.msrb.mxu2 %v15957_v47 }
 0x344   :  { %6975 = vmatpush.bf16.msra.mxu3 %v15869_v16 }
 0x345   :  { %v5863_v2 = vpop.f32.mrf.mxu0 }
 0x346   :  { %v5864_v44 = vadd.f32 %v5863_v2, %v5850_v19  ;;  %v21316_v3 = vpop.f32.mrf.mxu2  ;;  %6962 = vmatpush.bf16.msra.mxu1 %v15805_v40  ;;  %v15948_v19 = vld [vmem:[#allocation9 + $0x1d0] sm:$0xf]  ;;  %v19475_v2 = vld [vmem:[#allocation9 + $0x104] sm:$0xf0] }
 0x347   :  { %v15949_v16 = vor.u32 %v19501_v46, %v15948_v19  ;;  %v19499_v40 = vld [vmem:[#allocation9 + $0x1c4] sm:$0xf0] }
 0x348   :  { %v5826_v5 = vpop.f32.mrf.mxu3  ;;  %v5895_v26 = vmul.f32 %v5864_v44, %v21032_v41  ;;  %6976 = vmatpush.bf16.msra.mxu3 %v15861_v11  ;;  %v15845_v44 = vor.u32 %v19475_v2, %v15844_v18  ;;  %v15941_v52 = vor.u32 %v19499_v40, %v15940_v6  ;;  %v19497_v11 = vld [vmem:[#allocation9 + $0x1b4] sm:$0xf0]  ;;  %v15916_v18 = vld [vmem:[#allocation9 + $0x190] sm:$0xf]  ;;  %v15908_v6 = vld [vmem:[#allocation9 + $0x180] sm:$0xf] }
 0x349   :  { %6986 = vmatpush.bf16.msrb.mxu2 %v15949_v16  ;;  %v15781_v5 = vor.u32 %v19459_v37, %v15780_v59  ;;  %v19454_v59 = vld [vmem:[#allocation9 + $0x64] sm:$0xf]  ;;  %v15766_v37 = vld [vmem:[#allocation9 + $0x68] sm:$0xf0] }
 0x34a   :  { %v21323_v35 = vadd.f32 %v5895_v26, %v21265_v0  ;;  %v5852_v17 = vpop.f32.mrf.mxu1  ;;  %6963 = vmatpush.bf16.msra.mxu1 %v15797_v8  ;;  %v15788_v0 = vld [vmem:[#allocation9 + $0x90] sm:$0xf]  ;;  %v21331_v26 = vld [vmem:[#allocation7] sm:$0xf]  ;;  %v5897_v8 = vadd.f32 %v5893_v43, %v5568_v42  ;;  %v15769_v40 = vor.u32 %v19454_v59, %v15766_v37 }
 0x34b   :  { %v15789_v30 = vor.u32 %v19461_v45, %v15788_v0  ;;  %v15933_v17 = vor.u32 %v19497_v11, %v15932_v34  ;;  %v6232_v21 = vperm.slane %v21331_v26, 0  ;;  %v19456_v45 = vld [vmem:[#allocation9 + $0x74] sm:$0xf]  ;;  %v21801_v42 = vld [vmem:[#allocation34_spill] sm:$0xff] }
 0x34c   :  { %6977 = vmatpush.bf16.msra.mxu3 %v15853_v58  ;;  %v19495_v58 = vld [vmem:[#allocation9 + $0x1a4] sm:$0xf0] }
 0x34d   :  { %v5865_v41 = vpop.f32.mrf.mxu0  ;;  %6987 = vmatpush.bf16.msrb.mxu2 %v15941_v52  ;;  %v19452_v52 = vld [vmem:[#allocation9 + $0x54] sm:$0xf] }
 0x34e   :  { %v5839_v55 = vpop.f32.mrf.mxu2  ;;  %6964 = vmatpush.bf16.msra.mxu1 %v15789_v30  ;;  %v15924_v41 = vld [vmem:[#allocation9 + $0x1a0] sm:$0xf] }
 0x34f   :  { %v15925_v55 = vor.u32 %v19495_v58, %v15924_v41  ;;  %v6233_v41 = vperm.slane %v21331_v26, 1 }
 0x350   :  { %v5889_v39 = vpop.f32.mrf.mxu3  ;;  %6978 = vmatpush.bf16.msra.mxu3 %v15845_v44  ;;  %v15917_v44 = vor.u32 %v19493_v27, %v15916_v18 }
 0x351   :  { %6988 = vmatpush.bf16.msrb.mxu2 %v15933_v17 }
 0x352   :  { %v6140_v61 = vpop.f32.mrf.mxu1  ;;  %6965 = vmatpush.bf16.msra.mxu1 %v15781_v5 }
 0x355   :  { %6989 = vmatpush.bf16.msrb.mxu2 %v15925_v55 }
 0x358   :  { %v5891_v9 = vpop.f32.mrf.mxu3 }
 0x359   :  { %v6127_v23 = vpop.f32.mrf.mxu0  ;;  %6990 = vmatpush.bf16.msrb.mxu2 %v15917_v44  ;;  %v21802_v9 = vld [vmem:[#allocation36_spill] sm:$0xff]  ;;  %v15838_v44 = vld [vmem:[#allocation9 + $0xf8] sm:$0xf0] }
 0x35a   :  { %v6141_v32 = vadd.f32 %v6140_v61, %v6127_v23  ;;  %v5876_v28 = vpop.f32.mrf.mxu2  ;;  %v6142_v13 = vpop.f32.mrf.mxu1  ;;  %v19491_v61 = vld [vmem:[#allocation9 + $0x184] sm:$0xf0]  ;;  %v15758_v23 = vld [vmem:[#allocation9 + $0x58] sm:$0xf0] }
 0x35b   :  { %v5890_v7 = vadd.f32 %v5889_v39, %v5876_v28  ;;  %v15774_v39 = vld [vmem:[#allocation9 + $0x78] sm:$0xf0]  ;;  %v15909_v43 = vor.u32 %v19491_v61, %v15908_v6  ;;  %v19446_v6 = vld [vmem:[#allocation9 + $0x24] sm:$0xf] }
 0x35c   :  { %v6222_v49 = vmul.f32 %v6141_v32, %v21042_v4  ;;  %v15777_v2 = vor.u32 %v19456_v45, %v15774_v39 }
 0x35d   :  { %v5896_v47 = vmul.f32 %v5890_v7, %v21800_v22  ;;  %6991 = vmatpush.bf16.msrb.mxu2 %v15909_v43  ;;  %v15894_v43 = vld [vmem:[#allocation9 + $0x168] sm:$0xf0] }
 0x35e   :  { %v6226_v33 = vadd.f32 %v6222_v49, %v5897_v8  ;;  %v6234_v8 = vperm.slane %v21331_v26, 2  ;;  %v19450_v49 = vld [vmem:[#allocation9 + $0x44] sm:$0xf] }
 0x35f   :  { %v21338_v20 = vadd.f32 %v5896_v47, %v21306_v50  ;;  %v5838_v50 = vadd.f32 %v21316_v3, %v21311_v31  ;;  %v15761_v3 = vor.u32 %v19452_v52, %v15758_v23  ;;  %v21803_v47 = vld [vmem:[#allocation37_spill] sm:$0xff] }
 0x360   :  { %v6240_v0 = vadd.f32 %v6232_v21, %v6226_v33  ;;  %v15750_v21 = vld [vmem:[#allocation9 + $0x48] sm:$0xf0] }
 0x361   :  { %v6129_v30 = vpop.f32.mrf.mxu0  ;;  %v5894_v32 = vmul.f32 %v5838_v50, %v21801_v42  ;;  %v15753_v55 = vor.u32 %v19450_v49, %v15750_v21  ;;  %v19468_v49 = vld [vmem:[#allocation9 + $0xd4] sm:$0xf]  ;;  %v15822_v21 = vld [vmem:[#allocation9 + $0xd8] sm:$0xf0] }
 0x362   :  { %v6244_v19 = vmax.f32 %v6240_v0, 0.0  ;;  %v5878_v46 = vpop.f32.mrf.mxu2  ;;  %v19448_v0 = vld [vmem:[#allocation9 + $0x34] sm:$0xf]  ;;  %v15742_v30 = vld [vmem:[#allocation9 + $0x38] sm:$0xf0] }
 0x363   :  { %v5898_v22 = vadd.f32 %v5894_v32, %v21271_v54  ;;  %v15902_v46 = vld [vmem:[#allocation9 + $0x178] sm:$0xf0]  ;;  %v19472_v54 = vld [vmem:[#allocation9 + $0xf4] sm:$0xf]  ;;  %v15745_v50 = vor.u32 %v19448_v0, %v15742_v30  ;;  %v19470_v32 = vld [vmem:[#allocation9 + $0xe4] sm:$0xf] }
 0x364   :  { %v6153_v16 = vpop.f32.mrf.mxu3  ;;  %v21340_v48 = vpack.c.bf16 %v6244_v19, %v6244_v19  ;;  %v19488_v19 = vld [vmem:[#allocation9 + $0x174] sm:$0xf]  ;;  %v15841_v23 = vor.u32 %v19472_v54, %v15838_v44  ;;  %v19482_v0 = vld [vmem:[#allocation9 + $0x144] sm:$0xf] }
 0x366   :  { %6516 = vmatmul.bf16.vlgmr.msra.gmra.mxu0 %v21340_v48  ;;  %v6179_v5 = vpop.f32.mrf.mxu1 }
 0x367   :  { %6997 = vmatpush.bf16.msra.mxu0 %v15777_v2 }
 0x369   :  { %v6192_v28 = vpop.f32.mrf.mxu0 }
 0x36a   :  { %v6193_v34 = vadd.f32 %v6192_v28, %v6179_v5  ;;  %v6166_v11 = vpop.f32.mrf.mxu2  ;;  %v15734_v5 = vld [vmem:[#allocation9 + $0x28] sm:$0xf0] }
 0x36b   :  { %6998 = vmatpush.bf16.msra.mxu0 %v15769_v40  ;;  %v6167_v31 = vadd.f32 %v6166_v11, %v6153_v16  ;;  %v19486_v40 = vld [vmem:[#allocation9 + $0x164] sm:$0xf]  ;;  %v15830_v28 = vld [vmem:[#allocation9 + $0xe8] sm:$0xf0] }
 0x36c   :  { %v6155_v7 = vpop.f32.mrf.mxu3  ;;  %v6224_v17 = vmul.f32 %v6193_v34, %v21802_v9  ;;  %v15737_v34 = vor.u32 %v19446_v6, %v15734_v5  ;;  %v15897_v11 = vor.u32 %v19486_v40, %v15894_v43  ;;  %v15886_v9 = vld [vmem:[#allocation9 + $0x158] sm:$0xf0]  ;;  %v16020_v40 = vld [vmem:[#allocation9 + $0x260] sm:$0xf]  ;;  %v19464_v43 = vld [vmem:[#allocation9 + $0xb4] sm:$0xf] }
 0x36d   :  { %v6223_v33 = vmul.f32 %v6167_v31, %v21803_v47  ;;  %v19444_v7 = vld [vmem:[#allocation9 + $0x14] sm:$0xf]  ;;  %v15726_v31 = vld [vmem:[#allocation9 + $0x18] sm:$0xf0] }
 0x36e   :  { %v6228_v58 = vadd.f32 %v6224_v17, %v21323_v35  ;;  %v6181_v45 = vpop.f32.mrf.mxu1  ;;  %v15905_v35 = vor.u32 %v19488_v19, %v15902_v46  ;;  %v15833_v17 = vor.u32 %v19470_v32, %v15830_v28  ;;  %v6235_v19 = vperm.slane %v21331_v26, 3  ;;  %v19519_v26 = vld [vmem:[#allocation9 + $0x264] sm:$0xf0]  ;;  %v15806_v32 = vld [vmem:[#allocation9 + $0xb8] sm:$0xf0] }
 0x36f   :  { %v6227_v13 = vadd.f32 %v6223_v33, %v5898_v22  ;;  %6999 = vmatpush.bf16.msra.mxu0 %v15761_v3  ;;  %v19484_v3 = vld [vmem:[#allocation9 + $0x154] sm:$0xf]  ;;  %v15878_v45 = vld [vmem:[#allocation9 + $0x148] sm:$0xf0]  ;;  %v15825_v46 = vor.u32 %v19468_v49, %v15822_v21  ;;  %v16012_v49 = vld [vmem:[#allocation9 + $0x250] sm:$0xf] }
 0x370   :  { %v6242_v39 = vadd.f32 %v6234_v8, %v6228_v58  ;;  %v15889_v58 = vor.u32 %v19484_v3, %v15886_v9  ;;  %v19504_v28 = vld [vmem:[#allocation9 + $0x1f4] sm:$0xf]  ;;  %v15862_v3 = vld [vmem:[#allocation9 + $0x128] sm:$0xf0]  ;;  %v19517_v21 = vld [vmem:[#allocation9 + $0x254] sm:$0xf0] }
 0x371   :  { %v6241_v18 = vadd.f32 %v6233_v41, %v6227_v13  ;;  %v6194_v27 = vpop.f32.mrf.mxu0  ;;  %v15729_v41 = vor.u32 %v19444_v7, %v15726_v31  ;;  %v19442_v13 = vld [vmem:[#allocation9 + $0x4] sm:$0xf]  ;;  %v16021_v7 = vor.u32 %v19519_v26, %v16020_v40  ;;  %v16156_v40 = vld [vmem:[#allocation9 + $0x370] sm:$0xf]  ;;  %v19553_v26 = vld [vmem:[#allocation9 + $0x374] sm:$0xf0] }
 0x372   :  { %v6246_v16 = vmax.f32 %v6242_v39, 0.0  ;;  %v6168_v2 = vpop.f32.mrf.mxu2  ;;  %v21804_v39 = vld [vmem:[#allocation38_spill] sm:$0xff]  ;;  %v19478_v31 = vld [vmem:[#allocation9 + $0x124] sm:$0xf] }
 0x373   :  { %v6245_v59 = vmax.f32 %v6241_v18, 0.0  ;;  %7000 = vmatpush.bf16.msra.mxu0 %v15753_v55  ;;  %v15718_v55 = vld [vmem:[#allocation9 + $0x8] sm:$0xf0]  ;;  %v16028_v18 = vld [vmem:[#allocation9 + $0x270] sm:$0xf] }
 0x374   :  { %v6218_v37 = vpop.f32.mrf.mxu3  ;;  %v21352_v61 = vpack.c.bf16 %v6246_v16, %v6246_v16  ;;  %v19521_v27 = vld [vmem:[#allocation9 + $0x274] sm:$0xf0]  ;;  %v19466_v16 = vld [vmem:[#allocation9 + $0xc4] sm:$0xf]  ;;  %v15814_v2 = vld [vmem:[#allocation9 + $0xc8] sm:$0xf0]  ;;  %v15721_v44 = vor.u32 %v19442_v13, %v15718_v55  ;;  %v15865_v13 = vor.u32 %v19478_v31, %v15862_v3  ;;  %v16013_v55 = vor.u32 %v19517_v21, %v16012_v49 }
 0x375   :  { %v21354_v52 = vpack.c.bf16 %v6245_v59, %v6245_v59  ;;  %v15881_v59 = vor.u32 %v19482_v0, %v15878_v45  ;;  %v15817_v5 = vor.u32 %v19466_v16, %v15814_v2  ;;  %v19476_v0 = vld [vmem:[#allocation9 + $0x114] sm:$0xf]  ;;  %v15854_v45 = vld [vmem:[#allocation9 + $0x118] sm:$0xf0]  ;;  %v16157_v31 = vor.u32 %v19553_v26, %v16156_v40  ;;  %v15988_v3 = vld [vmem:[#allocation9 + $0x220] sm:$0xf] }
 0x376   :  { %6542 = vmatmul.bf16.vlgmr.msrb.gmra.mxu3 %v21352_v61  ;;  %6953 = vmatmul.bf16.vlgmr.msrb.gmra.mxu0 %v21340_v48  ;;  %v19500_v16 = vld [vmem:[#allocation9 + $0x1d4] sm:$0xf]  ;;  %v15950_v2 = vld [vmem:[#allocation9 + $0x1d8] sm:$0xf0]  ;;  %v19511_v49 = vld [vmem:[#allocation9 + $0x224] sm:$0xf0] }
 0x377   :  { %7001 = vmatpush.bf16.msra.mxu0 %v15745_v50  ;;  %7023 = vmatpush.bf16.msrb.mxu3 %v15905_v35  ;;  %v19480_v50 = vld [vmem:[#allocation9 + $0x134] sm:$0xf]  ;;  %v15870_v35 = vld [vmem:[#allocation9 + $0x138] sm:$0xf0]  ;;  %v16148_v21 = vld [vmem:[#allocation9 + $0x360] sm:$0xf] }
 0x378   :  { %6529 = vmatmul.bf16.vlgmr.msrb.gmra.mxu1 %v21354_v52  ;;  %v19547_v40 = vld [vmem:[#allocation9 + $0x344] sm:$0xf0]  ;;  %v19520_v26 = vld [vmem:[#allocation9 + $0x274] sm:$0xf] }
 0x379   :  { %7010 = vmatpush.bf16.msrb.mxu1 %v15841_v23 }
 0x37b   :  { %7002 = vmatpush.bf16.msra.mxu0 %v15737_v34  ;;  %7024 = vmatpush.bf16.msrb.mxu3 %v15897_v11  ;;  %v15966_v34 = vld [vmem:[#allocation9 + $0x1f8] sm:$0xf0] }
 0x37c   :  { %v6220_v33 = vpop.f32.mrf.mxu3 }
 0x37d   :  { %7011 = vmatpush.bf16.msrb.mxu1 %v15833_v17  ;;  %v15809_v17 = vor.u32 %v19464_v43, %v15806_v32  ;;  %v15798_v33 = vld [vmem:[#allocation9 + $0xa8] sm:$0xf0]  ;;  %v19458_v43 = vld [vmem:[#allocation9 + $0x84] sm:$0xf] }
 0x37e   :  { %v6205_v8 = vpop.f32.mrf.mxu2  ;;  %v19498_v32 = vld [vmem:[#allocation9 + $0x1c4] sm:$0xf] }
 0x37f   :  { %v6219_v22 = vadd.f32 %v6218_v37, %v6205_v8  ;;  %7003 = vmatpush.bf16.msra.mxu0 %v15729_v41  ;;  %7025 = vmatpush.bf16.msrb.mxu3 %v15889_v58  ;;  %v16029_v37 = vor.u32 %v19521_v27, %v16028_v18  ;;  %v15969_v8 = vor.u32 %v19504_v28, %v15966_v34  ;;  %v19502_v41 = vld [vmem:[#allocation9 + $0x1e4] sm:$0xf]  ;;  %v15958_v58 = vld [vmem:[#allocation9 + $0x1e8] sm:$0xf0]  ;;  %v19460_v18 = vld [vmem:[#allocation9 + $0x94] sm:$0xf] }
 0x380   :  { %v15790_v27 = vld [vmem:[#allocation9 + $0x98] sm:$0xf0]  ;;  %v15942_v28 = vld [vmem:[#allocation9 + $0x1c8] sm:$0xf0] }
 0x381   :  { %v6225_v30 = vmul.f32 %v6219_v22, %v21804_v39  ;;  %7012 = vmatpush.bf16.msrb.mxu1 %v15825_v46  ;;  %v19462_v22 = vld [vmem:[#allocation9 + $0xa4] sm:$0xf]  ;;  %v19515_v46 = vld [vmem:[#allocation9 + $0x244] sm:$0xf0] }
 0x382   :  { %v15801_v39 = vor.u32 %v19462_v22, %v15798_v33  ;;  %v19551_v22 = vld [vmem:[#allocation9 + $0x364] sm:$0xf0] }
 0x383   :  { %v6229_v54 = vadd.f32 %v6225_v30, %v21338_v20  ;;  %7004 = vmatpush.bf16.msra.mxu0 %v15721_v44  ;;  %7026 = vmatpush.bf16.msrb.mxu3 %v15881_v59  ;;  %v15873_v20 = vor.u32 %v19480_v50, %v15870_v35  ;;  %v15961_v30 = vor.u32 %v19502_v41, %v15958_v58  ;;  %v19474_v44 = vld [vmem:[#allocation9 + $0x104] sm:$0xf]  ;;  %v15996_v50 = vld [vmem:[#allocation9 + $0x230] sm:$0xf]  ;;  %v19513_v35 = vld [vmem:[#allocation9 + $0x234] sm:$0xf0] }
 0x384   :  { %v19496_v41 = vld [vmem:[#allocation9 + $0x1b4] sm:$0xf]  ;;  %v15934_v58 = vld [vmem:[#allocation9 + $0x1b8] sm:$0xf0] }
 0x385   :  { %v6243_v6 = vadd.f32 %v6235_v19, %v6229_v54  ;;  %7013 = vmatpush.bf16.msrb.mxu1 %v15817_v5  ;;  %v16004_v19 = vld [vmem:[#allocation9 + $0x240] sm:$0xf]  ;;  %v15857_v54 = vor.u32 %v19476_v0, %v15854_v45  ;;  %v15953_v5 = vor.u32 %v19500_v16, %v15950_v2  ;;  %v15989_v0 = vor.u32 %v19511_v49, %v15988_v3  ;;  %v19494_v16 = vld [vmem:[#allocation9 + $0x1a4] sm:$0xf]  ;;  %v15926_v2 = vld [vmem:[#allocation9 + $0x1a8] sm:$0xf0] }
 0x386   :  { %v6207_v23 = vpop.f32.mrf.mxu2  ;;  %6979 = vmatmul.bf16.vlgmr.msra.gmra.mxu3 %v21352_v61  ;;  %7005 = vmatmul.bf16.vlgmr.msra.gmra.mxu0 %v21340_v48  ;;  %v16005_v59 = vor.u32 %v19515_v46, %v16004_v19  ;;  %v16149_v45 = vor.u32 %v19551_v22, %v16148_v21  ;;  %v19509_v19 = vld [vmem:[#allocation9 + $0x214] sm:$0xf0]  ;;  %v16140_v46 = vld [vmem:[#allocation9 + $0x350] sm:$0xf]  ;;  %v19518_v49 = vld [vmem:[#allocation9 + $0x264] sm:$0xf] }
 0x387   :  { %v6247_v11 = vmax.f32 %v6243_v6, 0.0  ;;  %7436 = vmatpush.bf16.msrb.mxu0 %v16029_v37  ;;  %7027 = vmatpush.bf16.msrb.mxu3 %v15873_v20  ;;  %v15846_v37 = vld [vmem:[#allocation9 + $0x108] sm:$0xf0]  ;;  %v15793_v6 = vor.u32 %v19460_v18, %v15790_v27  ;;  %v19537_v20 = vld [vmem:[#allocation9 + $0x2f4] sm:$0xf0] }
 0x388   :  { %6966 = vmatmul.bf16.vlgmr.msra.gmra.mxu1 %v21354_v52  ;;  %v15782_v23 = vld [vmem:[#allocation9 + $0x88] sm:$0xf0]  ;;  %v15849_v34 = vor.u32 %v19474_v44, %v15846_v37  ;;  %v19549_v18 = vld [vmem:[#allocation9 + $0x354] sm:$0xf0] }
 0x389   :  { %v21362_v9 = vpack.c.bf16 %v6247_v11, %v6247_v11  ;;  %7014 = vmatpush.bf16.msrb.mxu1 %v15809_v17  ;;  %v16092_v11 = vld [vmem:[#allocation9 + $0x2f0] sm:$0xf]  ;;  %v15785_v17 = vor.u32 %v19458_v43, %v15782_v23  ;;  %v19533_v44 = vld [vmem:[#allocation9 + $0x2d4] sm:$0xf0]  ;;  %v16141_v37 = vor.u32 %v19549_v18, %v16140_v46  ;;  %v19492_v23 = vld [vmem:[#allocation9 + $0x194] sm:$0xf] }
 0x38a   :  { %v16093_v33 = vor.u32 %v19537_v20, %v16092_v11  ;;  %v19531_v11 = vld [vmem:[#allocation9 + $0x2c4] sm:$0xf0]  ;;  %v16022_v21 = vld [vmem:[#allocation9 + $0x268] sm:$0xf0] }
 0x38b   :  { %6555 = vmatmul.bf16.vlgmr.msra.gmra.mxu2 %v21362_v9  ;;  %7437 = vmatpush.bf16.msrb.mxu0 %v16021_v7  ;;  %v15997_v7 = vor.u32 %v19513_v35, %v15996_v50  ;;  %v15972_v50 = vld [vmem:[#allocation9 + $0x200] sm:$0xf]  ;;  %v19507_v35 = vld [vmem:[#allocation9 + $0x204] sm:$0xf0] }
 0x38c   :  { %7036 = vmatpush.bf16.msra.mxu2 %v15969_v8  ;;  %7028 = vmatpush.bf16.msrb.mxu3 %v15865_v13  ;;  %v15945_v8 = vor.u32 %v19498_v32, %v15942_v28  ;;  %v16084_v13 = vld [vmem:[#allocation9 + $0x2e0] sm:$0xf]  ;;  %v15918_v32 = vld [vmem:[#allocation9 + $0x198] sm:$0xf0]  ;;  %v15973_v20 = vor.u32 %v19507_v35, %v15972_v50  ;;  %v19543_v46 = vld [vmem:[#allocation9 + $0x324] sm:$0xf0] }
 0x38d   :  { %7015 = vmatpush.bf16.msrb.mxu1 %v15801_v39  ;;  %v15980_v39 = vld [vmem:[#allocation9 + $0x210] sm:$0xf]  ;;  %v16030_v28 = vld [vmem:[#allocation9 + $0x278] sm:$0xf0]  ;;  %v15921_v3 = vor.u32 %v19492_v23, %v15918_v32  ;;  %v16006_v23 = vld [vmem:[#allocation9 + $0x248] sm:$0xf0] }
 0x38e   :  { %v16044_v32 = vld [vmem:[#allocation9 + $0x290] sm:$0xf] }
 0x38f   :  { %7438 = vmatpush.bf16.msrb.mxu0 %v16013_v55  ;;  %v19535_v55 = vld [vmem:[#allocation9 + $0x2e4] sm:$0xf0] }
 0x390   :  { %7037 = vmatpush.bf16.msra.mxu2 %v15961_v30  ;;  %7029 = vmatpush.bf16.msrb.mxu3 %v15857_v54  ;;  %v15937_v30 = vor.u32 %v19496_v41, %v15934_v58  ;;  %v16085_v27 = vor.u32 %v19535_v55, %v16084_v13  ;;  %v16076_v54 = vld [vmem:[#allocation9 + $0x2d0] sm:$0xf]  ;;  %v15910_v41 = vld [vmem:[#allocation9 + $0x188] sm:$0xf0]  ;;  %v19529_v13 = vld [vmem:[#allocation9 + $0x2b4] sm:$0xf0] }
 0x391   :  { %7016 = vmatpush.bf16.msrb.mxu1 %v15793_v6  ;;  %v15929_v6 = vor.u32 %v19494_v16, %v15926_v2  ;;  %v16077_v43 = vor.u32 %v19533_v44, %v16076_v54  ;;  %v16060_v58 = vld [vmem:[#allocation9 + $0x2b0] sm:$0xf]  ;;  %v19516_v16 = vld [vmem:[#allocation9 + $0x254] sm:$0xf]  ;;  %v16014_v2 = vld [vmem:[#allocation9 + $0x258] sm:$0xf0] }
 0x392   :  { %v16220_v55 = vld [vmem:[#allocation9 + $0x3f0] sm:$0xf]  ;;  %v16061_v18 = vor.u32 %v19529_v13, %v16060_v58  ;;  %v16052_v54 = vld [vmem:[#allocation9 + $0x2a0] sm:$0xf]  ;;  %v19527_v44 = vld [vmem:[#allocation9 + $0x2a4] sm:$0xf0]  ;;  %v16017_v35 = vor.u32 %v19516_v16, %v16014_v2 }
 0x393   :  { %7439 = vmatpush.bf16.msrb.mxu0 %v16005_v59  ;;  %v15981_v59 = vor.u32 %v19509_v19, %v15980_v39  ;;  %v16116_v19 = vld [vmem:[#allocation9 + $0x320] sm:$0xf]  ;;  %v19523_v58 = vld [vmem:[#allocation9 + $0x284] sm:$0xf0]  ;;  %v15990_v16 = vld [vmem:[#allocation9 + $0x228] sm:$0xf0] }
 0x394   :  { %7038 = vmatpush.bf16.msra.mxu2 %v15953_v5  ;;  %7030 = vmatpush.bf16.msrb.mxu3 %v15849_v34  ;;  %v16132_v5 = vld [vmem:[#allocation9 + $0x340] sm:$0xf]  ;;  %v16117_v50 = vor.u32 %v19543_v46, %v16116_v19  ;;  %v19550_v2 = vld [vmem:[#allocation9 + $0x364] sm:$0xf] }
 0x395   :  { %7017 = vmatpush.bf16.msrb.mxu1 %v15785_v17  ;;  %v16068_v34 = vld [vmem:[#allocation9 + $0x2c0] sm:$0xf]  ;;  %v16033_v17 = vor.u32 %v19520_v26, %v16030_v28  ;;  %v19525_v28 = vld [vmem:[#allocation9 + $0x294] sm:$0xf0] }
 0x396   :  { %v16069_v22 = vor.u32 %v19531_v11, %v16068_v34  ;;  %v16204_v34 = vld [vmem:[#allocation9 + $0x3d0] sm:$0xf]  ;;  %v19565_v11 = vld [vmem:[#allocation9 + $0x3d4] sm:$0xf0]  ;;  %v16196_v13 = vld [vmem:[#allocation9 + $0x3c0] sm:$0xf] }
 0x397   :  { %7440 = vmatpush.bf16.msrb.mxu0 %v15997_v7  ;;  %7031 = vmatmul.bf16.vlgmr.msrb.gmra.mxu3 %v21352_v61  ;;  %v16133_v7 = vor.u32 %v19547_v40, %v16132_v5  ;;  %v19541_v5 = vld [vmem:[#allocation9 + $0x314] sm:$0xf0]  ;;  %v16053_v40 = vor.u32 %v19527_v44, %v16052_v54  ;;  %v16150_v44 = vld [vmem:[#allocation9 + $0x368] sm:$0xf0] }
 0x398   :  { %7462 = vmatpush.bf16.msra.mxu3 %v16157_v31  ;;  %7039 = vmatpush.bf16.msra.mxu2 %v15945_v8  ;;  %v16124_v31 = vld [vmem:[#allocation9 + $0x330] sm:$0xf]  ;;  %v19545_v8 = vld [vmem:[#allocation9 + $0x334] sm:$0xf0] }
 0x399   :  { %7449 = vmatpush.bf16.msra.mxu1 %v16093_v33  ;;  %v19490_v33 = vld [vmem:[#allocation9 + $0x184] sm:$0xf] }
 0x39a   :  { %7018 = vmatmul.bf16.vlgmr.msrb.gmra.mxu1 %v21354_v52  ;;  %v15913_v39 = vor.u32 %v19490_v33, %v15910_v41  ;;  %v16158_v33 = vld [vmem:[#allocation9 + $0x378] sm:$0xf0]  ;;  %v16036_v41 = vld [vmem:[#allocation9 + $0x280] sm:$0xf] }
 0x39b   :  { %6992 = vmatmul.bf16.vlgmr.msrb.gmra.mxu2 %v21362_v9  ;;  %7441 = vmatpush.bf16.msrb.mxu0 %v15989_v0  ;;  %v19569_v0 = vld [vmem:[#allocation9 + $0x3f4] sm:$0xf0]  ;;  %v16037_v46 = vor.u32 %v19523_v58, %v16036_v41  ;;  %v16172_v41 = vld [vmem:[#allocation9 + $0x390] sm:$0xf] }
 0x39c   :  { %7463 = vmatpush.bf16.msra.mxu3 %v16149_v45  ;;  %7040 = vmatpush.bf16.msra.mxu2 %v15937_v30  ;;  %v16125_v45 = vor.u32 %v19545_v8, %v16124_v31  ;;  %v16025_v30 = vor.u32 %v19518_v49, %v16022_v21  ;;  %v15998_v8 = vld [vmem:[#allocation9 + $0x238] sm:$0xf0]  ;;  %v16045_v49 = vor.u32 %v19525_v28, %v16044_v32  ;;  %v19557_v58 = vld [vmem:[#allocation9 + $0x394] sm:$0xf0] }
 0x39d   :  { %7450 = vmatpush.bf16.msra.mxu1 %v16085_v27  ;;  %v16221_v27 = vor.u32 %v19569_v0, %v16220_v55  ;;  %v16205_v21 = vor.u32 %v19565_v11, %v16204_v34  ;;  %v19563_v55 = vld [vmem:[#allocation9 + $0x3c4] sm:$0xf0]  ;;  %v16142_v28 = vld [vmem:[#allocation9 + $0x358] sm:$0xf0]  ;;  %v16180_v34 = vld [vmem:[#allocation9 + $0x3a0] sm:$0xf] }
 0x39e   :  { %v19559_v11 = vld [vmem:[#allocation9 + $0x3a4] sm:$0xf0] }
 0x39f   :  { %7442 = vmatpush.bf16.msrb.mxu0 %v15981_v59  ;;  %v16212_v59 = vld [vmem:[#allocation9 + $0x3e0] sm:$0xf] }
 0x3a0   :  { %7464 = vmatpush.bf16.msra.mxu3 %v16141_v37  ;;  %7041 = vmatpush.bf16.msra.mxu2 %v15929_v6  ;;  %v19567_v37 = vld [vmem:[#allocation9 + $0x3e4] sm:$0xf0]  ;;  %v16108_v6 = vld [vmem:[#allocation9 + $0x310] sm:$0xf] }
 0x3a1   :  { %7451 = vmatpush.bf16.msra.mxu1 %v16077_v43  ;;  %v16213_v26 = vor.u32 %v19567_v37, %v16212_v59  ;;  %v19514_v43 = vld [vmem:[#allocation9 + $0x244] sm:$0xf]  ;;  %v16188_v59 = vld [vmem:[#allocation9 + $0x3b0] sm:$0xf]  ;;  %v19561_v37 = vld [vmem:[#allocation9 + $0x3b4] sm:$0xf0] }
 0x3a2   :  { %v16009_v31 = vor.u32 %v19514_v43, %v16006_v23  ;;  %v15982_v43 = vld [vmem:[#allocation9 + $0x218] sm:$0xf0]  ;;  %v19548_v23 = vld [vmem:[#allocation9 + $0x354] sm:$0xf] }
 0x3a3   :  { %7443 = vmatpush.bf16.msrb.mxu0 %v15973_v20  ;;  %v16109_v20 = vor.u32 %v19541_v5, %v16108_v6  ;;  %v16153_v5 = vor.u32 %v19550_v2, %v16150_v44  ;;  %v16164_v2 = vld [vmem:[#allocation9 + $0x380] sm:$0xf] }
 0x3a4   :  { %7465 = vmatpush.bf16.msra.mxu3 %v16133_v7  ;;  %7042 = vmatpush.bf16.msra.mxu2 %v15921_v3  ;;  %v16100_v7 = vld [vmem:[#allocation9 + $0x300] sm:$0xf]  ;;  %v19539_v3 = vld [vmem:[#allocation9 + $0x304] sm:$0xf0] }
 0x3a5   :  { %7452 = vmatpush.bf16.msra.mxu1 %v16069_v22  ;;  %v19552_v22 = vld [vmem:[#allocation9 + $0x374] sm:$0xf]  ;;  %v16101_v0 = vor.u32 %v19539_v3, %v16100_v7  ;;  %v16078_v7 = vld [vmem:[#allocation9 + $0x2d8] sm:$0xf0]  ;;  %v19506_v3 = vld [vmem:[#allocation9 + $0x204] sm:$0xf] }
 0x3a6   :  { %7444 = vmatmul.bf16.vlgmr.msrb.gmra.mxu0 %v21340_v48  ;;  %v16161_v19 = vor.u32 %v19552_v22, %v16158_v33  ;;  %v16134_v22 = vld [vmem:[#allocation9 + $0x348] sm:$0xf0]  ;;  %v16276_v44 = vld [vmem:[#allocation9 + $0x460] sm:$0xf] }
 0x3a7   :  { %7488 = vmatpush.bf16.msra.mxu0 %v16033_v17  ;;  %v19512_v17 = vld [vmem:[#allocation9 + $0x234] sm:$0xf] }
 0x3a8   :  { %7466 = vmatpush.bf16.msra.mxu3 %v16125_v45  ;;  %7043 = vmatpush.bf16.msra.mxu2 %v15913_v39  ;;  %v19536_v45 = vld [vmem:[#allocation9 + $0x2f4] sm:$0xf]  ;;  %v16094_v39 = vld [vmem:[#allocation9 + $0x2f8] sm:$0xf0] }
 0x3a9   :  { %7453 = vmatpush.bf16.msra.mxu1 %v16061_v18  ;;  %v16197_v18 = vor.u32 %v19563_v55, %v16196_v13  ;;  %v16097_v54 = vor.u32 %v19536_v45, %v16094_v39  ;;  %v16284_v13 = vld [vmem:[#allocation9 + $0x470] sm:$0xf]  ;;  %v19585_v55 = vld [vmem:[#allocation9 + $0x474] sm:$0xf0]  ;;  %v16070_v45 = vld [vmem:[#allocation9 + $0x2c8] sm:$0xf0] }
 0x3ab   :  { %7489 = vmatpush.bf16.msra.mxu0 %v16025_v30  ;;  %7044 = vmatmul.bf16.vlgmr.msra.gmra.mxu2 %v21362_v9  ;;  %v16001_v30 = vor.u32 %v19512_v17, %v15998_v8  ;;  %v16145_v17 = vor.u32 %v19548_v23, %v16142_v28  ;;  %v16181_v8 = vor.u32 %v19559_v11, %v16180_v34  ;;  %v19542_v23 = vld [vmem:[#allocation9 + $0x324] sm:$0xf]  ;;  %v16268_v28 = vld [vmem:[#allocation9 + $0x450] sm:$0xf]  ;;  %v19581_v11 = vld [vmem:[#allocation9 + $0x454] sm:$0xf0] }
 0x3ac   :  { %7475 = vmatpush.bf16.msrb.mxu2 %v16221_v27  ;;  %7467 = vmatpush.bf16.msra.mxu3 %v16117_v50  ;;  %v19510_v27 = vld [vmem:[#allocation9 + $0x224] sm:$0xf] }
 0x3ad   :  { %7454 = vmatpush.bf16.msra.mxu1 %v16053_v40  ;;  %v19534_v50 = vld [vmem:[#allocation9 + $0x2e4] sm:$0xf]  ;;  %v15993_v6 = vor.u32 %v19510_v27, %v15990_v16  ;;  %v16189_v40 = vor.u32 %v19561_v37, %v16188_v59  ;;  %v16285_v27 = vor.u32 %v19585_v55, %v16284_v13  ;;  %v19583_v59 = vld [vmem:[#allocation9 + $0x464] sm:$0xf0]  ;;  %v19528_v37 = vld [vmem:[#allocation9 + $0x2b4] sm:$0xf] }
 0x3ae   :  { %v19524_v13 = vld [vmem:[#allocation9 + $0x294] sm:$0xf]  ;;  %v16046_v55 = vld [vmem:[#allocation9 + $0x298] sm:$0xf0] }
 0x3af   :  { %7490 = vmatpush.bf16.msra.mxu0 %v16017_v35  ;;  %v16086_v35 = vld [vmem:[#allocation9 + $0x2e8] sm:$0xf0] }
 0x3b0   :  { %7476 = vmatpush.bf16.msrb.mxu2 %v16213_v26  ;;  %7468 = vmatpush.bf16.msra.mxu3 %v16109_v20  ;;  %v19508_v26 = vld [vmem:[#allocation9 + $0x214] sm:$0xf]  ;;  %v16089_v32 = vor.u32 %v19534_v50, %v16086_v35  ;;  %v16062_v50 = vld [vmem:[#allocation9 + $0x2b8] sm:$0xf0] }
 0x3b1   :  { %7455 = vmatpush.bf16.msra.mxu1 %v16045_v49  ;;  %v19532_v20 = vld [vmem:[#allocation9 + $0x2d4] sm:$0xf]  ;;  %v15974_v49 = vld [vmem:[#allocation9 + $0x208] sm:$0xf0] }
 0x3b2   :  { %v16081_v33 = vor.u32 %v19532_v20, %v16078_v7  ;;  %v15977_v39 = vor.u32 %v19506_v3, %v15974_v49  ;;  %v19568_v35 = vld [vmem:[#allocation9 + $0x3f4] sm:$0xf]  ;;  %v19526_v20 = vld [vmem:[#allocation9 + $0x2a4] sm:$0xf]  ;;  %v16054_v7 = vld [vmem:[#allocation9 + $0x2a8] sm:$0xf0] }
 0x3b3   :  { %7491 = vmatpush.bf16.msra.mxu0 %v16009_v31  ;;  %v15985_v31 = vor.u32 %v19508_v26, %v15982_v43  ;;  %v16277_v26 = vor.u32 %v19583_v59, %v16276_v44  ;;  %v16065_v43 = vor.u32 %v19528_v37, %v16062_v50  ;;  %v16214_v3 = vld [vmem:[#allocation9 + $0x3e8] sm:$0xf0]  ;;  %v16057_v49 = vor.u32 %v19526_v20, %v16054_v7  ;;  %v19617_v44 = vld [vmem:[#allocation9 + $0x574] sm:$0xf0]  ;;  %v19522_v59 = vld [vmem:[#allocation9 + $0x284] sm:$0xf] }
 0x3b4   :  { %7477 = vmatpush.bf16.msrb.mxu2 %v16205_v21  ;;  %7469 = vmatpush.bf16.msra.mxu3 %v16101_v0  ;;  %v19546_v21 = vld [vmem:[#allocation9 + $0x344] sm:$0xf]  ;;  %v16038_v37 = vld [vmem:[#allocation9 + $0x288] sm:$0xf0]  ;;  %v19615_v7 = vld [vmem:[#allocation9 + $0x564] sm:$0xf0] }
 0x3b5   :  { %7456 = vmatpush.bf16.msra.mxu1 %v16037_v46  ;;  %v19530_v0 = vld [vmem:[#allocation9 + $0x2c4] sm:$0xf]  ;;  %v19544_v46 = vld [vmem:[#allocation9 + $0x334] sm:$0xf] }
 0x3b6   :  { %v16073_v16 = vor.u32 %v19530_v0, %v16070_v45  ;;  %v19564_v0 = vld [vmem:[#allocation9 + $0x3d4] sm:$0xf]  ;;  %v16206_v45 = vld [vmem:[#allocation9 + $0x3d8] sm:$0xf0]  ;;  %v19562_v50 = vld [vmem:[#allocation9 + $0x3c4] sm:$0xf] }
 0x3b7   :  { %7492 = vmatpush.bf16.msra.mxu0 %v16001_v30  ;;  %7470 = vmatmul.bf16.vlgmr.msra.gmra.mxu3 %v21352_v61  ;;  %v16137_v30 = vor.u32 %v19546_v21, %v16134_v22  ;;  %v19540_v21 = vld [vmem:[#allocation9 + $0x314] sm:$0xf]  ;;  %v16110_v22 = vld [vmem:[#allocation9 + $0x318] sm:$0xf0] }
 0x3b8   :  { %7514 = vmatpush.bf16.msrb.mxu3 %v16161_v19  ;;  %7478 = vmatpush.bf16.msrb.mxu2 %v16197_v18  ;;  %v16173_v19 = vor.u32 %v19557_v58, %v16172_v41  ;;  %v16126_v18 = vld [vmem:[#allocation9 + $0x338] sm:$0xf0]  ;;  %v19579_v58 = vld [vmem:[#allocation9 + $0x444] sm:$0xf0] }
 0x3b9   :  { %7501 = vmatpush.bf16.msrb.mxu1 %v16097_v54  ;;  %v19555_v54 = vld [vmem:[#allocation9 + $0x384] sm:$0xf0] }
 0x3ba   :  { %7457 = vmatmul.bf16.vlgmr.msra.gmra.mxu1 %v21354_v52 }
 0x3bb   :  { %7493 = vmatpush.bf16.msra.mxu0 %v15993_v6  ;;  %v16222_v6 = vld [vmem:[#allocation9 + $0x3f8] sm:$0xf0] }
 0x3bc   :  { %7515 = vmatpush.bf16.msrb.mxu3 %v16153_v5  ;;  %7479 = vmatpush.bf16.msrb.mxu2 %v16189_v40  ;;  %v16129_v5 = vor.u32 %v19544_v46, %v16126_v18  ;;  %v16165_v40 = vor.u32 %v19555_v54, %v16164_v2  ;;  %v16225_v34 = vor.u32 %v19568_v35, %v16222_v6  ;;  %v16102_v18 = vld [vmem:[#allocation9 + $0x308] sm:$0xf0]  ;;  %v16412_v54 = vld [vmem:[#allocation9 + $0x570] sm:$0xf] }
 0x3bd   :  { %7502 = vmatpush.bf16.msrb.mxu1 %v16089_v32  ;;  %v16118_v32 = vld [vmem:[#allocation9 + $0x328] sm:$0xf0]  ;;  %v16049_v46 = vor.u32 %v19524_v13, %v16046_v55  ;;  %v16209_v2 = vor.u32 %v19564_v0, %v16206_v45  ;;  %v19613_v55 = vld [vmem:[#allocation9 + $0x554] sm:$0xf0]  ;;  %v19558_v0 = vld [vmem:[#allocation9 + $0x3a4] sm:$0xf] }
 0x3be   :  { %v16198_v35 = vld [vmem:[#allocation9 + $0x3c8] sm:$0xf0] }
 0x3bf   :  { %7494 = vmatpush.bf16.msra.mxu0 %v15985_v31  ;;  %v19566_v31 = vld [vmem:[#allocation9 + $0x3e4] sm:$0xf]  ;;  %v16182_v45 = vld [vmem:[#allocation9 + $0x3a8] sm:$0xf0] }
 0x3c0   :  { %7516 = vmatpush.bf16.msrb.mxu3 %v16145_v17  ;;  %7480 = vmatpush.bf16.msrb.mxu2 %v16181_v8  ;;  %v16121_v17 = vor.u32 %v19542_v23, %v16118_v32  ;;  %v16269_v8 = vor.u32 %v19581_v11, %v16268_v28  ;;  %v16217_v41 = vor.u32 %v19566_v31, %v16214_v3  ;;  %v16244_v28 = vld [vmem:[#allocation9 + $0x420] sm:$0xf]  ;;  %v19560_v31 = vld [vmem:[#allocation9 + $0x3b4] sm:$0xf]  ;;  %v16190_v3 = vld [vmem:[#allocation9 + $0x3b8] sm:$0xf0] }
 0x3c1   :  { %7503 = vmatpush.bf16.msrb.mxu1 %v16081_v33  ;;  %v16260_v33 = vld [vmem:[#allocation9 + $0x440] sm:$0xf]  ;;  %v16041_v23 = vor.u32 %v19522_v59, %v16038_v37  ;;  %v16201_v32 = vor.u32 %v19562_v50, %v16198_v35  ;;  %v19556_v59 = vld [vmem:[#allocation9 + $0x394] sm:$0xf]  ;;  %v16174_v37 = vld [vmem:[#allocation9 + $0x398] sm:$0xf0] }
 0x3c2   :  { %v16404_v11 = vld [vmem:[#allocation9 + $0x560] sm:$0xf]  ;;  %v19584_v50 = vld [vmem:[#allocation9 + $0x474] sm:$0xf]  ;;  %v16286_v35 = vld [vmem:[#allocation9 + $0x478] sm:$0xf0] }
 0x3c3   :  { %7495 = vmatpush.bf16.msra.mxu0 %v15977_v39  ;;  %v16113_v39 = vor.u32 %v19540_v21, %v16110_v22  ;;  %v16405_v21 = vor.u32 %v19615_v7, %v16404_v11  ;;  %v16193_v22 = vor.u32 %v19560_v31, %v16190_v3  ;;  %v19554_v11 = vld [vmem:[#allocation9 + $0x384] sm:$0xf]  ;;  %v16278_v31 = vld [vmem:[#allocation9 + $0x468] sm:$0xf0]  ;;  %v16316_v3 = vld [vmem:[#allocation9 + $0x4b0] sm:$0xf] }
 0x3c4   :  { %7517 = vmatpush.bf16.msrb.mxu3 %v16137_v30  ;;  %7481 = vmatpush.bf16.msrb.mxu2 %v16173_v19  ;;  %v19538_v30 = vld [vmem:[#allocation9 + $0x304] sm:$0xf]  ;;  %v16261_v19 = vor.u32 %v19579_v58, %v16260_v33  ;;  %v16236_v33 = vld [vmem:[#allocation9 + $0x410] sm:$0xf] }
 0x3c5   :  { %7504 = vmatpush.bf16.msrb.mxu1 %v16073_v16  ;;  %v19577_v16 = vld [vmem:[#allocation9 + $0x434] sm:$0xf0]  ;;  %v16105_v6 = vor.u32 %v19538_v30, %v16102_v18  ;;  %v16396_v58 = vld [vmem:[#allocation9 + $0x550] sm:$0xf]  ;;  %v19582_v7 = vld [vmem:[#allocation9 + $0x464] sm:$0xf] }
 0x3c6   :  { %7496 = vmatmul.bf16.vlgmr.msra.gmra.mxu0 %v21340_v48  ;;  %v19597_v30 = vld [vmem:[#allocation9 + $0x4d4] sm:$0xf0]  ;;  %v16397_v18 = vor.u32 %v19613_v55, %v16396_v58  ;;  %v16372_v58 = vld [vmem:[#allocation9 + $0x520] sm:$0xf]  ;;  %v19580_v55 = vld [vmem:[#allocation9 + $0x454] sm:$0xf] }
 0x3c7   :  { %7929 = vmatpush.bf16.msrb.mxu0 %v16285_v27  ;;  %v16252_v27 = vld [vmem:[#allocation9 + $0x430] sm:$0xf] }
 0x3c8   :  { %7518 = vmatpush.bf16.msrb.mxu3 %v16129_v5  ;;  %7482 = vmatpush.bf16.msrb.mxu2 %v16165_v40  ;;  %v16348_v5 = vld [vmem:[#allocation9 + $0x4f0] sm:$0xf]  ;;  %v19601_v40 = vld [vmem:[#allocation9 + $0x4f4] sm:$0xf0] }
 0x3c9   :  { %7505 = vmatpush.bf16.msrb.mxu1 %v16065_v43  ;;  %v16413_v43 = vor.u32 %v19617_v44, %v16412_v54  ;;  %v16349_v20 = vor.u32 %v19601_v40, %v16348_v5  ;;  %v19611_v54 = vld [vmem:[#allocation9 + $0x544] sm:$0xf0] }
 0x3ca   :  { %v19595_v5 = vld [vmem:[#allocation9 + $0x4c4] sm:$0xf0] }
 0x3cb   :  { %7930 = vmatpush.bf16.msrb.mxu0 %v16277_v26  ;;  %7483 = vmatmul.bf16.vlgmr.msrb.gmra.mxu2 %v21362_v9  ;;  %v16253_v26 = vor.u32 %v19577_v16, %v16252_v27  ;;  %v16185_v27 = vor.u32 %v19558_v0, %v16182_v45  ;;  %v19571_v16 = vld [vmem:[#allocation9 + $0x404] sm:$0xf0]  ;;  %v16270_v45 = vld [vmem:[#allocation9 + $0x458] sm:$0xf0] }
 0x3cc   :  { %7527 = vmatpush.bf16.msra.mxu2 %v16225_v34  ;;  %7519 = vmatpush.bf16.msrb.mxu3 %v16121_v17  ;;  %v19575_v34 = vld [vmem:[#allocation9 + $0x424] sm:$0xf0]  ;;  %v16340_v17 = vld [vmem:[#allocation9 + $0x4e0] sm:$0xf] }
 0x3cd   :  { %7506 = vmatpush.bf16.msrb.mxu1 %v16057_v49  ;;  %v16245_v49 = vor.u32 %v19575_v34, %v16244_v28  ;;  %v16289_v28 = vor.u32 %v19584_v50, %v16286_v35  ;;  %v16300_v50 = vld [vmem:[#allocation9 + $0x490] sm:$0xf]  ;;  %v19589_v35 = vld [vmem:[#allocation9 + $0x494] sm:$0xf0] }
 0x3cf   :  { %7931 = vmatpush.bf16.msrb.mxu0 %v16269_v8  ;;  %v19599_v8 = vld [vmem:[#allocation9 + $0x4e4] sm:$0xf0] }
 0x3d0   :  { %7528 = vmatpush.bf16.msra.mxu2 %v16217_v41  ;;  %7520 = vmatpush.bf16.msrb.mxu3 %v16113_v39  ;;  %v19573_v41 = vld [vmem:[#allocation9 + $0x414] sm:$0xf0]  ;;  %v16341_v13 = vor.u32 %v19599_v8, %v16340_v17  ;;  %v16332_v39 = vld [vmem:[#allocation9 + $0x4d0] sm:$0xf] }
 0x3d1   :  { %7507 = vmatpush.bf16.msrb.mxu1 %v16049_v46  ;;  %v16228_v46 = vld [vmem:[#allocation9 + $0x400] sm:$0xf]  ;;  %v16333_v44 = vor.u32 %v19597_v30, %v16332_v39  ;;  %v19593_v17 = vld [vmem:[#allocation9 + $0x4b4] sm:$0xf0]  ;;  %v16476_v8 = vld [vmem:[#allocation9 + $0x5f0] sm:$0xf] }
 0x3d2   :  { %v16229_v40 = vor.u32 %v19571_v16, %v16228_v46  ;;  %v16308_v39 = vld [vmem:[#allocation9 + $0x4a0] sm:$0xf]  ;;  %v19591_v30 = vld [vmem:[#allocation9 + $0x4a4] sm:$0xf0] }
 0x3d3   :  { %7932 = vmatpush.bf16.msrb.mxu0 %v16261_v19  ;;  %v16237_v19 = vor.u32 %v19573_v41, %v16236_v33  ;;  %v16281_v33 = vor.u32 %v19582_v7, %v16278_v31  ;;  %v16317_v41 = vor.u32 %v19593_v17, %v16316_v3  ;;  %v19631_v46 = vld [vmem:[#allocation9 + $0x5e4] sm:$0xf0]  ;;  %v16309_v16 = vor.u32 %v19591_v30, %v16308_v39  ;;  %v19616_v7 = vld [vmem:[#allocation9 + $0x574] sm:$0xf]  ;;  %v16414_v31 = vld [vmem:[#allocation9 + $0x578] sm:$0xf0] }
 0x3d4   :  { %7529 = vmatpush.bf16.msra.mxu2 %v16209_v2  ;;  %7521 = vmatpush.bf16.msrb.mxu3 %v16105_v6  ;;  %v16388_v2 = vld [vmem:[#allocation9 + $0x540] sm:$0xf]  ;;  %v19587_v17 = vld [vmem:[#allocation9 + $0x484] sm:$0xf0]  ;;  %v19614_v39 = vld [vmem:[#allocation9 + $0x564] sm:$0xf] }
 0x3d5   :  { %7508 = vmatpush.bf16.msrb.mxu1 %v16041_v23  ;;  %v16324_v6 = vld [vmem:[#allocation9 + $0x4c0] sm:$0xf]  ;;  %v16380_v23 = vld [vmem:[#allocation9 + $0x530] sm:$0xf] }
 0x3d6   :  { %v16325_v34 = vor.u32 %v19595_v5, %v16324_v6  ;;  %v16460_v5 = vld [vmem:[#allocation9 + $0x5d0] sm:$0xf]  ;;  %v16292_v3 = vld [vmem:[#allocation9 + $0x480] sm:$0xf] }
 0x3d7   :  { %7933 = vmatpush.bf16.msrb.mxu0 %v16253_v26  ;;  %7522 = vmatmul.bf16.vlgmr.msrb.gmra.mxu3 %v21352_v61  ;;  %v16389_v26 = vor.u32 %v19611_v54, %v16388_v2  ;;  %v16364_v2 = vld [vmem:[#allocation9 + $0x510] sm:$0xf]  ;;  %v19605_v54 = vld [vmem:[#allocation9 + $0x514] sm:$0xf0] }
 0x3d8   :  { %7955 = vmatpush.bf16.msra.mxu3 %v16413_v43  ;;  %7530 = vmatpush.bf16.msra.mxu2 %v16201_v32  ;;  %v16177_v43 = vor.u32 %v19556_v59, %v16174_v37  ;;  %v19609_v32 = vld [vmem:[#allocation9 + $0x534] sm:$0xf0]  ;;  %v16262_v37 = vld [vmem:[#allocation9 + $0x448] sm:$0xf0] }
 0x3d9   :  { %7942 = vmatpush.bf16.msra.mxu1 %v16349_v20  ;;  %v16166_v20 = vld [vmem:[#allocation9 + $0x388] sm:$0xf0] }
 0x3da   :  { %7509 = vmatmul.bf16.vlgmr.msrb.gmra.mxu1 %v21354_v52 }
 0x3db   :  { %7934 = vmatpush.bf16.msrb.mxu0 %v16245_v49  ;;  %v19633_v49 = vld [vmem:[#allocation9 + $0x5f4] sm:$0xf0] }
 0x3dc   :  { %7956 = vmatpush.bf16.msra.mxu3 %v16405_v21  ;;  %7531 = vmatpush.bf16.msra.mxu2 %v16193_v22  ;;  %v16381_v21 = vor.u32 %v19609_v32, %v16380_v23  ;;  %v16169_v22 = vor.u32 %v19554_v11, %v16166_v20  ;;  %v16477_v0 = vor.u32 %v19633_v49, %v16476_v8  ;;  %v16254_v11 = vld [vmem:[#allocation9 + $0x438] sm:$0xf0]  ;;  %v16452_v8 = vld [vmem:[#allocation9 + $0x5c0] sm:$0xf]  ;;  %v19627_v49 = vld [vmem:[#allocation9 + $0x5c4] sm:$0xf0] }
 0x3dd   :  { %7943 = vmatpush.bf16.msra.mxu1 %v16341_v13  ;;  %v19607_v13 = vld [vmem:[#allocation9 + $0x524] sm:$0xf0]  ;;  %v16301_v32 = vor.u32 %v19589_v35, %v16300_v50  ;;  %v16238_v50 = vld [vmem:[#allocation9 + $0x418] sm:$0xf0]  ;;  %v19612_v35 = vld [vmem:[#allocation9 + $0x554] sm:$0xf] }
 0x3df   :  { %7935 = vmatpush.bf16.msrb.mxu0 %v16237_v19  ;;  %v16468_v19 = vld [vmem:[#allocation9 + $0x5e0] sm:$0xf] }
 0x3e0   :  { %7957 = vmatpush.bf16.msra.mxu3 %v16397_v18  ;;  %7532 = vmatpush.bf16.msra.mxu2 %v16185_v27  ;;  %v16373_v18 = vor.u32 %v19607_v13, %v16372_v58  ;;  %v16273_v27 = vor.u32 %v19580_v55, %v16270_v45  ;;  %v16469_v59 = vor.u32 %v19631_v46, %v16468_v19  ;;  %v16246_v45 = vld [vmem:[#allocation9 + $0x428] sm:$0xf0] }
 0x3e1   :  { %7944 = vmatpush.bf16.msra.mxu1 %v16333_v44  ;;  %v19578_v44 = vld [vmem:[#allocation9 + $0x444] sm:$0xf]  ;;  %v16417_v58 = vor.u32 %v19616_v7, %v16414_v31  ;;  %v16293_v13 = vor.u32 %v19587_v17, %v16292_v3  ;;  %v16453_v55 = vor.u32 %v19627_v49, %v16452_v8  ;;  %v16406_v46 = vld [vmem:[#allocation9 + $0x568] sm:$0xf0]  ;;  %v16428_v49 = vld [vmem:[#allocation9 + $0x590] sm:$0xf] }
 0x3e2   :  { %v16265_v23 = vor.u32 %v19578_v44, %v16262_v37  ;;  %v16409_v44 = vor.u32 %v19614_v39, %v16406_v46  ;;  %v19572_v37 = vld [vmem:[#allocation9 + $0x414] sm:$0xf]  ;;  %v16230_v7 = vld [vmem:[#allocation9 + $0x408] sm:$0xf0]  ;;  %v19610_v31 = vld [vmem:[#allocation9 + $0x544] sm:$0xf] }
 0x3e3   :  { %7936 = vmatpush.bf16.msrb.mxu0 %v16229_v40  ;;  %v21381_v6 = vpop.f32.mrf.mxu0  ;;  %v19629_v40 = vld [vmem:[#allocation9 + $0x5d4] sm:$0xf0]  ;;  %v16390_v3 = vld [vmem:[#allocation9 + $0x548] sm:$0xf0] }
 0x3e4   :  { %7958 = vmatpush.bf16.msra.mxu3 %v16389_v26  ;;  %7533 = vmatpush.bf16.msra.mxu2 %v16177_v43  ;;  %v16365_v26 = vor.u32 %v19605_v54, %v16364_v2  ;;  %v16356_v43 = vld [vmem:[#allocation9 + $0x500] sm:$0xf]  ;;  %v16461_v20 = vor.u32 %v19629_v40, %v16460_v5  ;;  %v16342_v2 = vld [vmem:[#allocation9 + $0x4e8] sm:$0xf0]  ;;  %v16398_v40 = vld [vmem:[#allocation9 + $0x558] sm:$0xf0] }
 0x3e5   :  { %7945 = vmatpush.bf16.msra.mxu1 %v16325_v34  ;;  %v19576_v34 = vld [vmem:[#allocation9 + $0x434] sm:$0xf] }
 0x3e6   :  { %7937 = vmatmul.bf16.vlgmr.msrb.gmra.mxu0 %v21340_v48 }
 0x3e7   :  { %7981 = vmatpush.bf16.msra.mxu0 %v16289_v28  ;;  %v19603_v28 = vld [vmem:[#allocation9 + $0x504] sm:$0xf0] }
 0x3e8   :  { %7959 = vmatpush.bf16.msra.mxu3 %v16381_v21  ;;  %7534 = vmatpush.bf16.msra.mxu2 %v16169_v22  ;;  %v16357_v21 = vor.u32 %v19603_v28, %v16356_v43  ;;  %v19600_v22 = vld [vmem:[#allocation9 + $0x4f4] sm:$0xf]  ;;  %v19623_v43 = vld [vmem:[#allocation9 + $0x5a4] sm:$0xf0]  ;;  %v16241_v28 = vor.u32 %v19572_v37, %v16238_v50 }
 0x3e9   :  { %7946 = vmatpush.bf16.msra.mxu1 %v16317_v41  ;;  %v16257_v41 = vor.u32 %v19576_v34, %v16254_v11  ;;  %v19570_v34 = vld [vmem:[#allocation9 + $0x404] sm:$0xf]  ;;  %v16401_v11 = vor.u32 %v19612_v35, %v16398_v40  ;;  %v19632_v50 = vld [vmem:[#allocation9 + $0x5f4] sm:$0xf]  ;;  %v16478_v35 = vld [vmem:[#allocation9 + $0x5f8] sm:$0xf0] }
 0x3eb   :  { %7982 = vmatpush.bf16.msra.mxu0 %v16281_v33  ;;  %7535 = vmatmul.bf16.vlgmr.msra.gmra.mxu2 %v21362_v9  ;;  %v16350_v33 = vld [vmem:[#allocation9 + $0x4f8] sm:$0xf0]  ;;  %v6519_v30 = vpop.f32.mrf.mxu0 }
 0x3ec   :  { %7968 = vmatpush.bf16.msrb.mxu2 %v16477_v0  ;;  %7960 = vmatpush.bf16.msra.mxu3 %v16373_v18  ;;  %v19574_v0 = vld [vmem:[#allocation9 + $0x424] sm:$0xf]  ;;  %v16353_v19 = vor.u32 %v19600_v22, %v16350_v33  ;;  %v16444_v18 = vld [vmem:[#allocation9 + $0x5b0] sm:$0xf]  ;;  %v19649_v33 = vld [vmem:[#allocation9 + $0x674] sm:$0xf0] }
 0x3ed   :  { %7947 = vmatpush.bf16.msra.mxu1 %v16309_v16  ;;  %v19598_v16 = vld [vmem:[#allocation9 + $0x4e4] sm:$0xf]  ;;  %v16249_v54 = vor.u32 %v19574_v0, %v16246_v45  ;;  %v16540_v22 = vld [vmem:[#allocation9 + $0x670] sm:$0xf]  ;;  %v16393_v45 = vor.u32 %v19610_v31, %v16390_v3  ;;  %v19608_v30 = vld [vmem:[#allocation9 + $0x534] sm:$0xf] }
 0x3ee   :  { %v16345_v5 = vor.u32 %v19598_v16, %v16342_v2  ;;  %v16541_v46 = vor.u32 %v19649_v33, %v16540_v22  ;;  %v19619_v16 = vld [vmem:[#allocation9 + $0x584] sm:$0xf0]  ;;  %v16532_v2 = vld [vmem:[#allocation9 + $0x660] sm:$0xf]  ;;  %v16310_v31 = vld [vmem:[#allocation9 + $0x4a8] sm:$0xf0] }
 0x3ef   :  { %7983 = vmatpush.bf16.msra.mxu0 %v16273_v27  ;;  %v19625_v27 = vld [vmem:[#allocation9 + $0x5b4] sm:$0xf0] }
 0x3f0   :  { %7969 = vmatpush.bf16.msrb.mxu2 %v16469_v59  ;;  %7961 = vmatpush.bf16.msra.mxu3 %v16365_v26  ;;  %v16445_v59 = vor.u32 %v19625_v27, %v16444_v18  ;;  %v16436_v26 = vld [vmem:[#allocation9 + $0x5a0] sm:$0xf] }
 0x3f1   :  { %7948 = vmatpush.bf16.msra.mxu1 %v16301_v32  ;;  %v16334_v32 = vld [vmem:[#allocation9 + $0x4d8] sm:$0xf0]  ;;  %v16420_v27 = vld [vmem:[#allocation9 + $0x580] sm:$0xf] }
 0x3f2   :  { %v16421_v40 = vor.u32 %v19619_v16, %v16420_v27  ;;  %v19602_v27 = vld [vmem:[#allocation9 + $0x504] sm:$0xf] }
 0x3f3   :  { %7984 = vmatpush.bf16.msra.mxu0 %v16265_v23  ;;  %v19596_v23 = vld [vmem:[#allocation9 + $0x4d4] sm:$0xf]  ;;  %v21385_v17 = vpop.f32.mrf.mxu0 }
 0x3f4   :  { %7970 = vmatpush.bf16.msrb.mxu2 %v16461_v20  ;;  %7962 = vmatpush.bf16.msra.mxu3 %v16357_v21  ;;  %v16437_v20 = vor.u32 %v19623_v43, %v16436_v26  ;;  %v16337_v8 = vor.u32 %v19596_v23, %v16334_v32  ;;  %v19621_v21 = vld [vmem:[#allocation9 + $0x594] sm:$0xf0]  ;;  %v19606_v32 = vld [vmem:[#allocation9 + $0x524] sm:$0xf] }
 0x3f5   :  { %7949 = vmatpush.bf16.msra.mxu1 %v16293_v13  ;;  %v6530_v13 = vpop.f32.mrf.mxu1  ;;  %v16429_v39 = vor.u32 %v19621_v21, %v16428_v49  ;;  %v16470_v49 = vld [vmem:[#allocation9 + $0x5e8] sm:$0xf0] }
 0x3f6   :  { %v6531_v0 = vadd.f32 %v6530_v13, %v21381_v6  ;;  %v16516_v13 = vld [vmem:[#allocation9 + $0x640] sm:$0xf] }
 0x3f7   :  { %7985 = vmatpush.bf16.msra.mxu0 %v16257_v41  ;;  %7963 = vmatmul.bf16.vlgmr.msra.gmra.mxu3 %v21352_v61  ;;  %v19594_v41 = vld [vmem:[#allocation9 + $0x4c4] sm:$0xf] }
 0x3f8   :  { %8007 = vmatpush.bf16.msrb.mxu3 %v16417_v58  ;;  %7971 = vmatpush.bf16.msrb.mxu2 %v16453_v55  ;;  %v16326_v58 = vld [vmem:[#allocation9 + $0x4c8] sm:$0xf0]  ;;  %v16233_v55 = vor.u32 %v19570_v34, %v16230_v7  ;;  %v16524_v34 = vld [vmem:[#allocation9 + $0x650] sm:$0xf]  ;;  %v19590_v7 = vld [vmem:[#allocation9 + $0x4a4] sm:$0xf] }
 0x3f9   :  { %7994 = vmatpush.bf16.msrb.mxu1 %v16353_v19  ;;  %v16382_v19 = vld [vmem:[#allocation9 + $0x538] sm:$0xf0]  ;;  %v16329_v18 = vor.u32 %v19594_v41, %v16326_v58  ;;  %v6543_v37 = vpop.f32.mrf.mxu3  ;;  %v16313_v33 = vor.u32 %v19590_v7, %v16310_v31  ;;  %v19604_v41 = vld [vmem:[#allocation9 + $0x514] sm:$0xf]  ;;  %v20224_v7 = vld [vmem:[#allocation24] ss:$0 sm:$0xff] }
 0x3fa   :  { %7950 = vmatmul.bf16.vlgmr.msra.gmra.mxu1 %v21354_v52  ;;  %v21388_v6 = vadd.f32 %v6543_v37, %v6531_v0  ;;  %v16366_v58 = vld [vmem:[#allocation9 + $0x518] sm:$0xf0]  ;;  %v19643_v0 = vld [vmem:[#allocation9 + $0x644] sm:$0xf0]  ;;  %v19641_v37 = vld [vmem:[#allocation9 + $0x634] sm:$0xf0] }
 0x3fb   :  { %7986 = vmatpush.bf16.msra.mxu0 %v16249_v54  ;;  %v19647_v54 = vld [vmem:[#allocation9 + $0x664] sm:$0xf0]  ;;  %v6956_v26 = vpop.f32.mrf.mxu0 }
 0x3fc   :  { %8008 = vmatpush.bf16.msrb.mxu3 %v16409_v44  ;;  %7972 = vmatpush.bf16.msrb.mxu2 %v16445_v59  ;;  %v19592_v44 = vld [vmem:[#allocation9 + $0x4b4] sm:$0xf]  ;;  %v16318_v59 = vld [vmem:[#allocation9 + $0x4b8] sm:$0xf0]  ;;  %v16533_v43 = vor.u32 %v19647_v54, %v16532_v2  ;;  %v16517_v2 = vor.u32 %v19643_v0, %v16516_v13  ;;  %v19679_v13 = vld [vmem:[#allocation9 + $0x764] sm:$0xf0] }
 0x3fd   :  { %7995 = vmatpush.bf16.msrb.mxu1 %v16345_v5  ;;  %v16385_v5 = vor.u32 %v19608_v30, %v16382_v19  ;;  %v16321_v23 = vor.u32 %v19592_v44, %v16318_v59  ;;  %v6532_v3 = vpop.f32.mrf.mxu1  ;;  %v19628_v19 = vld [vmem:[#allocation9 + $0x5d4] sm:$0xf]  ;;  %v16358_v44 = vld [vmem:[#allocation9 + $0x508] sm:$0xf0]  ;;  %v16508_v59 = vld [vmem:[#allocation9 + $0x630] sm:$0xf] }
 0x3fe   :  { %v16509_v31 = vor.u32 %v19641_v37, %v16508_v59  ;;  %v16446_v0 = vld [vmem:[#allocation9 + $0x5b8] sm:$0xf0]  ;;  %v16492_v59 = vld [vmem:[#allocation9 + $0x610] sm:$0xf]  ;;  %v19637_v37 = vld [vmem:[#allocation9 + $0x614] sm:$0xf0] }
 0x3ff   :  { %7987 = vmatpush.bf16.msra.mxu0 %v16241_v28  ;;  %v16374_v28 = vld [vmem:[#allocation9 + $0x528] sm:$0xf0] }
 0x400   :  { %8009 = vmatpush.bf16.msrb.mxu3 %v16401_v11  ;;  %7973 = vmatpush.bf16.msrb.mxu2 %v16437_v20  ;;  %v16481_v11 = vor.u32 %v19632_v50, %v16478_v35  ;;  %v19645_v20 = vld [vmem:[#allocation9 + $0x654] sm:$0xf0]  ;;  %v16377_v21 = vor.u32 %v19606_v32, %v16374_v28  ;;  %v16668_v35 = vld [vmem:[#allocation9 + $0x770] sm:$0xf]  ;;  %v16454_v32 = vld [vmem:[#allocation9 + $0x5c8] sm:$0xf0] }
 0x401   :  { %7996 = vmatpush.bf16.msrb.mxu1 %v16337_v8  ;;  %v19630_v8 = vld [vmem:[#allocation9 + $0x5e4] sm:$0xf]  ;;  %v16525_v22 = vor.u32 %v19645_v20, %v16524_v34  ;;  %v6545_v30 = vpop.f32.mrf.mxu3  ;;  %v16361_v34 = vor.u32 %v19602_v27, %v16358_v44  ;;  %v19665_v20 = vld [vmem:[#allocation9 + $0x6f4] sm:$0xf0] }
 0x402   :  { %v19663_v30 = vld [vmem:[#allocation9 + $0x6e4] sm:$0xf0] }
 0x403   :  { %7988 = vmatpush.bf16.msra.mxu0 %v16233_v55  ;;  %v16473_v55 = vor.u32 %v19630_v8, %v16470_v49  ;;  %v21392_v16 = vpop.f32.mrf.mxu0 }
 0x404   :  { %8010 = vmatpush.bf16.msrb.mxu3 %v16393_v45  ;;  %7974 = vmatpush.bf16.msrb.mxu2 %v16429_v39  ;;  %v19588_v45 = vld [vmem:[#allocation9 + $0x494] sm:$0xf]  ;;  %v16302_v39 = vld [vmem:[#allocation9 + $0x498] sm:$0xf0] }
 0x405   :  { %7997 = vmatpush.bf16.msrb.mxu1 %v16329_v18  ;;  %v16369_v18 = vor.u32 %v19604_v41, %v16366_v58  ;;  %v16305_v54 = vor.u32 %v19588_v45, %v16302_v39  ;;  %v6967_v26 = vpop.f32.mrf.mxu1  ;;  %v16596_v39 = vld [vmem:[#allocation9 + $0x6e0] sm:$0xf] }
 0x406   :  { %7989 = vmatmul.bf16.vlgmr.msra.gmra.mxu0 %v21340_v48  ;;  %v6968_v28 = vadd.f32 %v6967_v26, %v21385_v17  ;;  %v19677_v26 = vld [vmem:[#allocation9 + $0x754] sm:$0xf0] }
 0x407   :  { %8422 = vmatpush.bf16.msrb.mxu0 %v16541_v46  ;;  %v16462_v46 = vld [vmem:[#allocation9 + $0x5d8] sm:$0xf0] }
 0x408   :  { %8011 = vmatpush.bf16.msrb.mxu3 %v16385_v5  ;;  %7975 = vmatpush.bf16.msrb.mxu2 %v16421_v40  ;;  %v16465_v50 = vor.u32 %v19628_v19, %v16462_v46  ;;  %v19681_v5 = vld [vmem:[#allocation9 + $0x774] sm:$0xf0]  ;;  %v19586_v40 = vld [vmem:[#allocation9 + $0x484] sm:$0xf] }
 0x409   :  { %7998 = vmatpush.bf16.msrb.mxu1 %v16321_v23  ;;  %v19626_v23 = vld [vmem:[#allocation9 + $0x5c4] sm:$0xf]  ;;  %v16669_v3 = vor.u32 %v19681_v5, %v16668_v35  ;;  %v6980_v41 = vpop.f32.mrf.mxu3  ;;  %v21805_v19 = vld [vmem:[#allocation33_spill] sm:$0xff] }
 0x40a   :  { %v16457_v49 = vor.u32 %v19626_v23, %v16454_v32  ;;  %v21395_v17 = vadd.f32 %v6980_v41, %v6968_v28  ;;  %v393_v46 = vadd.f32 %v20224_v7, %v21805_v19  ;;  %v16438_v23 = vld [vmem:[#allocation9 + $0x5a8] sm:$0xf0]  ;;  %v19661_v32 = vld [vmem:[#allocation9 + $0x6d4] sm:$0xf0]  ;;  %v16493_v28 = vor.u32 %v19637_v37, %v16492_v59  ;;  %v19635_v7 = vld [vmem:[#allocation9 + $0x604] sm:$0xf0] }
 0x40b   :  { %8423 = vmatpush.bf16.msrb.mxu0 %v16533_v43  ;;  %7976 = vmatmul.bf16.vlgmr.msrb.gmra.mxu2 %v21362_v9  ;;  %v16294_v43 = vld [vmem:[#allocation9 + $0x488] sm:$0xf0]  ;;  %v7008_v27 = vpop.f32.mrf.mxu0  ;;  %v19673_v19 = vld [vmem:[#allocation9 + $0x734] sm:$0xf0]  ;;  %v16572_v37 = vld [vmem:[#allocation9 + $0x6b0] sm:$0xf] }
 0x40c   :  { %8020 = vmatpush.bf16.msra.mxu2 %v16481_v11  ;;  %8012 = vmatpush.bf16.msrb.mxu3 %v16377_v21  ;;  %v16604_v11 = vld [vmem:[#allocation9 + $0x6f0] sm:$0xf]  ;;  %v16297_v8 = vor.u32 %v19586_v40, %v16294_v43  ;;  %v16500_v21 = vld [vmem:[#allocation9 + $0x620] sm:$0xf]  ;;  %v16597_v40 = vor.u32 %v19663_v30, %v16596_v39  ;;  %v19622_v43 = vld [vmem:[#allocation9 + $0x5a4] sm:$0xf] }
 0x40d   :  { %7999 = vmatpush.bf16.msrb.mxu1 %v16313_v33  ;;  %v16660_v33 = vld [vmem:[#allocation9 + $0x760] sm:$0xf]  ;;  %v16605_v58 = vor.u32 %v19665_v20, %v16604_v11  ;;  %v6969_v5 = vpop.f32.mrf.mxu1  ;;  %v16441_v20 = vor.u32 %v19622_v43, %v16438_v23  ;;  %v16636_v30 = vld [vmem:[#allocation9 + $0x730] sm:$0xf]  ;;  %v19618_v27 = vld [vmem:[#allocation9 + $0x584] sm:$0xf] }
 0x40e   :  { %v6556_v45 = vpop.f32.mrf.mxu2  ;;  %v16534_v59 = vld [vmem:[#allocation9 + $0x668] sm:$0xf0]  ;;  %v16637_v43 = vor.u32 %v19673_v19, %v16636_v30 }
 0x40f   :  { %8424 = vmatpush.bf16.msrb.mxu0 %v16525_v22  ;;  %v19639_v22 = vld [vmem:[#allocation9 + $0x624] sm:$0xf0]  ;;  %v16518_v19 = vld [vmem:[#allocation9 + $0x648] sm:$0xf0] }
 0x410   :  { %8021 = vmatpush.bf16.msra.mxu2 %v16473_v55  ;;  %8013 = vmatpush.bf16.msrb.mxu3 %v16369_v18  ;;  %v19624_v55 = vld [vmem:[#allocation9 + $0x5b4] sm:$0xf]  ;;  %v6557_v18 = vadd.f32 %v6556_v45, %v21388_v6  ;;  %v16588_v6 = vld [vmem:[#allocation9 + $0x6d0] sm:$0xf] }
 0x411   :  { %8000 = vmatpush.bf16.msrb.mxu1 %v16305_v54  ;;  %v16661_v54 = vor.u32 %v19679_v13, %v16660_v33  ;;  %v16449_v44 = vor.u32 %v19624_v55, %v16446_v0  ;;  %v19648_v33 = vld [vmem:[#allocation9 + $0x674] sm:$0xf]  ;;  %v16580_v13 = vld [vmem:[#allocation9 + $0x6c0] sm:$0xf]  ;;  %v19659_v55 = vld [vmem:[#allocation9 + $0x6c4] sm:$0xf0] }
 0x412   :  { %v21400_v35 = vadd.f32 %v6557_v18, %v393_v46  ;;  %v16581_v18 = vor.u32 %v19659_v55, %v16580_v13  ;;  %v16620_v55 = vld [vmem:[#allocation9 + $0x710] sm:$0xf] }
 0x413   :  { %8425 = vmatpush.bf16.msrb.mxu0 %v16517_v2  ;;  %v16501_v2 = vor.u32 %v19639_v22, %v16500_v21  ;;  %v19620_v21 = vld [vmem:[#allocation9 + $0x594] sm:$0xf]  ;;  %v16430_v22 = vld [vmem:[#allocation9 + $0x598] sm:$0xf0] }
 0x414   :  { %8022 = vmatpush.bf16.msra.mxu2 %v16465_v50  ;;  %8014 = vmatpush.bf16.msrb.mxu3 %v16361_v34  ;;  %v16652_v50 = vld [vmem:[#allocation9 + $0x750] sm:$0xf]  ;;  %v16484_v34 = vld [vmem:[#allocation9 + $0x600] sm:$0xf]  ;;  %v16433_v39 = vor.u32 %v19620_v21, %v16430_v22 }
 0x415   :  { %8001 = vmatpush.bf16.msrb.mxu1 %v16297_v8  ;;  %v16653_v11 = vor.u32 %v19677_v26, %v16652_v50  ;;  %v6982_v8 = vpop.f32.mrf.mxu3  ;;  %v16485_v0 = vor.u32 %v19635_v7, %v16484_v34  ;;  %v19657_v50 = vld [vmem:[#allocation9 + $0x6b4] sm:$0xf0]  ;;  %v16628_v34 = vld [vmem:[#allocation9 + $0x720] sm:$0xf] }
 0x416   :  { %v6558_v41 = vpop.f32.mrf.mxu2  ;;  %v19697_v26 = vld [vmem:[#allocation9 + $0x7f4] sm:$0xf0]  ;;  %v16564_v8 = vld [vmem:[#allocation9 + $0x6a0] sm:$0xf] }
 0x417   :  { %8426 = vmatpush.bf16.msrb.mxu0 %v16509_v31  ;;  %8015 = vmatmul.bf16.vlgmr.msrb.gmra.mxu3 %v21352_v61  ;;  %v16644_v31 = vld [vmem:[#allocation9 + $0x740] sm:$0xf] }
 0x418   :  { %8448 = vmatpush.bf16.msra.mxu3 %v16669_v3  ;;  %8023 = vmatpush.bf16.msra.mxu2 %v16457_v49  ;;  %v19675_v3 = vld [vmem:[#allocation9 + $0x744] sm:$0xf0]  ;;  %v16589_v49 = vor.u32 %v19661_v32, %v16588_v6  ;;  %v16724_v22 = vld [vmem:[#allocation9 + $0x7e0] sm:$0xf] }
 0x419   :  { %8435 = vmatpush.bf16.msra.mxu1 %v16605_v58  ;;  %v16542_v58 = vld [vmem:[#allocation9 + $0x678] sm:$0xf0]  ;;  %v16645_v45 = vor.u32 %v19675_v3, %v16644_v31 }
 0x41a   :  { %8002 = vmatmul.bf16.vlgmr.msrb.gmra.mxu1 %v21354_v52  ;;  %v16545_v46 = vor.u32 %v19648_v33, %v16542_v58  ;;  %v16526_v3 = vld [vmem:[#allocation9 + $0x658] sm:$0xf0]  ;;  %v19695_v33 = vld [vmem:[#allocation9 + $0x7e4] sm:$0xf0] }
 0x41b   :  { %8427 = vmatpush.bf16.msrb.mxu0 %v16501_v2  ;;  %v16422_v2 = vld [vmem:[#allocation9 + $0x588] sm:$0xf0]  ;;  %v16725_v30 = vor.u32 %v19695_v33, %v16724_v22 }
 0x41c   :  { %8449 = vmatpush.bf16.msra.mxu3 %v16661_v54  ;;  %8024 = vmatpush.bf16.msra.mxu2 %v16449_v44  ;;  %v19646_v54 = vld [vmem:[#allocation9 + $0x664] sm:$0xf]  ;;  %v7019_v44 = vpop.f32.mrf.mxu1  ;;  %v16425_v23 = vor.u32 %v19618_v27, %v16422_v2  ;;  %v19693_v27 = vld [vmem:[#allocation9 + $0x7d4] sm:$0xf0] }
 0x41d   :  { %8436 = vmatpush.bf16.msra.mxu1 %v16597_v40  ;;  %v7020_v5 = vadd.f32 %v7019_v44, %v21392_v16  ;;  %v16732_v40 = vld [vmem:[#allocation9 + $0x7f0] sm:$0xf]  ;;  %v16537_v6 = vor.u32 %v19646_v54, %v16534_v59  ;;  %v7032_v32 = vpop.f32.mrf.mxu3  ;;  %v16612_v44 = vld [vmem:[#allocation9 + $0x700] sm:$0xf] }
 0x41e   :  { %v16733_v31 = vor.u32 %v19697_v26, %v16732_v40  ;;  %v6993_v16 = vpop.f32.mrf.mxu2  ;;  %v19640_v40 = vld [vmem:[#allocation9 + $0x634] sm:$0xf]  ;;  %v16510_v26 = vld [vmem:[#allocation9 + $0x638] sm:$0xf0] }
 0x41f   :  { %8428 = vmatpush.bf16.msrb.mxu0 %v16493_v28  ;;  %v16573_v28 = vor.u32 %v19657_v50, %v16572_v37  ;;  %v21405_v7 = vadd.f32 %v7032_v32, %v7020_v5  ;;  %v21408_v21 = vadd.f32 %v6993_v16, %v21395_v17  ;;  %v16716_v17 = vld [vmem:[#allocation9 + $0x7d0] sm:$0xf]  ;;  %v19667_v5 = vld [vmem:[#allocation9 + $0x704] sm:$0xf0]  ;;  %v16670_v32 = vld [vmem:[#allocation9 + $0x778] sm:$0xf0] }
 0x420   :  { %8450 = vmatpush.bf16.msra.mxu3 %v16653_v11  ;;  %8025 = vmatpush.bf16.msra.mxu2 %v16441_v20  ;;  %v19671_v11 = vld [vmem:[#allocation9 + $0x724] sm:$0xf0]  ;;  %v19644_v20 = vld [vmem:[#allocation9 + $0x654] sm:$0xf] }
 0x421   :  { %8437 = vmatpush.bf16.msra.mxu1 %v16589_v49  ;;  %v19655_v49 = vld [vmem:[#allocation9 + $0x6a4] sm:$0xf0]  ;;  %v16629_v41 = vor.u32 %v19671_v11, %v16628_v34  ;;  %v16529_v58 = vor.u32 %v19644_v20, %v16526_v3  ;;  %v16708_v11 = vld [vmem:[#allocation9 + $0x7c0] sm:$0xf]  ;;  %v19664_v16 = vld [vmem:[#allocation9 + $0x6f4] sm:$0xf] }
 0x422   :  { %v16565_v13 = vor.u32 %v19655_v49, %v16564_v8  ;;  %v19651_v34 = vld [vmem:[#allocation9 + $0x684] sm:$0xf0]  ;;  %v16606_v3 = vld [vmem:[#allocation9 + $0x6f8] sm:$0xf0]  ;;  %v16513_v8 = vor.u32 %v19640_v40, %v16510_v26  ;;  %v16692_v40 = vld [vmem:[#allocation9 + $0x7a0] sm:$0xf] }
 0x423   :  { %8429 = vmatpush.bf16.msrb.mxu0 %v16485_v0  ;;  %v19669_v0 = vld [vmem:[#allocation9 + $0x714] sm:$0xf0]  ;;  %v21411_v2 = vpop.f32.mrf.mxu0  ;;  %v19691_v20 = vld [vmem:[#allocation9 + $0x7c4] sm:$0xf0] }
 0x424   :  { %8451 = vmatpush.bf16.msra.mxu3 %v16645_v45  ;;  %8026 = vmatpush.bf16.msra.mxu2 %v16433_v39  ;;  %v19642_v45 = vld [vmem:[#allocation9 + $0x644] sm:$0xf]  ;;  %v7021_v39 = vpop.f32.mrf.mxu1  ;;  %v16621_v54 = vor.u32 %v19669_v0, %v16620_v55  ;;  %v16709_v33 = vor.u32 %v19691_v20, %v16708_v11  ;;  %v16609_v55 = vor.u32 %v19664_v16, %v16606_v3  ;;  %v16662_v0 = vld [vmem:[#allocation9 + $0x768] sm:$0xf0]  ;;  %v19687_v26 = vld [vmem:[#allocation9 + $0x7a4] sm:$0xf0] }
 0x425   :  { %8438 = vmatpush.bf16.msra.mxu1 %v16581_v18  ;;  %v19653_v18 = vld [vmem:[#allocation9 + $0x694] sm:$0xf0]  ;;  %v16521_v59 = vor.u32 %v19642_v45, %v16518_v19  ;;  %v7034_v37 = vpop.f32.mrf.mxu3  ;;  %v16700_v45 = vld [vmem:[#allocation9 + $0x7b0] sm:$0xf]  ;;  %v19662_v19 = vld [vmem:[#allocation9 + $0x6e4] sm:$0xf]  ;;  %v16693_v11 = vor.u32 %v19687_v26, %v16692_v40 }
 0x426   :  { %8430 = vmatmul.bf16.vlgmr.msrb.gmra.mxu0 %v21340_v48  ;;  %v19689_v39 = vld [vmem:[#allocation9 + $0x7b4] sm:$0xf0]  ;;  %v16486_v20 = vld [vmem:[#allocation9 + $0x608] sm:$0xf0] }
 0x427   :  { %8474 = vmatpush.bf16.msra.mxu0 %v16545_v46  ;;  %v16556_v46 = vld [vmem:[#allocation9 + $0x690] sm:$0xf]  ;;  %v16646_v16 = vld [vmem:[#allocation9 + $0x748] sm:$0xf0] }
 0x428   :  { %8452 = vmatpush.bf16.msra.mxu3 %v16637_v43  ;;  %8027 = vmatpush.bf16.msra.mxu2 %v16425_v23  ;;  %v16557_v50 = vor.u32 %v19653_v18, %v16556_v46  ;;  %v16717_v43 = vor.u32 %v19693_v27, %v16716_v17  ;;  %v6995_v23 = vpop.f32.mrf.mxu2  ;;  %v16598_v46 = vld [vmem:[#allocation9 + $0x6e8] sm:$0xf0]  ;;  %v16701_v27 = vor.u32 %v19689_v39, %v16700_v45  ;;  %v19672_v45 = vld [vmem:[#allocation9 + $0x734] sm:$0xf]  ;;  %v16638_v39 = vld [vmem:[#allocation9 + $0x738] sm:$0xf0] }
 0x429   :  { %8439 = vmatpush.bf16.msra.mxu1 %v16573_v28  ;;  %v16548_v28 = vld [vmem:[#allocation9 + $0x680] sm:$0xf]  ;;  %v16601_v37 = vor.u32 %v19662_v19, %v16598_v46  ;;  %v19660_v23 = vld [vmem:[#allocation9 + $0x6d4] sm:$0xf]  ;;  %v16641_v40 = vor.u32 %v19672_v45, %v16638_v39  ;;  %v19707_v45 = vld [vmem:[#allocation9 + $0x844] sm:$0xf0] }
 0x42a   :  { %v16549_v22 = vor.u32 %v19651_v34, %v16548_v28  ;;  %v19634_v28 = vld [vmem:[#allocation9 + $0x604] sm:$0xf]  ;;  %v19652_v39 = vld [vmem:[#allocation9 + $0x694] sm:$0xf] }
 0x42b   :  { %8475 = vmatpush.bf16.msra.mxu0 %v16537_v6  ;;  %8028 = vmatmul.bf16.vlgmr.msra.gmra.mxu2 %v21362_v9  ;;  %v19680_v6 = vld [vmem:[#allocation9 + $0x774] sm:$0xf] }
 0x42c   :  { %8461 = vmatpush.bf16.msrb.mxu2 %v16733_v31  ;;  %8453 = vmatpush.bf16.msra.mxu3 %v16629_v41  ;;  %v16613_v31 = vor.u32 %v19667_v5, %v16612_v44  ;;  %v16673_v49 = vor.u32 %v19680_v6, %v16670_v32  ;;  %v19638_v41 = vld [vmem:[#allocation9 + $0x624] sm:$0xf]  ;;  %v16494_v44 = vld [vmem:[#allocation9 + $0x618] sm:$0xf0] }
 0x42d   :  { %8440 = vmatpush.bf16.msra.mxu1 %v16565_v13  ;;  %v19678_v13 = vld [vmem:[#allocation9 + $0x764] sm:$0xf]  ;;  %v16654_v5 = vld [vmem:[#allocation9 + $0x758] sm:$0xf0] }
 0x42e   :  { %v16665_v17 = vor.u32 %v19678_v13, %v16662_v0  ;;  %v16590_v6 = vld [vmem:[#allocation9 + $0x6d8] sm:$0xf0] }
 0x42f   :  { %8476 = vmatpush.bf16.msra.mxu0 %v16529_v58  ;;  %v16502_v58 = vld [vmem:[#allocation9 + $0x628] sm:$0xf0]  ;;  %v16593_v3 = vor.u32 %v19660_v23, %v16590_v6 }
 0x430   :  { %8462 = vmatpush.bf16.msrb.mxu2 %v16725_v30  ;;  %8454 = vmatpush.bf16.msra.mxu3 %v16621_v54  ;;  %v7447_v30 = vpop.f32.mrf.mxu0  ;;  %v16505_v18 = vor.u32 %v19638_v41, %v16502_v58  ;;  %v19636_v54 = vld [vmem:[#allocation9 + $0x614] sm:$0xf]  ;;  %v16582_v41 = vld [vmem:[#allocation9 + $0x6c8] sm:$0xf0]  ;;  %v16489_v58 = vor.u32 %v19634_v28, %v16486_v20  ;;  %v19670_v28 = vld [vmem:[#allocation9 + $0x724] sm:$0xf] }
 0x431   :  { %8441 = vmatpush.bf16.msra.mxu1 %v16557_v50  ;;  %v7045_v50 = vpop.f32.mrf.mxu2  ;;  %v16497_v32 = vor.u32 %v19636_v54, %v16494_v44  ;;  %v16788_v54 = vld [vmem:[#allocation9 + $0x860] sm:$0xf]  ;;  %v19711_v44 = vld [vmem:[#allocation9 + $0x864] sm:$0xf0] }
 0x432   :  { %v16789_v6 = vor.u32 %v19711_v44, %v16788_v54  ;;  %v19666_v54 = vld [vmem:[#allocation9 + $0x704] sm:$0xf] }
 0x433   :  { %8477 = vmatpush.bf16.msra.mxu0 %v16521_v59  ;;  %v19676_v59 = vld [vmem:[#allocation9 + $0x754] sm:$0xf] }
 0x434   :  { %8463 = vmatpush.bf16.msrb.mxu2 %v16717_v43  ;;  %8455 = vmatpush.bf16.msra.mxu3 %v16613_v31  ;;  %v21415_v43 = vadd.f32 %v7045_v50, %v21405_v7  ;;  %v16657_v34 = vor.u32 %v19676_v59, %v16654_v5  ;;  %v19674_v31 = vld [vmem:[#allocation9 + $0x744] sm:$0xf]  ;;  %v16796_v7 = vld [vmem:[#allocation9 + $0x870] sm:$0xf]  ;;  %v19656_v59 = vld [vmem:[#allocation9 + $0x6b4] sm:$0xf] }
 0x435   :  { %8442 = vmatpush.bf16.msra.mxu1 %v16549_v22  ;;  %v19713_v22 = vld [vmem:[#allocation9 + $0x874] sm:$0xf0]  ;;  %v16649_v13 = vor.u32 %v19674_v31, %v16646_v16  ;;  %v19696_v50 = vld [vmem:[#allocation9 + $0x7f4] sm:$0xf]  ;;  %v16734_v5 = vld [vmem:[#allocation9 + $0x7f8] sm:$0xf0] }
 0x436   :  { %v16797_v19 = vor.u32 %v19713_v22, %v16796_v7  ;;  %v16737_v20 = vor.u32 %v19696_v50, %v16734_v5  ;;  %v19709_v31 = vld [vmem:[#allocation9 + $0x854] sm:$0xf0]  ;;  %v19654_v16 = vld [vmem:[#allocation9 + $0x6a4] sm:$0xf]  ;;  %v16764_v50 = vld [vmem:[#allocation9 + $0x830] sm:$0xf] }
 0x437   :  { %8478 = vmatpush.bf16.msra.mxu0 %v16513_v8  ;;  %8456 = vmatmul.bf16.vlgmr.msra.gmra.mxu3 %v21352_v61  ;;  %v16684_v8 = vld [vmem:[#allocation9 + $0x790] sm:$0xf]  ;;  %v19705_v5 = vld [vmem:[#allocation9 + $0x834] sm:$0xf0] }
 0x438   :  { %8500 = vmatpush.bf16.msrb.mxu3 %v16673_v49  ;;  %8464 = vmatpush.bf16.msrb.mxu2 %v16709_v33  ;;  %v19685_v49 = vld [vmem:[#allocation9 + $0x794] sm:$0xf0]  ;;  %v19658_v33 = vld [vmem:[#allocation9 + $0x6c4] sm:$0xf] }
 0x439   :  { %8487 = vmatpush.bf16.msrb.mxu1 %v16609_v55  ;;  %v7458_v55 = vpop.f32.mrf.mxu1  ;;  %v16685_v0 = vor.u32 %v19685_v49, %v16684_v8  ;;  %v16585_v46 = vor.u32 %v19658_v33, %v16582_v41  ;;  %v19694_v8 = vld [vmem:[#allocation9 + $0x7e4] sm:$0xf]  ;;  %v16726_v49 = vld [vmem:[#allocation9 + $0x7e8] sm:$0xf0] }
 0x43a   :  { %8443 = vmatmul.bf16.vlgmr.msra.gmra.mxu1 %v21354_v52  ;;  %v7459_v30 = vadd.f32 %v7458_v55, %v21411_v2  ;;  %v7471_v26 = vpop.f32.mrf.mxu3  ;;  %v16772_v55 = vld [vmem:[#allocation9 + $0x840] sm:$0xf] }
 0x43b   :  { %8479 = vmatpush.bf16.msra.mxu0 %v16505_v18  ;;  %v7047_v18 = vpop.f32.mrf.mxu2  ;;  %v16773_v44 = vor.u32 %v19707_v45, %v16772_v55  ;;  %v19688_v55 = vld [vmem:[#allocation9 + $0x7b4] sm:$0xf]  ;;  %v16852_v45 = vld [vmem:[#allocation9 + $0x8e0] sm:$0xf] }
 0x43c   :  { %8501 = vmatpush.bf16.msrb.mxu3 %v16665_v17  ;;  %8465 = vmatpush.bf16.msrb.mxu2 %v16701_v27  ;;  %v16676_v17 = vld [vmem:[#allocation9 + $0x780] sm:$0xf]  ;;  %v19683_v27 = vld [vmem:[#allocation9 + $0x784] sm:$0xf0]  ;;  %v21419_v2 = vadd.f32 %v7471_v26, %v7459_v30  ;;  %v16558_v30 = vld [vmem:[#allocation9 + $0x698] sm:$0xf0] }
 0x43d   :  { %8488 = vmatpush.bf16.msrb.mxu1 %v16601_v37  ;;  %v16574_v37 = vld [vmem:[#allocation9 + $0x6b8] sm:$0xf0]  ;;  %v16677_v23 = vor.u32 %v19683_v27, %v16676_v17  ;;  %v16924_v26 = vld [vmem:[#allocation9 + $0x970] sm:$0xf] }
 0x43e   :  { %v16718_v18 = vld [vmem:[#allocation9 + $0x7d8] sm:$0xf0] }
 0x43f   :  { %8480 = vmatpush.bf16.msra.mxu0 %v16497_v32  ;;  %v16577_v32 = vor.u32 %v19656_v59, %v16574_v37  ;;  %v16561_v59 = vor.u32 %v19652_v39, %v16558_v30  ;;  %v16614_v37 = vld [vmem:[#allocation9 + $0x708] sm:$0xf0]  ;;  %v19727_v39 = vld [vmem:[#allocation9 + $0x8e4] sm:$0xf0] }
 0x440   :  { %8502 = vmatpush.bf16.msrb.mxu3 %v16657_v34  ;;  %8466 = vmatpush.bf16.msrb.mxu2 %v16693_v11  ;;  %v16630_v34 = vld [vmem:[#allocation9 + $0x728] sm:$0xf0]  ;;  %v16780_v11 = vld [vmem:[#allocation9 + $0x850] sm:$0xf] }
 0x441   :  { %8489 = vmatpush.bf16.msrb.mxu1 %v16593_v3  ;;  %v16566_v3 = vld [vmem:[#allocation9 + $0x6a8] sm:$0xf0]  ;;  %v16633_v7 = vor.u32 %v19670_v28, %v16630_v34  ;;  %v7460_v22 = vpop.f32.mrf.mxu1  ;;  %v16781_v33 = vor.u32 %v19709_v31, %v16780_v11  ;;  %v19690_v28 = vld [vmem:[#allocation9 + $0x7c4] sm:$0xf]  ;;  %v16617_v11 = vor.u32 %v19666_v54, %v16614_v37  ;;  %v19729_v31 = vld [vmem:[#allocation9 + $0x8f4] sm:$0xf0]  ;;  %v16853_v37 = vor.u32 %v19727_v39, %v16852_v45 }
 0x442   :  { %v16569_v41 = vor.u32 %v19654_v16, %v16566_v3  ;;  %v7473_v27 = vpop.f32.mrf.mxu3  ;;  %v16710_v34 = vld [vmem:[#allocation9 + $0x7c8] sm:$0xf0]  ;;  %v16765_v16 = vor.u32 %v19705_v5, %v16764_v50  ;;  %v19703_v22 = vld [vmem:[#allocation9 + $0x824] sm:$0xf0]  ;;  %v19701_v54 = vld [vmem:[#allocation9 + $0x814] sm:$0xf0] }
 0x443   :  { %8481 = vmatpush.bf16.msra.mxu0 %v16489_v58  ;;  %v19668_v58 = vld [vmem:[#allocation9 + $0x714] sm:$0xf]  ;;  %v16748_v27 = vld [vmem:[#allocation9 + $0x810] sm:$0xf]  ;;  %v19741_v50 = vld [vmem:[#allocation9 + $0x954] sm:$0xf0] }
 0x444   :  { %8503 = vmatpush.bf16.msrb.mxu3 %v16649_v13  ;;  %8467 = vmatpush.bf16.msrb.mxu2 %v16685_v0  ;;  %v16622_v13 = vld [vmem:[#allocation9 + $0x718] sm:$0xf0]  ;;  %v16729_v0 = vor.u32 %v19694_v8, %v16726_v49  ;;  %v16713_v49 = vor.u32 %v19690_v28, %v16710_v34  ;;  %v19686_v5 = vld [vmem:[#allocation9 + $0x7a4] sm:$0xf]  ;;  %v16749_v28 = vor.u32 %v19701_v54, %v16748_v27  ;;  %v16740_v34 = vld [vmem:[#allocation9 + $0x800] sm:$0xf] }
 0x445   :  { %8490 = vmatpush.bf16.msrb.mxu1 %v16585_v46  ;;  %v19692_v46 = vld [vmem:[#allocation9 + $0x7d4] sm:$0xf]  ;;  %v16625_v17 = vor.u32 %v19668_v58, %v16622_v13  ;;  %v19743_v13 = vld [vmem:[#allocation9 + $0x964] sm:$0xf0]  ;;  %v16892_v39 = vld [vmem:[#allocation9 + $0x930] sm:$0xf] }
 0x446   :  { %8482 = vmatmul.bf16.vlgmr.msra.gmra.mxu0 %v21340_v48  ;;  %v19682_v27 = vld [vmem:[#allocation9 + $0x784] sm:$0xf]  ;;  %v16678_v54 = vld [vmem:[#allocation9 + $0x788] sm:$0xf0] }
 0x447   :  { %8915 = vmatpush.bf16.msrb.mxu0 %v16797_v19  ;;  %v21423_v19 = vpop.f32.mrf.mxu0 }
 0x448   :  { %8504 = vmatpush.bf16.msrb.mxu3 %v16641_v40  ;;  %8468 = vmatpush.bf16.msrb.mxu2 %v16677_v23  ;;  %v16721_v40 = vor.u32 %v19692_v46, %v16718_v18  ;;  %v19745_v23 = vld [vmem:[#allocation9 + $0x974] sm:$0xf0] }
 0x449   :  { %8491 = vmatpush.bf16.msrb.mxu1 %v16577_v32  ;;  %v16550_v32 = vld [vmem:[#allocation9 + $0x688] sm:$0xf0]  ;;  %v16925_v3 = vor.u32 %v19745_v23, %v16924_v26  ;;  %v16844_v26 = vld [vmem:[#allocation9 + $0x8d0] sm:$0xf]  ;;  %v19725_v23 = vld [vmem:[#allocation9 + $0x8d4] sm:$0xf0] }
 0x44b   :  { %8916 = vmatpush.bf16.msrb.mxu0 %v16789_v6  ;;  %8469 = vmatmul.bf16.vlgmr.msrb.gmra.mxu2 %v21362_v9  ;;  %v19650_v6 = vld [vmem:[#allocation9 + $0x684] sm:$0xf] }
 0x44c   :  { %8513 = vmatpush.bf16.msra.mxu2 %v16737_v20  ;;  %8505 = vmatpush.bf16.msrb.mxu3 %v16633_v7  ;;  %v16860_v20 = vld [vmem:[#allocation9 + $0x8f0] sm:$0xf]  ;;  %v16553_v8 = vor.u32 %v19650_v6, %v16550_v32  ;;  %v16756_v7 = vld [vmem:[#allocation9 + $0x820] sm:$0xf]  ;;  %v7049_v6 = vmul.f32 %v21408_v21, %v20886_v53  ;;  %v16686_v21 = vld [vmem:[#allocation9 + $0x798] sm:$0xf0] }
 0x44d   :  { %8492 = vmatpush.bf16.msrb.mxu1 %v16569_v41  ;;  %v16861_v41 = vor.u32 %v19729_v31, %v16860_v20  ;;  %v16757_v30 = vor.u32 %v19703_v22, %v16756_v7  ;;  %v19699_v20 = vld [vmem:[#allocation9 + $0x804] sm:$0xf0]  ;;  %v16900_v31 = vld [vmem:[#allocation9 + $0x940] sm:$0xf]  ;;  %v19712_v7 = vld [vmem:[#allocation9 + $0x874] sm:$0xf] }
 0x44e   :  { %v16798_v22 = vld [vmem:[#allocation9 + $0x878] sm:$0xf0] }
 0x44f   :  { %8917 = vmatpush.bf16.msrb.mxu0 %v16781_v33  ;;  %v16916_v33 = vld [vmem:[#allocation9 + $0x960] sm:$0xf]  ;;  %v7499_v58 = vpop.f32.mrf.mxu0 }
 0x450   :  { %8514 = vmatpush.bf16.msra.mxu2 %v16729_v0  ;;  %8506 = vmatpush.bf16.msrb.mxu3 %v16625_v17  ;;  %v16702_v0 = vld [vmem:[#allocation9 + $0x7b8] sm:$0xf0]  ;;  %v16917_v46 = vor.u32 %v19743_v13, %v16916_v33  ;;  %v7484_v17 = vpop.f32.mrf.mxu2  ;;  %v16836_v33 = vld [vmem:[#allocation9 + $0x8c0] sm:$0xf]  ;;  %v16741_v58 = vor.u32 %v19699_v20, %v16740_v34 }
 0x451   :  { %8493 = vmatpush.bf16.msrb.mxu1 %v16561_v59  ;;  %v16705_v18 = vor.u32 %v19688_v55, %v16702_v0  ;;  %v7485_v59 = vadd.f32 %v7484_v17, %v21419_v2  ;;  %v16884_v34 = vld [vmem:[#allocation9 + $0x920] sm:$0xf] }
 0x453   :  { %8918 = vmatpush.bf16.msrb.mxu0 %v16773_v44  ;;  %v16908_v44 = vld [vmem:[#allocation9 + $0x950] sm:$0xf]  ;;  %v7540_v32 = vmul.f32 %v7485_v59, %v20901_v60  ;;  %v16790_v59 = vld [vmem:[#allocation9 + $0x868] sm:$0xf0] }
 0x454   :  { %8515 = vmatpush.bf16.msra.mxu2 %v16721_v40  ;;  %8507 = vmatpush.bf16.msrb.mxu3 %v16617_v11  ;;  %v16694_v40 = vld [vmem:[#allocation9 + $0x7a8] sm:$0xf0]  ;;  %v16909_v11 = vor.u32 %v19741_v50, %v16908_v44  ;;  %v19710_v44 = vld [vmem:[#allocation9 + $0x864] sm:$0xf]  ;;  %v19721_v50 = vld [vmem:[#allocation9 + $0x8b4] sm:$0xf0] }
 0x455   :  { %8494 = vmatpush.bf16.msrb.mxu1 %v16553_v8  ;;  %v16697_v2 = vor.u32 %v19686_v5, %v16694_v40  ;;  %v16845_v8 = vor.u32 %v19725_v23, %v16844_v26  ;;  %v16988_v5 = vld [vmem:[#allocation9 + $0x9f0] sm:$0xf]  ;;  %v19761_v40 = vld [vmem:[#allocation9 + $0x9f4] sm:$0xf0] }
 0x456   :  { %v16989_v20 = vor.u32 %v19761_v40, %v16988_v5  ;;  %v19704_v5 = vld [vmem:[#allocation9 + $0x834] sm:$0xf]  ;;  %v16766_v40 = vld [vmem:[#allocation9 + $0x838] sm:$0xf0] }
 0x457   :  { %8919 = vmatpush.bf16.msrb.mxu0 %v16765_v16  ;;  %8508 = vmatmul.bf16.vlgmr.msrb.gmra.mxu3 %v21352_v61  ;;  %v19739_v16 = vld [vmem:[#allocation9 + $0x944] sm:$0xf0]  ;;  %v7510_v55 = vpop.f32.mrf.mxu1 }
 0x458   :  { %8941 = vmatpush.bf16.msra.mxu3 %v16925_v3  ;;  %8516 = vmatpush.bf16.msra.mxu2 %v16713_v49  ;;  %v21431_v3 = vadd.f32 %v7540_v32, %v7049_v6  ;;  %v19684_v49 = vld [vmem:[#allocation9 + $0x794] sm:$0xf]  ;;  %v16901_v13 = vor.u32 %v19739_v16, %v16900_v31  ;;  %v7486_v45 = vpop.f32.mrf.mxu2  ;;  %v16681_v6 = vor.u32 %v19682_v27, %v16678_v54  ;;  %v16782_v31 = vld [vmem:[#allocation9 + $0x858] sm:$0xf0]  ;;  %v16820_v16 = vld [vmem:[#allocation9 + $0x8a0] sm:$0xf] }
 0x459   :  { %8928 = vmatpush.bf16.msra.mxu1 %v16861_v41  ;;  %v19723_v41 = vld [vmem:[#allocation9 + $0x8c4] sm:$0xf0]  ;;  %v16689_v0 = vor.u32 %v19684_v49, %v16686_v21  ;;  %v16980_v49 = vld [vmem:[#allocation9 + $0x9e0] sm:$0xf]  ;;  %v16774_v45 = vld [vmem:[#allocation9 + $0x848] sm:$0xf0] }
 0x45a   :  { %8495 = vmatmul.bf16.vlgmr.msrb.gmra.mxu1 %v21354_v52  ;;  %v16837_v17 = vor.u32 %v19723_v41, %v16836_v33  ;;  %v7523_v23 = vpop.f32.mrf.mxu3  ;;  %v19759_v21 = vld [vmem:[#allocation9 + $0x9e4] sm:$0xf0] }
 0x45b   :  { %8920 = vmatpush.bf16.msrb.mxu0 %v16757_v30  ;;  %v19737_v30 = vld [vmem:[#allocation9 + $0x934] sm:$0xf0] }
 0x45c   :  { %8942 = vmatpush.bf16.msra.mxu3 %v16917_v46  ;;  %8517 = vmatpush.bf16.msra.mxu2 %v16705_v18  ;;  %v7511_v46 = vadd.f32 %v7510_v55, %v21423_v19  ;;  %v16801_v18 = vor.u32 %v19712_v7, %v16798_v22  ;;  %v16893_v26 = vor.u32 %v19737_v30, %v16892_v39  ;;  %v19706_v55 = vld [vmem:[#allocation9 + $0x844] sm:$0xf]  ;;  %v16812_v39 = vld [vmem:[#allocation9 + $0x890] sm:$0xf]  ;;  %v19717_v30 = vld [vmem:[#allocation9 + $0x894] sm:$0xf0] }
 0x45d   :  { %8929 = vmatpush.bf16.msra.mxu1 %v16853_v37  ;;  %v16828_v37 = vld [vmem:[#allocation9 + $0x8b0] sm:$0xf]  ;;  %v16793_v19 = vor.u32 %v19710_v44, %v16790_v59  ;;  %v16868_v44 = vld [vmem:[#allocation9 + $0x900] sm:$0xf]  ;;  %v16777_v59 = vor.u32 %v19706_v55, %v16774_v45  ;;  %v19726_v45 = vld [vmem:[#allocation9 + $0x8e4] sm:$0xf] }
 0x45e   :  { %v21434_v32 = vadd.f32 %v7523_v23, %v7511_v46  ;;  %v19744_v23 = vld [vmem:[#allocation9 + $0x974] sm:$0xf]  ;;  %v16956_v55 = vld [vmem:[#allocation9 + $0x9b0] sm:$0xf] }
 0x45f   :  { %8921 = vmatpush.bf16.msrb.mxu0 %v16749_v28  ;;  %v16829_v28 = vor.u32 %v19721_v50, %v16828_v37  ;;  %v7512_v22 = vpop.f32.mrf.mxu1  ;;  %v16813_v37 = vor.u32 %v19717_v30, %v16812_v39  ;;  %v19731_v50 = vld [vmem:[#allocation9 + $0x904] sm:$0xf0]  ;;  %v16854_v39 = vld [vmem:[#allocation9 + $0x8e8] sm:$0xf0] }
 0x460   :  { %8943 = vmatpush.bf16.msra.mxu3 %v16909_v11  ;;  %8518 = vmatpush.bf16.msra.mxu2 %v16697_v2  ;;  %v19735_v11 = vld [vmem:[#allocation9 + $0x924] sm:$0xf0]  ;;  %v19708_v2 = vld [vmem:[#allocation9 + $0x854] sm:$0xf]  ;;  %v16758_v22 = vld [vmem:[#allocation9 + $0x828] sm:$0xf0] }
 0x461   :  { %8930 = vmatpush.bf16.msra.mxu1 %v16845_v8  ;;  %v19719_v8 = vld [vmem:[#allocation9 + $0x8a4] sm:$0xf0]  ;;  %v16885_v7 = vor.u32 %v19735_v11, %v16884_v34  ;;  %v16785_v33 = vor.u32 %v19708_v2, %v16782_v31  ;;  %v16964_v34 = vld [vmem:[#allocation9 + $0x9c0] sm:$0xf]  ;;  %v16869_v2 = vor.u32 %v19731_v50, %v16868_v44  ;;  %v16862_v31 = vld [vmem:[#allocation9 + $0x8f8] sm:$0xf0]  ;;  %v16857_v50 = vor.u32 %v19726_v45, %v16854_v39 }
 0x462   :  { %v16821_v41 = vor.u32 %v19719_v8, %v16820_v16  ;;  %v7525_v54 = vpop.f32.mrf.mxu3  ;;  %v19755_v11 = vld [vmem:[#allocation9 + $0x9c4] sm:$0xf0]  ;;  %v16769_v16 = vor.u32 %v19704_v5, %v16766_v40  ;;  %v16750_v44 = vld [vmem:[#allocation9 + $0x818] sm:$0xf0]  ;;  %v16948_v40 = vld [vmem:[#allocation9 + $0x9a0] sm:$0xf] }
 0x463   :  { %8922 = vmatpush.bf16.msrb.mxu0 %v16741_v58  ;;  %v16876_v58 = vld [vmem:[#allocation9 + $0x910] sm:$0xf]  ;;  %v21438_v46 = vpop.f32.mrf.mxu0  ;;  %v19700_v54 = vld [vmem:[#allocation9 + $0x814] sm:$0xf]  ;;  %v16910_v5 = vld [vmem:[#allocation9 + $0x958] sm:$0xf0] }
 0x464   :  { %8944 = vmatpush.bf16.msra.mxu3 %v16901_v13  ;;  %8519 = vmatpush.bf16.msra.mxu2 %v16689_v0  ;;  %v19733_v13 = vld [vmem:[#allocation9 + $0x914] sm:$0xf0]  ;;  %v16981_v0 = vor.u32 %v19759_v21, %v16980_v49  ;;  %v16965_v21 = vor.u32 %v19755_v11, %v16964_v34  ;;  %v16753_v34 = vor.u32 %v19700_v54, %v16750_v44  ;;  %v19698_v11 = vld [vmem:[#allocation9 + $0x804] sm:$0xf]  ;;  %v16894_v45 = vld [vmem:[#allocation9 + $0x938] sm:$0xf0] }
 0x465   :  { %8931 = vmatpush.bf16.msra.mxu1 %v16837_v17  ;;  %v19757_v17 = vld [vmem:[#allocation9 + $0x9d4] sm:$0xf0]  ;;  %v16877_v27 = vor.u32 %v19733_v13, %v16876_v58  ;;  %v16918_v13 = vld [vmem:[#allocation9 + $0x968] sm:$0xf0]  ;;  %v17044_v54 = vld [vmem:[#allocation9 + $0xa60] sm:$0xf] }
 0x466   :  { %8923 = vmatmul.bf16.vlgmr.msrb.gmra.mxu0 %v21340_v48  ;;  %v19775_v44 = vld [vmem:[#allocation9 + $0xa64] sm:$0xf0] }
 0x467   :  { %8967 = vmatpush.bf16.msra.mxu0 %v16801_v18  ;;  %v16972_v18 = vld [vmem:[#allocation9 + $0x9d0] sm:$0xf] }
 0x468   :  { %8945 = vmatpush.bf16.msra.mxu3 %v16893_v26  ;;  %8520 = vmatpush.bf16.msra.mxu2 %v16681_v6  ;;  %v16973_v26 = vor.u32 %v19757_v17, %v16972_v18  ;;  %v16926_v6 = vld [vmem:[#allocation9 + $0x978] sm:$0xf0] }
 0x469   :  { %8932 = vmatpush.bf16.msra.mxu1 %v16829_v28  ;;  %v19715_v28 = vld [vmem:[#allocation9 + $0x884] sm:$0xf0]  ;;  %v16929_v8 = vor.u32 %v19744_v23, %v16926_v6  ;;  %v19724_v23 = vld [vmem:[#allocation9 + $0x8d4] sm:$0xf]  ;;  %v16846_v6 = vld [vmem:[#allocation9 + $0x8d8] sm:$0xf0] }
 0x46b   :  { %8968 = vmatpush.bf16.msra.mxu0 %v16793_v19  ;;  %8521 = vmatmul.bf16.vlgmr.msra.gmra.mxu2 %v21362_v9  ;;  %v16804_v19 = vld [vmem:[#allocation9 + $0x880] sm:$0xf]  ;;  %v7940_v58 = vpop.f32.mrf.mxu0 }
 0x46c   :  { %8954 = vmatpush.bf16.msrb.mxu2 %v16989_v20  ;;  %8946 = vmatpush.bf16.msra.mxu3 %v16885_v7  ;;  %v19728_v20 = vld [vmem:[#allocation9 + $0x8f4] sm:$0xf]  ;;  %v16805_v49 = vor.u32 %v19715_v28, %v16804_v19  ;;  %v19702_v7 = vld [vmem:[#allocation9 + $0x824] sm:$0xf]  ;;  %v7050_v19 = vmul.f32 %v21415_v43, %v20880_v38  ;;  %v19749_v38 = vld [vmem:[#allocation9 + $0x994] sm:$0xf0] }
 0x46d   :  { %8933 = vmatpush.bf16.msra.mxu1 %v16821_v41  ;;  %v16865_v41 = vor.u32 %v19728_v20, %v16862_v31  ;;  %v16761_v30 = vor.u32 %v19702_v7, %v16758_v22  ;;  %v16742_v20 = vld [vmem:[#allocation9 + $0x808] sm:$0xf0]  ;;  %v19738_v31 = vld [vmem:[#allocation9 + $0x944] sm:$0xf]  ;;  %v17052_v43 = vld [vmem:[#allocation9 + $0xa70] sm:$0xf] }
 0x46e   :  { %v19777_v7 = vld [vmem:[#allocation9 + $0xa74] sm:$0xf0]  ;;  %v19722_v22 = vld [vmem:[#allocation9 + $0x8c4] sm:$0xf] }
 0x46f   :  { %8969 = vmatpush.bf16.msra.mxu0 %v16785_v33  ;;  %v19742_v33 = vld [vmem:[#allocation9 + $0x964] sm:$0xf] }
 0x470   :  { %8955 = vmatpush.bf16.msrb.mxu2 %v16981_v0  ;;  %8947 = vmatpush.bf16.msra.mxu3 %v16877_v27  ;;  %v19753_v0 = vld [vmem:[#allocation9 + $0x9b4] sm:$0xf0]  ;;  %v16921_v18 = vor.u32 %v19742_v33, %v16918_v13  ;;  %v7536_v27 = vpop.f32.mrf.mxu2  ;;  %v16838_v33 = vld [vmem:[#allocation9 + $0x8c8] sm:$0xf0] }
 0x471   :  { %8934 = vmatpush.bf16.msra.mxu1 %v16813_v37  ;;  %v16957_v17 = vor.u32 %v19753_v0, %v16956_v55  ;;  %v7537_v37 = vadd.f32 %v7536_v27, %v21434_v32  ;;  %v19736_v0 = vld [vmem:[#allocation9 + $0x934] sm:$0xf]  ;;  %v19747_v27 = vld [vmem:[#allocation9 + $0x984] sm:$0xf0] }
 0x473   :  { %8970 = vmatpush.bf16.msra.mxu0 %v16777_v59  ;;  %v19740_v59 = vld [vmem:[#allocation9 + $0x954] sm:$0xf]  ;;  %v7541_v28 = vmul.f32 %v7537_v37, %v20914_v56  ;;  %v16745_v56 = vor.u32 %v19698_v11, %v16742_v20  ;;  %v16830_v37 = vld [vmem:[#allocation9 + $0x8b8] sm:$0xf0]  ;;  %v17036_v11 = vld [vmem:[#allocation9 + $0xa50] sm:$0xf] }
 0x474   :  { %8956 = vmatpush.bf16.msrb.mxu2 %v16973_v26  ;;  %8948 = vmatpush.bf16.msra.mxu3 %v16869_v2  ;;  %v19751_v26 = vld [vmem:[#allocation9 + $0x9a4] sm:$0xf0]  ;;  %v16913_v2 = vor.u32 %v19740_v59, %v16910_v5  ;;  %v19720_v59 = vld [vmem:[#allocation9 + $0x8b4] sm:$0xf]  ;;  %v16990_v5 = vld [vmem:[#allocation9 + $0x9f8] sm:$0xf0] }
 0x475   :  { %8935 = vmatpush.bf16.msra.mxu1 %v16805_v49  ;;  %v16949_v32 = vor.u32 %v19751_v26, %v16948_v40  ;;  %v16849_v49 = vor.u32 %v19724_v23, %v16846_v6  ;;  %v16897_v40 = vor.u32 %v19736_v0, %v16894_v45  ;;  %v19718_v20 = vld [vmem:[#allocation9 + $0x8a4] sm:$0xf]  ;;  %v19756_v45 = vld [vmem:[#allocation9 + $0x9d4] sm:$0xf] }
 0x477   :  { %8971 = vmatpush.bf16.msra.mxu0 %v16769_v16  ;;  %8949 = vmatmul.bf16.vlgmr.msra.gmra.mxu3 %v21352_v61  ;;  %v16902_v16 = vld [vmem:[#allocation9 + $0x948] sm:$0xf0]  ;;  %v7951_v58 = vpop.f32.mrf.mxu1 }
 0x478   :  { %8993 = vmatpush.bf16.msrb.mxu3 %v16929_v8  ;;  %8957 = vmatpush.bf16.msrb.mxu2 %v16965_v21  ;;  %v21446_v8 = vadd.f32 %v7541_v28, %v7050_v19  ;;  %v16940_v21 = vld [vmem:[#allocation9 + $0x990] sm:$0xf]  ;;  %v7538_v55 = vpop.f32.mrf.mxu2  ;;  %v7952_v39 = vadd.f32 %v7951_v58, %v21438_v46  ;;  %v17045_v46 = vor.u32 %v19775_v44, %v17044_v54  ;;  %v19734_v28 = vld [vmem:[#allocation9 + $0x924] sm:$0xf]  ;;  %v19771_v58 = vld [vmem:[#allocation9 + $0xa44] sm:$0xf0] }
 0x479   :  { %8980 = vmatpush.bf16.msrb.mxu1 %v16865_v41  ;;  %v16905_v41 = vor.u32 %v19738_v31, %v16902_v16  ;;  %v16941_v13 = vor.u32 %v19749_v38, %v16940_v21  ;;  %v16833_v19 = vor.u32 %v19720_v59, %v16830_v37  ;;  %v16822_v31 = vld [vmem:[#allocation9 + $0x8a8] sm:$0xf0]  ;;  %v19758_v16 = vld [vmem:[#allocation9 + $0x9e4] sm:$0xf]  ;;  %v16814_v55 = vld [vmem:[#allocation9 + $0x898] sm:$0xf0] }
 0x47a   :  { %8936 = vmatmul.bf16.vlgmr.msra.gmra.mxu1 %v21354_v52  ;;  %v7964_v26 = vpop.f32.mrf.mxu3  ;;  %v16870_v44 = vld [vmem:[#allocation9 + $0x908] sm:$0xf0]  ;;  %v17020_v59 = vld [vmem:[#allocation9 + $0xa30] sm:$0xf]  ;;  %v19769_v37 = vld [vmem:[#allocation9 + $0xa34] sm:$0xf0] }
 0x47b   :  { %8972 = vmatpush.bf16.msra.mxu0 %v16761_v30  ;;  %v17053_v30 = vor.u32 %v19777_v7, %v17052_v43  ;;  %v21449_v6 = vadd.f32 %v7964_v26, %v7952_v39  ;;  %v16825_v7 = vor.u32 %v19718_v20, %v16822_v31  ;;  %v16974_v39 = vld [vmem:[#allocation9 + $0x9d8] sm:$0xf0]  ;;  %v19714_v26 = vld [vmem:[#allocation9 + $0x884] sm:$0xf] }
 0x47c   :  { %8994 = vmatpush.bf16.msrb.mxu3 %v16921_v18  ;;  %8958 = vmatpush.bf16.msrb.mxu2 %v16957_v17  ;;  %v16841_v18 = vor.u32 %v19722_v22, %v16838_v33  ;;  %v16932_v17 = vld [vmem:[#allocation9 + $0x980] sm:$0xf]  ;;  %v19732_v22 = vld [vmem:[#allocation9 + $0x914] sm:$0xf]  ;;  %v16878_v33 = vld [vmem:[#allocation9 + $0x918] sm:$0xf0] }
 0x47d   :  { %8981 = vmatpush.bf16.msrb.mxu1 %v16857_v50  ;;  %v19760_v50 = vld [vmem:[#allocation9 + $0x9f4] sm:$0xf]  ;;  %v16933_v23 = vor.u32 %v19747_v27, %v16932_v17  ;;  %v19730_v17 = vld [vmem:[#allocation9 + $0x904] sm:$0xf] }
 0x47f   :  { %8973 = vmatpush.bf16.msra.mxu0 %v16753_v34  ;;  %v16886_v34 = vld [vmem:[#allocation9 + $0x928] sm:$0xf0]  ;;  %v7953_v38 = vpop.f32.mrf.mxu1 }
 0x480   :  { %8995 = vmatpush.bf16.msrb.mxu3 %v16913_v2  ;;  %8959 = vmatpush.bf16.msrb.mxu2 %v16949_v32  ;;  %v16993_v2 = vor.u32 %v19760_v50, %v16990_v5  ;;  %v19773_v32 = vld [vmem:[#allocation9 + $0xa54] sm:$0xf0]  ;;  %v16889_v21 = vor.u32 %v19734_v28, %v16886_v34  ;;  %v16977_v50 = vor.u32 %v19756_v45, %v16974_v39  ;;  %v17180_v5 = vld [vmem:[#allocation9 + $0xb70] sm:$0xf] }
 0x481   :  { %8982 = vmatpush.bf16.msrb.mxu1 %v16849_v49  ;;  %v16982_v49 = vld [vmem:[#allocation9 + $0x9e8] sm:$0xf0]  ;;  %v17037_v43 = vor.u32 %v19773_v32, %v17036_v11  ;;  %v16873_v28 = vor.u32 %v19730_v17, %v16870_v44  ;;  %v17116_v34 = vld [vmem:[#allocation9 + $0xaf0] sm:$0xf]  ;;  %v19793_v11 = vld [vmem:[#allocation9 + $0xaf4] sm:$0xf0] }
 0x482   :  { %v17117_v38 = vor.u32 %v19793_v11, %v17116_v34  ;;  %v17004_v39 = vld [vmem:[#allocation9 + $0xa10] sm:$0xf]  ;;  %v19750_v44 = vld [vmem:[#allocation9 + $0x9a4] sm:$0xf] }
 0x483   :  { %8974 = vmatpush.bf16.msra.mxu0 %v16745_v56  ;;  %v17028_v56 = vld [vmem:[#allocation9 + $0xa40] sm:$0xf]  ;;  %v21453_v0 = vpop.f32.mrf.mxu0 }
 0x484   :  { %8996 = vmatpush.bf16.msrb.mxu3 %v16905_v41  ;;  %8960 = vmatpush.bf16.msrb.mxu2 %v16941_v13  ;;  %v16985_v41 = vor.u32 %v19758_v16, %v16982_v49  ;;  %v19716_v13 = vld [vmem:[#allocation9 + $0x894] sm:$0xf]  ;;  %v17029_v27 = vor.u32 %v19771_v58, %v17028_v56  ;;  %v17012_v16 = vld [vmem:[#allocation9 + $0xa20] sm:$0xf]  ;;  %v19767_v49 = vld [vmem:[#allocation9 + $0xa24] sm:$0xf0] }
 0x485   :  { %8983 = vmatpush.bf16.msrb.mxu1 %v16841_v18  ;;  %v7966_v18 = vpop.f32.mrf.mxu3  ;;  %v16817_v54 = vor.u32 %v19716_v13, %v16814_v55  ;;  %v17108_v56 = vld [vmem:[#allocation9 + $0xae0] sm:$0xf]  ;;  %v17013_v58 = vor.u32 %v19767_v49, %v17012_v16  ;;  %v19787_v49 = vld [vmem:[#allocation9 + $0xac4] sm:$0xf0] }
 0x486   :  { %8975 = vmatmul.bf16.vlgmr.msra.gmra.mxu0 %v21340_v48  ;;  %v17164_v18 = vld [vmem:[#allocation9 + $0xb50] sm:$0xf]  ;;  %v17092_v16 = vld [vmem:[#allocation9 + $0xac0] sm:$0xf] }
 0x487   :  { %9408 = vmatpush.bf16.msrb.mxu0 %v17053_v30  ;;  %v16881_v30 = vor.u32 %v19732_v22, %v16878_v33  ;;  %v19752_v22 = vld [vmem:[#allocation9 + $0x9b4] sm:$0xf]  ;;  %v16958_v33 = vld [vmem:[#allocation9 + $0x9b8] sm:$0xf0] }
 0x488   :  { %8997 = vmatpush.bf16.msrb.mxu3 %v16897_v40  ;;  %8961 = vmatpush.bf16.msrb.mxu2 %v16933_v23  ;;  %v19809_v40 = vld [vmem:[#allocation9 + $0xb74] sm:$0xf0]  ;;  %v16806_v23 = vld [vmem:[#allocation9 + $0x888] sm:$0xf0]  ;;  %v16961_v55 = vor.u32 %v19752_v22, %v16958_v33  ;;  %v17148_v33 = vld [vmem:[#allocation9 + $0xb30] sm:$0xf] }
 0x489   :  { %8984 = vmatpush.bf16.msrb.mxu1 %v16833_v19  ;;  %v16966_v19 = vld [vmem:[#allocation9 + $0x9c8] sm:$0xf0]  ;;  %v17181_v32 = vor.u32 %v19809_v40, %v17180_v5  ;;  %v16809_v20 = vor.u32 %v19714_v26, %v16806_v23  ;;  %v16996_v26 = vld [vmem:[#allocation9 + $0xa00] sm:$0xf] }
 0x48b   :  { %9409 = vmatpush.bf16.msrb.mxu0 %v17045_v46  ;;  %8962 = vmatmul.bf16.vlgmr.msrb.gmra.mxu2 %v21362_v9  ;;  %v19754_v46 = vld [vmem:[#allocation9 + $0x9c4] sm:$0xf] }
 0x48c   :  { %9006 = vmatpush.bf16.msra.mxu2 %v16993_v2  ;;  %8998 = vmatpush.bf16.msrb.mxu3 %v16889_v21  ;;  %v17021_v2 = vor.u32 %v19769_v37, %v17020_v59  ;;  %v16969_v31 = vor.u32 %v19754_v46, %v16966_v19  ;;  %v17172_v21 = vld [vmem:[#allocation9 + $0xb60] sm:$0xf]  ;;  %v16950_v59 = vld [vmem:[#allocation9 + $0x9a8] sm:$0xf0]  ;;  %v17100_v37 = vld [vmem:[#allocation9 + $0xad0] sm:$0xf] }
 0x48d   :  { %8985 = vmatpush.bf16.msrb.mxu1 %v16825_v7  ;;  %v19807_v7 = vld [vmem:[#allocation9 + $0xb64] sm:$0xf0]  ;;  %v16953_v46 = vor.u32 %v19750_v44, %v16950_v59 }
 0x48e   :  { %v17173_v13 = vor.u32 %v19807_v7, %v17172_v21  ;;  %v7977_v45 = vpop.f32.mrf.mxu2  ;;  %v19763_v19 = vld [vmem:[#allocation9 + $0xa04] sm:$0xf0] }
 0x48f   :  { %9410 = vmatpush.bf16.msrb.mxu0 %v17037_v43  ;;  %v7992_v43 = vpop.f32.mrf.mxu0  ;;  %v7978_v17 = vadd.f32 %v7977_v45, %v21449_v6  ;;  %v19803_v6 = vld [vmem:[#allocation9 + $0xb44] sm:$0xf0]  ;;  %v16997_v21 = vor.u32 %v19763_v19, %v16996_v26  ;;  %v19774_v45 = vld [vmem:[#allocation9 + $0xa64] sm:$0xf]  ;;  %v19772_v26 = vld [vmem:[#allocation9 + $0xa54] sm:$0xf] }
 0x490   :  { %9007 = vmatpush.bf16.msra.mxu2 %v16985_v41  ;;  %8999 = vmatpush.bf16.msrb.mxu3 %v16881_v30  ;;  %v19791_v41 = vld [vmem:[#allocation9 + $0xae4] sm:$0xf0]  ;;  %v19765_v30 = vld [vmem:[#allocation9 + $0xa14] sm:$0xf0]  ;;  %v17076_v19 = vld [vmem:[#allocation9 + $0xaa0] sm:$0xf] }
 0x491   :  { %8986 = vmatpush.bf16.msrb.mxu1 %v16817_v54  ;;  %v19805_v54 = vld [vmem:[#allocation9 + $0xb54] sm:$0xf0]  ;;  %v8033_v5 = vmul.f32 %v7978_v17, %v20922_v62  ;;  %v17005_v40 = vor.u32 %v19765_v30, %v17004_v39  ;;  %v17046_v39 = vld [vmem:[#allocation9 + $0xa68] sm:$0xf0]  ;;  %v17084_v30 = vld [vmem:[#allocation9 + $0xab0] sm:$0xf] }
 0x492   :  { %v17165_v23 = vor.u32 %v19805_v54, %v17164_v18  ;;  %v19785_v18 = vld [vmem:[#allocation9 + $0xab4] sm:$0xf0]  ;;  %v17244_v17 = vld [vmem:[#allocation9 + $0xbf0] sm:$0xf] }
 0x493   :  { %9411 = vmatpush.bf16.msrb.mxu0 %v17029_v27  ;;  %v17109_v27 = vor.u32 %v19791_v41, %v17108_v56  ;;  %v21460_v34 = vadd.f32 %v8033_v5, %v21431_v3  ;;  %v19801_v56 = vld [vmem:[#allocation9 + $0xb34] sm:$0xf0]  ;;  %v17140_v5 = vld [vmem:[#allocation9 + $0xb20] sm:$0xf] }
 0x494   :  { %9008 = vmatpush.bf16.msra.mxu2 %v16977_v50  ;;  %9000 = vmatpush.bf16.msrb.mxu3 %v16873_v28  ;;  %v19789_v50 = vld [vmem:[#allocation9 + $0xad4] sm:$0xf0]  ;;  %v17156_v28 = vld [vmem:[#allocation9 + $0xb40] sm:$0xf]  ;;  %v17149_v54 = vor.u32 %v19801_v56, %v17148_v33  ;;  %v17228_v56 = vld [vmem:[#allocation9 + $0xbd0] sm:$0xf] }
 0x495   :  { %8987 = vmatpush.bf16.msrb.mxu1 %v16809_v20  ;;  %v17101_v11 = vor.u32 %v19789_v50, %v17100_v37  ;;  %v19776_v20 = vld [vmem:[#allocation9 + $0xa74] sm:$0xf]  ;;  %v17085_v50 = vor.u32 %v19785_v18, %v17084_v30  ;;  %v17022_v18 = vld [vmem:[#allocation9 + $0xa38] sm:$0xf0] }
 0x496   :  { %v7979_v22 = vpop.f32.mrf.mxu2  ;;  %v19768_v30 = vld [vmem:[#allocation9 + $0xa34] sm:$0xf] }
 0x497   :  { %9412 = vmatpush.bf16.msrb.mxu0 %v17021_v2  ;;  %9001 = vmatmul.bf16.vlgmr.msrb.gmra.mxu3 %v21352_v61  ;;  %v19748_v2 = vld [vmem:[#allocation9 + $0x994] sm:$0xf]  ;;  %v8003_v43 = vpop.f32.mrf.mxu1  ;;  %v19781_v22 = vld [vmem:[#allocation9 + $0xa94] sm:$0xf0] }
 0x498   :  { %9434 = vmatpush.bf16.msra.mxu3 %v17181_v32  ;;  %9009 = vmatpush.bf16.msra.mxu2 %v16969_v31  ;;  %v16942_v32 = vld [vmem:[#allocation9 + $0x998] sm:$0xf0]  ;;  %v8004_v3 = vadd.f32 %v8003_v43, %v21453_v0  ;;  %v17049_v0 = vor.u32 %v19774_v45, %v17046_v39  ;;  %v17030_v43 = vld [vmem:[#allocation9 + $0xa48] sm:$0xf0]  ;;  %v19795_v39 = vld [vmem:[#allocation9 + $0xb04] sm:$0xf0] }
 0x499   :  { %9421 = vmatpush.bf16.msra.mxu1 %v17117_v38  ;;  %v17054_v31 = vld [vmem:[#allocation9 + $0xa78] sm:$0xf0]  ;;  %v17157_v38 = vor.u32 %v19803_v6, %v17156_v28  ;;  %v16945_v7 = vor.u32 %v19748_v2, %v16942_v32  ;;  %v19783_v28 = vld [vmem:[#allocation9 + $0xaa4] sm:$0xf0]  ;;  %v17236_v6 = vld [vmem:[#allocation9 + $0xbe0] sm:$0xf] }
 0x49a   :  { %8988 = vmatmul.bf16.vlgmr.msrb.gmra.mxu1 %v21354_v52  ;;  %v17057_v41 = vor.u32 %v19776_v20, %v17054_v31  ;;  %v8016_v44 = vpop.f32.mrf.mxu3  ;;  %v17077_v31 = vor.u32 %v19783_v28, %v17076_v19 }
 0x49b   :  { %9413 = vmatpush.bf16.msrb.mxu0 %v17013_v58  ;;  %v17093_v58 = vor.u32 %v19787_v49, %v17092_v16  ;;  %v21463_v37 = vadd.f32 %v8016_v44, %v8004_v3  ;;  %v17132_v16 = vld [vmem:[#allocation9 + $0xb10] sm:$0xf]  ;;  %v19797_v49 = vld [vmem:[#allocation9 + $0xb14] sm:$0xf0]  ;;  %v17060_v44 = vld [vmem:[#allocation9 + $0xa80] sm:$0xf] }
 0x49c   :  { %9435 = vmatpush.bf16.msra.mxu3 %v17173_v13  ;;  %9010 = vmatpush.bf16.msra.mxu2 %v16961_v55  ;;  %v19746_v13 = vld [vmem:[#allocation9 + $0x984] sm:$0xf]  ;;  %v16934_v55 = vld [vmem:[#allocation9 + $0x988] sm:$0xf0]  ;;  %v19821_v3 = vld [vmem:[#allocation9 + $0xbd4] sm:$0xf0] }
 0x49d   :  { %9422 = vmatpush.bf16.msra.mxu1 %v17109_v27  ;;  %v19825_v27 = vld [vmem:[#allocation9 + $0xbf4] sm:$0xf0]  ;;  %v16937_v59 = vor.u32 %v19746_v13, %v16934_v55  ;;  %v17124_v13 = vld [vmem:[#allocation9 + $0xb00] sm:$0xf] }
 0x49f   :  { %9414 = vmatpush.bf16.msrb.mxu0 %v17005_v40  ;;  %v19799_v40 = vld [vmem:[#allocation9 + $0xb24] sm:$0xf0]  ;;  %v8005_v32 = vpop.f32.mrf.mxu1 }
 0x4a0   :  { %9436 = vmatpush.bf16.msra.mxu3 %v17165_v23  ;;  %9011 = vmatpush.bf16.msra.mxu2 %v16953_v46  ;;  %v17245_v23 = vor.u32 %v19825_v27, %v17244_v17  ;;  %v17038_v46 = vld [vmem:[#allocation9 + $0xa58] sm:$0xf0]  ;;  %v17141_v2 = vor.u32 %v19799_v40, %v17140_v5  ;;  %v17229_v17 = vor.u32 %v19821_v3, %v17228_v56  ;;  %v19808_v27 = vld [vmem:[#allocation9 + $0xb74] sm:$0xf] }
 0x4a1   :  { %9423 = vmatpush.bf16.msra.mxu1 %v17101_v11  ;;  %v19823_v11 = vld [vmem:[#allocation9 + $0xbe4] sm:$0xf0]  ;;  %v17041_v20 = vor.u32 %v19772_v26, %v17038_v46  ;;  %v17125_v5 = vor.u32 %v19795_v39, %v17124_v13  ;;  %v19792_v40 = vld [vmem:[#allocation9 + $0xaf4] sm:$0xf]  ;;  %v17118_v26 = vld [vmem:[#allocation9 + $0xaf8] sm:$0xf0] }
 0x4a2   :  { %v17121_v32 = vor.u32 %v19792_v40, %v17118_v26  ;;  %v19764_v3 = vld [vmem:[#allocation9 + $0xa14] sm:$0xf]  ;;  %v17204_v39 = vld [vmem:[#allocation9 + $0xba0] sm:$0xf] }
 0x4a3   :  { %9415 = vmatpush.bf16.msrb.mxu0 %v16997_v21  ;;  %v19770_v21 = vld [vmem:[#allocation9 + $0xa44] sm:$0xf]  ;;  %v21467_v33 = vpop.f32.mrf.mxu0 }
 0x4a4   :  { %9437 = vmatpush.bf16.msra.mxu3 %v17157_v38  ;;  %9012 = vmatpush.bf16.msra.mxu2 %v16945_v7  ;;  %v17237_v38 = vor.u32 %v19823_v11, %v17236_v6  ;;  %v17068_v7 = vld [vmem:[#allocation9 + $0xa90] sm:$0xf]  ;;  %v17033_v55 = vor.u32 %v19770_v21, %v17030_v43  ;;  %v19766_v6 = vld [vmem:[#allocation9 + $0xa24] sm:$0xf]  ;;  %v17014_v11 = vld [vmem:[#allocation9 + $0xa28] sm:$0xf0] }
 0x4a5   :  { %9424 = vmatpush.bf16.msra.mxu1 %v17093_v58  ;;  %v8018_v58 = vpop.f32.mrf.mxu3  ;;  %v17069_v45 = vor.u32 %v19781_v22, %v17068_v7  ;;  %v19790_v21 = vld [vmem:[#allocation9 + $0xae4] sm:$0xf]  ;;  %v17017_v43 = vor.u32 %v19766_v6, %v17014_v11 }
 0x4a6   :  { %9416 = vmatmul.bf16.vlgmr.msrb.gmra.mxu0 %v21340_v48  ;;  %v19804_v58 = vld [vmem:[#allocation9 + $0xb54] sm:$0xf]  ;;  %v19786_v6 = vld [vmem:[#allocation9 + $0xac4] sm:$0xf] }
 0x4a7   :  { %9460 = vmatpush.bf16.msra.mxu0 %v17057_v41  ;;  %v17133_v41 = vor.u32 %v19797_v49, %v17132_v16  ;;  %v17212_v16 = vld [vmem:[#allocation9 + $0xbb0] sm:$0xf]  ;;  %v19817_v49 = vld [vmem:[#allocation9 + $0xbb4] sm:$0xf0] }
 0x4a8   :  { %9438 = vmatpush.bf16.msra.mxu3 %v17149_v54  ;;  %9013 = vmatpush.bf16.msra.mxu2 %v16937_v59  ;;  %v17182_v54 = vld [vmem:[#allocation9 + $0xb78] sm:$0xf0]  ;;  %v19779_v59 = vld [vmem:[#allocation9 + $0xa84] sm:$0xf0]  ;;  %v17213_v22 = vor.u32 %v19817_v49, %v17212_v16  ;;  %v19800_v16 = vld [vmem:[#allocation9 + $0xb34] sm:$0xf] }
 0x4a9   :  { %9425 = vmatpush.bf16.msra.mxu1 %v17085_v50  ;;  %v19819_v50 = vld [vmem:[#allocation9 + $0xbc4] sm:$0xf0]  ;;  %v17185_v46 = vor.u32 %v19808_v27, %v17182_v54  ;;  %v17061_v19 = vor.u32 %v19779_v59, %v17060_v44  ;;  %v19762_v44 = vld [vmem:[#allocation9 + $0xa04] sm:$0xf]  ;;  %v17150_v49 = vld [vmem:[#allocation9 + $0xb38] sm:$0xf0] }
 0x4ab   :  { %9461 = vmatpush.bf16.msra.mxu0 %v17049_v0  ;;  %9014 = vmatmul.bf16.vlgmr.msra.gmra.mxu2 %v21362_v9  ;;  %v17220_v0 = vld [vmem:[#allocation9 + $0xbc0] sm:$0xf] }
 0x4ac   :  { %9447 = vmatpush.bf16.msrb.mxu2 %v17245_v23  ;;  %9439 = vmatpush.bf16.msra.mxu3 %v17141_v2  ;;  %v17025_v23 = vor.u32 %v19768_v30, %v17022_v18  ;;  %v17221_v28 = vor.u32 %v19819_v50, %v17220_v0  ;;  %v19806_v2 = vld [vmem:[#allocation9 + $0xb64] sm:$0xf]  ;;  %v19815_v30 = vld [vmem:[#allocation9 + $0xba4] sm:$0xf0]  ;;  %v19788_v18 = vld [vmem:[#allocation9 + $0xad4] sm:$0xf] }
 0x4ad   :  { %9426 = vmatpush.bf16.msra.mxu1 %v17077_v31  ;;  %v17174_v31 = vld [vmem:[#allocation9 + $0xb68] sm:$0xf0]  ;;  %v17205_v0 = vor.u32 %v19815_v30, %v17204_v39 }
 0x4ae   :  { %v17177_v7 = vor.u32 %v19806_v2, %v17174_v31  ;;  %v8029_v56 = vpop.f32.mrf.mxu2  ;;  %v16998_v50 = vld [vmem:[#allocation9 + $0xa08] sm:$0xf0] }
 0x4af   :  { %9462 = vmatpush.bf16.msra.mxu0 %v17041_v20  ;;  %v8433_v20 = vpop.f32.mrf.mxu0  ;;  %v8030_v13 = vadd.f32 %v8029_v56, %v21463_v37  ;;  %v17158_v37 = vld [vmem:[#allocation9 + $0xb48] sm:$0xf0]  ;;  %v17001_v11 = vor.u32 %v19762_v44, %v16998_v50  ;;  %v19839_v56 = vld [vmem:[#allocation9 + $0xc64] sm:$0xf0] }
 0x4b0   :  { %9448 = vmatpush.bf16.msrb.mxu2 %v17237_v38  ;;  %9440 = vmatpush.bf16.msra.mxu3 %v17133_v41  ;;  %v17110_v38 = vld [vmem:[#allocation9 + $0xae8] sm:$0xf0]  ;;  %v17006_v41 = vld [vmem:[#allocation9 + $0xa18] sm:$0xf0] }
 0x4b1   :  { %9427 = vmatpush.bf16.msra.mxu1 %v17069_v45  ;;  %v17166_v45 = vld [vmem:[#allocation9 + $0xb58] sm:$0xf0]  ;;  %v8034_v27 = vmul.f32 %v8030_v13, %v20934_v12  ;;  %v17009_v54 = vor.u32 %v19764_v3, %v17006_v41  ;;  %v17094_v12 = vld [vmem:[#allocation9 + $0xac8] sm:$0xf0]  ;;  %v19784_v3 = vld [vmem:[#allocation9 + $0xab4] sm:$0xf] }
 0x4b2   :  { %v17169_v59 = vor.u32 %v19804_v58, %v17166_v45  ;;  %v17086_v41 = vld [vmem:[#allocation9 + $0xab8] sm:$0xf0]  ;;  %v19824_v58 = vld [vmem:[#allocation9 + $0xbf4] sm:$0xf]  ;;  %v17078_v50 = vld [vmem:[#allocation9 + $0xaa8] sm:$0xf0] }
 0x4b3   :  { %9463 = vmatpush.bf16.msra.mxu0 %v17033_v55  ;;  %v17113_v55 = vor.u32 %v19790_v21, %v17110_v38  ;;  %v21474_v40 = vadd.f32 %v8034_v27, %v21446_v8  ;;  %v17097_v38 = vor.u32 %v19786_v6, %v17094_v12  ;;  %v17246_v13 = vld [vmem:[#allocation9 + $0xbf8] sm:$0xf0]  ;;  %v17142_v27 = vld [vmem:[#allocation9 + $0xb28] sm:$0xf0]  ;;  %v17284_v12 = vld [vmem:[#allocation9 + $0xc40] sm:$0xf] }
 0x4b4   :  { %9449 = vmatpush.bf16.msrb.mxu2 %v17229_v17  ;;  %9441 = vmatpush.bf16.msra.mxu3 %v17125_v5  ;;  %v17102_v17 = vld [vmem:[#allocation9 + $0xad8] sm:$0xf0]  ;;  %v19802_v5 = vld [vmem:[#allocation9 + $0xb44] sm:$0xf]  ;;  %v17249_v44 = vor.u32 %v19824_v58, %v17246_v13  ;;  %v17436_v58 = vld [vmem:[#allocation9 + $0xd70] sm:$0xf] }
 0x4b5   :  { %9428 = vmatpush.bf16.msra.mxu1 %v17061_v19  ;;  %v17105_v26 = vor.u32 %v19788_v18, %v17102_v17  ;;  %v17308_v19 = vld [vmem:[#allocation9 + $0xc70] sm:$0xf]  ;;  %v17161_v2 = vor.u32 %v19802_v5, %v17158_v37  ;;  %v17089_v18 = vor.u32 %v19784_v3, %v17086_v41  ;;  %v19798_v17 = vld [vmem:[#allocation9 + $0xb24] sm:$0xf]  ;;  %v17238_v37 = vld [vmem:[#allocation9 + $0xbe8] sm:$0xf0] }
 0x4b6   :  { %v8031_v31 = vpop.f32.mrf.mxu2  ;;  %v19822_v5 = vld [vmem:[#allocation9 + $0xbe4] sm:$0xf]  ;;  %v17134_v6 = vld [vmem:[#allocation9 + $0xb18] sm:$0xf0]  ;;  %v19833_v3 = vld [vmem:[#allocation9 + $0xc34] sm:$0xf0] }
 0x4b7   :  { %9464 = vmatpush.bf16.msra.mxu0 %v17025_v23  ;;  %9442 = vmatmul.bf16.vlgmr.msra.gmra.mxu3 %v21352_v61  ;;  %v17196_v23 = vld [vmem:[#allocation9 + $0xb90] sm:$0xf]  ;;  %v19873_v13 = vld [vmem:[#allocation9 + $0xd74] sm:$0xf0] }
 0x4b8   :  { %9486 = vmatpush.bf16.msrb.mxu3 %v17185_v46  ;;  %9450 = vmatpush.bf16.msrb.mxu2 %v17221_v28  ;;  %v19813_v46 = vld [vmem:[#allocation9 + $0xb94] sm:$0xf0] }
 0x4b9   :  { %9473 = vmatpush.bf16.msrb.mxu1 %v17121_v32  ;;  %v19841_v28 = vld [vmem:[#allocation9 + $0xc74] sm:$0xf0]  ;;  %v8444_v32 = vpop.f32.mrf.mxu1  ;;  %v17197_v20 = vor.u32 %v19813_v46, %v17196_v23 }
 0x4ba   :  { %9429 = vmatmul.bf16.vlgmr.msra.gmra.mxu1 %v21354_v52  ;;  %v8445_v8 = vadd.f32 %v8444_v32, %v21467_v33  ;;  %v17309_v21 = vor.u32 %v19841_v28, %v17308_v19  ;;  %v8457_v45 = vpop.f32.mrf.mxu3  ;;  %v19796_v28 = vld [vmem:[#allocation9 + $0xb14] sm:$0xf] }
 0x4bb   :  { %9465 = vmatpush.bf16.msra.mxu0 %v17017_v43  ;;  %v17188_v43 = vld [vmem:[#allocation9 + $0xb80] sm:$0xf]  ;;  %v19780_v32 = vld [vmem:[#allocation9 + $0xa94] sm:$0xf] }
 0x4bc   :  { %9487 = vmatpush.bf16.msrb.mxu3 %v17177_v7  ;;  %9451 = vmatpush.bf16.msrb.mxu2 %v17213_v22  ;;  %v19811_v7 = vld [vmem:[#allocation9 + $0xb84] sm:$0xf0]  ;;  %v17300_v22 = vld [vmem:[#allocation9 + $0xc60] sm:$0xf]  ;;  %v21477_v30 = vadd.f32 %v8457_v45, %v8445_v8  ;;  %v17137_v8 = vor.u32 %v19796_v28, %v17134_v6  ;;  %v17062_v45 = vld [vmem:[#allocation9 + $0xa88] sm:$0xf0] }
 0x4bd   :  { %9474 = vmatpush.bf16.msrb.mxu1 %v17113_v55  ;;  %v17153_v55 = vor.u32 %v19800_v16, %v17150_v49  ;;  %v17189_v39 = vor.u32 %v19811_v7, %v17188_v43  ;;  %v17301_v33 = vor.u32 %v19839_v56, %v17300_v22  ;;  %v19820_v16 = vld [vmem:[#allocation9 + $0xbd4] sm:$0xf]  ;;  %v17230_v49 = vld [vmem:[#allocation9 + $0xbd8] sm:$0xf0]  ;;  %v17126_v22 = vld [vmem:[#allocation9 + $0xb08] sm:$0xf0] }
 0x4be   :  { %v17276_v56 = vld [vmem:[#allocation9 + $0xc30] sm:$0xf]  ;;  %v17233_v41 = vor.u32 %v19820_v16, %v17230_v49  ;;  %v17214_v28 = vld [vmem:[#allocation9 + $0xbb8] sm:$0xf0]  ;;  %v17364_v6 = vld [vmem:[#allocation9 + $0xce0] sm:$0xf] }
 0x4bf   :  { %9466 = vmatpush.bf16.msra.mxu0 %v17009_v54  ;;  %v17292_v54 = vld [vmem:[#allocation9 + $0xc50] sm:$0xf]  ;;  %v19829_v49 = vld [vmem:[#allocation9 + $0xc14] sm:$0xf0] }
 0x4c0   :  { %9488 = vmatpush.bf16.msrb.mxu3 %v17169_v59  ;;  %9452 = vmatpush.bf16.msrb.mxu2 %v17205_v0  ;;  %v19837_v59 = vld [vmem:[#allocation9 + $0xc54] sm:$0xf0]  ;;  %v19782_v0 = vld [vmem:[#allocation9 + $0xaa4] sm:$0xf]  ;;  %v17260_v16 = vld [vmem:[#allocation9 + $0xc10] sm:$0xf] }
 0x4c1   :  { %9475 = vmatpush.bf16.msrb.mxu1 %v17105_v26  ;;  %v17145_v26 = vor.u32 %v19798_v17, %v17142_v27  ;;  %v8446_v23 = vpop.f32.mrf.mxu1  ;;  %v17293_v46 = vor.u32 %v19837_v59, %v17292_v54  ;;  %v17081_v19 = vor.u32 %v19782_v0, %v17078_v50  ;;  %v17372_v17 = vld [vmem:[#allocation9 + $0xcf0] sm:$0xf]  ;;  %v19857_v27 = vld [vmem:[#allocation9 + $0xcf4] sm:$0xf0]  ;;  %v17277_v54 = vor.u32 %v19833_v3, %v17276_v56  ;;  %v17268_v50 = vld [vmem:[#allocation9 + $0xc20] sm:$0xf] }
 0x4c2   :  { %v17356_v56 = vld [vmem:[#allocation9 + $0xcd0] sm:$0xf]  ;;  %v19853_v3 = vld [vmem:[#allocation9 + $0xcd4] sm:$0xf0] }
 0x4c3   :  { %9467 = vmatpush.bf16.msra.mxu0 %v17001_v11  ;;  %v17241_v11 = vor.u32 %v19822_v5, %v17238_v37  ;;  %v21481_v31 = vpop.f32.mrf.mxu0  ;;  %v19831_v5 = vld [vmem:[#allocation9 + $0xc24] sm:$0xf0]  ;;  %v17428_v37 = vld [vmem:[#allocation9 + $0xd60] sm:$0xf] }
 0x4c4   :  { %9489 = vmatpush.bf16.msrb.mxu3 %v17161_v2  ;;  %9453 = vmatpush.bf16.msrb.mxu2 %v17197_v20  ;;  %v19835_v2 = vld [vmem:[#allocation9 + $0xc44] sm:$0xf0]  ;;  %v17070_v20 = vld [vmem:[#allocation9 + $0xa98] sm:$0xf0] }
 0x4c5   :  { %9476 = vmatpush.bf16.msrb.mxu1 %v17097_v38  ;;  %v19794_v38 = vld [vmem:[#allocation9 + $0xb04] sm:$0xf]  ;;  %v17285_v43 = vor.u32 %v19835_v2, %v17284_v12  ;;  %v17073_v7 = vor.u32 %v19780_v32, %v17070_v20  ;;  %v19855_v12 = vld [vmem:[#allocation9 + $0xce4] sm:$0xf0] }
 0x4c6   :  { %9468 = vmatmul.bf16.vlgmr.msra.gmra.mxu0 %v21340_v48 }
 0x4c7   :  { %9901 = vmatpush.bf16.msrb.mxu0 %v17309_v21  ;;  %v8459_v21 = vpop.f32.mrf.mxu3 }
 0x4c8   :  { %9490 = vmatpush.bf16.msrb.mxu3 %v17153_v55  ;;  %9454 = vmatpush.bf16.msrb.mxu2 %v17189_v39  ;;  %v19778_v55 = vld [vmem:[#allocation9 + $0xa84] sm:$0xf] }
 0x4c9   :  { %9477 = vmatpush.bf16.msrb.mxu1 %v17089_v18  ;;  %v19818_v39 = vld [vmem:[#allocation9 + $0xbc4] sm:$0xf]  ;;  %v17129_v18 = vor.u32 %v19794_v38, %v17126_v22  ;;  %v17065_v59 = vor.u32 %v19778_v55, %v17062_v45  ;;  %v17365_v38 = vor.u32 %v19855_v12, %v17364_v6  ;;  %v17206_v22 = vld [vmem:[#allocation9 + $0xba8] sm:$0xf0] }
 0x4cb   :  { %9902 = vmatpush.bf16.msrb.mxu0 %v17301_v33  ;;  %9455 = vmatmul.bf16.vlgmr.msrb.gmra.mxu2 %v21362_v9  ;;  %v17222_v33 = vld [vmem:[#allocation9 + $0xbc8] sm:$0xf0]  ;;  %v8485_v23 = vpop.f32.mrf.mxu0 }
 0x4cc   :  { %9499 = vmatpush.bf16.msra.mxu2 %v17249_v44  ;;  %9491 = vmatpush.bf16.msrb.mxu3 %v17145_v26  ;;  %v17437_v44 = vor.u32 %v19873_v13, %v17436_v58  ;;  %v17225_v0 = vor.u32 %v19818_v39, %v17222_v33  ;;  %v17373_v26 = vor.u32 %v19857_v27, %v17372_v17  ;;  %v17252_v13 = vld [vmem:[#allocation9 + $0xc00] sm:$0xf]  ;;  %v19827_v39 = vld [vmem:[#allocation9 + $0xc04] sm:$0xf0]  ;;  %v19812_v27 = vld [vmem:[#allocation9 + $0xb94] sm:$0xf] }
 0x4cd   :  { %9478 = vmatpush.bf16.msrb.mxu1 %v17081_v19  ;;  %v19816_v19 = vld [vmem:[#allocation9 + $0xbb4] sm:$0xf]  ;;  %v17261_v58 = vor.u32 %v19829_v49, %v17260_v16  ;;  %v17412_v33 = vld [vmem:[#allocation9 + $0xd40] sm:$0xf]  ;;  %v17357_v17 = vor.u32 %v19853_v3, %v17356_v56  ;;  %v17340_v16 = vld [vmem:[#allocation9 + $0xcb0] sm:$0xf] }
 0x4ce   :  { %v17217_v32 = vor.u32 %v19816_v19, %v17214_v28  ;;  %v8470_v20 = vpop.f32.mrf.mxu2  ;;  %v17404_v19 = vld [vmem:[#allocation9 + $0xd30] sm:$0xf]  ;;  %v19865_v28 = vld [vmem:[#allocation9 + $0xd34] sm:$0xf0]  ;;  %v17396_v3 = vld [vmem:[#allocation9 + $0xd20] sm:$0xf] }
 0x4cf   :  { %9903 = vmatpush.bf16.msrb.mxu0 %v17293_v46  ;;  %v19871_v46 = vld [vmem:[#allocation9 + $0xd64] sm:$0xf0]  ;;  %v8471_v21 = vadd.f32 %v8470_v20, %v21477_v30  ;;  %v17302_v20 = vld [vmem:[#allocation9 + $0xc68] sm:$0xf0]  ;;  %v19849_v49 = vld [vmem:[#allocation9 + $0xcb4] sm:$0xf0] }
 0x4d0   :  { %9500 = vmatpush.bf16.msra.mxu2 %v17241_v11  ;;  %9492 = vmatpush.bf16.msrb.mxu3 %v17137_v8  ;;  %v17269_v11 = vor.u32 %v19831_v5, %v17268_v50  ;;  %v17429_v2 = vor.u32 %v19871_v46, %v17428_v37  ;;  %v17420_v8 = vld [vmem:[#allocation9 + $0xd50] sm:$0xf]  ;;  %v19867_v30 = vld [vmem:[#allocation9 + $0xd44] sm:$0xf0]  ;;  %v17253_v5 = vor.u32 %v19827_v39, %v17252_v13 }
 0x4d1   :  { %9479 = vmatpush.bf16.msrb.mxu1 %v17073_v7  ;;  %v19814_v7 = vld [vmem:[#allocation9 + $0xba4] sm:$0xf]  ;;  %v19851_v50 = vld [vmem:[#allocation9 + $0xcc4] sm:$0xf0]  ;;  %v17413_v37 = vor.u32 %v19867_v30, %v17412_v33  ;;  %v17341_v56 = vor.u32 %v19849_v49, %v17340_v16  ;;  %v17492_v33 = vld [vmem:[#allocation9 + $0xde0] sm:$0xf] }
 0x4d2   :  { %v17209_v45 = vor.u32 %v19814_v7, %v17206_v22  ;;  %v19847_v39 = vld [vmem:[#allocation9 + $0xca4] sm:$0xf0]  ;;  %v17278_v16 = vld [vmem:[#allocation9 + $0xc38] sm:$0xf0] }
 0x4d3   :  { %9904 = vmatpush.bf16.msrb.mxu0 %v17285_v43  ;;  %v19869_v43 = vld [vmem:[#allocation9 + $0xd54] sm:$0xf0]  ;;  %v19887_v30 = vld [vmem:[#allocation9 + $0xde4] sm:$0xf0] }
 0x4d4   :  { %9501 = vmatpush.bf16.msra.mxu2 %v17233_v41  ;;  %9493 = vmatpush.bf16.msrb.mxu3 %v17129_v18  ;;  %v8526_v41 = vmul.f32 %v8471_v21, %v20942_v29  ;;  %v17421_v55 = vor.u32 %v19869_v43, %v17420_v8  ;;  %v17500_v8 = vld [vmem:[#allocation9 + $0xdf0] sm:$0xf]  ;;  %v19889_v21 = vld [vmem:[#allocation9 + $0xdf4] sm:$0xf0] }
 0x4d5   :  { %9480 = vmatpush.bf16.msrb.mxu1 %v17065_v59  ;;  %v17310_v59 = vld [vmem:[#allocation9 + $0xc78] sm:$0xf0]  ;;  %v17501_v13 = vor.u32 %v19889_v21, %v17500_v8  ;;  %v19872_v8 = vld [vmem:[#allocation9 + $0xd74] sm:$0xf] }
 0x4d6   :  { %v21488_v18 = vadd.f32 %v8526_v41, %v21460_v34  ;;  %v8472_v46 = vpop.f32.mrf.mxu2  ;;  %v19863_v41 = vld [vmem:[#allocation9 + $0xd24] sm:$0xf0]  ;;  %v17438_v21 = vld [vmem:[#allocation9 + $0xd78] sm:$0xf0] }
 0x4d7   :  { %9905 = vmatpush.bf16.msrb.mxu0 %v17277_v54  ;;  %9494 = vmatmul.bf16.vlgmr.msrb.gmra.mxu3 %v21352_v61  ;;  %v17198_v54 = vld [vmem:[#allocation9 + $0xb98] sm:$0xf0] }
 0x4d8   :  { %9927 = vmatpush.bf16.msra.mxu3 %v17437_v44  ;;  %9502 = vmatpush.bf16.msra.mxu2 %v17225_v0  ;;  %v19840_v44 = vld [vmem:[#allocation9 + $0xc74] sm:$0xf]  ;;  %v17348_v0 = vld [vmem:[#allocation9 + $0xcc0] sm:$0xf]  ;;  %v17201_v23 = vor.u32 %v19812_v27, %v17198_v54 }
 0x4d9   :  { %9914 = vmatpush.bf16.msra.mxu1 %v17373_v26  ;;  %v8496_v26 = vpop.f32.mrf.mxu1  ;;  %v17313_v6 = vor.u32 %v19840_v44, %v17310_v59  ;;  %v17349_v12 = vor.u32 %v19851_v50, %v17348_v0  ;;  %v17388_v59 = vld [vmem:[#allocation9 + $0xd10] sm:$0xf]  ;;  %v19861_v0 = vld [vmem:[#allocation9 + $0xd14] sm:$0xf0]  ;;  %v19834_v50 = vld [vmem:[#allocation9 + $0xc44] sm:$0xf] }
 0x4da   :  { %9481 = vmatmul.bf16.vlgmr.msrb.gmra.mxu1 %v21354_v52  ;;  %v8497_v34 = vadd.f32 %v8496_v26, %v21481_v31  ;;  %v8509_v43 = vpop.f32.mrf.mxu3  ;;  %v17324_v26 = vld [vmem:[#allocation9 + $0xc90] sm:$0xf] }
 0x4db   :  { %9906 = vmatpush.bf16.msrb.mxu0 %v17269_v11  ;;  %v19810_v11 = vld [vmem:[#allocation9 + $0xb84] sm:$0xf] }
 0x4dc   :  { %9928 = vmatpush.bf16.msra.mxu3 %v17429_v2  ;;  %9503 = vmatpush.bf16.msra.mxu2 %v17217_v32  ;;  %v17190_v2 = vld [vmem:[#allocation9 + $0xb88] sm:$0xf0]  ;;  %v19838_v32 = vld [vmem:[#allocation9 + $0xc64] sm:$0xf]  ;;  %v21491_v22 = vadd.f32 %v8509_v43, %v8497_v34  ;;  %v17389_v34 = vor.u32 %v19861_v0, %v17388_v59  ;;  %v19843_v43 = vld [vmem:[#allocation9 + $0xc84] sm:$0xf0] }
 0x4dd   :  { %9915 = vmatpush.bf16.msra.mxu1 %v17365_v38  ;;  %v17405_v38 = vor.u32 %v19865_v28, %v17404_v19  ;;  %v17193_v7 = vor.u32 %v19810_v11, %v17190_v2  ;;  %v17305_v31 = vor.u32 %v19838_v32, %v17302_v20  ;;  %v17484_v19 = vld [vmem:[#allocation9 + $0xdd0] sm:$0xf]  ;;  %v19885_v28 = vld [vmem:[#allocation9 + $0xdd4] sm:$0xf0]  ;;  %v19859_v32 = vld [vmem:[#allocation9 + $0xd04] sm:$0xf0] }
 0x4de   :  { %v19832_v20 = vld [vmem:[#allocation9 + $0xc34] sm:$0xf]  ;;  %v17485_v49 = vor.u32 %v19885_v28, %v17484_v19  ;;  %v19881_v59 = vld [vmem:[#allocation9 + $0xdb4] sm:$0xf0]  ;;  %v19854_v0 = vld [vmem:[#allocation9 + $0xce4] sm:$0xf] }
 0x4df   :  { %9907 = vmatpush.bf16.msrb.mxu0 %v17261_v58  ;;  %v19836_v58 = vld [vmem:[#allocation9 + $0xc54] sm:$0xf]  ;;  %v17262_v28 = vld [vmem:[#allocation9 + $0xc18] sm:$0xf0] }
 0x4e0   :  { %9929 = vmatpush.bf16.msra.mxu3 %v17421_v55  ;;  %9504 = vmatpush.bf16.msra.mxu2 %v17209_v45  ;;  %v17294_v55 = vld [vmem:[#allocation9 + $0xc58] sm:$0xf0]  ;;  %v17332_v45 = vld [vmem:[#allocation9 + $0xca0] sm:$0xf]  ;;  %v19828_v19 = vld [vmem:[#allocation9 + $0xc14] sm:$0xf] }
 0x4e1   :  { %9916 = vmatpush.bf16.msra.mxu1 %v17357_v17  ;;  %v17397_v17 = vor.u32 %v19863_v41, %v17396_v3  ;;  %v8498_v27 = vpop.f32.mrf.mxu1  ;;  %v17297_v54 = vor.u32 %v19836_v58, %v17294_v55  ;;  %v17333_v44 = vor.u32 %v19847_v39, %v17332_v45  ;;  %v19856_v3 = vld [vmem:[#allocation9 + $0xcf4] sm:$0xf]  ;;  %v17374_v41 = vld [vmem:[#allocation9 + $0xcf8] sm:$0xf0]  ;;  %v17281_v58 = vor.u32 %v19832_v20, %v17278_v16  ;;  %v19830_v39 = vld [vmem:[#allocation9 + $0xc24] sm:$0xf] }
 0x4e2   :  { %v19852_v20 = vld [vmem:[#allocation9 + $0xcd4] sm:$0xf]  ;;  %v17358_v16 = vld [vmem:[#allocation9 + $0xcd8] sm:$0xf0] }
 0x4e3   :  { %9908 = vmatpush.bf16.msrb.mxu0 %v17253_v5  ;;  %v17493_v5 = vor.u32 %v19887_v30, %v17492_v33  ;;  %v21495_v46 = vpop.f32.mrf.mxu0  ;;  %v17270_v33 = vld [vmem:[#allocation9 + $0xc28] sm:$0xf0]  ;;  %v19870_v30 = vld [vmem:[#allocation9 + $0xd64] sm:$0xf] }
 0x4e4   :  { %9930 = vmatpush.bf16.msra.mxu3 %v17413_v37  ;;  %9505 = vmatpush.bf16.msra.mxu2 %v17201_v23  ;;  %v17286_v37 = vld [vmem:[#allocation9 + $0xc48] sm:$0xf0]  ;;  %v19845_v23 = vld [vmem:[#allocation9 + $0xc94] sm:$0xf0] }
 0x4e5   :  { %9917 = vmatpush.bf16.msra.mxu1 %v17349_v12  ;;  %v17380_v12 = vld [vmem:[#allocation9 + $0xd00] sm:$0xf]  ;;  %v17289_v11 = vor.u32 %v19834_v50, %v17286_v37  ;;  %v17325_v2 = vor.u32 %v19845_v23, %v17324_v26  ;;  %v17366_v50 = vld [vmem:[#allocation9 + $0xce8] sm:$0xf0] }
 0x4e6   :  { %9909 = vmatmul.bf16.vlgmr.msrb.gmra.mxu0 %v21340_v48 }
 0x4e7   :  { %9953 = vmatpush.bf16.msra.mxu0 %v17313_v6  ;;  %v8511_v6 = vpop.f32.mrf.mxu3 }
 0x4e8   :  { %9931 = vmatpush.bf16.msra.mxu3 %v17405_v38  ;;  %9506 = vmatpush.bf16.msra.mxu2 %v17193_v7  ;;  %v17316_v38 = vld [vmem:[#allocation9 + $0xc80] sm:$0xf] }
 0x4e9   :  { %9918 = vmatpush.bf16.msra.mxu1 %v17341_v56  ;;  %v17476_v7 = vld [vmem:[#allocation9 + $0xdc0] sm:$0xf]  ;;  %v17381_v56 = vor.u32 %v19859_v32, %v17380_v12  ;;  %v17317_v55 = vor.u32 %v19843_v43, %v17316_v38  ;;  %v17369_v12 = vor.u32 %v19854_v0, %v17366_v50  ;;  %v19879_v32 = vld [vmem:[#allocation9 + $0xda4] sm:$0xf0] }
 0x4ea   :  { %v17444_v50 = vld [vmem:[#allocation9 + $0xd80] sm:$0xf] }
 0x4eb   :  { %9954 = vmatpush.bf16.msra.mxu0 %v17305_v31  ;;  %9507 = vmatmul.bf16.vlgmr.msra.gmra.mxu2 %v21362_v9  ;;  %v19883_v31 = vld [vmem:[#allocation9 + $0xdc4] sm:$0xf0]  ;;  %v8926_v27 = vpop.f32.mrf.mxu0 }
 0x4ec   :  { %9940 = vmatpush.bf16.msrb.mxu2 %v17501_v13  ;;  %9932 = vmatpush.bf16.msra.mxu3 %v17397_v17  ;;  %v17441_v13 = vor.u32 %v19872_v8, %v17438_v21  ;;  %v17477_v45 = vor.u32 %v19883_v31, %v17476_v7  ;;  %v17377_v17 = vor.u32 %v19856_v3, %v17374_v41  ;;  %v19826_v21 = vld [vmem:[#allocation9 + $0xc04] sm:$0xf]  ;;  %v17254_v7 = vld [vmem:[#allocation9 + $0xc08] sm:$0xf0]  ;;  %v17452_v41 = vld [vmem:[#allocation9 + $0xd90] sm:$0xf] }
 0x4ed   :  { %9919 = vmatpush.bf16.msra.mxu1 %v17333_v44  ;;  %v17468_v44 = vld [vmem:[#allocation9 + $0xdb0] sm:$0xf]  ;;  %v17265_v8 = vor.u32 %v19828_v19, %v17262_v28  ;;  %v19866_v31 = vld [vmem:[#allocation9 + $0xd44] sm:$0xf]  ;;  %v17361_v3 = vor.u32 %v19852_v20, %v17358_v16  ;;  %v17342_v19 = vld [vmem:[#allocation9 + $0xcb8] sm:$0xf0] }
 0x4ee   :  { %v17469_v26 = vor.u32 %v19881_v59, %v17468_v44  ;;  %v8522_v23 = vpop.f32.mrf.mxu2  ;;  %v17406_v44 = vld [vmem:[#allocation9 + $0xd38] sm:$0xf0]  ;;  %v19888_v28 = vld [vmem:[#allocation9 + $0xdf4] sm:$0xf]  ;;  %v19862_v20 = vld [vmem:[#allocation9 + $0xd24] sm:$0xf] }
 0x4ef   :  { %9955 = vmatpush.bf16.msra.mxu0 %v17297_v54  ;;  %v17430_v54 = vld [vmem:[#allocation9 + $0xd68] sm:$0xf0]  ;;  %v8523_v6 = vadd.f32 %v8522_v23, %v21491_v22  ;;  %v19848_v23 = vld [vmem:[#allocation9 + $0xcb4] sm:$0xf] }
 0x4f0   :  { %9941 = vmatpush.bf16.msrb.mxu2 %v17493_v5  ;;  %9933 = vmatpush.bf16.msra.mxu3 %v17389_v34  ;;  %v17273_v5 = vor.u32 %v19830_v39, %v17270_v33  ;;  %v17433_v37 = vor.u32 %v19870_v30, %v17430_v54  ;;  %v19868_v34 = vld [vmem:[#allocation9 + $0xd54] sm:$0xf]  ;;  %v17414_v22 = vld [vmem:[#allocation9 + $0xd48] sm:$0xf0]  ;;  %v17257_v39 = vor.u32 %v19826_v21, %v17254_v7  ;;  %v19901_v21 = vld [vmem:[#allocation9 + $0xe54] sm:$0xf0] }
 0x4f1   :  { %9920 = vmatpush.bf16.msra.mxu1 %v17325_v2  ;;  %v17460_v2 = vld [vmem:[#allocation9 + $0xda0] sm:$0xf]  ;;  %v17417_v33 = vor.u32 %v19866_v31, %v17414_v22  ;;  %v19864_v54 = vld [vmem:[#allocation9 + $0xd34] sm:$0xf]  ;;  %v17398_v16 = vld [vmem:[#allocation9 + $0xd28] sm:$0xf0] }
 0x4f2   :  { %v17461_v43 = vor.u32 %v19879_v32, %v17460_v2  ;;  %v17345_v32 = vor.u32 %v19848_v23, %v17342_v19  ;;  %v19886_v7 = vld [vmem:[#allocation9 + $0xde4] sm:$0xf]  ;;  %v17494_v31 = vld [vmem:[#allocation9 + $0xde8] sm:$0xf0]  ;;  %v17401_v22 = vor.u32 %v19862_v20, %v17398_v16  ;;  %v17692_v19 = vld [vmem:[#allocation9 + $0xf70] sm:$0xf] }
 0x4f3   :  { %9956 = vmatpush.bf16.msra.mxu0 %v17289_v11  ;;  %v17422_v11 = vld [vmem:[#allocation9 + $0xd58] sm:$0xf0]  ;;  %v19921_v20 = vld [vmem:[#allocation9 + $0xef4] sm:$0xf0] }
 0x4f4   :  { %9942 = vmatpush.bf16.msrb.mxu2 %v17485_v49  ;;  %9934 = vmatpush.bf16.msra.mxu3 %v17381_v56  ;;  %v8527_v49 = vmul.f32 %v8523_v6, %v20955_v63  ;;  %v17425_v38 = vor.u32 %v19868_v34, %v17422_v11  ;;  %v17350_v63 = vld [vmem:[#allocation9 + $0xcc8] sm:$0xf0]  ;;  %v17502_v34 = vld [vmem:[#allocation9 + $0xdf8] sm:$0xf0]  ;;  %v17409_v6 = vor.u32 %v19864_v54, %v17406_v44 }
 0x4f5   :  { %9921 = vmatpush.bf16.msra.mxu1 %v17317_v55  ;;  %v19905_v55 = vld [vmem:[#allocation9 + $0xe74] sm:$0xf0]  ;;  %v17486_v54 = vld [vmem:[#allocation9 + $0xdd8] sm:$0xf0] }
 0x4f6   :  { %v21502_v56 = vadd.f32 %v8527_v49, %v21474_v40  ;;  %v8524_v27 = vpop.f32.mrf.mxu2  ;;  %v17548_v49 = vld [vmem:[#allocation9 + $0xe50] sm:$0xf] }
 0x4f7   :  { %9957 = vmatpush.bf16.msra.mxu0 %v17281_v58  ;;  %9935 = vmatmul.bf16.vlgmr.msra.gmra.mxu3 %v21352_v61  ;;  %v19877_v58 = vld [vmem:[#allocation9 + $0xd94] sm:$0xf0]  ;;  %v8937_v30 = vpop.f32.mrf.mxu1  ;;  %v19884_v27 = vld [vmem:[#allocation9 + $0xdd4] sm:$0xf] }
 0x4f8   :  { %9979 = vmatpush.bf16.msrb.mxu3 %v17441_v13  ;;  %9943 = vmatpush.bf16.msrb.mxu2 %v17477_v45  ;;  %v17564_v13 = vld [vmem:[#allocation9 + $0xe70] sm:$0xf]  ;;  %v19850_v45 = vld [vmem:[#allocation9 + $0xcc4] sm:$0xf]  ;;  %v8938_v40 = vadd.f32 %v8937_v30, %v21495_v46  ;;  %v17326_v30 = vld [vmem:[#allocation9 + $0xc98] sm:$0xf0]  ;;  %v17489_v23 = vor.u32 %v19884_v27, %v17486_v54 }
 0x4f9   :  { %9966 = vmatpush.bf16.msrb.mxu1 %v17377_v17  ;;  %v17453_v17 = vor.u32 %v19877_v58, %v17452_v41  ;;  %v17565_v59 = vor.u32 %v19905_v55, %v17564_v13  ;;  %v17353_v0 = vor.u32 %v19850_v45, %v17350_v63  ;;  %v17549_v41 = vor.u32 %v19901_v21, %v17548_v49  ;;  %v19860_v13 = vld [vmem:[#allocation9 + $0xd14] sm:$0xf]  ;;  %v17390_v55 = vld [vmem:[#allocation9 + $0xd18] sm:$0xf0]  ;;  %v17540_v45 = vld [vmem:[#allocation9 + $0xe40] sm:$0xf] }
 0x4fa   :  { %9922 = vmatmul.bf16.vlgmr.msra.gmra.mxu1 %v21354_v52  ;;  %v17497_v63 = vor.u32 %v19886_v7, %v17494_v31  ;;  %v17393_v44 = vor.u32 %v19860_v13, %v17390_v55  ;;  %v17684_v7 = vld [vmem:[#allocation9 + $0xf60] sm:$0xf]  ;;  %v19919_v55 = vld [vmem:[#allocation9 + $0xee4] sm:$0xf0]  ;;  %v19893_v27 = vld [vmem:[#allocation9 + $0xe14] sm:$0xf0] }
 0x4fb   :  { %9958 = vmatpush.bf16.msra.mxu0 %v17273_v5  ;;  %v19875_v5 = vld [vmem:[#allocation9 + $0xd84] sm:$0xf0]  ;;  %v17620_v13 = vld [vmem:[#allocation9 + $0xee0] sm:$0xf]  ;;  %v17676_v54 = vld [vmem:[#allocation9 + $0xf50] sm:$0xf] }
 0x4fc   :  { %9980 = vmatpush.bf16.msrb.mxu3 %v17433_v37  ;;  %9944 = vmatpush.bf16.msrb.mxu2 %v17469_v26  ;;  %v17556_v37 = vld [vmem:[#allocation9 + $0xe60] sm:$0xf]  ;;  %v19903_v26 = vld [vmem:[#allocation9 + $0xe64] sm:$0xf0]  ;;  %v17445_v11 = vor.u32 %v19875_v5, %v17444_v50  ;;  %v17382_v5 = vld [vmem:[#allocation9 + $0xd08] sm:$0xf0] }
 0x4fd   :  { %9967 = vmatpush.bf16.msrb.mxu1 %v17369_v12  ;;  %v8950_v12 = vpop.f32.mrf.mxu3  ;;  %v17557_v46 = vor.u32 %v19903_v26, %v17556_v37  ;;  %v17532_v37 = vld [vmem:[#allocation9 + $0xe30] sm:$0xf]  ;;  %v19897_v26 = vld [vmem:[#allocation9 + $0xe34] sm:$0xf0] }
 0x4fe   :  { %v21505_v2 = vadd.f32 %v8950_v12, %v8938_v40  ;;  %v19882_v12 = vld [vmem:[#allocation9 + $0xdc4] sm:$0xf]  ;;  %v17533_v16 = vor.u32 %v19897_v26, %v17532_v37  ;;  %v19917_v37 = vld [vmem:[#allocation9 + $0xed4] sm:$0xf0] }
 0x4ff   :  { %9959 = vmatpush.bf16.msra.mxu0 %v17265_v8  ;;  %v17505_v8 = vor.u32 %v19888_v28, %v17502_v34  ;;  %v19937_v28 = vld [vmem:[#allocation9 + $0xf74] sm:$0xf0]  ;;  %v19842_v34 = vld [vmem:[#allocation9 + $0xc84] sm:$0xf] }
 0x500   :  { %9981 = vmatpush.bf16.msrb.mxu3 %v17425_v38  ;;  %9945 = vmatpush.bf16.msrb.mxu2 %v17461_v43  ;;  %v19846_v38 = vld [vmem:[#allocation9 + $0xca4] sm:$0xf]  ;;  %v17334_v43 = vld [vmem:[#allocation9 + $0xca8] sm:$0xf0]  ;;  %v17693_v49 = vor.u32 %v19937_v28, %v17692_v19  ;;  %v17508_v19 = vld [vmem:[#allocation9 + $0xe00] sm:$0xf] }
 0x501   :  { %9968 = vmatpush.bf16.msrb.mxu1 %v17361_v3  ;;  %v8939_v3 = vpop.f32.mrf.mxu1  ;;  %v17337_v58 = vor.u32 %v19846_v38, %v17334_v43  ;;  %v17524_v38 = vld [vmem:[#allocation9 + $0xe20] sm:$0xf]  ;;  %v19895_v43 = vld [vmem:[#allocation9 + $0xe24] sm:$0xf0] }
 0x502   :  { %v19935_v3 = vld [vmem:[#allocation9 + $0xf64] sm:$0xf0] }
 0x503   :  { %9960 = vmatpush.bf16.msra.mxu0 %v17257_v39  ;;  %v19899_v39 = vld [vmem:[#allocation9 + $0xe44] sm:$0xf0] }
 0x504   :  { %9982 = vmatpush.bf16.msrb.mxu3 %v17417_v33  ;;  %9946 = vmatpush.bf16.msrb.mxu2 %v17453_v17  ;;  %v19844_v33 = vld [vmem:[#allocation9 + $0xc94] sm:$0xf]  ;;  %v21509_v17 = vpop.f32.mrf.mxu0 }
 0x505   :  { %9969 = vmatpush.bf16.msrb.mxu1 %v17353_v0  ;;  %v8952_v40 = vpop.f32.mrf.mxu3  ;;  %v17541_v0 = vor.u32 %v19899_v39, %v17540_v45  ;;  %v17329_v50 = vor.u32 %v19844_v33, %v17326_v30  ;;  %v17525_v45 = vor.u32 %v19895_v43, %v17524_v38  ;;  %v17516_v30 = vld [vmem:[#allocation9 + $0xe10] sm:$0xf] }
 0x506   :  { %9961 = vmatmul.bf16.vlgmr.msra.gmra.mxu0 %v21340_v48  ;;  %v17621_v40 = vor.u32 %v19919_v55, %v17620_v13  ;;  %v19874_v55 = vld [vmem:[#allocation9 + $0xd84] sm:$0xf] }
 0x507   :  { %10394 = vmatpush.bf16.msrb.mxu0 %v17565_v59  ;;  %v19858_v59 = vld [vmem:[#allocation9 + $0xd04] sm:$0xf] }
 0x508   :  { %9983 = vmatpush.bf16.msrb.mxu3 %v17409_v6  ;;  %9947 = vmatpush.bf16.msrb.mxu2 %v17445_v11  ;;  %v17318_v6 = vld [vmem:[#allocation9 + $0xc88] sm:$0xf0] }
 0x509   :  { %9970 = vmatpush.bf16.msrb.mxu1 %v17345_v32  ;;  %v17478_v11 = vld [vmem:[#allocation9 + $0xdc8] sm:$0xf0]  ;;  %v17628_v32 = vld [vmem:[#allocation9 + $0xef0] sm:$0xf] }
 0x50a   :  { %v17481_v21 = vor.u32 %v19882_v12, %v17478_v11  ;;  %v17629_v31 = vor.u32 %v19921_v20, %v17628_v32  ;;  %v17668_v12 = vld [vmem:[#allocation9 + $0xf40] sm:$0xf]  ;;  %v19876_v32 = vld [vmem:[#allocation9 + $0xd94] sm:$0xf]  ;;  %v17454_v20 = vld [vmem:[#allocation9 + $0xd98] sm:$0xf0] }
 0x50b   :  { %10395 = vmatpush.bf16.msrb.mxu0 %v17557_v46  ;;  %9948 = vmatmul.bf16.vlgmr.msrb.gmra.mxu2 %v21362_v9  ;;  %v17385_v46 = vor.u32 %v19858_v59, %v17382_v5  ;;  %v19933_v59 = vld [vmem:[#allocation9 + $0xf54] sm:$0xf0]  ;;  %v17612_v5 = vld [vmem:[#allocation9 + $0xed0] sm:$0xf] }
 0x50c   :  { %9992 = vmatpush.bf16.msra.mxu2 %v17505_v8  ;;  %9984 = vmatpush.bf16.msrb.mxu3 %v17401_v22  ;;  %v17321_v8 = vor.u32 %v19842_v34, %v17318_v6  ;;  %v8978_v22 = vpop.f32.mrf.mxu0  ;;  %v17677_v28 = vor.u32 %v19933_v59, %v17676_v54  ;;  %v19891_v6 = vld [vmem:[#allocation9 + $0xe04] sm:$0xf0]  ;;  %v19953_v54 = vld [vmem:[#allocation9 + $0xff4] sm:$0xf0] }
 0x50d   :  { %9971 = vmatpush.bf16.msrb.mxu1 %v17337_v58  ;;  %v17470_v58 = vld [vmem:[#allocation9 + $0xdb8] sm:$0xf0]  ;;  %v17509_v38 = vor.u32 %v19891_v6, %v17508_v19  ;;  %v17748_v6 = vld [vmem:[#allocation9 + $0xfe0] sm:$0xf] }
 0x50e   :  { %v8963_v33 = vpop.f32.mrf.mxu2  ;;  %v17550_v19 = vld [vmem:[#allocation9 + $0xe58] sm:$0xf0] }
 0x50f   :  { %10396 = vmatpush.bf16.msrb.mxu0 %v17549_v41  ;;  %v19880_v41 = vld [vmem:[#allocation9 + $0xdb4] sm:$0xf] }
 0x510   :  { %9993 = vmatpush.bf16.msra.mxu2 %v17497_v63  ;;  %9985 = vmatpush.bf16.msrb.mxu3 %v17393_v44  ;;  %v17685_v63 = vor.u32 %v19935_v3, %v17684_v7  ;;  %v17473_v39 = vor.u32 %v19880_v41, %v17470_v58  ;;  %v8964_v44 = vadd.f32 %v8963_v33, %v21505_v2  ;;  %v19931_v2 = vld [vmem:[#allocation9 + $0xf44] sm:$0xf0]  ;;  %v17660_v3 = vld [vmem:[#allocation9 + $0xf30] sm:$0xf]  ;;  %v19929_v41 = vld [vmem:[#allocation9 + $0xf34] sm:$0xf0] }
 0x511   :  { %9972 = vmatpush.bf16.msrb.mxu1 %v17329_v50  ;;  %v17462_v50 = vld [vmem:[#allocation9 + $0xda8] sm:$0xf0]  ;;  %v17669_v43 = vor.u32 %v19931_v2, %v17668_v12  ;;  %v17596_v33 = vld [vmem:[#allocation9 + $0xeb0] sm:$0xf]  ;;  %v19951_v12 = vld [vmem:[#allocation9 + $0xfe4] sm:$0xf0] }
 0x512   :  { %v9019_v26 = vmul.f32 %v8964_v44, %v20962_v15  ;;  %v17661_v44 = vor.u32 %v19929_v41, %v17660_v3  ;;  %v19949_v3 = vld [vmem:[#allocation9 + $0xfd4] sm:$0xf0] }
 0x513   :  { %10397 = vmatpush.bf16.msrb.mxu0 %v17541_v0  ;;  %v19878_v0 = vld [vmem:[#allocation9 + $0xda4] sm:$0xf] }
 0x514   :  { %9994 = vmatpush.bf16.msra.mxu2 %v17489_v23  ;;  %9986 = vmatpush.bf16.msrb.mxu3 %v17385_v46  ;;  %v17517_v23 = vor.u32 %v19893_v27, %v17516_v30  ;;  %v17465_v34 = vor.u32 %v19878_v0, %v17462_v50  ;;  %v21516_v11 = vadd.f32 %v9019_v26, %v21488_v18  ;;  %v19913_v30 = vld [vmem:[#allocation9 + $0xeb4] sm:$0xf0]  ;;  %v17756_v27 = vld [vmem:[#allocation9 + $0xff0] sm:$0xf]  ;;  %v19900_v26 = vld [vmem:[#allocation9 + $0xe54] sm:$0xf] }
 0x515   :  { %9973 = vmatpush.bf16.msrb.mxu1 %v17321_v8  ;;  %v17613_v46 = vor.u32 %v19917_v37, %v17612_v5  ;;  %v17604_v8 = vld [vmem:[#allocation9 + $0xec0] sm:$0xf]  ;;  %v17597_v50 = vor.u32 %v19913_v30, %v17596_v33  ;;  %v19927_v37 = vld [vmem:[#allocation9 + $0xf24] sm:$0xf0]  ;;  %v19936_v30 = vld [vmem:[#allocation9 + $0xf74] sm:$0xf] }
 0x516   :  { %v8965_v22 = vpop.f32.mrf.mxu2  ;;  %v17652_v5 = vld [vmem:[#allocation9 + $0xf20] sm:$0xf] }
 0x517   :  { %10398 = vmatpush.bf16.msrb.mxu0 %v17533_v16  ;;  %9987 = vmatmul.bf16.vlgmr.msrb.gmra.mxu3 %v21352_v61  ;;  %v19904_v16 = vld [vmem:[#allocation9 + $0xe74] sm:$0xf]  ;;  %v8989_v7 = vpop.f32.mrf.mxu1  ;;  %v17653_v2 = vor.u32 %v19927_v37, %v17652_v5  ;;  %v17740_v22 = vld [vmem:[#allocation9 + $0xfd0] sm:$0xf]  ;;  %v17630_v5 = vld [vmem:[#allocation9 + $0xef8] sm:$0xf0] }
 0x518   :  { %10420 = vmatpush.bf16.msra.mxu3 %v17693_v49  ;;  %9995 = vmatpush.bf16.msra.mxu2 %v17481_v21  ;;  %v17566_v49 = vld [vmem:[#allocation9 + $0xe78] sm:$0xf0]  ;;  %v19915_v21 = vld [vmem:[#allocation9 + $0xec4] sm:$0xf0]  ;;  %v8990_v18 = vadd.f32 %v8989_v7, %v21509_v17  ;;  %v19909_v7 = vld [vmem:[#allocation9 + $0xe94] sm:$0xf0]  ;;  %v17741_v33 = vor.u32 %v19949_v3, %v17740_v22 }
 0x519   :  { %10407 = vmatpush.bf16.msra.mxu1 %v17629_v31  ;;  %v17457_v31 = vor.u32 %v19876_v32, %v17454_v20  ;;  %v17569_v58 = vor.u32 %v19904_v16, %v17566_v49  ;;  %v17605_v13 = vor.u32 %v19915_v21, %v17604_v8  ;;  %v17553_v32 = vor.u32 %v19900_v26, %v17550_v19  ;;  %v17644_v16 = vld [vmem:[#allocation9 + $0xf10] sm:$0xf]  ;;  %v19925_v49 = vld [vmem:[#allocation9 + $0xf14] sm:$0xf0]  ;;  %v19898_v8 = vld [vmem:[#allocation9 + $0xe44] sm:$0xf] }
 0x51a   :  { %9974 = vmatmul.bf16.vlgmr.msrb.gmra.mxu1 %v21354_v52  ;;  %v17749_v21 = vor.u32 %v19951_v12, %v17748_v6  ;;  %v17645_v41 = vor.u32 %v19925_v49, %v17644_v16  ;;  %v19934_v6 = vld [vmem:[#allocation9 + $0xf64] sm:$0xf]  ;;  %v17622_v49 = vld [vmem:[#allocation9 + $0xee8] sm:$0xf0]  ;;  %v17518_v22 = vld [vmem:[#allocation9 + $0xe18] sm:$0xf0] }
 0x51b   :  { %10399 = vmatpush.bf16.msrb.mxu0 %v17525_v45  ;;  %v17446_v45 = vld [vmem:[#allocation9 + $0xd88] sm:$0xf0]  ;;  %v19918_v16 = vld [vmem:[#allocation9 + $0xee4] sm:$0xf]  ;;  %v19932_v3 = vld [vmem:[#allocation9 + $0xf54] sm:$0xf] }
 0x51c   :  { %10421 = vmatpush.bf16.msra.mxu3 %v17685_v63  ;;  %9996 = vmatpush.bf16.msra.mxu2 %v17473_v39  ;;  %v19902_v63 = vld [vmem:[#allocation9 + $0xe64] sm:$0xf]  ;;  %v17558_v39 = vld [vmem:[#allocation9 + $0xe68] sm:$0xf0]  ;;  %v17449_v59 = vor.u32 %v19874_v55, %v17446_v45  ;;  %v19923_v45 = vld [vmem:[#allocation9 + $0xf04] sm:$0xf0] }
 0x51d   :  { %10408 = vmatpush.bf16.msra.mxu1 %v17621_v40  ;;  %v9002_v40 = vpop.f32.mrf.mxu3  ;;  %v17561_v17 = vor.u32 %v19902_v63, %v17558_v39  ;;  %v19896_v63 = vld [vmem:[#allocation9 + $0xe34] sm:$0xf]  ;;  %v17534_v39 = vld [vmem:[#allocation9 + $0xe38] sm:$0xf0] }
 0x51e   :  { %v21519_v0 = vadd.f32 %v9002_v40, %v8990_v18  ;;  %v17732_v40 = vld [vmem:[#allocation9 + $0xfc0] sm:$0xf]  ;;  %v17537_v37 = vor.u32 %v19896_v63, %v17534_v39  ;;  %v17614_v63 = vld [vmem:[#allocation9 + $0xed8] sm:$0xf0] }
 0x51f   :  { %10400 = vmatpush.bf16.msrb.mxu0 %v17517_v23  ;;  %v17757_v23 = vor.u32 %v19953_v54, %v17756_v27  ;;  %v17694_v27 = vld [vmem:[#allocation9 + $0xf78] sm:$0xf0]  ;;  %v17572_v54 = vld [vmem:[#allocation9 + $0xe80] sm:$0xf] }
 0x520   :  { %10422 = vmatpush.bf16.msra.mxu3 %v17677_v28  ;;  %9997 = vmatpush.bf16.msra.mxu2 %v17465_v34  ;;  %v17588_v28 = vld [vmem:[#allocation9 + $0xea0] sm:$0xf]  ;;  %v19911_v34 = vld [vmem:[#allocation9 + $0xea4] sm:$0xf0]  ;;  %v17697_v26 = vor.u32 %v19936_v30, %v17694_v27  ;;  %v19890_v30 = vld [vmem:[#allocation9 + $0xe04] sm:$0xf] }
 0x521   :  { %10409 = vmatpush.bf16.msra.mxu1 %v17613_v46  ;;  %v8991_v46 = vpop.f32.mrf.mxu1  ;;  %v17589_v20 = vor.u32 %v19911_v34, %v17588_v28  ;;  %v19894_v28 = vld [vmem:[#allocation9 + $0xe24] sm:$0xf]  ;;  %v17526_v34 = vld [vmem:[#allocation9 + $0xe28] sm:$0xf0] }
 0x522   :  { %v17686_v46 = vld [vmem:[#allocation9 + $0xf68] sm:$0xf0] }
 0x523   :  { %10401 = vmatpush.bf16.msrb.mxu0 %v17509_v38  ;;  %v17542_v38 = vld [vmem:[#allocation9 + $0xe48] sm:$0xf0] }
 0x524   :  { %10423 = vmatpush.bf16.msra.mxu3 %v17669_v43  ;;  %9998 = vmatpush.bf16.msra.mxu2 %v17457_v31  ;;  %v17580_v43 = vld [vmem:[#allocation9 + $0xe90] sm:$0xf]  ;;  %v21523_v31 = vpop.f32.mrf.mxu0 }
 0x525   :  { %10410 = vmatpush.bf16.msra.mxu1 %v17605_v13  ;;  %v9004_v18 = vpop.f32.mrf.mxu3  ;;  %v17545_v13 = vor.u32 %v19898_v8, %v17542_v38  ;;  %v17581_v55 = vor.u32 %v19909_v7, %v17580_v43  ;;  %v17529_v8 = vor.u32 %v19894_v28, %v17526_v34  ;;  %v19892_v7 = vld [vmem:[#allocation9 + $0xe14] sm:$0xf] }
 0x526   :  { %10402 = vmatmul.bf16.vlgmr.msrb.gmra.mxu0 %v21340_v48  ;;  %v17625_v18 = vor.u32 %v19918_v16, %v17622_v49  ;;  %v17700_v16 = vld [vmem:[#allocation9 + $0xf80] sm:$0xf]  ;;  %v19939_v49 = vld [vmem:[#allocation9 + $0xf84] sm:$0xf0] }
 0x527   :  { %10446 = vmatpush.bf16.msra.mxu0 %v17569_v58  ;;  %v17636_v58 = vld [vmem:[#allocation9 + $0xf00] sm:$0xf] }
 0x528   :  { %10424 = vmatpush.bf16.msra.mxu3 %v17661_v44  ;;  %9999 = vmatpush.bf16.msra.mxu2 %v17449_v59  ;;  %v19907_v44 = vld [vmem:[#allocation9 + $0xe84] sm:$0xf0] }
 0x529   :  { %10411 = vmatpush.bf16.msra.mxu1 %v17597_v50  ;;  %v19947_v59 = vld [vmem:[#allocation9 + $0xfc4] sm:$0xf0]  ;;  %v19920_v50 = vld [vmem:[#allocation9 + $0xef4] sm:$0xf] }
 0x52a   :  { %v17733_v19 = vor.u32 %v19947_v59, %v17732_v40  ;;  %v17633_v12 = vor.u32 %v19920_v50, %v17630_v5  ;;  %v19930_v40 = vld [vmem:[#allocation9 + $0xf44] sm:$0xf]  ;;  %v17708_v50 = vld [vmem:[#allocation9 + $0xf90] sm:$0xf]  ;;  %v19941_v5 = vld [vmem:[#allocation9 + $0xf94] sm:$0xf0] }
 0x52b   :  { %10447 = vmatpush.bf16.msra.mxu0 %v17561_v17  ;;  %10000 = vmatmul.bf16.vlgmr.msra.gmra.mxu2 %v21362_v9  ;;  %v17637_v17 = vor.u32 %v19923_v45, %v17636_v58  ;;  %v17678_v58 = vld [vmem:[#allocation9 + $0xf58] sm:$0xf0]  ;;  %v19916_v45 = vld [vmem:[#allocation9 + $0xed4] sm:$0xf] }
 0x52c   :  { %10433 = vmatpush.bf16.msrb.mxu2 %v17757_v23  ;;  %10425 = vmatpush.bf16.msra.mxu3 %v17653_v2  ;;  %v17573_v23 = vor.u32 %v19907_v44, %v17572_v54  ;;  %v9419_v2 = vpop.f32.mrf.mxu0  ;;  %v17681_v27 = vor.u32 %v19932_v3, %v17678_v58  ;;  %v17510_v44 = vld [vmem:[#allocation9 + $0xe08] sm:$0xf0] }
 0x52d   :  { %10412 = vmatpush.bf16.msra.mxu1 %v17589_v20  ;;  %v19945_v20 = vld [vmem:[#allocation9 + $0xfb4] sm:$0xf0]  ;;  %v19928_v2 = vld [vmem:[#allocation9 + $0xf34] sm:$0xf] }
 0x52e   :  { %v9015_v43 = vpop.f32.mrf.mxu2 }
 0x52f   :  { %10448 = vmatpush.bf16.msra.mxu0 %v17553_v32  ;;  %v17724_v32 = vld [vmem:[#allocation9 + $0xfb0] sm:$0xf] }
 0x530   :  { %10434 = vmatpush.bf16.msrb.mxu2 %v17749_v21  ;;  %10426 = vmatpush.bf16.msra.mxu3 %v17645_v41  ;;  %v17689_v21 = vor.u32 %v19934_v6, %v17686_v46  ;;  %v17725_v38 = vor.u32 %v19945_v20, %v17724_v32  ;;  %v9016_v41 = vadd.f32 %v9015_v43, %v21519_v0  ;;  %v17670_v0 = vld [vmem:[#allocation9 + $0xf48] sm:$0xf0]  ;;  %v17662_v46 = vld [vmem:[#allocation9 + $0xf38] sm:$0xf0] }
 0x531   :  { %10413 = vmatpush.bf16.msra.mxu1 %v17581_v55  ;;  %v19943_v55 = vld [vmem:[#allocation9 + $0xfa4] sm:$0xf0]  ;;  %v17673_v28 = vor.u32 %v19930_v40, %v17670_v0  ;;  %v17709_v6 = vor.u32 %v19941_v5, %v17708_v50  ;;  %v17598_v43 = vld [vmem:[#allocation9 + $0xeb8] sm:$0xf0]  ;;  %v17665_v3 = vor.u32 %v19928_v2, %v17662_v46  ;;  %v19924_v5 = vld [vmem:[#allocation9 + $0xf14] sm:$0xf] }
 0x532   :  { %v9020_v39 = vmul.f32 %v9016_v41, %v20975_v51  ;;  %v17606_v51 = vld [vmem:[#allocation9 + $0xec8] sm:$0xf0] }
 0x533   :  { %10449 = vmatpush.bf16.msra.mxu0 %v17545_v13  ;;  %v17716_v13 = vld [vmem:[#allocation9 + $0xfa0] sm:$0xf] }
 0x534   :  { %10435 = vmatpush.bf16.msrb.mxu2 %v17741_v33  ;;  %10427 = vmatpush.bf16.msra.mxu3 %v17637_v17  ;;  %v17521_v33 = vor.u32 %v19892_v7, %v17518_v22  ;;  %v17717_v54 = vor.u32 %v19943_v55, %v17716_v13  ;;  %v21530_v59 = vadd.f32 %v9020_v39, %v21502_v56  ;;  %v19952_v7 = vld [vmem:[#allocation9 + $0xff4] sm:$0xf]  ;;  %v17758_v22 = vld [vmem:[#allocation9 + $0xff8] sm:$0xf0]  ;;  %v19926_v55 = vld [vmem:[#allocation9 + $0xf24] sm:$0xf] }
 0x535   :  { %10414 = vmatpush.bf16.msra.mxu1 %v17573_v23  ;;  %v17617_v17 = vor.u32 %v19916_v45, %v17614_v63  ;;  %v19914_v23 = vld [vmem:[#allocation9 + $0xec4] sm:$0xf]  ;;  %v17654_v45 = vld [vmem:[#allocation9 + $0xf28] sm:$0xf0]  ;;  %v17804_v63 = vld [vmem:[#allocation9 + $0x1050] sm:$0xf]  ;;  %v17761_v39 = vor.u32 %v19952_v7, %v17758_v22 }
 0x536   :  { %v17609_v20 = vor.u32 %v19914_v23, %v17606_v51  ;;  %v17657_v40 = vor.u32 %v19926_v55, %v17654_v45  ;;  %v19963_v51 = vld [vmem:[#allocation9 + $0x1044] sm:$0xf0]  ;;  %v19906_v7 = vld [vmem:[#allocation9 + $0xe84] sm:$0xf]  ;;  %v17574_v22 = vld [vmem:[#allocation9 + $0xe88] sm:$0xf0] }
 0x537   :  { %10450 = vmatpush.bf16.msra.mxu0 %v17537_v37  ;;  %10428 = vmatmul.bf16.vlgmr.msra.gmra.mxu3 %v21352_v61  ;;  %v17820_v37 = vld [vmem:[#allocation9 + $0x1070] sm:$0xf]  ;;  %v9430_v34 = vpop.f32.mrf.mxu1 }
 0x538   :  { %10472 = vmatpush.bf16.msrb.mxu3 %v17697_v26  ;;  %10436 = vmatpush.bf16.msrb.mxu2 %v17733_v19  ;;  %v19969_v26 = vld [vmem:[#allocation9 + $0x1074] sm:$0xf0]  ;;  %v17513_v19 = vor.u32 %v19890_v30, %v17510_v44  ;;  %v9431_v56 = vadd.f32 %v9430_v34, %v21523_v31  ;;  %v19910_v30 = vld [vmem:[#allocation9 + $0xea4] sm:$0xf]  ;;  %v17750_v44 = vld [vmem:[#allocation9 + $0xfe8] sm:$0xf0] }
 0x539   :  { %10459 = vmatpush.bf16.msrb.mxu1 %v17633_v12  ;;  %v9017_v12 = vpop.f32.mrf.mxu2  ;;  %v17821_v32 = vor.u32 %v19969_v26, %v17820_v37  ;;  %v17646_v37 = vld [vmem:[#allocation9 + $0xf18] sm:$0xf0]  ;;  %v17796_v26 = vld [vmem:[#allocation9 + $0x1040] sm:$0xf] }
 0x53a   :  { %10415 = vmatmul.bf16.vlgmr.msra.gmra.mxu1 %v21354_v52  ;;  %v9443_v41 = vpop.f32.mrf.mxu3  ;;  %v17742_v12 = vld [vmem:[#allocation9 + $0xfd8] sm:$0xf0]  ;;  %v17649_v2 = vor.u32 %v19924_v5, %v17646_v37  ;;  %v19983_v5 = vld [vmem:[#allocation9 + $0x10e4] sm:$0xf0] }
 0x53b   :  { %10451 = vmatpush.bf16.msra.mxu0 %v17529_v8  ;;  %v17812_v8 = vld [vmem:[#allocation9 + $0x1060] sm:$0xf]  ;;  %v21533_v58 = vadd.f32 %v9443_v41, %v9431_v56  ;;  %v19922_v56 = vld [vmem:[#allocation9 + $0xf04] sm:$0xf]  ;;  %v17734_v41 = vld [vmem:[#allocation9 + $0xfc8] sm:$0xf0] }
 0x53c   :  { %10473 = vmatpush.bf16.msrb.mxu3 %v17689_v21  ;;  %10437 = vmatpush.bf16.msrb.mxu2 %v17725_v38  ;;  %v19967_v21 = vld [vmem:[#allocation9 + $0x1064] sm:$0xf0]  ;;  %v19912_v38 = vld [vmem:[#allocation9 + $0xeb4] sm:$0xf] }
 0x53d   :  { %10460 = vmatpush.bf16.msrb.mxu1 %v17625_v18  ;;  %v17701_v18 = vor.u32 %v19939_v49, %v17700_v16  ;;  %v17813_v31 = vor.u32 %v19967_v21, %v17812_v8  ;;  %v17601_v13 = vor.u32 %v19912_v38, %v17598_v43  ;;  %v17638_v16 = vld [vmem:[#allocation9 + $0xf08] sm:$0xf0]  ;;  %v17788_v49 = vld [vmem:[#allocation9 + $0x1030] sm:$0xf]  ;;  %v19961_v8 = vld [vmem:[#allocation9 + $0x1034] sm:$0xf0] }
 0x53e   :  { %v17948_v38 = vld [vmem:[#allocation9 + $0x1170] sm:$0xf]  ;;  %v20001_v43 = vld [vmem:[#allocation9 + $0x1174] sm:$0xf0]  ;;  %v17789_v55 = vor.u32 %v19961_v8, %v17788_v49 }
 0x53f   :  { %10452 = vmatpush.bf16.msra.mxu0 %v17521_v33  ;;  %v19965_v33 = vld [vmem:[#allocation9 + $0x1054] sm:$0xf0]  ;;  %v9432_v0 = vpop.f32.mrf.mxu1  ;;  %v17949_v45 = vor.u32 %v20001_v43, %v17948_v38 }
 0x540   :  { %10474 = vmatpush.bf16.msrb.mxu3 %v17681_v27  ;;  %10438 = vmatpush.bf16.msrb.mxu2 %v17717_v54  ;;  %v17590_v27 = vld [vmem:[#allocation9 + $0xea8] sm:$0xf0]  ;;  %v19950_v54 = vld [vmem:[#allocation9 + $0xfe4] sm:$0xf]  ;;  %v19944_v0 = vld [vmem:[#allocation9 + $0xfb4] sm:$0xf] }
 0x541   :  { %10461 = vmatpush.bf16.msrb.mxu1 %v17617_v17  ;;  %v17805_v17 = vor.u32 %v19965_v33, %v17804_v63  ;;  %v17593_v50 = vor.u32 %v19910_v30, %v17590_v27  ;;  %v17753_v23 = vor.u32 %v19950_v54, %v17750_v44  ;;  %v17577_v63 = vor.u32 %v19906_v7, %v17574_v22  ;;  %v17780_v33 = vld [vmem:[#allocation9 + $0x1020] sm:$0xf]  ;;  %v19959_v30 = vld [vmem:[#allocation9 + $0x1024] sm:$0xf0] }
 0x542   :  { %v9445_v46 = vpop.f32.mrf.mxu3  ;;  %v17940_v27 = vld [vmem:[#allocation9 + $0x1160] sm:$0xf]  ;;  %v17781_v37 = vor.u32 %v19959_v30, %v17780_v33  ;;  %v19955_v7 = vld [vmem:[#allocation9 + $0x1004] sm:$0xf0] }
 0x543   :  { %10453 = vmatpush.bf16.msra.mxu0 %v17513_v19  ;;  %v19908_v19 = vld [vmem:[#allocation9 + $0xe94] sm:$0xf]  ;;  %v21537_v34 = vpop.f32.mrf.mxu0  ;;  %v19997_v46 = vld [vmem:[#allocation9 + $0x1154] sm:$0xf0]  ;;  %v17924_v22 = vld [vmem:[#allocation9 + $0x1140] sm:$0xf] }
 0x544   :  { %10475 = vmatpush.bf16.msrb.mxu3 %v17673_v28  ;;  %10439 = vmatpush.bf16.msrb.mxu2 %v17709_v6  ;;  %v17582_v28 = vld [vmem:[#allocation9 + $0xe98] sm:$0xf0]  ;;  %v19948_v6 = vld [vmem:[#allocation9 + $0xfd4] sm:$0xf] }
 0x545   :  { %10462 = vmatpush.bf16.msrb.mxu1 %v17609_v20  ;;  %v17585_v20 = vor.u32 %v19908_v19, %v17582_v28  ;;  %v17745_v21 = vor.u32 %v19948_v6, %v17742_v12  ;;  %v17772_v19 = vld [vmem:[#allocation9 + $0x1010] sm:$0xf]  ;;  %v19957_v28 = vld [vmem:[#allocation9 + $0x1014] sm:$0xf0] }
 0x546   :  { %10454 = vmatmul.bf16.vlgmr.msra.gmra.mxu0 %v21340_v48  ;;  %v17932_v6 = vld [vmem:[#allocation9 + $0x1150] sm:$0xf]  ;;  %v17773_v8 = vor.u32 %v19957_v28, %v17772_v19  ;;  %v20017_v28 = vld [vmem:[#allocation9 + $0x11f4] sm:$0xf0] }
 0x547   :  { %10887 = vmatpush.bf16.msrb.mxu0 %v17821_v32  ;;  %v17797_v32 = vor.u32 %v19963_v51, %v17796_v26  ;;  %v17933_v38 = vor.u32 %v19997_v46, %v17932_v6  ;;  %v18012_v19 = vld [vmem:[#allocation9 + $0x11f0] sm:$0xf] }
 0x548   :  { %10476 = vmatpush.bf16.msrb.mxu3 %v17665_v3  ;;  %10440 = vmatpush.bf16.msrb.mxu2 %v17701_v18  ;;  %v19946_v3 = vld [vmem:[#allocation9 + $0xfc4] sm:$0xf]  ;;  %v17641_v18 = vor.u32 %v19922_v56, %v17638_v16  ;;  %v19981_v16 = vld [vmem:[#allocation9 + $0x10d4] sm:$0xf0] }
 0x549   :  { %10463 = vmatpush.bf16.msrb.mxu1 %v17601_v13  ;;  %v19985_v13 = vld [vmem:[#allocation9 + $0x10f4] sm:$0xf0]  ;;  %v19942_v56 = vld [vmem:[#allocation9 + $0xfa4] sm:$0xf] }
 0x54b   :  { %10888 = vmatpush.bf16.msrb.mxu0 %v17813_v31  ;;  %10441 = vmatmul.bf16.vlgmr.msrb.gmra.mxu2 %v21362_v9  ;;  %v17884_v31 = vld [vmem:[#allocation9 + $0x10f0] sm:$0xf]  ;;  %v9471_v44 = vpop.f32.mrf.mxu0 }
 0x54c   :  { %10485 = vmatpush.bf16.msra.mxu2 %v17761_v39  ;;  %10477 = vmatpush.bf16.msrb.mxu3 %v17657_v40  ;;  %v17737_v39 = vor.u32 %v19946_v3, %v17734_v41  ;;  %v17885_v54 = vor.u32 %v19985_v13, %v17884_v31  ;;  %v19999_v40 = vld [vmem:[#allocation9 + $0x1164] sm:$0xf0]  ;;  %v17710_v31 = vld [vmem:[#allocation9 + $0xf98] sm:$0xf0]  ;;  %v19968_v13 = vld [vmem:[#allocation9 + $0x1074] sm:$0xf] }
 0x54d   :  { %10464 = vmatpush.bf16.msrb.mxu1 %v17593_v50  ;;  %v17876_v50 = vld [vmem:[#allocation9 + $0x10e0] sm:$0xf]  ;;  %v17941_v26 = vor.u32 %v19999_v40, %v17940_v27  ;;  %v17916_v44 = vld [vmem:[#allocation9 + $0x1130] sm:$0xf]  ;;  %v19993_v40 = vld [vmem:[#allocation9 + $0x1134] sm:$0xf0] }
 0x54e   :  { %v9456_v51 = vpop.f32.mrf.mxu2  ;;  %v17917_v6 = vor.u32 %v19993_v40, %v17916_v44 }
 0x54f   :  { %10889 = vmatpush.bf16.msrb.mxu0 %v17805_v17  ;;  %v17726_v17 = vld [vmem:[#allocation9 + $0xfb8] sm:$0xf0]  ;;  %v9457_v12 = vadd.f32 %v9456_v51, %v21533_v58  ;;  %v19995_v58 = vld [vmem:[#allocation9 + $0x1144] sm:$0xf0]  ;;  %v19977_v51 = vld [vmem:[#allocation9 + $0x10b4] sm:$0xf0] }
 0x550   :  { %10486 = vmatpush.bf16.msra.mxu2 %v17753_v23  ;;  %10478 = vmatpush.bf16.msrb.mxu3 %v17649_v2  ;;  %v17729_v23 = vor.u32 %v19944_v0, %v17726_v17  ;;  %v17877_v2 = vor.u32 %v19983_v5, %v17876_v50  ;;  %v17925_v33 = vor.u32 %v19995_v58, %v17924_v22  ;;  %v19938_v50 = vld [vmem:[#allocation9 + $0xf84] sm:$0xf]  ;;  %v17702_v5 = vld [vmem:[#allocation9 + $0xf88] sm:$0xf0] }
 0x551   :  { %10465 = vmatpush.bf16.msrb.mxu1 %v17585_v20  ;;  %v17868_v20 = vld [vmem:[#allocation9 + $0x10d0] sm:$0xf]  ;;  %v9512_v49 = vmul.f32 %v9457_v12, %v20982_v10 }
 0x552   :  { %v17869_v41 = vor.u32 %v19981_v16, %v17868_v20  ;;  %v19991_v20 = vld [vmem:[#allocation9 + $0x1124] sm:$0xf0]  ;;  %v19964_v16 = vld [vmem:[#allocation9 + $0x1054] sm:$0xf] }
 0x553   :  { %10890 = vmatpush.bf16.msrb.mxu0 %v17797_v32  ;;  %v17718_v32 = vld [vmem:[#allocation9 + $0xfa8] sm:$0xf0]  ;;  %v21544_v3 = vadd.f32 %v9512_v49, %v21516_v11  ;;  %v18013_v49 = vor.u32 %v20017_v28, %v18012_v19  ;;  %v17828_v19 = vld [vmem:[#allocation9 + $0x1080] sm:$0xf]  ;;  %v19971_v28 = vld [vmem:[#allocation9 + $0x1084] sm:$0xf0] }
 0x554   :  { %10487 = vmatpush.bf16.msra.mxu2 %v17745_v21  ;;  %10479 = vmatpush.bf16.msrb.mxu3 %v17641_v18  ;;  %v17764_v21 = vld [vmem:[#allocation9 + $0x1000] sm:$0xf]  ;;  %v17721_v43 = vor.u32 %v19942_v56, %v17718_v32  ;;  %v19940_v18 = vld [vmem:[#allocation9 + $0xf94] sm:$0xf] }
 0x555   :  { %10466 = vmatpush.bf16.msrb.mxu1 %v17577_v63  ;;  %v19979_v63 = vld [vmem:[#allocation9 + $0x10c4] sm:$0xf0]  ;;  %v17713_v27 = vor.u32 %v19940_v18, %v17710_v31  ;;  %v17908_v32 = vld [vmem:[#allocation9 + $0x1120] sm:$0xf]  ;;  %v17900_v31 = vld [vmem:[#allocation9 + $0x1110] sm:$0xf] }
 0x556   :  { %v17909_v22 = vor.u32 %v19991_v20, %v17908_v32 }
 0x557   :  { %10891 = vmatpush.bf16.msrb.mxu0 %v17789_v55  ;;  %10480 = vmatmul.bf16.vlgmr.msrb.gmra.mxu3 %v21352_v61  ;;  %v17822_v55 = vld [vmem:[#allocation9 + $0x1078] sm:$0xf0]  ;;  %v9482_v30 = vpop.f32.mrf.mxu1 }
 0x558   :  { %10913 = vmatpush.bf16.msra.mxu3 %v17949_v45  ;;  %10488 = vmatpush.bf16.msra.mxu2 %v17737_v39  ;;  %v17860_v45 = vld [vmem:[#allocation9 + $0x10c0] sm:$0xf]  ;;  %v17765_v39 = vor.u32 %v19955_v7, %v17764_v21  ;;  %v9483_v11 = vadd.f32 %v9482_v30, %v21537_v34  ;;  %v17825_v0 = vor.u32 %v19968_v13, %v17822_v55  ;;  %v20015_v7 = vld [vmem:[#allocation9 + $0x11e4] sm:$0xf0]  ;;  %v19989_v13 = vld [vmem:[#allocation9 + $0x1114] sm:$0xf0] }
 0x559   :  { %10900 = vmatpush.bf16.msra.mxu1 %v17885_v54  ;;  %v9458_v54 = vpop.f32.mrf.mxu2  ;;  %v17861_v17 = vor.u32 %v19979_v63, %v17860_v45  ;;  %v17844_v21 = vld [vmem:[#allocation9 + $0x10a0] sm:$0xf]  ;;  %v19962_v55 = vld [vmem:[#allocation9 + $0x1044] sm:$0xf]  ;;  %v17798_v63 = vld [vmem:[#allocation9 + $0x1048] sm:$0xf0]  ;;  %v17901_v44 = vor.u32 %v19989_v13, %v17900_v31 }
 0x55a   :  { %10467 = vmatmul.bf16.vlgmr.msrb.gmra.mxu1 %v21354_v52  ;;  %v9495_v12 = vpop.f32.mrf.mxu3  ;;  %v20013_v54 = vld [vmem:[#allocation9 + $0x11d4] sm:$0xf0]  ;;  %v17878_v31 = vld [vmem:[#allocation9 + $0x10e8] sm:$0xf0] }
 0x55b   :  { %10892 = vmatpush.bf16.msrb.mxu0 %v17781_v37  ;;  %v19966_v37 = vld [vmem:[#allocation9 + $0x1064] sm:$0xf]  ;;  %v21547_v46 = vadd.f32 %v9495_v12, %v9483_v11  ;;  %v17892_v11 = vld [vmem:[#allocation9 + $0x1100] sm:$0xf]  ;;  %v20011_v12 = vld [vmem:[#allocation9 + $0x11c4] sm:$0xf0] }
 0x55c   :  { %10914 = vmatpush.bf16.msra.mxu3 %v17941_v26  ;;  %10489 = vmatpush.bf16.msra.mxu2 %v17729_v23  ;;  %v17814_v26 = vld [vmem:[#allocation9 + $0x1068] sm:$0xf0]  ;;  %v17852_v23 = vld [vmem:[#allocation9 + $0x10b0] sm:$0xf] }
 0x55d   :  { %10901 = vmatpush.bf16.msra.mxu1 %v17877_v2  ;;  %v17705_v2 = vor.u32 %v19938_v50, %v17702_v5  ;;  %v17817_v34 = vor.u32 %v19966_v37, %v17814_v26  ;;  %v17853_v56 = vor.u32 %v19977_v51, %v17852_v23  ;;  %v19987_v50 = vld [vmem:[#allocation9 + $0x1104] sm:$0xf0]  ;;  %v19960_v5 = vld [vmem:[#allocation9 + $0x1034] sm:$0xf]  ;;  %v17790_v37 = vld [vmem:[#allocation9 + $0x1038] sm:$0xf0] }
 0x55e   :  { %v20000_v23 = vld [vmem:[#allocation9 + $0x1174] sm:$0xf]  ;;  %v17950_v51 = vld [vmem:[#allocation9 + $0x1178] sm:$0xf0]  ;;  %v17793_v32 = vor.u32 %v19960_v5, %v17790_v37 }
 0x55f   :  { %10893 = vmatpush.bf16.msrb.mxu0 %v17773_v8  ;;  %v17806_v8 = vld [vmem:[#allocation9 + $0x1058] sm:$0xf0]  ;;  %v9484_v58 = vpop.f32.mrf.mxu1  ;;  %v17953_v20 = vor.u32 %v20000_v23, %v17950_v51  ;;  %v19954_v51 = vld [vmem:[#allocation9 + $0x1004] sm:$0xf] }
 0x560   :  { %10915 = vmatpush.bf16.msra.mxu3 %v17933_v38  ;;  %10490 = vmatpush.bf16.msra.mxu2 %v17721_v43  ;;  %v19975_v38 = vld [vmem:[#allocation9 + $0x10a4] sm:$0xf0]  ;;  %v18004_v43 = vld [vmem:[#allocation9 + $0x11e0] sm:$0xf]  ;;  %v17980_v58 = vld [vmem:[#allocation9 + $0x11b0] sm:$0xf] }
 0x561   :  { %10902 = vmatpush.bf16.msra.mxu1 %v17869_v41  ;;  %v17809_v41 = vor.u32 %v19964_v16, %v17806_v8  ;;  %v17845_v18 = vor.u32 %v19975_v38, %v17844_v21  ;;  %v18005_v45 = vor.u32 %v20015_v7, %v18004_v43  ;;  %v17829_v16 = vor.u32 %v19971_v28, %v17828_v19  ;;  %v19958_v8 = vld [vmem:[#allocation9 + $0x1024] sm:$0xf]  ;;  %v17782_v21 = vld [vmem:[#allocation9 + $0x1028] sm:$0xf0] }
 0x562   :  { %v9497_v40 = vpop.f32.mrf.mxu3  ;;  %v19998_v38 = vld [vmem:[#allocation9 + $0x1164] sm:$0xf]  ;;  %v17785_v13 = vor.u32 %v19958_v8, %v17782_v21  ;;  %v17766_v19 = vld [vmem:[#allocation9 + $0x1008] sm:$0xf0]  ;;  %v19992_v21 = vld [vmem:[#allocation9 + $0x1134] sm:$0xf] }
 0x563   :  { %10894 = vmatpush.bf16.msrb.mxu0 %v17765_v39  ;;  %v17836_v39 = vld [vmem:[#allocation9 + $0x1090] sm:$0xf]  ;;  %v21551_v30 = vpop.f32.mrf.mxu0  ;;  %v17934_v40 = vld [vmem:[#allocation9 + $0x1158] sm:$0xf0]  ;;  %v19994_v28 = vld [vmem:[#allocation9 + $0x1144] sm:$0xf] }
 0x564   :  { %10916 = vmatpush.bf16.msra.mxu3 %v17925_v33  ;;  %10491 = vmatpush.bf16.msra.mxu2 %v17713_v27  ;;  %v19973_v33 = vld [vmem:[#allocation9 + $0x1094] sm:$0xf0]  ;;  %v17996_v27 = vld [vmem:[#allocation9 + $0x11d0] sm:$0xf] }
 0x565   :  { %10903 = vmatpush.bf16.msra.mxu1 %v17861_v17  ;;  %v17837_v17 = vor.u32 %v19973_v33, %v17836_v39  ;;  %v17997_v26 = vor.u32 %v20013_v54, %v17996_v27  ;;  %v19956_v39 = vld [vmem:[#allocation9 + $0x1014] sm:$0xf]  ;;  %v17774_v33 = vld [vmem:[#allocation9 + $0x1018] sm:$0xf0] }
 0x566   :  { %10895 = vmatmul.bf16.vlgmr.msrb.gmra.mxu0 %v21340_v48  ;;  %v19996_v27 = vld [vmem:[#allocation9 + $0x1154] sm:$0xf]  ;;  %v17777_v37 = vor.u32 %v19956_v39, %v17774_v33 }
 0x567   :  { %10939 = vmatpush.bf16.msra.mxu0 %v17825_v0  ;;  %v17801_v0 = vor.u32 %v19962_v55, %v17798_v63 }
 0x568   :  { %10917 = vmatpush.bf16.msra.mxu3 %v17917_v6  ;;  %10492 = vmatpush.bf16.msra.mxu2 %v17705_v2  ;;  %v17988_v6 = vld [vmem:[#allocation9 + $0x11c0] sm:$0xf]  ;;  %v17893_v2 = vor.u32 %v19987_v50, %v17892_v11  ;;  %v17870_v50 = vld [vmem:[#allocation9 + $0x10d8] sm:$0xf0] }
 0x569   :  { %10904 = vmatpush.bf16.msra.mxu1 %v17853_v56  ;;  %v17886_v56 = vld [vmem:[#allocation9 + $0x10f8] sm:$0xf0]  ;;  %v17972_v11 = vld [vmem:[#allocation9 + $0x11a0] sm:$0xf] }
 0x56b   :  { %10940 = vmatpush.bf16.msra.mxu0 %v17817_v34  ;;  %10493 = vmatmul.bf16.vlgmr.msra.gmra.mxu2 %v21362_v9  ;;  %v19984_v34 = vld [vmem:[#allocation9 + $0x10f4] sm:$0xf]  ;;  %v9912_v7 = vpop.f32.mrf.mxu0 }
 0x56c   :  { %10926 = vmatpush.bf16.msrb.mxu2 %v18013_v49  ;;  %10918 = vmatpush.bf16.msra.mxu3 %v17909_v22  ;;  %v17989_v49 = vor.u32 %v20011_v12, %v17988_v6  ;;  %v17889_v43 = vor.u32 %v19984_v34, %v17886_v56  ;;  %v17942_v22 = vld [vmem:[#allocation9 + $0x1168] sm:$0xf0]  ;;  %v20005_v34 = vld [vmem:[#allocation9 + $0x1194] sm:$0xf0]  ;;  %v19978_v56 = vld [vmem:[#allocation9 + $0x10c4] sm:$0xf] }
 0x56d   :  { %10905 = vmatpush.bf16.msra.mxu1 %v17845_v18  ;;  %v19982_v18 = vld [vmem:[#allocation9 + $0x10e4] sm:$0xf]  ;;  %v17945_v55 = vor.u32 %v19998_v38, %v17942_v22  ;;  %v17926_v12 = vld [vmem:[#allocation9 + $0x1148] sm:$0xf0]  ;;  %v17918_v38 = vld [vmem:[#allocation9 + $0x1138] sm:$0xf0] }
 0x56e   :  { %v9508_v63 = vpop.f32.mrf.mxu2  ;;  %v17956_v7 = vld [vmem:[#allocation9 + $0x1180] sm:$0xf]  ;;  %v20003_v22 = vld [vmem:[#allocation9 + $0x1184] sm:$0xf0] }
 0x56f   :  { %10941 = vmatpush.bf16.msra.mxu0 %v17809_v41  ;;  %v20009_v41 = vld [vmem:[#allocation9 + $0x11b4] sm:$0xf0]  ;;  %v9509_v54 = vadd.f32 %v9508_v63, %v21547_v46 }
 0x570   :  { %10927 = vmatpush.bf16.msrb.mxu2 %v18005_v45  ;;  %10919 = vmatpush.bf16.msra.mxu3 %v17901_v44  ;;  %v17981_v45 = vor.u32 %v20009_v41, %v17980_v58  ;;  %v17881_v44 = vor.u32 %v19982_v18, %v17878_v31  ;;  %v19976_v58 = vld [vmem:[#allocation9 + $0x10b4] sm:$0xf]  ;;  %v17854_v41 = vld [vmem:[#allocation9 + $0x10b8] sm:$0xf0] }
 0x571   :  { %10906 = vmatpush.bf16.msra.mxu1 %v17837_v17  ;;  %v19980_v17 = vld [vmem:[#allocation9 + $0x10d4] sm:$0xf]  ;;  %v9513_v5 = vmul.f32 %v9509_v54, %v20995_v57  ;;  %v17769_v57 = vor.u32 %v19954_v51, %v17766_v19  ;;  %v18014_v31 = vld [vmem:[#allocation9 + $0x11f8] sm:$0xf0]  ;;  %v17857_v39 = vor.u32 %v19976_v58, %v17854_v41  ;;  %v17910_v54 = vld [vmem:[#allocation9 + $0x1128] sm:$0xf0] }
 0x572   :  { %v17873_v6 = vor.u32 %v19980_v17, %v17870_v50  ;;  %v20016_v18 = vld [vmem:[#allocation9 + $0x11f4] sm:$0xf]  ;;  %v17838_v51 = vld [vmem:[#allocation9 + $0x1098] sm:$0xf0]  ;;  %v20006_v41 = vld [vmem:[#allocation9 + $0x11a4] sm:$0xf] }
 0x573   :  { %10942 = vmatpush.bf16.msra.mxu0 %v17801_v0  ;;  %v20007_v0 = vld [vmem:[#allocation9 + $0x11a4] sm:$0xf0]  ;;  %v21558_v46 = vadd.f32 %v9513_v5, %v21530_v59  ;;  %v18017_v33 = vor.u32 %v20016_v18, %v18014_v31  ;;  %v20012_v19 = vld [vmem:[#allocation9 + $0x11d4] sm:$0xf]  ;;  %v17974_v18 = vld [vmem:[#allocation9 + $0x11a8] sm:$0xf0] }
 0x574   :  { %10928 = vmatpush.bf16.msrb.mxu2 %v17997_v26  ;;  %10920 = vmatpush.bf16.msra.mxu3 %v17893_v2  ;;  %v17937_v26 = vor.u32 %v19996_v27, %v17934_v40  ;;  %v17973_v23 = vor.u32 %v20007_v0, %v17972_v11  ;;  %v17964_v2 = vld [vmem:[#allocation9 + $0x1190] sm:$0xf]  ;;  %v19990_v27 = vld [vmem:[#allocation9 + $0x1124] sm:$0xf]  ;;  %v18006_v11 = vld [vmem:[#allocation9 + $0x11e8] sm:$0xf0] }
 0x575   :  { %10907 = vmatpush.bf16.msra.mxu1 %v17829_v16  ;;  %v20014_v40 = vld [vmem:[#allocation9 + $0x11e4] sm:$0xf]  ;;  %v17913_v0 = vor.u32 %v19990_v27, %v17910_v54 }
 0x576   :  { %v9510_v8 = vpop.f32.mrf.mxu2  ;;  %v18009_v5 = vor.u32 %v20014_v40, %v18006_v11  ;;  %v17958_v40 = vld [vmem:[#allocation9 + $0x1188] sm:$0xf0] }
 0x577   :  { %10943 = vmatpush.bf16.msra.mxu0 %v17793_v32  ;;  %10921 = vmatmul.bf16.vlgmr.msra.gmra.mxu3 %v21352_v61  ;;  %v17862_v32 = vld [vmem:[#allocation9 + $0x10c8] sm:$0xf0]  ;;  %v9923_v16 = vpop.f32.mrf.mxu1 }
 0x578   :  { %10965 = vmatpush.bf16.msrb.mxu3 %v17953_v20  ;;  %10929 = vmatpush.bf16.msrb.mxu2 %v17989_v49  ;;  %v17929_v20 = vor.u32 %v19994_v28, %v17926_v12  ;;  %v17965_v49 = vor.u32 %v20005_v34, %v17964_v2  ;;  %v9924_v59 = vadd.f32 %v9923_v16, %v21551_v30  ;;  %v19974_v30 = vld [vmem:[#allocation9 + $0x10a4] sm:$0xf]  ;;  %v17998_v28 = vld [vmem:[#allocation9 + $0x11d8] sm:$0xf0] }
 0x579   :  { %10952 = vmatpush.bf16.msrb.mxu1 %v17889_v43  ;;  %v17865_v43 = vor.u32 %v19978_v56, %v17862_v32  ;;  %v18001_v34 = vor.u32 %v20012_v19, %v17998_v28  ;;  %v19986_v56 = vld [vmem:[#allocation9 + $0x1104] sm:$0xf]  ;;  %v17894_v32 = vld [vmem:[#allocation9 + $0x1108] sm:$0xf0] }
 0x57a   :  { %10908 = vmatmul.bf16.vlgmr.msra.gmra.mxu1 %v21354_v52  ;;  %v20010_v16 = vld [vmem:[#allocation9 + $0x11c4] sm:$0xf]  ;;  %v17897_v8 = vor.u32 %v19986_v56, %v17894_v32  ;;  %v20039_v56 = vld [vmem:[#allocation12 + $0x28] sm:$0xff] }
 0x57b   :  { %10944 = vmatpush.bf16.msra.mxu0 %v17785_v13  ;;  %v17921_v13 = vor.u32 %v19992_v21, %v17918_v38 }
 0x57c   :  { %10966 = vmatpush.bf16.msrb.mxu3 %v17945_v55  ;;  %10930 = vmatpush.bf16.msrb.mxu2 %v17981_v45  ;;  %v9936_v55 = vpop.f32.mrf.mxu3  ;;  %v17957_v45 = vor.u32 %v20003_v22, %v17956_v7 }
 0x57d   :  { %10953 = vmatpush.bf16.msrb.mxu1 %v17881_v44  ;;  %v9937_v63 = vadd.f32 %v9936_v55, %v9924_v59  ;;  %v17846_v44 = vld [vmem:[#allocation9 + $0x10a8] sm:$0xf0]  ;;  %v20008_v59 = vld [vmem:[#allocation9 + $0x11b4] sm:$0xf]  ;;  %v17977_v55 = vor.u32 %v20006_v41, %v17974_v18 }
 0x57e   :  { %v17849_v50 = vor.u32 %v19974_v30, %v17846_v44  ;;  %v20002_v44 = vld [vmem:[#allocation9 + $0x1184] sm:$0xf]  ;;  %v20019_v41 = vld [vmem:[%s21768_s18 + $0x8] sm:$0xff]  ;;  %v20035_v18 = vld [vmem:[#allocation12 + $0x8] sm:$0xff] }
 0x57f   :  { %10945 = vmatpush.bf16.msra.mxu0 %v17777_v37  ;;  %v9925_v17 = vpop.f32.mrf.mxu1  ;;  %v19988_v37 = vld [vmem:[#allocation9 + $0x1114] sm:$0xf] }
 0x580   :  { %10967 = vmatpush.bf16.msrb.mxu3 %v17937_v26  ;;  %10931 = vmatpush.bf16.msrb.mxu2 %v17973_v23  ;;  %v17902_v26 = vld [vmem:[#allocation9 + $0x1118] sm:$0xf0]  ;;  %v19972_v23 = vld [vmem:[#allocation9 + $0x1094] sm:$0xf] }
 0x581   :  { %10954 = vmatpush.bf16.msrb.mxu1 %v17873_v6  ;;  %v17905_v6 = vor.u32 %v19988_v37, %v17902_v26  ;;  %v17841_v2 = vor.u32 %v19972_v23, %v17838_v51 }
 0x583   :  { %10946 = vmatpush.bf16.msra.mxu0 %v17769_v57  ;;  %v19970_v57 = vld [vmem:[#allocation9 + $0x1084] sm:$0xf] }
 0x584   :  { %10968 = vmatpush.bf16.msrb.mxu3 %v17929_v20  ;;  %10932 = vmatpush.bf16.msrb.mxu2 %v17965_v49  ;;  %v9938_v12 = vpop.f32.mrf.mxu3  ;;  %v17830_v20 = vld [vmem:[#allocation9 + $0x1088] sm:$0xf0] }
 0x585   :  { %10955 = vmatpush.bf16.msrb.mxu1 %v17865_v43  ;;  %v17990_v49 = vld [vmem:[#allocation9 + $0x11c8] sm:$0xf0]  ;;  %v17833_v21 = vor.u32 %v19970_v57, %v17830_v20  ;;  %v17982_v43 = vld [vmem:[#allocation9 + $0x11b8] sm:$0xf0] }
 0x586   :  { %10947 = vmatmul.bf16.vlgmr.msra.gmra.mxu0 %v21340_v48  ;;  %v9962_v48 = vpop.f32.mrf.mxu0  ;;  %v17993_v38 = vor.u32 %v20010_v16, %v17990_v49  ;;  %v17985_v22 = vor.u32 %v20008_v59, %v17982_v43  ;;  %v20022_v20 = vld [vmem:[%s21768_s18 + $0x20] sm:$0xff]  ;;  %v20038_v16 = vld [vmem:[#allocation12 + $0x20] sm:$0xff] }
 0x588   :  { %10969 = vmatpush.bf16.msrb.mxu3 %v17921_v13  ;;  %10933 = vmatpush.bf16.msrb.mxu2 %v17957_v45  ;;  %v20004_v45 = vld [vmem:[#allocation9 + $0x1194] sm:$0xf] }
 0x589   :  { %10956 = vmatpush.bf16.msrb.mxu1 %v17857_v39  ;;  %v17966_v39 = vld [vmem:[#allocation9 + $0x1198] sm:$0xf0] }
 0x58a   :  { %v17969_v27 = vor.u32 %v20004_v45, %v17966_v39  ;;  %v20018_v45 = vld [vmem:[%s21768_s18] sm:$0xff]  ;;  %v20034_v39 = vld [vmem:[#allocation12] sm:$0xff] }
 0x58b   :  { %10934 = vmatmul.bf16.vlgmr.msrb.gmra.mxu2 %v21362_v9 }
 0x58c   :  { %10978 = vmatpush.bf16.msra.mxu2 %v18017_v33  ;;  %10970 = vmatpush.bf16.msrb.mxu3 %v17913_v0 }
 0x58d   :  { %10957 = vmatpush.bf16.msrb.mxu1 %v17849_v50 }
 0x58e   :  { %v9964_v7 = vpop.f32.mrf.mxu0  ;;  %v9949_v58 = vpop.f32.mrf.mxu2 }
 0x58f   :  { %v9950_v31 = vadd.f32 %v9949_v58, %v9937_v63  ;;  %v20020_v7 = vld [vmem:[%s21768_s18 + $0x10] sm:$0xff] }
 0x590   :  { %10979 = vmatpush.bf16.msra.mxu2 %v18009_v5  ;;  %10971 = vmatpush.bf16.msrb.mxu3 %v17905_v6  ;;  %v20041_v6 = vld [vmem:[#allocation12 + $0x38] sm:$0xff] }
 0x591   :  { %10958 = vmatpush.bf16.msrb.mxu1 %v17841_v2  ;;  %v10005_v13 = vmul.f32 %v9950_v31, %v21002_v25  ;;  %v20024_v2 = vld [vmem:[%s21768_s18 + $0x30] sm:$0xff] }
 0x593   :  { %v10007_v33 = vadd.f32 %v10005_v13, %v21544_v3 }
 0x594   :  { %10980 = vmatpush.bf16.msra.mxu2 %v18001_v34  ;;  %10972 = vmatpush.bf16.msrb.mxu3 %v17897_v8  ;;  %v20021_v8 = vld [vmem:[%s21768_s18 + $0x18] sm:$0xff] }
 0x595   :  { %10959 = vmatpush.bf16.msrb.mxu1 %v17833_v21  ;;  %v20037_v21 = vld [vmem:[#allocation12 + $0x18] sm:$0xff] }
 0x596   :  { %v9951_v30 = vpop.f32.mrf.mxu2 }
 0x597   :  { %10973 = vmatmul.bf16.vlgmr.msrb.gmra.mxu3 %v21352_v61  ;;  %v9975_v54 = vpop.f32.mrf.mxu1  ;;  %v17961_v61 = vor.u32 %v20002_v44, %v17958_v40  ;;  %v20057_v30 = vld [vmem:[#allocation12 + $0xb8] sm:$0xff] }
 0x598   :  { %10981 = vmatpush.bf16.msra.mxu2 %v17993_v38  ;;  %10960 = vmatmul.bf16.vlgmr.msrb.gmra.mxu1 %v21354_v52  ;;  %v9976_v11 = vadd.f32 %v9975_v54, %v9962_v48  ;;  %v20025_v48 = vld [vmem:[%s21768_s18 + $0x38] sm:$0xff]  ;;  %v20049_v54 = vld [vmem:[#allocation12 + $0x78] sm:$0xff] }
 0x599   :  { %11135 = vmatpush.bf16.msrb.mxu0 %v20025_v48  ;;  %11290 = vmatpush.bf16.msra.mxu3 %v20041_v6  ;;  %v20073_v44 = vld [vmem:[#allocation12 + $0x138] sm:$0xff]  ;;  %v20070_v48 = vld [vmem:[#allocation12 + $0x120] sm:$0xff] }
 0x59a   :  { %v9988_v63 = vpop.f32.mrf.mxu3 }
 0x59b   :  { %v9989_v0 = vadd.f32 %v9988_v63, %v9976_v11  ;;  %v20032_v11 = vld [vmem:[%s21768_s18 + $0x70] sm:$0xff]  ;;  %v20056_v63 = vld [vmem:[#allocation12 + $0xb0] sm:$0xff] }
 0x59c   :  { %10982 = vmatpush.bf16.msra.mxu2 %v17985_v22  ;;  %v20036_v22 = vld [vmem:[#allocation12 + $0x10] sm:$0xff] }
 0x59d   :  { %11136 = vmatpush.bf16.msrb.mxu0 %v20024_v2  ;;  %v20053_v2 = vld [vmem:[#allocation12 + $0x98] sm:$0xff] }
 0x59f   :  { %v9977_v52 = vpop.f32.mrf.mxu1 }
 0x5a0   :  { %10983 = vmatpush.bf16.msra.mxu2 %v17977_v55 }
 0x5a2   :  { %v9990_v50 = vpop.f32.mrf.mxu3 }
 0x5a3   :  { %v10403_v17 = vpop.f32.mrf.mxu0  ;;  %v20047_v50 = vld [vmem:[#allocation12 + $0x68] sm:$0xff] }
 0x5a4   :  { %10984 = vmatpush.bf16.msra.mxu2 %v17969_v27 }
 0x5a8   :  { %10985 = vmatpush.bf16.msra.mxu2 %v17961_v61  ;;  %v20048_v61 = vld [vmem:[#allocation12 + $0x70] sm:$0xff] }
 0x5ab   :  { %10986 = vmatmul.bf16.vlgmr.msra.gmra.mxu2 %v21362_v9  ;;  %v10405_v5 = vpop.f32.mrf.mxu0 }
 0x5ac   :  { %11303 = vmatpush.bf16.msrb.mxu2 %v20049_v54 }
 0x5ae   :  { %v10001_v37 = vpop.f32.mrf.mxu2 }
 0x5af   :  { %v10002_v3 = vadd.f32 %v10001_v37, %v9989_v0  ;;  %v20072_v0 = vld [vmem:[#allocation12 + $0x130] sm:$0xff]  ;;  %v20055_v37 = vld [vmem:[#allocation12 + $0xa8] sm:$0xff] }
 0x5b0   :  { %11304 = vmatpush.bf16.msrb.mxu2 %v20048_v61 }
 0x5b1   :  { %v10006_v26 = vmul.f32 %v10002_v3, %v21015_v14  ;;  %v20040_v14 = vld [vmem:[#allocation12 + $0x30] sm:$0xff]  ;;  %v20071_v3 = vld [vmem:[#allocation12 + $0x128] sm:$0xff] }
 0x5b2   :  { %11291 = vmatpush.bf16.msra.mxu3 %v20040_v14  ;;  %v20069_v14 = vld [vmem:[#allocation12 + $0x118] sm:$0xff] }
 0x5b3   :  { %v21570_v23 = vadd.f32 %v10006_v26, %v21558_v46  ;;  %v20023_v46 = vld [vmem:[%s21768_s18 + $0x28] sm:$0xff] }
 0x5b4   :  { %11137 = vmatpush.bf16.msrb.mxu0 %v20023_v46  ;;  %11305 = vmatpush.bf16.msrb.mxu2 %v20047_v50  ;;  %v21630_v50 = vld [vmem:[#allocation10] sm:$0x3] }
 0x5b6   :  { %v10003_v19 = vpop.f32.mrf.mxu2  ;;  %11292 = vmatpush.bf16.msra.mxu3 %v20039_v56  ;;  %v20028_v56 = vld [vmem:[%s21768_s18 + $0x50] sm:$0xff] }
 0x5b7   :  { %v10416_v51 = vpop.f32.mrf.mxu1  ;;  %v20046_v19 = vld [vmem:[#allocation12 + $0x60] sm:$0xff] }
 0x5b8   :  { %v10417_v28 = vadd.f32 %v10416_v51, %v10403_v17  ;;  %11138 = vmatpush.bf16.msrb.mxu0 %v20022_v20  ;;  %v20031_v17 = vld [vmem:[%s21768_s18 + $0x68] sm:$0xff]  ;;  %v20030_v51 = vld [vmem:[%s21768_s18 + $0x60] sm:$0xff]  ;;  %11306 = vmatpush.bf16.msrb.mxu2 %v20046_v19  ;;  %v10997_v19 = vperm.slane %v21630_v50, 0 }
 0x5ba   :  { %v10429_v12 = vpop.f32.mrf.mxu3  ;;  %11293 = vmatpush.bf16.msra.mxu3 %v20038_v16  ;;  %v20068_v16 = vld [vmem:[#allocation12 + $0x110] sm:$0xff] }
 0x5bb   :  { %v10430_v9 = vadd.f32 %v10429_v12, %v10417_v28  ;;  %v20054_v28 = vld [vmem:[#allocation12 + $0xa0] sm:$0xff] }
 0x5bc   :  { %11139 = vmatpush.bf16.msrb.mxu0 %v20021_v8  ;;  %v20029_v12 = vld [vmem:[%s21768_s18 + $0x58] sm:$0xff]  ;;  %v20027_v8 = vld [vmem:[%s21768_s18 + $0x48] sm:$0xff] }
 0x5be   :  { %11294 = vmatpush.bf16.msra.mxu3 %v20037_v21  ;;  %v20043_v21 = vld [vmem:[#allocation12 + $0x48] sm:$0xff] }
 0x5bf   :  { %v10418_v34 = vpop.f32.mrf.mxu1 }
 0x5c0   :  { %11140 = vmatpush.bf16.msrb.mxu0 %v20020_v7 }
 0x5c2   :  { %v10431_v57 = vpop.f32.mrf.mxu3  ;;  %11295 = vmatpush.bf16.msra.mxu3 %v20036_v22  ;;  %v20050_v22 = vld [vmem:[#allocation12 + $0x80] sm:$0xff] }
 0x5c3   :  { %v10455_v32 = vpop.f32.mrf.mxu0  ;;  %v20052_v57 = vld [vmem:[#allocation12 + $0x90] sm:$0xff] }
 0x5c4   :  { %11141 = vmatpush.bf16.msrb.mxu0 %v20019_v41  ;;  %v20066_v41 = vld [vmem:[#allocation12 + $0x100] sm:$0xff] }
 0x5c6   :  { %11296 = vmatpush.bf16.msra.mxu3 %v20035_v18  ;;  %v20065_v18 = vld [vmem:[#allocation12 + $0xf8] sm:$0xff] }
 0x5c8   :  { %11142 = vmatpush.bf16.msrb.mxu0 %v20018_v45  ;;  %v20080_v45 = vld [vmem:[#allocation12 + $0x170] sm:$0xff] }
 0x5ca   :  { %11297 = vmatpush.bf16.msra.mxu3 %v20034_v39 }
 0x5cb   :  { %v10457_v49 = vpop.f32.mrf.mxu0 }
 0x5cc   :  { %11446 = vmatpush.bf16.msra.mxu0 %v20057_v30 }
 0x5ce   :  { %v10442_v38 = vpop.f32.mrf.mxu2  ;;  %11603 = vmatpush.bf16.msrb.mxu3 %v20073_v44  ;;  %v20062_v44 = vld [vmem:[#allocation12 + $0xe0] sm:$0xff] }
 0x5cf   :  { %v10443_v59 = vadd.f32 %v10442_v38, %v10430_v9  ;;  %v20045_v9 = vld [vmem:[#allocation12 + $0x58] sm:$0xff]  ;;  %v20051_v38 = vld [vmem:[#allocation12 + $0x88] sm:$0xff] }
 0x5d0   :  { %11447 = vmatpush.bf16.msra.mxu0 %v20056_v63  ;;  %11307 = vmatpush.bf16.msrb.mxu2 %v20045_v9  ;;  %v20061_v63 = vld [vmem:[#allocation12 + $0xd8] sm:$0xff] }
 0x5d1   :  { %v10498_v43 = vmul.f32 %v10443_v59, %v21022_v1  ;;  %v20067_v59 = vld [vmem:[#allocation12 + $0x108] sm:$0xff] }
 0x5d2   :  { %11604 = vmatpush.bf16.msrb.mxu3 %v20072_v0  ;;  %v20077_v0 = vld [vmem:[#allocation12 + $0x158] sm:$0xff] }
 0x5d3   :  { %v21591_v58 = vadd.f32 %v10498_v43, %v10007_v33  ;;  %v20033_v33 = vld [vmem:[%s21768_s18 + $0x78] sm:$0xff] }
 0x5d4   :  { %11148 = vmatpush.bf16.msra.mxu1 %v20033_v33  ;;  %11448 = vmatpush.bf16.msra.mxu0 %v20055_v37  ;;  %v20063_v33 = vld [vmem:[#allocation12 + $0xe8] sm:$0xff] }
 0x5d6   :  { %v10444_v13 = vpop.f32.mrf.mxu2  ;;  %11605 = vmatpush.bf16.msrb.mxu3 %v20071_v3  ;;  %v20060_v3 = vld [vmem:[#allocation12 + $0xd0] sm:$0xff] }
 0x5d7   :  { %v10468_v31 = vpop.f32.mrf.mxu1 }
 0x5d8   :  { %v10469_v55 = vadd.f32 %v10468_v31, %v10455_v32  ;;  %11149 = vmatpush.bf16.msra.mxu1 %v20032_v11  ;;  %11449 = vmatpush.bf16.msra.mxu0 %v20054_v28  ;;  %v20044_v32 = vld [vmem:[#allocation12 + $0x50] sm:$0xff]  ;;  %v20081_v31 = vld [vmem:[#allocation12 + $0x178] sm:$0xff]  ;;  %v20059_v28 = vld [vmem:[#allocation12 + $0xc8] sm:$0xff] }
 0x5d9   :  { %11308 = vmatpush.bf16.msrb.mxu2 %v20044_v32 }
 0x5da   :  { %v10481_v27 = vpop.f32.mrf.mxu3  ;;  %11606 = vmatpush.bf16.msrb.mxu3 %v20070_v48  ;;  %v20075_v48 = vld [vmem:[#allocation12 + $0x148] sm:$0xff] }
 0x5db   :  { %v10482_v40 = vadd.f32 %v10481_v27, %v10469_v55  ;;  %v20064_v55 = vld [vmem:[#allocation12 + $0xf0] sm:$0xff]  ;;  %v20079_v27 = vld [vmem:[#allocation12 + $0x168] sm:$0xff] }
 0x5dc   :  { %11150 = vmatpush.bf16.msra.mxu1 %v20031_v17  ;;  %11450 = vmatpush.bf16.msra.mxu0 %v20053_v2  ;;  %v20058_v2 = vld [vmem:[#allocation12 + $0xc0] sm:$0xff] }
 0x5dd   :  { %11309 = vmatpush.bf16.msrb.mxu2 %v20043_v21  ;;  %v20103_v21 = vld [vmem:[#allocation12 + $0x228] sm:$0xff] }
 0x5de   :  { %11607 = vmatpush.bf16.msrb.mxu3 %v20069_v14  ;;  %v20074_v14 = vld [vmem:[#allocation12 + $0x140] sm:$0xff] }
 0x5df   :  { %v10470_v52 = vpop.f32.mrf.mxu1 }
 0x5e0   :  { %11151 = vmatpush.bf16.msra.mxu1 %v20030_v51  ;;  %11451 = vmatpush.bf16.msra.mxu0 %v20052_v57 }
 0x5e2   :  { %v10483_v26 = vpop.f32.mrf.mxu3  ;;  %11608 = vmatpush.bf16.msrb.mxu3 %v20068_v16 }
 0x5e3   :  { %v21608_v5 = vpop.f32.mrf.mxu0  ;;  %v20076_v26 = vld [vmem:[#allocation12 + $0x150] sm:$0xff] }
 0x5e4   :  { %11152 = vmatpush.bf16.msra.mxu1 %v20029_v12  ;;  %11452 = vmatpush.bf16.msra.mxu0 %v20051_v38 }
 0x5e6   :  { %11609 = vmatpush.bf16.msrb.mxu3 %v20067_v59  ;;  %v20086_v59 = vld [vmem:[#allocation12 + $0x1a0] sm:$0xff] }
 0x5e8   :  { %11153 = vmatpush.bf16.msra.mxu1 %v20028_v56  ;;  %11453 = vmatpush.bf16.msra.mxu0 %v20050_v22  ;;  %v20105_v56 = vld [vmem:[#allocation12 + $0x238] sm:$0xff] }
 0x5ea   :  { %11610 = vmatpush.bf16.msrb.mxu3 %v20066_v41 }
 0x5eb   :  { %v10898_v6 = vpop.f32.mrf.mxu0 }
 0x5ec   :  { %11154 = vmatpush.bf16.msra.mxu1 %v20027_v8  ;;  %v20087_v8 = vld [vmem:[#allocation12 + $0x1a8] sm:$0xff] }
 0x5ee   :  { %v10494_v34 = vpop.f32.mrf.mxu2 }
 0x5ef   :  { %v10495_v46 = vadd.f32 %v10494_v34, %v10482_v40  ;;  %v20078_v40 = vld [vmem:[#allocation12 + $0x160] sm:$0xff] }
 0x5f1   :  { %v10499_v20 = vmul.f32 %v10495_v46, %v21801_v42  ;;  %v20026_v42 = vld [vmem:[%s21768_s18 + $0x40] sm:$0xff]  ;;  %v20089_v46 = vld [vmem:[#allocation12 + $0x1b8] sm:$0xff] }
 0x5f2   :  { %11155 = vmatpush.bf16.msra.mxu1 %v20026_v42  ;;  %v20085_v42 = vld [vmem:[#allocation12 + $0x198] sm:$0xff] }
 0x5f3   :  { %v21621_v49 = vadd.f32 %v10499_v20, %v21570_v23  ;;  %v20042_v23 = vld [vmem:[#allocation12 + $0x40] sm:$0xff]  ;;  %v20104_v20 = vld [vmem:[#allocation12 + $0x230] sm:$0xff] }
 0x5f4   :  { %11310 = vmatpush.bf16.msrb.mxu2 %v20042_v23  ;;  %v20101_v23 = vld [vmem:[#allocation12 + $0x218] sm:$0xff] }
 0x5f6   :  { %v10496_v7 = vpop.f32.mrf.mxu2  ;;  %11459 = vmatpush.bf16.msrb.mxu1 %v20065_v18 }
 0x5f7   :  { %v10909_v43 = vpop.f32.mrf.mxu1 }
 0x5f8   :  { %11616 = vmatpush.bf16.msra.mxu2 %v20081_v31  ;;  %v10910_v11 = vadd.f32 %v10909_v43, %v21608_v5  ;;  %v20102_v43 = vld [vmem:[#allocation12 + $0x220] sm:$0xff]  ;;  %v20084_v31 = vld [vmem:[#allocation12 + $0x190] sm:$0xff] }
 0x5fa   :  { %v10922_v13 = vpop.f32.mrf.mxu3  ;;  %11460 = vmatpush.bf16.msrb.mxu1 %v20064_v55 }
 0x5fb   :  { %v10923_v52 = vadd.f32 %v10922_v13, %v10910_v11  ;;  %v20100_v13 = vld [vmem:[#allocation12 + $0x210] sm:$0xff]  ;;  %v20098_v11 = vld [vmem:[#allocation12 + $0x200] sm:$0xff] }
 0x5fc   :  { %11617 = vmatpush.bf16.msra.mxu2 %v20080_v45  ;;  %v10998_v45 = vperm.slane %v21630_v50, 1  ;;  %v20120_v50 = vld [vmem:[#allocation12 + $0x2b0] sm:$0xff] }
 0x5fe   :  { %11461 = vmatpush.bf16.msrb.mxu1 %v20063_v33  ;;  %v20083_v33 = vld [vmem:[#allocation12 + $0x188] sm:$0xff] }
 0x5ff   :  { %v10911_v39 = vpop.f32.mrf.mxu1 }
 0x600   :  { %11618 = vmatpush.bf16.msra.mxu2 %v20079_v27  ;;  %v20099_v27 = vld [vmem:[#allocation12 + $0x208] sm:$0xff] }
 0x602   :  { %v10924_v30 = vpop.f32.mrf.mxu3  ;;  %11462 = vmatpush.bf16.msrb.mxu1 %v20062_v44 }
 0x603   :  { %v10948_v54 = vpop.f32.mrf.mxu0 }
 0x604   :  { %11619 = vmatpush.bf16.msra.mxu2 %v20078_v40  ;;  %v20082_v40 = vld [vmem:[#allocation12 + $0x180] sm:$0xff] }
 0x606   :  { %11463 = vmatpush.bf16.msrb.mxu1 %v20061_v63  ;;  %v20097_v63 = vld [vmem:[#allocation12 + $0x1f8] sm:$0xff] }
 0x608   :  { %11620 = vmatpush.bf16.msra.mxu2 %v20077_v0  ;;  %v20113_v0 = vld [vmem:[#allocation12 + $0x278] sm:$0xff] }
 0x60a   :  { %11464 = vmatpush.bf16.msrb.mxu1 %v20060_v3  ;;  %v20095_v3 = vld [vmem:[#allocation12 + $0x1e8] sm:$0xff] }
 0x60b   :  { %v10950_v61 = vpop.f32.mrf.mxu0 }
 0x60c   :  { %11621 = vmatpush.bf16.msra.mxu2 %v20076_v26  ;;  %v20111_v26 = vld [vmem:[#allocation12 + $0x268] sm:$0xff] }
 0x60e   :  { %v10935_v17 = vpop.f32.mrf.mxu2  ;;  %11465 = vmatpush.bf16.msrb.mxu1 %v20059_v28  ;;  %v20110_v28 = vld [vmem:[#allocation12 + $0x260] sm:$0xff] }
 0x60f   :  { %v10936_v37 = vadd.f32 %v10935_v17, %v10923_v52  ;;  %v20137_v52 = vld [vmem:[#allocation12 + $0x338] sm:$0xff]  ;;  %v20112_v17 = vld [vmem:[#allocation12 + $0x270] sm:$0xff] }
 0x610   :  { %11622 = vmatpush.bf16.msra.mxu2 %v20075_v48  ;;  %v20118_v48 = vld [vmem:[#allocation12 + $0x2a0] sm:$0xff] }
 0x611   :  { %v10991_v51 = vmul.f32 %v10936_v37, %v21042_v4  ;;  %v20136_v37 = vld [vmem:[#allocation12 + $0x330] sm:$0xff] }
 0x612   :  { %11466 = vmatpush.bf16.msrb.mxu1 %v20058_v2  ;;  %v20117_v2 = vld [vmem:[#allocation12 + $0x298] sm:$0xff] }
 0x613   :  { %v10993_v5 = vadd.f32 %v10991_v51, %v21591_v58  ;;  %v20088_v58 = vld [vmem:[#allocation12 + $0x1b0] sm:$0xff]  ;;  %v20119_v51 = vld [vmem:[#allocation12 + $0x2a8] sm:$0xff] }
 0x614   :  { %11623 = vmatpush.bf16.msra.mxu2 %v20074_v14  ;;  %v20133_v14 = vld [vmem:[#allocation12 + $0x318] sm:$0xff] }
 0x615   :  { %v11001_v6 = vadd.f32 %v10997_v19, %v10993_v5  ;;  %v10961_v12 = vpop.f32.mrf.mxu1  ;;  %v20135_v19 = vld [vmem:[#allocation12 + $0x328] sm:$0xff]  ;;  %v20094_v5 = vld [vmem:[#allocation12 + $0x1e0] sm:$0xff] }
 0x616   :  { %v10937_v9 = vpop.f32.mrf.mxu2  ;;  %v10962_v7 = vadd.f32 %v10961_v12, %v10948_v54  ;;  %v20093_v12 = vld [vmem:[#allocation12 + $0x1d8] sm:$0xff] }
 0x617   :  { %v11003_v34 = vmax.f32 %v11001_v6, 0.0  ;;  %v20134_v6 = vld [vmem:[#allocation12 + $0x320] sm:$0xff]  ;;  %v20109_v9 = vld [vmem:[#allocation12 + $0x258] sm:$0xff] }
 0x619   :  { %v21635_v32 = vpack.c.bf16 %v11003_v34, %v11003_v34  ;;  %v20092_v34 = vld [vmem:[#allocation12 + $0x1d0] sm:$0xff] }
 0x61a   :  { %v10974_v57 = vpop.f32.mrf.mxu3 }
 0x61b   :  { %11143 = vmatmul.bf16.vlgmr.msrb.gmra.mxu0 %v21635_v32  ;;  %11298 = vmatmul.bf16.vlgmr.msra.gmra.mxu3 %v21635_v32  ;;  %v10975_v22 = vadd.f32 %v10974_v57, %v10962_v7  ;;  %v20132_v57 = vld [vmem:[#allocation12 + $0x310] sm:$0xff]  ;;  %v20129_v7 = vld [vmem:[#allocation12 + $0x2f8] sm:$0xff] }
 0x61c   :  { %11760 = vmatpush.bf16.msrb.mxu0 %v20089_v46  ;;  %11917 = vmatpush.bf16.msra.mxu3 %v20105_v56  ;;  %v20108_v46 = vld [vmem:[#allocation12 + $0x250] sm:$0xff] }
 0x61d   :  { %v10963_v16 = vpop.f32.mrf.mxu1  ;;  %v20116_v56 = vld [vmem:[#allocation12 + $0x290] sm:$0xff] }
 0x61e   :  { %v20115_v16 = vld [vmem:[#allocation12 + $0x288] sm:$0xff] }
 0x620   :  { %11761 = vmatpush.bf16.msrb.mxu0 %v20088_v58  ;;  %11918 = vmatpush.bf16.msra.mxu3 %v20104_v20  ;;  %v20091_v58 = vld [vmem:[#allocation12 + $0x1c8] sm:$0xff] }
 0x621   :  { %v20107_v20 = vld [vmem:[#allocation12 + $0x248] sm:$0xff] }
 0x622   :  { %v10976_v38 = vpop.f32.mrf.mxu3 }
 0x623   :  { %v20106_v38 = vld [vmem:[#allocation12 + $0x240] sm:$0xff] }
 0x624   :  { %11762 = vmatpush.bf16.msrb.mxu0 %v20087_v8  ;;  %11919 = vmatpush.bf16.msra.mxu3 %v20103_v21  ;;  %v20131_v8 = vld [vmem:[#allocation12 + $0x308] sm:$0xff]  ;;  %v20090_v21 = vld [vmem:[#allocation12 + $0x1c0] sm:$0xff] }
 0x628   :  { %11763 = vmatpush.bf16.msrb.mxu0 %v20086_v59  ;;  %11920 = vmatpush.bf16.msra.mxu3 %v20102_v43  ;;  %v20114_v59 = vld [vmem:[#allocation12 + $0x280] sm:$0xff] }
 0x629   :  { %v20130_v43 = vld [vmem:[#allocation12 + $0x300] sm:$0xff] }
 0x62b   :  { %11454 = vmatmul.bf16.vlgmr.msra.gmra.mxu0 %v21635_v32  ;;  %11611 = vmatmul.bf16.vlgmr.msrb.gmra.mxu3 %v21635_v32 }
 0x62c   :  { %11764 = vmatpush.bf16.msrb.mxu0 %v20085_v42  ;;  %11921 = vmatpush.bf16.msra.mxu3 %v20101_v23  ;;  %v20145_v42 = vld [vmem:[#allocation12 + $0x378] sm:$0xff] }
 0x62d   :  { %v20153_v23 = vld [vmem:[#allocation12 + $0x3b8] sm:$0xff] }
 0x62e   :  { %v10987_v41 = vpop.f32.mrf.mxu2 }
 0x62f   :  { %v10988_v18 = vadd.f32 %v10987_v41, %v10975_v22  ;;  %v20169_v22 = vld [vmem:[#allocation12 + $0x438] sm:$0xff]  ;;  %v20128_v41 = vld [vmem:[#allocation12 + $0x2f0] sm:$0xff] }
 0x630   :  { %11765 = vmatpush.bf16.msrb.mxu0 %v20084_v31  ;;  %11922 = vmatpush.bf16.msra.mxu3 %v20100_v13  ;;  %v20152_v31 = vld [vmem:[#allocation12 + $0x3b0] sm:$0xff] }
 0x631   :  { %v10992_v55 = vmul.f32 %v10988_v18, %v21803_v47  ;;  %v20121_v47 = vld [vmem:[#allocation12 + $0x2b8] sm:$0xff]  ;;  %v20144_v18 = vld [vmem:[#allocation12 + $0x370] sm:$0xff] }
 0x632   :  { %v20168_v13 = vld [vmem:[#allocation12 + $0x430] sm:$0xff] }
 0x633   :  { %v10994_v39 = vadd.f32 %v10992_v55, %v21621_v49  ;;  %v20096_v49 = vld [vmem:[#allocation12 + $0x1f0] sm:$0xff]  ;;  %v20127_v55 = vld [vmem:[#allocation12 + $0x2e8] sm:$0xff] }
 0x634   :  { %11766 = vmatpush.bf16.msrb.mxu0 %v20083_v33  ;;  %11923 = vmatpush.bf16.msra.mxu3 %v20099_v27  ;;  %v20167_v33 = vld [vmem:[#allocation12 + $0x428] sm:$0xff]  ;;  %v20126_v27 = vld [vmem:[#allocation12 + $0x2e0] sm:$0xff] }
 0x635   :  { %v11002_v54 = vadd.f32 %v10998_v45, %v10994_v39  ;;  %v20143_v45 = vld [vmem:[#allocation12 + $0x368] sm:$0xff] }
 0x636   :  { %v10989_v30 = vpop.f32.mrf.mxu2  ;;  %v20151_v39 = vld [vmem:[#allocation12 + $0x3a8] sm:$0xff] }
 0x637   :  { %v11004_v44 = vmax.f32 %v11002_v54, 0.0  ;;  %v20142_v54 = vld [vmem:[#allocation12 + $0x360] sm:$0xff] }
 0x638   :  { %11767 = vmatpush.bf16.msrb.mxu0 %v20082_v40  ;;  %11924 = vmatpush.bf16.msra.mxu3 %v20098_v11  ;;  %v20150_v30 = vld [vmem:[#allocation12 + $0x3a0] sm:$0xff]  ;;  %v20125_v40 = vld [vmem:[#allocation12 + $0x2d8] sm:$0xff] }
 0x639   :  { %v21644_v61 = vpack.c.bf16 %v11004_v44, %v11004_v44  ;;  %v20166_v44 = vld [vmem:[#allocation12 + $0x420] sm:$0xff]  ;;  %v20141_v11 = vld [vmem:[#allocation12 + $0x358] sm:$0xff] }
 0x63b   :  { %11156 = vmatmul.bf16.vlgmr.msra.gmra.mxu1 %v21644_v61  ;;  %11311 = vmatmul.bf16.vlgmr.msrb.gmra.mxu2 %v21644_v61 }
 0x63c   :  { %11773 = vmatpush.bf16.msra.mxu1 %v20097_v63  ;;  %11930 = vmatpush.bf16.msrb.mxu2 %v20113_v0  ;;  %v20149_v63 = vld [vmem:[#allocation12 + $0x398] sm:$0xff] }
 0x63d   :  { %12074 = vmatpush.bf16.msra.mxu0 %v20121_v47  ;;  %12231 = vmatpush.bf16.msrb.mxu3 %v20137_v52  ;;  %v20165_v0 = vld [vmem:[#allocation12 + $0x418] sm:$0xff]  ;;  %v20124_v47 = vld [vmem:[#allocation12 + $0x2d0] sm:$0xff] }
 0x63e   :  { %11768 = vmatmul.bf16.vlgmr.msrb.gmra.mxu0 %v21635_v32  ;;  %11925 = vmatmul.bf16.vlgmr.msra.gmra.mxu3 %v21635_v32  ;;  %v20140_v52 = vld [vmem:[#allocation12 + $0x350] sm:$0xff] }
 0x640   :  { %11774 = vmatpush.bf16.msra.mxu1 %v20096_v49  ;;  %11931 = vmatpush.bf16.msrb.mxu2 %v20112_v17  ;;  %v20148_v49 = vld [vmem:[#allocation12 + $0x390] sm:$0xff] }
 0x641   :  { %12075 = vmatpush.bf16.msra.mxu0 %v20120_v50  ;;  %12232 = vmatpush.bf16.msrb.mxu3 %v20136_v37  ;;  %v20164_v17 = vld [vmem:[#allocation12 + $0x410] sm:$0xff]  ;;  %v20123_v50 = vld [vmem:[#allocation12 + $0x2c8] sm:$0xff] }
 0x642   :  { %v20139_v37 = vld [vmem:[#allocation12 + $0x348] sm:$0xff] }
 0x644   :  { %11775 = vmatpush.bf16.msra.mxu1 %v20095_v3  ;;  %11932 = vmatpush.bf16.msrb.mxu2 %v20111_v26  ;;  %v20147_v3 = vld [vmem:[#allocation12 + $0x388] sm:$0xff] }
 0x645   :  { %12076 = vmatpush.bf16.msra.mxu0 %v20119_v51  ;;  %12233 = vmatpush.bf16.msrb.mxu3 %v20135_v19  ;;  %v20163_v26 = vld [vmem:[#allocation12 + $0x408] sm:$0xff]  ;;  %v20122_v51 = vld [vmem:[#allocation12 + $0x2c0] sm:$0xff] }
 0x646   :  { %v20138_v19 = vld [vmem:[#allocation12 + $0x340] sm:$0xff] }
 0x648   :  { %11776 = vmatpush.bf16.msra.mxu1 %v20094_v5  ;;  %11933 = vmatpush.bf16.msrb.mxu2 %v20110_v28  ;;  %v20146_v5 = vld [vmem:[#allocation12 + $0x380] sm:$0xff] }
 0x649   :  { %12077 = vmatpush.bf16.msra.mxu0 %v20118_v48  ;;  %12234 = vmatpush.bf16.msrb.mxu3 %v20134_v6  ;;  %v20162_v28 = vld [vmem:[#allocation12 + $0x400] sm:$0xff]  ;;  %v20161_v48 = vld [vmem:[#allocation12 + $0x3f8] sm:$0xff] }
 0x64a   :  { %v20177_v6 = vld [vmem:[#allocation12 + $0x478] sm:$0xff] }
 0x64b   :  { %11467 = vmatmul.bf16.vlgmr.msrb.gmra.mxu1 %v21644_v61  ;;  %11624 = vmatmul.bf16.vlgmr.msra.gmra.mxu2 %v21644_v61 }
 0x64c   :  { %11777 = vmatpush.bf16.msra.mxu1 %v20093_v12  ;;  %11934 = vmatpush.bf16.msrb.mxu2 %v20109_v9  ;;  %v20160_v12 = vld [vmem:[#allocation12 + $0x3f0] sm:$0xff] }
 0x64d   :  { %12078 = vmatpush.bf16.msra.mxu0 %v20117_v2  ;;  %12235 = vmatpush.bf16.msrb.mxu3 %v20133_v14  ;;  %v20176_v9 = vld [vmem:[#allocation12 + $0x470] sm:$0xff]  ;;  %v20159_v2 = vld [vmem:[#allocation12 + $0x3e8] sm:$0xff] }
 0x64e   :  { %v20175_v14 = vld [vmem:[#allocation12 + $0x468] sm:$0xff] }
 0x650   :  { %11778 = vmatpush.bf16.msra.mxu1 %v20092_v34  ;;  %11935 = vmatpush.bf16.msrb.mxu2 %v20108_v46  ;;  %v20194_v34 = vld [vmem:[%s21758_s8 + $0x40] sm:$0xff]  ;;  %v20158_v46 = vld [vmem:[#allocation12 + $0x3e0] sm:$0xff] }
 0x651   :  { %12079 = vmatpush.bf16.msra.mxu0 %v20116_v56  ;;  %12236 = vmatpush.bf16.msrb.mxu3 %v20132_v57  ;;  %v20174_v56 = vld [vmem:[#allocation12 + $0x460] sm:$0xff]  ;;  %v20157_v57 = vld [vmem:[#allocation12 + $0x3d8] sm:$0xff] }
 0x654   :  { %11779 = vmatpush.bf16.msra.mxu1 %v20091_v58  ;;  %11936 = vmatpush.bf16.msrb.mxu2 %v20107_v20  ;;  %v20173_v58 = vld [vmem:[#allocation12 + $0x458] sm:$0xff]  ;;  %v20172_v20 = vld [vmem:[#allocation12 + $0x450] sm:$0xff] }
 0x655   :  { %12080 = vmatpush.bf16.msra.mxu0 %v20115_v16  ;;  %12237 = vmatpush.bf16.msrb.mxu3 %v20131_v8  ;;  %v20155_v16 = vld [vmem:[#allocation12 + $0x3c8] sm:$0xff] }
 0x656   :  { %v20171_v8 = vld [vmem:[#allocation12 + $0x448] sm:$0xff] }
 0x658   :  { %11780 = vmatpush.bf16.msra.mxu1 %v20090_v21  ;;  %11937 = vmatpush.bf16.msrb.mxu2 %v20106_v38  ;;  %v20154_v21 = vld [vmem:[#allocation12 + $0x3c0] sm:$0xff] }
 0x659   :  { %12081 = vmatpush.bf16.msra.mxu0 %v20114_v59  ;;  %12238 = vmatpush.bf16.msrb.mxu3 %v20130_v43  ;;  %v20170_v38 = vld [vmem:[#allocation12 + $0x440] sm:$0xff] }
 0x65a   :  { %v20193_v59 = vld [vmem:[%s21758_s8 + $0x38] sm:$0xff]  ;;  %v20192_v43 = vld [vmem:[%s21758_s8 + $0x30] sm:$0xff] }
 0x65b   :  { %11781 = vmatmul.bf16.vlgmr.msra.gmra.mxu1 %v21644_v61  ;;  %11938 = vmatmul.bf16.vlgmr.msrb.gmra.mxu2 %v21644_v61 }
 0x65c   :  { %12087 = vmatpush.bf16.msrb.mxu1 %v20129_v7  ;;  %12244 = vmatpush.bf16.msra.mxu2 %v20145_v42  ;;  %v20190_v42 = vld [vmem:[%s21758_s8 + $0x20] sm:$0xff] }
 0x65d   :  { %12388 = vmatpush.bf16.msrb.mxu0 %v20153_v23  ;;  %12545 = vmatpush.bf16.msra.mxu3 %v20169_v22  ;;  %v20189_v22 = vld [vmem:[%s21758_s8 + $0x18] sm:$0xff] }
 0x65e   :  { %12082 = vmatmul.bf16.vlgmr.msra.gmra.mxu0 %v21635_v32  ;;  %12239 = vmatmul.bf16.vlgmr.msrb.gmra.mxu3 %v21635_v32 }
 0x660   :  { %12088 = vmatpush.bf16.msrb.mxu1 %v20128_v41  ;;  %12245 = vmatpush.bf16.msra.mxu2 %v20144_v18 }
 0x661   :  { %12389 = vmatpush.bf16.msrb.mxu0 %v20152_v31  ;;  %12546 = vmatpush.bf16.msra.mxu3 %v20168_v13  ;;  %v20187_v31 = vld [vmem:[%s21758_s8 + $0x8] sm:$0xff] }
 0x664   :  { %12089 = vmatpush.bf16.msrb.mxu1 %v20127_v55  ;;  %12246 = vmatpush.bf16.msra.mxu2 %v20143_v45  ;;  %v20186_v55 = vld [vmem:[%s21758_s8] sm:$0xff] }
 0x665   :  { %12390 = vmatpush.bf16.msrb.mxu0 %v20151_v39  ;;  %12547 = vmatpush.bf16.msra.mxu3 %v20167_v33 }
 0x668   :  { %12090 = vmatpush.bf16.msrb.mxu1 %v20126_v27  ;;  %12247 = vmatpush.bf16.msra.mxu2 %v20142_v54 }
 0x669   :  { %12391 = vmatpush.bf16.msrb.mxu0 %v20150_v30  ;;  %12548 = vmatpush.bf16.msra.mxu3 %v20166_v44 }
 0x66c   :  { %12091 = vmatpush.bf16.msrb.mxu1 %v20125_v40  ;;  %12248 = vmatpush.bf16.msra.mxu2 %v20141_v11 }
 0x66d   :  { %12392 = vmatpush.bf16.msrb.mxu0 %v20149_v63  ;;  %12549 = vmatpush.bf16.msra.mxu3 %v20165_v0 }
 0x670   :  { %12092 = vmatpush.bf16.msrb.mxu1 %v20124_v47  ;;  %12249 = vmatpush.bf16.msra.mxu2 %v20140_v52 }
 0x671   :  { %12393 = vmatpush.bf16.msrb.mxu0 %v20148_v49  ;;  %12550 = vmatpush.bf16.msra.mxu3 %v20164_v17 }
 0x674   :  { %12093 = vmatpush.bf16.msrb.mxu1 %v20123_v50  ;;  %12250 = vmatpush.bf16.msra.mxu2 %v20139_v37 }
 0x675   :  { %12394 = vmatpush.bf16.msrb.mxu0 %v20147_v3  ;;  %12551 = vmatpush.bf16.msra.mxu3 %v20163_v26 }
 0x678   :  { %12094 = vmatpush.bf16.msrb.mxu1 %v20122_v51  ;;  %12251 = vmatpush.bf16.msra.mxu2 %v20138_v19 }
 0x679   :  { %12395 = vmatpush.bf16.msrb.mxu0 %v20146_v5  ;;  %12552 = vmatpush.bf16.msra.mxu3 %v20162_v28 }
 0x67b   :  { %12095 = vmatmul.bf16.vlgmr.msrb.gmra.mxu1 %v21644_v61  ;;  %12252 = vmatmul.bf16.vlgmr.msra.gmra.mxu2 %v21644_v61 }
 0x67c   :  { %12401 = vmatpush.bf16.msra.mxu1 %v20161_v48  ;;  %12558 = vmatpush.bf16.msrb.mxu2 %v20177_v6 }
 0x67d   :  { %12396 = vmatmul.bf16.vlgmr.msrb.gmra.mxu0 %v21635_v32  ;;  %12553 = vmatmul.bf16.vlgmr.msra.gmra.mxu3 %v21635_v32  ;;  %v20156_v32 = vld [vmem:[#allocation12 + $0x3d0] sm:$0xff] }
 0x67e   :  { %12754 = vmatpush.bf16.msrb.mxu3 %v20194_v34 }
 0x680   :  { %12402 = vmatpush.bf16.msra.mxu1 %v20160_v12  ;;  %12559 = vmatpush.bf16.msrb.mxu2 %v20176_v9 }
 0x684   :  { %12403 = vmatpush.bf16.msra.mxu1 %v20159_v2  ;;  %12560 = vmatpush.bf16.msrb.mxu2 %v20175_v14 }
 0x688   :  { %12404 = vmatpush.bf16.msra.mxu1 %v20158_v46  ;;  %12561 = vmatpush.bf16.msrb.mxu2 %v20174_v56 }
 0x68c   :  { %12405 = vmatpush.bf16.msra.mxu1 %v20157_v57  ;;  %12562 = vmatpush.bf16.msrb.mxu2 %v20173_v58 }
 0x68d   :  { %18726 = vmatmul.msk.bf16.vlgmr.msrb.gmra.mxu3 %vm360_vm0, %v20800_v24  ;;  %v20191_v24 = vld [vmem:[%s21758_s8 + $0x28] sm:$0xff] }
 0x690   :  { %12406 = vmatpush.bf16.msra.mxu1 %v20156_v32  ;;  %12563 = vmatpush.bf16.msrb.mxu2 %v20172_v20  ;;  %v20184_v32 = vld [vmem:[%s21769_s19 + $0x30] sm:$0xff]  ;;  %v20183_v20 = vld [vmem:[%s21769_s19 + $0x28] sm:$0xff] }
 0x694   :  { %12407 = vmatpush.bf16.msra.mxu1 %v20155_v16  ;;  %12564 = vmatpush.bf16.msrb.mxu2 %v20171_v8  ;;  %v20181_v8 = vld [vmem:[%s21769_s19 + $0x18] sm:$0xff] }
 0x698   :  { %12408 = vmatpush.bf16.msra.mxu1 %v20154_v21  ;;  %12565 = vmatpush.bf16.msrb.mxu2 %v20170_v38  ;;  %v11144_v7 = vpop.f32.mrf.mxu0  ;;  %v20180_v38 = vld [vmem:[%s21769_s19 + $0x10] sm:$0xff] }
 0x69b   :  { %12409 = vmatmul.bf16.vlgmr.msra.gmra.mxu1 %v21644_v61  ;;  %12566 = vmatmul.bf16.vlgmr.msrb.gmra.mxu2 %v21644_v61  ;;  %v20188_v61 = vld [vmem:[%s21758_s8 + $0x10] sm:$0xff] }
 0x69c   :  { %12734 = vmatpush.bf16.msrb.mxu1 %v20193_v59 }
 0x69e   :  { %v11299_v23 = vpop.f32.mrf.mxu3 }
 0x6a0   :  { %12735 = vmatpush.bf16.msrb.mxu1 %v20192_v43  ;;  %v11146_v41 = vpop.f32.mrf.mxu0 }
 0x6a4   :  { %12736 = vmatpush.bf16.msrb.mxu1 %v20191_v24 }
 0x6a6   :  { %v11301_v18 = vpop.f32.mrf.mxu3 }
 0x6a8   :  { %12737 = vmatpush.bf16.msrb.mxu1 %v20190_v42  ;;  %v11455_v13 = vpop.f32.mrf.mxu0 }
 0x6ac   :  { %12738 = vmatpush.bf16.msrb.mxu1 %v20189_v22 }
 0x6ae   :  { %v11612_v45 = vpop.f32.mrf.mxu3 }
 0x6b0   :  { %12739 = vmatpush.bf16.msrb.mxu1 %v20188_v61  ;;  %v11457_v39 = vpop.f32.mrf.mxu0  ;;  %v20198_v61 = vld [vmem:[%s21806_s22 + $0x18] sm:$0xff] }
 0x6b1   :  { %12816 = vmatpush.bf16.msra.mxu2 %v20198_v61 }
 0x6b4   :  { %12740 = vmatpush.bf16.msrb.mxu1 %v20187_v31 }
 0x6b6   :  { %v11614_v27 = vpop.f32.mrf.mxu3 }
 0x6b8   :  { %12741 = vmatpush.bf16.msrb.mxu1 %v20186_v55  ;;  %v11157_v33 = vpop.f32.mrf.mxu1 }
 0x6b9   :  { %v11158_v54 = vadd.f32 %v11157_v33, %v11144_v7  ;;  %v20179_v7 = vld [vmem:[%s21769_s19 + $0x8] sm:$0xff] }
 0x6bb   :  { %12742 = vmatmul.bf16.vlgmr.msrb.gmra.mxu1 %v20826_v36  ;;  %v11769_v30 = vpop.f32.mrf.mxu0  ;;  %v21693_v44 = vadd.f32 %v11158_v54, %v21400_v35  ;;  %v20196_v54 = vld [vmem:[%s21806_s22 + $0x8] sm:$0xff] }
 0x6be   :  { %v11312_v40 = vpop.f32.mrf.mxu2 }
 0x6bf   :  { %v11313_v11 = vadd.f32 %v11312_v40, %v11299_v23  ;;  %v20178_v23 = vld [vmem:[%s21769_s19] sm:$0xff] }
 0x6c0   :  { %v11159_v63 = vpop.f32.mrf.mxu1 }
 0x6c1   :  { %v11926_v0 = vpop.f32.mrf.mxu3  ;;  %v11316_v37 = vmul.f32 %v11313_v11, %v20886_v53  ;;  %v20195_v63 = vld [vmem:[%s21806_s22] sm:$0xff] }
 0x6c3   :  { %v11771_v47 = vpop.f32.mrf.mxu0 }
 0x6c6   :  { %v11314_v52 = vpop.f32.mrf.mxu2 }
 0x6c8   :  { %v11468_v49 = vpop.f32.mrf.mxu1 }
 0x6c9   :  { %v11469_v17 = vadd.f32 %v11468_v49, %v11455_v13  ;;  %v11928_v50 = vpop.f32.mrf.mxu3  ;;  %v20197_v13 = vld [vmem:[%s21806_s22 + $0x10] sm:$0xff] }
 0x6ca   :  { %12817 = vmatpush.bf16.msra.mxu2 %v20197_v13  ;;  %v20225_v50 = vld [vmem:[#allocation13] ss:$0 sm:$0xff] }
 0x6cb   :  { %v11472_v36 = vmul.f32 %v11469_v17, %v20901_v60 }
 0x6cd   :  { %v11473_v3 = vadd.f32 %v11472_v36, %v11316_v37 }
 0x6ce   :  { %v11625_v26 = vpop.f32.mrf.mxu2  ;;  %12818 = vmatpush.bf16.msra.mxu2 %v20196_v54 }
 0x6cf   :  { %v11626_v51 = vadd.f32 %v11625_v26, %v11612_v45 }
 0x6d0   :  { %v11470_v19 = vpop.f32.mrf.mxu1 }
 0x6d1   :  { %v11629_v35 = vmul.f32 %v11626_v51, %v20922_v62  ;;  %v20185_v62 = vld [vmem:[%s21769_s19 + $0x38] sm:$0xff] }
 0x6d2   :  { %12644 = vmatpush.bf16.msra.mxu0 %v20185_v62  ;;  %12819 = vmatpush.bf16.msra.mxu2 %v20195_v63 }
 0x6d3   :  { %v11630_v5 = vadd.f32 %v11629_v35, %v11473_v3  ;;  %v20227_v35 = vld [vmem:[#allocation16] ss:$0 sm:$0xff] }
 0x6d6   :  { %v11627_v28 = vpop.f32.mrf.mxu2  ;;  %12645 = vmatpush.bf16.msra.mxu0 %v20184_v32 }
 0x6d7   :  { %v20228_v28 = vld [vmem:[#allocation18] ss:$0 sm:$0xff] }
 0x6d8   :  { %v11782_v6 = vpop.f32.mrf.mxu1 }
 0x6d9   :  { %v11783_v12 = vadd.f32 %v11782_v6, %v11769_v30 }
 0x6da   :  { %12646 = vmatpush.bf16.msra.mxu0 %v20183_v20 }
 0x6db   :  { %v12083_v48 = vpop.f32.mrf.mxu0  ;;  %v11786_v9 = vmul.f32 %v11783_v12, %v20942_v29 }
 0x6dd   :  { %v11787_v2 = vadd.f32 %v11786_v9, %v11630_v5 }
 0x6de   :  { %v11939_v34 = vpop.f32.mrf.mxu2 }
 0x6df   :  { %v11940_v46 = vadd.f32 %v11939_v34, %v11926_v0 }
 0x6e0   :  { %v11784_v56 = vpop.f32.mrf.mxu1 }
 0x6e1   :  { %v12240_v14 = vpop.f32.mrf.mxu3  ;;  %v11943_v60 = vmul.f32 %v11940_v46, %v20962_v15  ;;  %v20182_v15 = vld [vmem:[%s21769_s19 + $0x20] sm:$0xff]  ;;  %v20229_v56 = vld [vmem:[#allocation19] ss:$0 sm:$0xff] }
 0x6e2   :  { %12647 = vmatpush.bf16.msra.mxu0 %v20182_v15  ;;  %v20199_v46 = vld [vmem:[%s21807_s3] sm:$0xff] }
 0x6e3   :  { %v12085_v53 = vpop.f32.mrf.mxu0  ;;  %v11944_v57 = vadd.f32 %v11943_v60, %v11787_v2  ;;  %v20230_v60 = vld [vmem:[#allocation21] ss:$0 sm:$0xff] }
 0x6e6   :  { %v11941_v29 = vpop.f32.mrf.mxu2  ;;  %12648 = vmatpush.bf16.msra.mxu0 %v20181_v8 }
 0x6e9   :  { %v12242_v58 = vpop.f32.mrf.mxu3 }
 0x6ea   :  { %12649 = vmatpush.bf16.msra.mxu0 %v20180_v38  ;;  %v20231_v58 = vld [vmem:[#allocation22] ss:$0 sm:$0xff] }
 0x6ee   :  { %12650 = vmatpush.bf16.msra.mxu0 %v20179_v7 }
 0x6f2   :  { %12651 = vmatpush.bf16.msra.mxu0 %v20178_v23 }
 0x6f8   :  { %v12096_v16 = vpop.f32.mrf.mxu1 }
 0x6f9   :  { %v12097_v31 = vadd.f32 %v12096_v16, %v12083_v48 }
 0x6fa   :  { %v12397_v21 = vpop.f32.mrf.mxu0 }
 0x6fb   :  { %v12100_v39 = vmul.f32 %v12097_v31, %v20982_v10 }
 0x6fd   :  { %v12101_v40 = vadd.f32 %v12100_v39, %v11944_v57 }
 0x6fe   :  { %v12253_v59 = vpop.f32.mrf.mxu2 }
 0x6ff   :  { %v12254_v55 = vadd.f32 %v12253_v59, %v12240_v14 }
 0x700   :  { %v12554_v43 = vpop.f32.mrf.mxu3  ;;  %v12098_v24 = vpop.f32.mrf.mxu1 }
 0x701   :  { %v12257_v30 = vmul.f32 %v12254_v55, %v21002_v25 }
 0x702   :  { %v12399_v42 = vpop.f32.mrf.mxu0 }
 0x703   :  { %v12258_v47 = vadd.f32 %v12257_v30, %v12101_v40 }
 0x706   :  { %v12255_v22 = vpop.f32.mrf.mxu2 }
 0x708   :  { %v12556_v41 = vpop.f32.mrf.mxu3 }
 0x710   :  { %v12756_v18 = vpop.f32.mrf.mxu3 }
 0x718   :  { %v12410_v45 = vpop.f32.mrf.mxu1  ;;  %v12758_v27 = vpop.f32.mrf.mxu3 }
 0x719   :  { %v12411_v33 = vadd.f32 %v12410_v45, %v12397_v21 }
 0x71b   :  { %v12414_v11 = vmul.f32 %v12411_v33, %v21022_v1  ;;  %v20226_v1 = vld [vmem:[#allocation15] ss:$0 sm:$0xff] }
 0x71d   :  { %v12415_v49 = vadd.f32 %v12414_v11, %v12258_v47 }
 0x71e   :  { %v12567_v0 = vpop.f32.mrf.mxu2 }
 0x71f   :  { %v12568_v52 = vadd.f32 %v12567_v0, %v12554_v43 }
 0x720   :  { %v12412_v10 = vpop.f32.mrf.mxu1 }
 0x721   :  { %v12571_v17 = vmul.f32 %v12568_v52, %v21042_v4  ;;  %v20200_v4 = vld [vmem:[%s21807_s3 + $0x8] sm:$0xff] }
 0x722   :  { %12863 = vmatpush.bf16.msra.mxu3 %v20200_v4 }
 0x723   :  { %v12572_v37 = vadd.f32 %v12571_v17, %v12415_v49 }
 0x725   :  { %v12577_v36 = vadd.f32 %v20225_v50, %v12572_v37 }
 0x726   :  { %v12569_v25 = vpop.f32.mrf.mxu2  ;;  %12864 = vmatpush.bf16.msra.mxu3 %v20199_v46 }
 0x727   :  { %v12578_v3 = vmax.f32 %v12577_v36, 0.0 }
 0x729   :  { %v12579_v26 = vpack.c.bf16 %v12578_v3, %v12578_v3 }
 0x72b   :  { %12652 = vmatmul.bf16.vlgmr.msra.gmra.mxu0 %v12579_v26 }
 0x738   :  { %v12743_v51 = vpop.f32.mrf.mxu1 }
 0x739   :  { %v12744_v19 = vadd.f32 %v20226_v1, %v12743_v51 }
 0x73b   :  { %v12757_v5 = vadd.f32 %v12756_v18, %v12744_v19 }
 0x73d   :  { %v12764_v48 = vmul.f32 %v20227_v35, %v12757_v5 }
 0x73f   :  { %v12769_v6 = vadd.f32 %v20228_v28, %v12764_v48 }
 0x740   :  { %v12745_v12 = vpop.f32.mrf.mxu1 }
 0x741   :  { %v12770_v9 = vmax.f32 %v12769_v6, 0.0 }
 0x743   :  { %v12771_v2 = vpack.c.bf16 %v12770_v9, %v12770_v9 }
 0x745   :  { %18743 = vmatmul.msk.bf16.vlgmr.msra.gmra.mxu2 %vm12808_vm1, %v12771_v2 }
 0x7a8   :  { %v12653_v14 = vpop.f32.mrf.mxu0 }
 0x7a9   :  { %v12657_v34 = vadd.f32 %v12653_v14, %v21693_v44 }
 0x7b0   :  { %v12655_v53 = vpop.f32.mrf.mxu0 }
 0x7c8   :  { %v12821_v57 = vpop.f32.mrf.mxu2 }
 0x7c9   :  { %v12822_v62 = vadd.f32 %v20229_v56, %v12821_v57 }
 0x7cb   :  { %v12829_v32 = vmul.f32 %v20230_v60, %v12822_v62 }
 0x7cd   :  { %v12834_v29 = vadd.f32 %v20231_v58, %v12829_v32 }
 0x7cf   :  { %v12835_v20 = vmax.f32 %v12834_v29, 0.0 }
 0x7d0   :  { %v12823_v15 = vpop.f32.mrf.mxu2 }
 0x7d1   :  { %v12836_v16 = vpack.c.bf16 %v12835_v20, %v12835_v20 }
 0x7d3   :  { %18752 = vmatmul.msk.bf16.vlgmr.msra.gmra.mxu3 %vm12853_vm2, %v12836_v16 }
 0x856   :  { %v12866_v8 = vpop.f32.mrf.mxu3 }
 0x857   :  { %v12870_v44 = vadd.f32 %v12866_v8, %v12657_v34 }
 0x859   :  { %12872 = vst.msk [vmem:[%s21808_s28] sm:$0xff] %vm12871_vm3, %v12870_v44 }
 0x85e   :  { %v12868_v21 = vpop.f32.mrf.mxu3 }
 0x85f   :  { %12877 = vsyncpa [#allocation3], 1 }
 0x860   :  { %12878 = vsyncpa [#allocation5], 1 }
 0x861   :  { %12879 = vsyncpa [#allocation8], 1 }
 0x862   :  { %12880 = vsyncpa [#allocation11], 1 }
 0x863   :  { %12881 = vsyncpa [#allocation14], 1 }
 0x864   :  { %12882 = vsyncpa [#allocation17], 1 }
 0x865   :  { %12883 = vsyncpa [#allocation20], 1 }
 0x866   :  { %12884 = vsyncpa [#allocation23], 1 }

</bundles_post_ra>
